<compile_context>
chip_gen: v6e
topology: v6e:2x2x1
jax: 0.10.0
libtpu: 0.0.40
codegen_flags: <defaults>
</compile_context>

<pallas_src>
import functools

import numpy as np

import jax
import jax.numpy as jnp
from jax import lax
from jax.experimental import pallas as pl
from jax.experimental.pallas import tpu as pltpu


# ---------------------------------------------------------------------------
# Fused Pallas kernel: whole ConvNet for one image per grid step.
# ---------------------------------------------------------------------------
def _convnet_fused_kernel(x_ref, w_ref, b_ref, m_ref, o_ref, act_ref,
                          *, H, W, Cin, Cout, cmax, relu):
    # x_ref:   (1, Cin, H*W)       bf16  input image (channels on sublanes)
    # w_ref:   (L, 9, cmax, cmax)  bf16  per-tap weights, BN scale folded in:
    #                                    w_ref[l, t, co, ci]
    # b_ref:   (L, cmax, 1)        f32   per-channel bias (conv bias + BN)
    # m_ref:   (9, H*W)            f32   border-validity mask per tap
    # o_ref:   (1, Cout, H*W)      f32   final-layer output
    # act_ref: (cmax, H*W)         bf16  VMEM-resident activation
    HW = H * W
    num_layers = len(relu)

    # Load this image; unused channel rows must be zeroed every grid step
    # (the scratch persists across grid iterations / images).
    act_ref[:Cin, :] = x_ref[0]
    if cmax > Cin:
        act_ref[Cin:, :] = jnp.zeros((cmax - Cin, HW), act_ref.dtype)

    for layer in range(num_layers):
        a_bf = act_ref[...]                       # (cmax, HW) bf16
        a32 = a_bf.astype(jnp.float32)            # 32-bit copy for lane rolls

        acc = None
        for dy in (-1, 0, 1):
            for dx in (-1, 0, 1):
                t = (dy + 1) * 3 + (dx + 1)
                off = dy * W + dx                 # flat pixel offset of tap
                if off == 0:
                    lhs = a_bf                    # centre tap: no roll / mask
                else:
                    # rolled[:, p] == a[:, (p + off) % HW]; wrapped border
                    # pixels are zeroed by the precomputed mask.  Lane-axis
                    # roll -> XLU slot (slack), mask -> one VPU multiply.
                    rolled = pltpu.roll(a32, (-off) % HW, axis=1)
                    lhs = (rolled * m_ref[t:t + 1, :]).astype(jnp.bfloat16)
                c = jnp.dot(w_ref[layer, t], lhs,
                            preferred_element_type=jnp.float32)
                acc = c if acc is None else acc + c

        out = acc + b_ref[layer]                  # (cmax, 1) lane-broadcast
        if relu[layer]:
            out = jnp.maximum(out, 0.0)

        if layer == num_layers - 1:
            o_ref[0] = out[:Cout, :].astype(o_ref.dtype)
        else:
            # Next layer's input: cast once on the writeback store; the
            # activation never leaves VMEM.
            act_ref[...] = out.astype(act_ref.dtype)


# ---------------------------------------------------------------------------
# Wrapper helpers.
# ---------------------------------------------------------------------------
def _build_tap_masks(H, W):
    """(9, H*W) f32 validity mask per 3x3 tap, built once with numpy."""
    y = np.arange(H).reshape(H, 1)
    x = np.arange(W).reshape(1, W)
    masks = np.zeros((9, H * W), np.float32)
    for ky in range(3):
        for kx in range(3):
            dy, dx = ky - 1, kx - 1
            valid = ((y + dy >= 0) & (y + dy < H) &
                     (x + dx >= 0) & (x + dx < W))
            masks[ky * 3 + kx] = valid.astype(np.float32).reshape(-1)
    return jnp.asarray(masks)


def _pack_params(params, cmax):
    """Fold BN scale into the weights, transpose to (tap, co, ci), zero-pad
    the real channel widths up to cmax and stack across layers."""
    L = len(params)
    w_all = jnp.zeros((L, 9, cmax, cmax), jnp.float32)
    b_all = jnp.zeros((L, cmax, 1), jnp.float32)
    relus = []
    for l, p in enumerate(params):
        w = p["w"]                                       # (3, 3, ci, co)
        ci, co = int(w.shape[2]), int(w.shape[3])
        wf = w * p["scale"][None, None, None, :]         # fold BN scale (f32)
        wt = jnp.transpose(wf, (0, 1, 3, 2)).reshape(9, co, ci)
        w_all = w_all.at[l, :, :co, :ci].set(wt)
        b_all = b_all.at[l, :co, 0].set(p["bias"])
        relus.append(bool(p["relu"]))
    return w_all.astype(jnp.bfloat16), b_all, tuple(relus)


def convnet_forward(params, x_nchw):
    """Forward pass. Input/output in NCHW, matching the PyTorch module."""
    N, Cin, H, W = x_nchw.shape
    HW = H * W
    Cout = int(params[-1]["w"].shape[-1])
    L = len(params)

    cmax = Cin
    for p in params:
        cmax = max(cmax, int(p["w"].shape[2]), int(p["w"].shape[3]))
    cmax = max(8, ((cmax + 7) // 8) * 8)      # sublane-align the channel dim

    w_all, b_all, relus = _pack_params(params, cmax)
    masks = _build_tap_masks(H, W)

    # NCHW already has channels-on-sublanes / pixels-on-lanes after a reshape.
    x = x_nchw.reshape(N, Cin, HW).astype(jnp.bfloat16)

    kernel = functools.partial(_convnet_fused_kernel, H=H, W=W, Cin=Cin,
                               Cout=Cout, cmax=cmax, relu=relus)

    flops = 2 * N * L * 9 * cmax * cmax * HW
    bytes_accessed = int(x.size * 2 + w_all.size * 2 + b_all.size * 4 +
                         masks.size * 4 + N * Cout * HW * 4)

    out = pl.pallas_call(
        kernel,
        out_shape=jax.ShapeDtypeStruct((N, Cout, HW), jnp.float32),
        grid_spec=pltpu.PrefetchScalarGridSpec(
            num_scalar_prefetch=0,
            grid=(N,),
            in_specs=[
                pl.BlockSpec((1, Cin, HW), lambda n: (n, 0, 0)),
                pl.BlockSpec((L, 9, cmax, cmax), lambda n: (0, 0, 0, 0)),
                pl.BlockSpec((L, cmax, 1), lambda n: (0, 0, 0)),
                pl.BlockSpec((9, HW), lambda n: (0, 0)),
            ],
            out_specs=pl.BlockSpec((1, Cout, HW), lambda n: (n, 0, 0)),
            scratch_shapes=[pltpu.VMEM((cmax, HW), jnp.bfloat16)],
        ),
        compiler_params=pltpu.CompilerParams(
            dimension_semantics=("parallel",),    # batch -> both v7x TCs
            vmem_limit_bytes=32 * 1024 * 1024),
        cost_estimate=pl.CostEstimate(
            flops=flops, transcendentals=0, bytes_accessed=bytes_accessed),
    )(x, w_all, b_all, masks)

    return out.reshape(N, Cout, H, W)


# ---------------------------------------------------------------------------
# Parameter construction (inference-mode BN folded into scale/bias).
# ---------------------------------------------------------------------------
def init_convnet_params(key, input_channels, output_channels,
                        arch=(64, 64, 64)):
    """Deterministic synthetic params matching the PyTorch module's shapes."""
    params = []
    in_c = input_channels
    eps = 1e-5
    for c in arch:
        key, kw, kb, kg, kbeta = jax.random.split(key, 5)
        w = jax.random.normal(kw, (3, 3, in_c, c), jnp.float32) * 0.05
        conv_b = jax.random.normal(kb, (c,), jnp.float32) * 0.05
        gamma = 1.0 + 0.1 * jax.random.normal(kg, (c,), jnp.float32)
        beta = 0.1 * jax.random.normal(kbeta, (c,), jnp.float32)
        # Inference-mode BatchNorm with running_mean=0, running_var=1, folded
        # together with the conv bias into (scale, bias).
        # TODO(synk): if real running stats exist they must be folded here too.
        scale = gamma / jnp.sqrt(1.0 + eps)
        bias = scale * conv_b + beta
        params.append(dict(w=w, scale=scale, bias=bias, relu=True))
        in_c = c
    key, kw, kb = jax.random.split(key, 3)
    w = jax.random.normal(kw, (3, 3, in_c, output_channels),
                          jnp.float32) * 0.05
    conv_b = jax.random.normal(kb, (output_channels,), jnp.float32) * 0.05
    params.append(dict(w=w, scale=jnp.ones((output_channels,), jnp.float32),
                       bias=conv_b, relu=False))
    return params


# ---------------------------------------------------------------------------
# Pure-JAX reference (lax.conv) with the kernel's rounding: BN scale folded
# into the weights before the bf16 cast, bf16 inputs/weights, f32 accumulation
# and f32 bias/ReLU epilogue.
# ---------------------------------------------------------------------------
def convnet_reference(params, x_nchw):
    x = jnp.transpose(x_nchw, (0, 2, 3, 1))
    for p in params:
        xin = x.astype(jnp.bfloat16).astype(jnp.float32)
        wf = (p["w"] * p["scale"][None, None, None, :])
        wf = wf.astype(jnp.bfloat16).astype(jnp.float32)
        y = lax.conv_general_dilated(
            xin, wf, window_strides=(1, 1), padding=((1, 1), (1, 1)),
            dimension_numbers=("NHWC", "HWIO", "NHWC"))
        y = y + p["bias"]
        if p["relu"]:
            y = jnp.maximum(y, 0.0)
        x = y
    return jnp.transpose(x, (0, 3, 1, 2))


if __name__ == "__main__":
    key = jax.random.PRNGKey(0)
    key, kx = jax.random.split(key)

    # Small shapes consistent with the module: batch=2, in_ch=4, 16x16 images,
    # arch=[64, 64, 64], output_channels=3.
    N, C_in, H, W = 2, 4, 16, 16
    C_out = 3
    x = jax.random.normal(kx, (N, C_in, H, W), jnp.float32)

    params = init_convnet_params(key, C_in, C_out, arch=(64, 64, 64))

    out = jax.block_until_ready(convnet_forward(params, x))
    assert out.shape == (N, C_out, H, W), out.shape

    ref = jax.block_until_ready(convnet_reference(params, x))
    max_err = float(jnp.max(jnp.abs(out - ref)))
    assert jnp.allclose(out, ref, atol=2e-3, rtol=2e-3), max_err

    print("KERNEL_OK")
</pallas_src>

<mosaic_0001>
module attributes {stable_mosaic.version = 11 : i64} {
  func.func @_convnet_fused_kernel(%arg0: i32, %arg1: memref<1x4x256xbf16, #tpu.memory_space<vmem>>, %arg2: memref<4x9x64x64xbf16, #tpu.memory_space<vmem>>, %arg3: memref<4x64x1xf32, #tpu.memory_space<vmem>>, %arg4: memref<9x256xf32, #tpu.memory_space<vmem>>, %arg5: memref<1x3x256xf32, #tpu.memory_space<vmem>>, %arg6: memref<64x256xbf16, #tpu.memory_space<vmem>>) attributes {dimension_semantics = [#tpu.dimension_semantics<parallel>], iteration_bounds = array<i64: 2>, scalar_prefetch = 0 : i64, scratch_operands = 1 : i64, tpu.core_type = #tpu.core_type<tc>, window_params = [{transform_indices = @transform_0, window_bounds = array<i64: 1, 4, 256>}, {pipeline_mode = #tpu.pipeline_mode<synchronous>, transform_indices = @transform_1, window_bounds = array<i64: 4, 9, 64, 64>}, {pipeline_mode = #tpu.pipeline_mode<synchronous>, transform_indices = @transform_2, window_bounds = array<i64: 4, 64, 1>}, {pipeline_mode = #tpu.pipeline_mode<synchronous>, transform_indices = @transform_3, window_bounds = array<i64: 9, 256>}, {transform_indices = @transform_4, window_bounds = array<i64: 1, 3, 256>}]} {
    %c0 = arith.constant 0 : index
    %c0_0 = arith.constant 0 : index
    %c0_1 = arith.constant 0 : index
    %0 = vector.load %arg1[%c0, %c0_0, %c0_1] : memref<1x4x256xbf16, #tpu.memory_space<vmem>>, vector<1x4x256xbf16>
    %1 = vector.shape_cast %0 : vector<1x4x256xbf16> to vector<4x256xbf16>
    %c0_2 = arith.constant 0 : index
    %c0_3 = arith.constant 0 : index
    %2 = vector.load %arg6[%c0_2, %c0_3] : memref<64x256xbf16, #tpu.memory_space<vmem>>, vector<4x256xbf16>
    tpu.vector_store %arg6[%c0_2, %c0_3], %1 {strides = array<i32>} : memref<64x256xbf16, #tpu.memory_space<vmem>>, vector<4x256xbf16>,
    %cst = arith.constant 0.000000e+00 : bf16
    %3 = vector.broadcast %cst : bf16 to vector<60x256xbf16>
    %c4 = arith.constant 4 : index
    %c0_4 = arith.constant 0 : index
    %4 = vector.load %arg6[%c4, %c0_4] : memref<64x256xbf16, #tpu.memory_space<vmem>>, vector<60x256xbf16>
    tpu.vector_store %arg6[%c4, %c0_4], %3 {strides = array<i32>} : memref<64x256xbf16, #tpu.memory_space<vmem>>, vector<60x256xbf16>,
    %c0_5 = arith.constant 0 : index
    %c0_6 = arith.constant 0 : index
    %5 = vector.load %arg6[%c0_5, %c0_6] : memref<64x256xbf16, #tpu.memory_space<vmem>>, vector<64x256xbf16>
    %6 = arith.extf %5 : vector<64x256xbf16> to vector<64x256xf32>
    %c17_i32 = arith.constant 17 : i32
    %7 = tpu.dynamic_rotate %6 by %c17_i32 dim 1 : vector<64x256xf32>, i32 -> vector<64x256xf32>
    %c0_7 = arith.constant 0 : index
    %c0_8 = arith.constant 0 : index
    %8 = vector.load %arg4[%c0_7, %c0_8] : memref<9x256xf32, #tpu.memory_space<vmem>>, vector<1x256xf32>
    %9 = vector.broadcast %8 : vector<1x256xf32> to vector<64x256xf32>
    %10 = arith.mulf %7, %9 : vector<64x256xf32>
    %11 = arith.truncf %10 : vector<64x256xf32> to vector<64x256xbf16>
    %c0_9 = arith.constant 0 : index
    %c0_10 = arith.constant 0 : index
    %c0_11 = arith.constant 0 : index
    %c0_12 = arith.constant 0 : index
    %12 = vector.load %arg2[%c0_9, %c0_10, %c0_11, %c0_12] : memref<4x9x64x64xbf16, #tpu.memory_space<vmem>>, vector<1x1x64x64xbf16>
    %13 = vector.shape_cast %12 : vector<1x1x64x64xbf16> to vector<64x64xbf16>
    %cst_13 = arith.constant dense<0.000000e+00> : vector<64x256xf32>
    %14 = tpu.matmul %13, %11, %cst_13 {dimension_numbers = #tpu.dot_dimension_numbers<[1], [0], [0], [1], [0, 0, 1, 1], [], []>} : vector<64x64xbf16>, vector<64x256xbf16>, vector<64x256xf32> -> vector<64x256xf32>
    %c16_i32 = arith.constant 16 : i32
    %15 = tpu.dynamic_rotate %6 by %c16_i32 dim 1 : vector<64x256xf32>, i32 -> vector<64x256xf32>
    %c1 = arith.constant 1 : index
    %c0_14 = arith.constant 0 : index
    %16 = vector.load %arg4[%c1, %c0_14] : memref<9x256xf32, #tpu.memory_space<vmem>>, vector<1x256xf32>
    %17 = vector.broadcast %16 : vector<1x256xf32> to vector<64x256xf32>
    %18 = arith.mulf %15, %17 : vector<64x256xf32>
    %19 = arith.truncf %18 : vector<64x256xf32> to vector<64x256xbf16>
    %c0_15 = arith.constant 0 : index
    %c1_16 = arith.constant 1 : index
    %c0_17 = arith.constant 0 : index
    %c0_18 = arith.constant 0 : index
    %20 = vector.load %arg2[%c0_15, %c1_16, %c0_17, %c0_18] : memref<4x9x64x64xbf16, #tpu.memory_space<vmem>>, vector<1x1x64x64xbf16>
    %21 = vector.shape_cast %20 : vector<1x1x64x64xbf16> to vector<64x64xbf16>
    %cst_19 = arith.constant dense<0.000000e+00> : vector<64x256xf32>
    %22 = tpu.matmul %21, %19, %cst_19 {dimension_numbers = #tpu.dot_dimension_numbers<[1], [0], [0], [1], [0, 0, 1, 1], [], []>} : vector<64x64xbf16>, vector<64x256xbf16>, vector<64x256xf32> -> vector<64x256xf32>
    %23 = arith.addf %14, %22 : vector<64x256xf32>
    %c15_i32 = arith.constant 15 : i32
    %24 = tpu.dynamic_rotate %6 by %c15_i32 dim 1 : vector<64x256xf32>, i32 -> vector<64x256xf32>
    %c2 = arith.constant 2 : index
    %c0_20 = arith.constant 0 : index
    %25 = vector.load %arg4[%c2, %c0_20] : memref<9x256xf32, #tpu.memory_space<vmem>>, vector<1x256xf32>
    %26 = vector.broadcast %25 : vector<1x256xf32> to vector<64x256xf32>
    %27 = arith.mulf %24, %26 : vector<64x256xf32>
    %28 = arith.truncf %27 : vector<64x256xf32> to vector<64x256xbf16>
    %c0_21 = arith.constant 0 : index
    %c2_22 = arith.constant 2 : index
    %c0_23 = arith.constant 0 : index
    %c0_24 = arith.constant 0 : index
    %29 = vector.load %arg2[%c0_21, %c2_22, %c0_23, %c0_24] : memref<4x9x64x64xbf16, #tpu.memory_space<vmem>>, vector<1x1x64x64xbf16>
    %30 = vector.shape_cast %29 : vector<1x1x64x64xbf16> to vector<64x64xbf16>
    %cst_25 = arith.constant dense<0.000000e+00> : vector<64x256xf32>
    %31 = tpu.matmul %30, %28, %cst_25 {dimension_numbers = #tpu.dot_dimension_numbers<[1], [0], [0], [1], [0, 0, 1, 1], [], []>} : vector<64x64xbf16>, vector<64x256xbf16>, vector<64x256xf32> -> vector<64x256xf32>
    %32 = arith.addf %23, %31 : vector<64x256xf32>
    %c1_i32 = arith.constant 1 : i32
    %33 = tpu.dynamic_rotate %6 by %c1_i32 dim 1 : vector<64x256xf32>, i32 -> vector<64x256xf32>
    %c3 = arith.constant 3 : index
    %c0_26 = arith.constant 0 : index
    %34 = vector.load %arg4[%c3, %c0_26] : memref<9x256xf32, #tpu.memory_space<vmem>>, vector<1x256xf32>
    %35 = vector.broadcast %34 : vector<1x256xf32> to vector<64x256xf32>
    %36 = arith.mulf %33, %35 : vector<64x256xf32>
    %37 = arith.truncf %36 : vector<64x256xf32> to vector<64x256xbf16>
    %c0_27 = arith.constant 0 : index
    %c3_28 = arith.constant 3 : index
    %c0_29 = arith.constant 0 : index
    %c0_30 = arith.constant 0 : index
    %38 = vector.load %arg2[%c0_27, %c3_28, %c0_29, %c0_30] : memref<4x9x64x64xbf16, #tpu.memory_space<vmem>>, vector<1x1x64x64xbf16>
    %39 = vector.shape_cast %38 : vector<1x1x64x64xbf16> to vector<64x64xbf16>
    %cst_31 = arith.constant dense<0.000000e+00> : vector<64x256xf32>
    %40 = tpu.matmul %39, %37, %cst_31 {dimension_numbers = #tpu.dot_dimension_numbers<[1], [0], [0], [1], [0, 0, 1, 1], [], []>} : vector<64x64xbf16>, vector<64x256xbf16>, vector<64x256xf32> -> vector<64x256xf32>
    %41 = arith.addf %32, %40 : vector<64x256xf32>
    %c0_32 = arith.constant 0 : index
    %c4_33 = arith.constant 4 : index
    %c0_34 = arith.constant 0 : index
    %c0_35 = arith.constant 0 : index
    %42 = vector.load %arg2[%c0_32, %c4_33, %c0_34, %c0_35] : memref<4x9x64x64xbf16, #tpu.memory_space<vmem>>, vector<1x1x64x64xbf16>
    %43 = vector.shape_cast %42 : vector<1x1x64x64xbf16> to vector<64x64xbf16>
    %cst_36 = arith.constant dense<0.000000e+00> : vector<64x256xf32>
    %44 = tpu.matmul %43, %5, %cst_36 {dimension_numbers = #tpu.dot_dimension_numbers<[1], [0], [0], [1], [0, 0, 1, 1], [], []>} : vector<64x64xbf16>, vector<64x256xbf16>, vector<64x256xf32> -> vector<64x256xf32>
    %45 = arith.addf %41, %44 : vector<64x256xf32>
    %c255_i32 = arith.constant 255 : i32
    %46 = tpu.dynamic_rotate %6 by %c255_i32 dim 1 : vector<64x256xf32>, i32 -> vector<64x256xf32>
    %c5 = arith.constant 5 : index
    %c0_37 = arith.constant 0 : index
    %47 = vector.load %arg4[%c5, %c0_37] : memref<9x256xf32, #tpu.memory_space<vmem>>, vector<1x256xf32>
    %48 = vector.broadcast %47 : vector<1x256xf32> to vector<64x256xf32>
    %49 = arith.mulf %46, %48 : vector<64x256xf32>
    %50 = arith.truncf %49 : vector<64x256xf32> to vector<64x256xbf16>
    %c0_38 = arith.constant 0 : index
    %c5_39 = arith.constant 5 : index
    %c0_40 = arith.constant 0 : index
    %c0_41 = arith.constant 0 : index
    %51 = vector.load %arg2[%c0_38, %c5_39, %c0_40, %c0_41] : memref<4x9x64x64xbf16, #tpu.memory_space<vmem>>, vector<1x1x64x64xbf16>
    %52 = vector.shape_cast %51 : vector<1x1x64x64xbf16> to vector<64x64xbf16>
    %cst_42 = arith.constant dense<0.000000e+00> : vector<64x256xf32>
    %53 = tpu.matmul %52, %50, %cst_42 {dimension_numbers = #tpu.dot_dimension_numbers<[1], [0], [0], [1], [0, 0, 1, 1], [], []>} : vector<64x64xbf16>, vector<64x256xbf16>, vector<64x256xf32> -> vector<64x256xf32>
    %54 = arith.addf %45, %53 : vector<64x256xf32>
    %c241_i32 = arith.constant 241 : i32
    %55 = tpu.dynamic_rotate %6 by %c241_i32 dim 1 : vector<64x256xf32>, i32 -> vector<64x256xf32>
    %c6 = arith.constant 6 : index
    %c0_43 = arith.constant 0 : index
    %56 = vector.load %arg4[%c6, %c0_43] : memref<9x256xf32, #tpu.memory_space<vmem>>, vector<1x256xf32>
    %57 = vector.broadcast %56 : vector<1x256xf32> to vector<64x256xf32>
    %58 = arith.mulf %55, %57 : vector<64x256xf32>
    %59 = arith.truncf %58 : vector<64x256xf32> to vector<64x256xbf16>
    %c0_44 = arith.constant 0 : index
    %c6_45 = arith.constant 6 : index
    %c0_46 = arith.constant 0 : index
    %c0_47 = arith.constant 0 : index
    %60 = vector.load %arg2[%c0_44, %c6_45, %c0_46, %c0_47] : memref<4x9x64x64xbf16, #tpu.memory_space<vmem>>, vector<1x1x64x64xbf16>
    %61 = vector.shape_cast %60 : vector<1x1x64x64xbf16> to vector<64x64xbf16>
    %cst_48 = arith.constant dense<0.000000e+00> : vector<64x256xf32>
    %62 = tpu.matmul %61, %59, %cst_48 {dimension_numbers = #tpu.dot_dimension_numbers<[1], [0], [0], [1], [0, 0, 1, 1], [], []>} : vector<64x64xbf16>, vector<64x256xbf16>, vector<64x256xf32> -> vector<64x256xf32>
    %63 = arith.addf %54, %62 : vector<64x256xf32>
    %c240_i32 = arith.constant 240 : i32
    %64 = tpu.dynamic_rotate %6 by %c240_i32 dim 1 : vector<64x256xf32>, i32 -> vector<64x256xf32>
    %c7 = arith.constant 7 : index
    %c0_49 = arith.constant 0 : index
    %65 = vector.load %arg4[%c7, %c0_49] : memref<9x256xf32, #tpu.memory_space<vmem>>, vector<1x256xf32>
    %66 = vector.broadcast %65 : vector<1x256xf32> to vector<64x256xf32>
    %67 = arith.mulf %64, %66 : vector<64x256xf32>
    %68 = arith.truncf %67 : vector<64x256xf32> to vector<64x256xbf16>
    %c0_50 = arith.constant 0 : index
    %c7_51 = arith.constant 7 : index
    %c0_52 = arith.constant 0 : index
    %c0_53 = arith.constant 0 : index
    %69 = vector.load %arg2[%c0_50, %c7_51, %c0_52, %c0_53] : memref<4x9x64x64xbf16, #tpu.memory_space<vmem>>, vector<1x1x64x64xbf16>
    %70 = vector.shape_cast %69 : vector<1x1x64x64xbf16> to vector<64x64xbf16>
    %cst_54 = arith.constant dense<0.000000e+00> : vector<64x256xf32>
    %71 = tpu.matmul %70, %68, %cst_54 {dimension_numbers = #tpu.dot_dimension_numbers<[1], [0], [0], [1], [0, 0, 1, 1], [], []>} : vector<64x64xbf16>, vector<64x256xbf16>, vector<64x256xf32> -> vector<64x256xf32>
    %72 = arith.addf %63, %71 : vector<64x256xf32>
    %c239_i32 = arith.constant 239 : i32
    %73 = tpu.dynamic_rotate %6 by %c239_i32 dim 1 : vector<64x256xf32>, i32 -> vector<64x256xf32>
    %c8 = arith.constant 8 : index
    %c0_55 = arith.constant 0 : index
    %74 = vector.load %arg4[%c8, %c0_55] : memref<9x256xf32, #tpu.memory_space<vmem>>, vector<1x256xf32>
    %75 = vector.broadcast %74 : vector<1x256xf32> to vector<64x256xf32>
    %76 = arith.mulf %73, %75 : vector<64x256xf32>
    %77 = arith.truncf %76 : vector<64x256xf32> to vector<64x256xbf16>
    %c0_56 = arith.constant 0 : index
    %c8_57 = arith.constant 8 : index
    %c0_58 = arith.constant 0 : index
    %c0_59 = arith.constant 0 : index
    %78 = vector.load %arg2[%c0_56, %c8_57, %c0_58, %c0_59] : memref<4x9x64x64xbf16, #tpu.memory_space<vmem>>, vector<1x1x64x64xbf16>
    %79 = vector.shape_cast %78 : vector<1x1x64x64xbf16> to vector<64x64xbf16>
    %cst_60 = arith.constant dense<0.000000e+00> : vector<64x256xf32>
    %80 = tpu.matmul %79, %77, %cst_60 {dimension_numbers = #tpu.dot_dimension_numbers<[1], [0], [0], [1], [0, 0, 1, 1], [], []>} : vector<64x64xbf16>, vector<64x256xbf16>, vector<64x256xf32> -> vector<64x256xf32>
    %81 = arith.addf %72, %80 : vector<64x256xf32>
    %c0_61 = arith.constant 0 : index
    %c0_62 = arith.constant 0 : index
    %c0_63 = arith.constant 0 : index
    %82 = vector.load %arg3[%c0_61, %c0_62, %c0_63] : memref<4x64x1xf32, #tpu.memory_space<vmem>>, vector<1x64x1xf32>
    %83 = vector.shape_cast %82 : vector<1x64x1xf32> to vector<64x1xf32>
    %84 = vector.broadcast %83 : vector<64x1xf32> to vector<64x256xf32>
    %85 = arith.addf %81, %84 : vector<64x256xf32>
    %cst_64 = arith.constant 0.000000e+00 : f32
    %86 = vector.broadcast %cst_64 : f32 to vector<64x256xf32>
    %87 = arith.maximumf %85, %86 : vector<64x256xf32>
    %88 = arith.truncf %87 : vector<64x256xf32> to vector<64x256xbf16>
    %c0_65 = arith.constant 0 : index
    %c0_66 = arith.constant 0 : index
    %89 = vector.load %arg6[%c0_65, %c0_66] : memref<64x256xbf16, #tpu.memory_space<vmem>>, vector<64x256xbf16>
    tpu.vector_store %arg6[%c0_65, %c0_66], %88 {strides = array<i32>} : memref<64x256xbf16, #tpu.memory_space<vmem>>, vector<64x256xbf16>,
    %c0_67 = arith.constant 0 : index
    %c0_68 = arith.constant 0 : index
    %90 = vector.load %arg6[%c0_67, %c0_68] : memref<64x256xbf16, #tpu.memory_space<vmem>>, vector<64x256xbf16>
    %91 = arith.extf %90 : vector<64x256xbf16> to vector<64x256xf32>
    %c17_i32_69 = arith.constant 17 : i32
    %92 = tpu.dynamic_rotate %91 by %c17_i32_69 dim 1 : vector<64x256xf32>, i32 -> vector<64x256xf32>
    %c0_70 = arith.constant 0 : index
    %c0_71 = arith.constant 0 : index
    %93 = vector.load %arg4[%c0_70, %c0_71] : memref<9x256xf32, #tpu.memory_space<vmem>>, vector<1x256xf32>
    %94 = vector.broadcast %93 : vector<1x256xf32> to vector<64x256xf32>
    %95 = arith.mulf %92, %94 : vector<64x256xf32>
    %96 = arith.truncf %95 : vector<64x256xf32> to vector<64x256xbf16>
    %c1_72 = arith.constant 1 : index
    %c0_73 = arith.constant 0 : index
    %c0_74 = arith.constant 0 : index
    %c0_75 = arith.constant 0 : index
    %97 = vector.load %arg2[%c1_72, %c0_73, %c0_74, %c0_75] : memref<4x9x64x64xbf16, #tpu.memory_space<vmem>>, vector<1x1x64x64xbf16>
    %98 = vector.shape_cast %97 : vector<1x1x64x64xbf16> to vector<64x64xbf16>
    %cst_76 = arith.constant dense<0.000000e+00> : vector<64x256xf32>
    %99 = tpu.matmul %98, %96, %cst_76 {dimension_numbers = #tpu.dot_dimension_numbers<[1], [0], [0], [1], [0, 0, 1, 1], [], []>} : vector<64x64xbf16>, vector<64x256xbf16>, vector<64x256xf32> -> vector<64x256xf32>
    %c16_i32_77 = arith.constant 16 : i32
    %100 = tpu.dynamic_rotate %91 by %c16_i32_77 dim 1 : vector<64x256xf32>, i32 -> vector<64x256xf32>
    %c1_78 = arith.constant 1 : index
    %c0_79 = arith.constant 0 : index
    %101 = vector.load %arg4[%c1_78, %c0_79] : memref<9x256xf32, #tpu.memory_space<vmem>>, vector<1x256xf32>
    %102 = vector.broadcast %101 : vector<1x256xf32> to vector<64x256xf32>
    %103 = arith.mulf %100, %102 : vector<64x256xf32>
    %104 = arith.truncf %103 : vector<64x256xf32> to vector<64x256xbf16>
    %c1_80 = arith.constant 1 : index
    %c1_81 = arith.constant 1 : index
    %c0_82 = arith.constant 0 : index
    %c0_83 = arith.constant 0 : index
    %105 = vector.load %arg2[%c1_80, %c1_81, %c0_82, %c0_83] : memref<4x9x64x64xbf16, #tpu.memory_space<vmem>>, vector<1x1x64x64xbf16>
    %106 = vector.shape_cast %105 : vector<1x1x64x64xbf16> to vector<64x64xbf16>
    %cst_84 = arith.constant dense<0.000000e+00> : vector<64x256xf32>
    %107 = tpu.matmul %106, %104, %cst_84 {dimension_numbers = #tpu.dot_dimension_numbers<[1], [0], [0], [1], [0, 0, 1, 1], [], []>} : vector<64x64xbf16>, vector<64x256xbf16>, vector<64x256xf32> -> vector<64x256xf32>
    %108 = arith.addf %99, %107 : vector<64x256xf32>
    %c15_i32_85 = arith.constant 15 : i32
    %109 = tpu.dynamic_rotate %91 by %c15_i32_85 dim 1 : vector<64x256xf32>, i32 -> vector<64x256xf32>
    %c2_86 = arith.constant 2 : index
    %c0_87 = arith.constant 0 : index
    %110 = vector.load %arg4[%c2_86, %c0_87] : memref<9x256xf32, #tpu.memory_space<vmem>>, vector<1x256xf32>
    %111 = vector.broadcast %110 : vector<1x256xf32> to vector<64x256xf32>
    %112 = arith.mulf %109, %111 : vector<64x256xf32>
    %113 = arith.truncf %112 : vector<64x256xf32> to vector<64x256xbf16>
    %c1_88 = arith.constant 1 : index
    %c2_89 = arith.constant 2 : index
    %c0_90 = arith.constant 0 : index
    %c0_91 = arith.constant 0 : index
    %114 = vector.load %arg2[%c1_88, %c2_89, %c0_90, %c0_91] : memref<4x9x64x64xbf16, #tpu.memory_space<vmem>>, vector<1x1x64x64xbf16>
    %115 = vector.shape_cast %114 : vector<1x1x64x64xbf16> to vector<64x64xbf16>
    %cst_92 = arith.constant dense<0.000000e+00> : vector<64x256xf32>
    %116 = tpu.matmul %115, %113, %cst_92 {dimension_numbers = #tpu.dot_dimension_numbers<[1], [0], [0], [1], [0, 0, 1, 1], [], []>} : vector<64x64xbf16>, vector<64x256xbf16>, vector<64x256xf32> -> vector<64x256xf32>
    %117 = arith.addf %108, %116 : vector<64x256xf32>
    %c1_i32_93 = arith.constant 1 : i32
    %118 = tpu.dynamic_rotate %91 by %c1_i32_93 dim 1 : vector<64x256xf32>, i32 -> vector<64x256xf32>
    %c3_94 = arith.constant 3 : index
    %c0_95 = arith.constant 0 : index
    %119 = vector.load %arg4[%c3_94, %c0_95] : memref<9x256xf32, #tpu.memory_space<vmem>>, vector<1x256xf32>
    %120 = vector.broadcast %119 : vector<1x256xf32> to vector<64x256xf32>
    %121 = arith.mulf %118, %120 : vector<64x256xf32>
    %122 = arith.truncf %121 : vector<64x256xf32> to vector<64x256xbf16>
    %c1_96 = arith.constant 1 : index
    %c3_97 = arith.constant 3 : index
    %c0_98 = arith.constant 0 : index
    %c0_99 = arith.constant 0 : index
    %123 = vector.load %arg2[%c1_96, %c3_97, %c0_98, %c0_99] : memref<4x9x64x64xbf16, #tpu.memory_space<vmem>>, vector<1x1x64x64xbf16>
    %124 = vector.shape_cast %123 : vector<1x1x64x64xbf16> to vector<64x64xbf16>
    %cst_100 = arith.constant dense<0.000000e+00> : vector<64x256xf32>
    %125 = tpu.matmul %124, %122, %cst_100 {dimension_numbers = #tpu.dot_dimension_numbers<[1], [0], [0], [1], [0, 0, 1, 1], [], []>} : vector<64x64xbf16>, vector<64x256xbf16>, vector<64x256xf32> -> vector<64x256xf32>
    %126 = arith.addf %117, %125 : vector<64x256xf32>
    %c1_101 = arith.constant 1 : index
    %c4_102 = arith.constant 4 : index
    %c0_103 = arith.constant 0 : index
    %c0_104 = arith.constant 0 : index
    %127 = vector.load %arg2[%c1_101, %c4_102, %c0_103, %c0_104] : memref<4x9x64x64xbf16, #tpu.memory_space<vmem>>, vector<1x1x64x64xbf16>
    %128 = vector.shape_cast %127 : vector<1x1x64x64xbf16> to vector<64x64xbf16>
    %cst_105 = arith.constant dense<0.000000e+00> : vector<64x256xf32>
    %129 = tpu.matmul %128, %90, %cst_105 {dimension_numbers = #tpu.dot_dimension_numbers<[1], [0], [0], [1], [0, 0, 1, 1], [], []>} : vector<64x64xbf16>, vector<64x256xbf16>, vector<64x256xf32> -> vector<64x256xf32>
    %130 = arith.addf %126, %129 : vector<64x256xf32>
    %c255_i32_106 = arith.constant 255 : i32
    %131 = tpu.dynamic_rotate %91 by %c255_i32_106 dim 1 : vector<64x256xf32>, i32 -> vector<64x256xf32>
    %c5_107 = arith.constant 5 : index
    %c0_108 = arith.constant 0 : index
    %132 = vector.load %arg4[%c5_107, %c0_108] : memref<9x256xf32, #tpu.memory_space<vmem>>, vector<1x256xf32>
    %133 = vector.broadcast %132 : vector<1x256xf32> to vector<64x256xf32>
    %134 = arith.mulf %131, %133 : vector<64x256xf32>
    %135 = arith.truncf %134 : vector<64x256xf32> to vector<64x256xbf16>
    %c1_109 = arith.constant 1 : index
    %c5_110 = arith.constant 5 : index
    %c0_111 = arith.constant 0 : index
    %c0_112 = arith.constant 0 : index
    %136 = vector.load %arg2[%c1_109, %c5_110, %c0_111, %c0_112] : memref<4x9x64x64xbf16, #tpu.memory_space<vmem>>, vector<1x1x64x64xbf16>
    %137 = vector.shape_cast %136 : vector<1x1x64x64xbf16> to vector<64x64xbf16>
    %cst_113 = arith.constant dense<0.000000e+00> : vector<64x256xf32>
    %138 = tpu.matmul %137, %135, %cst_113 {dimension_numbers = #tpu.dot_dimension_numbers<[1], [0], [0], [1], [0, 0, 1, 1], [], []>} : vector<64x64xbf16>, vector<64x256xbf16>, vector<64x256xf32> -> vector<64x256xf32>
    %139 = arith.addf %130, %138 : vector<64x256xf32>
    %c241_i32_114 = arith.constant 241 : i32
    %140 = tpu.dynamic_rotate %91 by %c241_i32_114 dim 1 : vector<64x256xf32>, i32 -> vector<64x256xf32>
    %c6_115 = arith.constant 6 : index
    %c0_116 = arith.constant 0 : index
    %141 = vector.load %arg4[%c6_115, %c0_116] : memref<9x256xf32, #tpu.memory_space<vmem>>, vector<1x256xf32>
    %142 = vector.broadcast %141 : vector<1x256xf32> to vector<64x256xf32>
    %143 = arith.mulf %140, %142 : vector<64x256xf32>
    %144 = arith.truncf %143 : vector<64x256xf32> to vector<64x256xbf16>
    %c1_117 = arith.constant 1 : index
    %c6_118 = arith.constant 6 : index
    %c0_119 = arith.constant 0 : index
    %c0_120 = arith.constant 0 : index
    %145 = vector.load %arg2[%c1_117, %c6_118, %c0_119, %c0_120] : memref<4x9x64x64xbf16, #tpu.memory_space<vmem>>, vector<1x1x64x64xbf16>
    %146 = vector.shape_cast %145 : vector<1x1x64x64xbf16> to vector<64x64xbf16>
    %cst_121 = arith.constant dense<0.000000e+00> : vector<64x256xf32>
    %147 = tpu.matmul %146, %144, %cst_121 {dimension_numbers = #tpu.dot_dimension_numbers<[1], [0], [0], [1], [0, 0, 1, 1], [], []>} : vector<64x64xbf16>, vector<64x256xbf16>, vector<64x256xf32> -> vector<64x256xf32>
    %148 = arith.addf %139, %147 : vector<64x256xf32>
    %c240_i32_122 = arith.constant 240 : i32
    %149 = tpu.dynamic_rotate %91 by %c240_i32_122 dim 1 : vector<64x256xf32>, i32 -> vector<64x256xf32>
    %c7_123 = arith.constant 7 : index
    %c0_124 = arith.constant 0 : index
    %150 = vector.load %arg4[%c7_123, %c0_124] : memref<9x256xf32, #tpu.memory_space<vmem>>, vector<1x256xf32>
    %151 = vector.broadcast %150 : vector<1x256xf32> to vector<64x256xf32>
    %152 = arith.mulf %149, %151 : vector<64x256xf32>
    %153 = arith.truncf %152 : vector<64x256xf32> to vector<64x256xbf16>
    %c1_125 = arith.constant 1 : index
    %c7_126 = arith.constant 7 : index
    %c0_127 = arith.constant 0 : index
    %c0_128 = arith.constant 0 : index
    %154 = vector.load %arg2[%c1_125, %c7_126, %c0_127, %c0_128] : memref<4x9x64x64xbf16, #tpu.memory_space<vmem>>, vector<1x1x64x64xbf16>
    %155 = vector.shape_cast %154 : vector<1x1x64x64xbf16> to vector<64x64xbf16>
    %cst_129 = arith.constant dense<0.000000e+00> : vector<64x256xf32>
    %156 = tpu.matmul %155, %153, %cst_129 {dimension_numbers = #tpu.dot_dimension_numbers<[1], [0], [0], [1], [0, 0, 1, 1], [], []>} : vector<64x64xbf16>, vector<64x256xbf16>, vector<64x256xf32> -> vector<64x256xf32>
    %157 = arith.addf %148, %156 : vector<64x256xf32>
    %c239_i32_130 = arith.constant 239 : i32
    %158 = tpu.dynamic_rotate %91 by %c239_i32_130 dim 1 : vector<64x256xf32>, i32 -> vector<64x256xf32>
    %c8_131 = arith.constant 8 : index
    %c0_132 = arith.constant 0 : index
    %159 = vector.load %arg4[%c8_131, %c0_132] : memref<9x256xf32, #tpu.memory_space<vmem>>, vector<1x256xf32>
    %160 = vector.broadcast %159 : vector<1x256xf32> to vector<64x256xf32>
    %161 = arith.mulf %158, %160 : vector<64x256xf32>
    %162 = arith.truncf %161 : vector<64x256xf32> to vector<64x256xbf16>
    %c1_133 = arith.constant 1 : index
    %c8_134 = arith.constant 8 : index
    %c0_135 = arith.constant 0 : index
    %c0_136 = arith.constant 0 : index
    %163 = vector.load %arg2[%c1_133, %c8_134, %c0_135, %c0_136] : memref<4x9x64x64xbf16, #tpu.memory_space<vmem>>, vector<1x1x64x64xbf16>
    %164 = vector.shape_cast %163 : vector<1x1x64x64xbf16> to vector<64x64xbf16>
    %cst_137 = arith.constant dense<0.000000e+00> : vector<64x256xf32>
    %165 = tpu.matmul %164, %162, %cst_137 {dimension_numbers = #tpu.dot_dimension_numbers<[1], [0], [0], [1], [0, 0, 1, 1], [], []>} : vector<64x64xbf16>, vector<64x256xbf16>, vector<64x256xf32> -> vector<64x256xf32>
    %166 = arith.addf %157, %165 : vector<64x256xf32>
    %c1_138 = arith.constant 1 : index
    %c0_139 = arith.constant 0 : index
    %c0_140 = arith.constant 0 : index
    %167 = vector.load %arg3[%c1_138, %c0_139, %c0_140] : memref<4x64x1xf32, #tpu.memory_space<vmem>>, vector<1x64x1xf32>
    %168 = vector.shape_cast %167 : vector<1x64x1xf32> to vector<64x1xf32>
    %169 = vector.broadcast %168 : vector<64x1xf32> to vector<64x256xf32>
    %170 = arith.addf %166, %169 : vector<64x256xf32>
    %cst_141 = arith.constant 0.000000e+00 : f32
    %171 = vector.broadcast %cst_141 : f32 to vector<64x256xf32>
    %172 = arith.maximumf %170, %171 : vector<64x256xf32>
    %173 = arith.truncf %172 : vector<64x256xf32> to vector<64x256xbf16>
    %c0_142 = arith.constant 0 : index
    %c0_143 = arith.constant 0 : index
    %174 = vector.load %arg6[%c0_142, %c0_143] : memref<64x256xbf16, #tpu.memory_space<vmem>>, vector<64x256xbf16>
    tpu.vector_store %arg6[%c0_142, %c0_143], %173 {strides = array<i32>} : memref<64x256xbf16, #tpu.memory_space<vmem>>, vector<64x256xbf16>,
    %c0_144 = arith.constant 0 : index
    %c0_145 = arith.constant 0 : index
    %175 = vector.load %arg6[%c0_144, %c0_145] : memref<64x256xbf16, #tpu.memory_space<vmem>>, vector<64x256xbf16>
    %176 = arith.extf %175 : vector<64x256xbf16> to vector<64x256xf32>
    %c17_i32_146 = arith.constant 17 : i32
    %177 = tpu.dynamic_rotate %176 by %c17_i32_146 dim 1 : vector<64x256xf32>, i32 -> vector<64x256xf32>
    %c0_147 = arith.constant 0 : index
    %c0_148 = arith.constant 0 : index
    %178 = vector.load %arg4[%c0_147, %c0_148] : memref<9x256xf32, #tpu.memory_space<vmem>>, vector<1x256xf32>
    %179 = vector.broadcast %178 : vector<1x256xf32> to vector<64x256xf32>
    %180 = arith.mulf %177, %179 : vector<64x256xf32>
    %181 = arith.truncf %180 : vector<64x256xf32> to vector<64x256xbf16>
    %c2_149 = arith.constant 2 : index
    %c0_150 = arith.constant 0 : index
    %c0_151 = arith.constant 0 : index
    %c0_152 = arith.constant 0 : index
    %182 = vector.load %arg2[%c2_149, %c0_150, %c0_151, %c0_152] : memref<4x9x64x64xbf16, #tpu.memory_space<vmem>>, vector<1x1x64x64xbf16>
    %183 = vector.shape_cast %182 : vector<1x1x64x64xbf16> to vector<64x64xbf16>
    %cst_153 = arith.constant dense<0.000000e+00> : vector<64x256xf32>
    %184 = tpu.matmul %183, %181, %cst_153 {dimension_numbers = #tpu.dot_dimension_numbers<[1], [0], [0], [1], [0, 0, 1, 1], [], []>} : vector<64x64xbf16>, vector<64x256xbf16>, vector<64x256xf32> -> vector<64x256xf32>
    %c16_i32_154 = arith.constant 16 : i32
    %185 = tpu.dynamic_rotate %176 by %c16_i32_154 dim 1 : vector<64x256xf32>, i32 -> vector<64x256xf32>
    %c1_155 = arith.constant 1 : index
    %c0_156 = arith.constant 0 : index
    %186 = vector.load %arg4[%c1_155, %c0_156] : memref<9x256xf32, #tpu.memory_space<vmem>>, vector<1x256xf32>
    %187 = vector.broadcast %186 : vector<1x256xf32> to vector<64x256xf32>
    %188 = arith.mulf %185, %187 : vector<64x256xf32>
    %189 = arith.truncf %188 : vector<64x256xf32> to vector<64x256xbf16>
    %c2_157 = arith.constant 2 : index
    %c1_158 = arith.constant 1 : index
    %c0_159 = arith.constant 0 : index
    %c0_160 = arith.constant 0 : index
    %190 = vector.load %arg2[%c2_157, %c1_158, %c0_159, %c0_160] : memref<4x9x64x64xbf16, #tpu.memory_space<vmem>>, vector<1x1x64x64xbf16>
    %191 = vector.shape_cast %190 : vector<1x1x64x64xbf16> to vector<64x64xbf16>
    %cst_161 = arith.constant dense<0.000000e+00> : vector<64x256xf32>
    %192 = tpu.matmul %191, %189, %cst_161 {dimension_numbers = #tpu.dot_dimension_numbers<[1], [0], [0], [1], [0, 0, 1, 1], [], []>} : vector<64x64xbf16>, vector<64x256xbf16>, vector<64x256xf32> -> vector<64x256xf32>
    %193 = arith.addf %184, %192 : vector<64x256xf32>
    %c15_i32_162 = arith.constant 15 : i32
    %194 = tpu.dynamic_rotate %176 by %c15_i32_162 dim 1 : vector<64x256xf32>, i32 -> vector<64x256xf32>
    %c2_163 = arith.constant 2 : index
    %c0_164 = arith.constant 0 : index
    %195 = vector.load %arg4[%c2_163, %c0_164] : memref<9x256xf32, #tpu.memory_space<vmem>>, vector<1x256xf32>
    %196 = vector.broadcast %195 : vector<1x256xf32> to vector<64x256xf32>
    %197 = arith.mulf %194, %196 : vector<64x256xf32>
    %198 = arith.truncf %197 : vector<64x256xf32> to vector<64x256xbf16>
    %c2_165 = arith.constant 2 : index
    %c2_166 = arith.constant 2 : index
    %c0_167 = arith.constant 0 : index
    %c0_168 = arith.constant 0 : index
    %199 = vector.load %arg2[%c2_165, %c2_166, %c0_167, %c0_168] : memref<4x9x64x64xbf16, #tpu.memory_space<vmem>>, vector<1x1x64x64xbf16>
    %200 = vector.shape_cast %199 : vector<1x1x64x64xbf16> to vector<64x64xbf16>
    %cst_169 = arith.constant dense<0.000000e+00> : vector<64x256xf32>
    %201 = tpu.matmul %200, %198, %cst_169 {dimension_numbers = #tpu.dot_dimension_numbers<[1], [0], [0], [1], [0, 0, 1, 1], [], []>} : vector<64x64xbf16>, vector<64x256xbf16>, vector<64x256xf32> -> vector<64x256xf32>
    %202 = arith.addf %193, %201 : vector<64x256xf32>
    %c1_i32_170 = arith.constant 1 : i32
    %203 = tpu.dynamic_rotate %176 by %c1_i32_170 dim 1 : vector<64x256xf32>, i32 -> vector<64x256xf32>
    %c3_171 = arith.constant 3 : index
    %c0_172 = arith.constant 0 : index
    %204 = vector.load %arg4[%c3_171, %c0_172] : memref<9x256xf32, #tpu.memory_space<vmem>>, vector<1x256xf32>
    %205 = vector.broadcast %204 : vector<1x256xf32> to vector<64x256xf32>
    %206 = arith.mulf %203, %205 : vector<64x256xf32>
    %207 = arith.truncf %206 : vector<64x256xf32> to vector<64x256xbf16>
    %c2_173 = arith.constant 2 : index
    %c3_174 = arith.constant 3 : index
    %c0_175 = arith.constant 0 : index
    %c0_176 = arith.constant 0 : index
    %208 = vector.load %arg2[%c2_173, %c3_174, %c0_175, %c0_176] : memref<4x9x64x64xbf16, #tpu.memory_space<vmem>>, vector<1x1x64x64xbf16>
    %209 = vector.shape_cast %208 : vector<1x1x64x64xbf16> to vector<64x64xbf16>
    %cst_177 = arith.constant dense<0.000000e+00> : vector<64x256xf32>
    %210 = tpu.matmul %209, %207, %cst_177 {dimension_numbers = #tpu.dot_dimension_numbers<[1], [0], [0], [1], [0, 0, 1, 1], [], []>} : vector<64x64xbf16>, vector<64x256xbf16>, vector<64x256xf32> -> vector<64x256xf32>
    %211 = arith.addf %202, %210 : vector<64x256xf32>
    %c2_178 = arith.constant 2 : index
    %c4_179 = arith.constant 4 : index
    %c0_180 = arith.constant 0 : index
    %c0_181 = arith.constant 0 : index
    %212 = vector.load %arg2[%c2_178, %c4_179, %c0_180, %c0_181] : memref<4x9x64x64xbf16, #tpu.memory_space<vmem>>, vector<1x1x64x64xbf16>
    %213 = vector.shape_cast %212 : vector<1x1x64x64xbf16> to vector<64x64xbf16>
    %cst_182 = arith.constant dense<0.000000e+00> : vector<64x256xf32>
    %214 = tpu.matmul %213, %175, %cst_182 {dimension_numbers = #tpu.dot_dimension_numbers<[1], [0], [0], [1], [0, 0, 1, 1], [], []>} : vector<64x64xbf16>, vector<64x256xbf16>, vector<64x256xf32> -> vector<64x256xf32>
    %215 = arith.addf %211, %214 : vector<64x256xf32>
    %c255_i32_183 = arith.constant 255 : i32
    %216 = tpu.dynamic_rotate %176 by %c255_i32_183 dim 1 : vector<64x256xf32>, i32 -> vector<64x256xf32>
    %c5_184 = arith.constant 5 : index
    %c0_185 = arith.constant 0 : index
    %217 = vector.load %arg4[%c5_184, %c0_185] : memref<9x256xf32, #tpu.memory_space<vmem>>, vector<1x256xf32>
    %218 = vector.broadcast %217 : vector<1x256xf32> to vector<64x256xf32>
    %219 = arith.mulf %216, %218 : vector<64x256xf32>
    %220 = arith.truncf %219 : vector<64x256xf32> to vector<64x256xbf16>
    %c2_186 = arith.constant 2 : index
    %c5_187 = arith.constant 5 : index
    %c0_188 = arith.constant 0 : index
    %c0_189 = arith.constant 0 : index
    %221 = vector.load %arg2[%c2_186, %c5_187, %c0_188, %c0_189] : memref<4x9x64x64xbf16, #tpu.memory_space<vmem>>, vector<1x1x64x64xbf16>
    %222 = vector.shape_cast %221 : vector<1x1x64x64xbf16> to vector<64x64xbf16>
    %cst_190 = arith.constant dense<0.000000e+00> : vector<64x256xf32>
    %223 = tpu.matmul %222, %220, %cst_190 {dimension_numbers = #tpu.dot_dimension_numbers<[1], [0], [0], [1], [0, 0, 1, 1], [], []>} : vector<64x64xbf16>, vector<64x256xbf16>, vector<64x256xf32> -> vector<64x256xf32>
    %224 = arith.addf %215, %223 : vector<64x256xf32>
    %c241_i32_191 = arith.constant 241 : i32
    %225 = tpu.dynamic_rotate %176 by %c241_i32_191 dim 1 : vector<64x256xf32>, i32 -> vector<64x256xf32>
    %c6_192 = arith.constant 6 : index
    %c0_193 = arith.constant 0 : index
    %226 = vector.load %arg4[%c6_192, %c0_193] : memref<9x256xf32, #tpu.memory_space<vmem>>, vector<1x256xf32>
    %227 = vector.broadcast %226 : vector<1x256xf32> to vector<64x256xf32>
    %228 = arith.mulf %225, %227 : vector<64x256xf32>
    %229 = arith.truncf %228 : vector<64x256xf32> to vector<64x256xbf16>
    %c2_194 = arith.constant 2 : index
    %c6_195 = arith.constant 6 : index
    %c0_196 = arith.constant 0 : index
    %c0_197 = arith.constant 0 : index
    %230 = vector.load %arg2[%c2_194, %c6_195, %c0_196, %c0_197] : memref<4x9x64x64xbf16, #tpu.memory_space<vmem>>, vector<1x1x64x64xbf16>
    %231 = vector.shape_cast %230 : vector<1x1x64x64xbf16> to vector<64x64xbf16>
    %cst_198 = arith.constant dense<0.000000e+00> : vector<64x256xf32>
    %232 = tpu.matmul %231, %229, %cst_198 {dimension_numbers = #tpu.dot_dimension_numbers<[1], [0], [0], [1], [0, 0, 1, 1], [], []>} : vector<64x64xbf16>, vector<64x256xbf16>, vector<64x256xf32> -> vector<64x256xf32>
    %233 = arith.addf %224, %232 : vector<64x256xf32>
    %c240_i32_199 = arith.constant 240 : i32
    %234 = tpu.dynamic_rotate %176 by %c240_i32_199 dim 1 : vector<64x256xf32>, i32 -> vector<64x256xf32>
    %c7_200 = arith.constant 7 : index
    %c0_201 = arith.constant 0 : index
    %235 = vector.load %arg4[%c7_200, %c0_201] : memref<9x256xf32, #tpu.memory_space<vmem>>, vector<1x256xf32>
    %236 = vector.broadcast %235 : vector<1x256xf32> to vector<64x256xf32>
    %237 = arith.mulf %234, %236 : vector<64x256xf32>
    %238 = arith.truncf %237 : vector<64x256xf32> to vector<64x256xbf16>
    %c2_202 = arith.constant 2 : index
    %c7_203 = arith.constant 7 : index
    %c0_204 = arith.constant 0 : index
    %c0_205 = arith.constant 0 : index
    %239 = vector.load %arg2[%c2_202, %c7_203, %c0_204, %c0_205] : memref<4x9x64x64xbf16, #tpu.memory_space<vmem>>, vector<1x1x64x64xbf16>
    %240 = vector.shape_cast %239 : vector<1x1x64x64xbf16> to vector<64x64xbf16>
    %cst_206 = arith.constant dense<0.000000e+00> : vector<64x256xf32>
    %241 = tpu.matmul %240, %238, %cst_206 {dimension_numbers = #tpu.dot_dimension_numbers<[1], [0], [0], [1], [0, 0, 1, 1], [], []>} : vector<64x64xbf16>, vector<64x256xbf16>, vector<64x256xf32> -> vector<64x256xf32>
    %242 = arith.addf %233, %241 : vector<64x256xf32>
    %c239_i32_207 = arith.constant 239 : i32
    %243 = tpu.dynamic_rotate %176 by %c239_i32_207 dim 1 : vector<64x256xf32>, i32 -> vector<64x256xf32>
    %c8_208 = arith.constant 8 : index
    %c0_209 = arith.constant 0 : index
    %244 = vector.load %arg4[%c8_208, %c0_209] : memref<9x256xf32, #tpu.memory_space<vmem>>, vector<1x256xf32>
    %245 = vector.broadcast %244 : vector<1x256xf32> to vector<64x256xf32>
    %246 = arith.mulf %243, %245 : vector<64x256xf32>
    %247 = arith.truncf %246 : vector<64x256xf32> to vector<64x256xbf16>
    %c2_210 = arith.constant 2 : index
    %c8_211 = arith.constant 8 : index
    %c0_212 = arith.constant 0 : index
    %c0_213 = arith.constant 0 : index
    %248 = vector.load %arg2[%c2_210, %c8_211, %c0_212, %c0_213] : memref<4x9x64x64xbf16, #tpu.memory_space<vmem>>, vector<1x1x64x64xbf16>
    %249 = vector.shape_cast %248 : vector<1x1x64x64xbf16> to vector<64x64xbf16>
    %cst_214 = arith.constant dense<0.000000e+00> : vector<64x256xf32>
    %250 = tpu.matmul %249, %247, %cst_214 {dimension_numbers = #tpu.dot_dimension_numbers<[1], [0], [0], [1], [0, 0, 1, 1], [], []>} : vector<64x64xbf16>, vector<64x256xbf16>, vector<64x256xf32> -> vector<64x256xf32>
    %251 = arith.addf %242, %250 : vector<64x256xf32>
    %c2_215 = arith.constant 2 : index
    %c0_216 = arith.constant 0 : index
    %c0_217 = arith.constant 0 : index
    %252 = vector.load %arg3[%c2_215, %c0_216, %c0_217] : memref<4x64x1xf32, #tpu.memory_space<vmem>>, vector<1x64x1xf32>
    %253 = vector.shape_cast %252 : vector<1x64x1xf32> to vector<64x1xf32>
    %254 = vector.broadcast %253 : vector<64x1xf32> to vector<64x256xf32>
    %255 = arith.addf %251, %254 : vector<64x256xf32>
    %cst_218 = arith.constant 0.000000e+00 : f32
    %256 = vector.broadcast %cst_218 : f32 to vector<64x256xf32>
    %257 = arith.maximumf %255, %256 : vector<64x256xf32>
    %258 = arith.truncf %257 : vector<64x256xf32> to vector<64x256xbf16>
    %c0_219 = arith.constant 0 : index
    %c0_220 = arith.constant 0 : index
    %259 = vector.load %arg6[%c0_219, %c0_220] : memref<64x256xbf16, #tpu.memory_space<vmem>>, vector<64x256xbf16>
    tpu.vector_store %arg6[%c0_219, %c0_220], %258 {strides = array<i32>} : memref<64x256xbf16, #tpu.memory_space<vmem>>, vector<64x256xbf16>,
    %c0_221 = arith.constant 0 : index
    %c0_222 = arith.constant 0 : index
    %260 = vector.load %arg6[%c0_221, %c0_222] : memref<64x256xbf16, #tpu.memory_space<vmem>>, vector<64x256xbf16>
    %261 = arith.extf %260 : vector<64x256xbf16> to vector<64x256xf32>
    %c17_i32_223 = arith.constant 17 : i32
    %262 = tpu.dynamic_rotate %261 by %c17_i32_223 dim 1 : vector<64x256xf32>, i32 -> vector<64x256xf32>
    %c0_224 = arith.constant 0 : index
    %c0_225 = arith.constant 0 : index
    %263 = vector.load %arg4[%c0_224, %c0_225] : memref<9x256xf32, #tpu.memory_space<vmem>>, vector<1x256xf32>
    %264 = vector.broadcast %263 : vector<1x256xf32> to vector<64x256xf32>
    %265 = arith.mulf %262, %264 : vector<64x256xf32>
    %266 = arith.truncf %265 : vector<64x256xf32> to vector<64x256xbf16>
    %c3_226 = arith.constant 3 : index
    %c0_227 = arith.constant 0 : index
    %c0_228 = arith.constant 0 : index
    %c0_229 = arith.constant 0 : index
    %267 = vector.load %arg2[%c3_226, %c0_227, %c0_228, %c0_229] : memref<4x9x64x64xbf16, #tpu.memory_space<vmem>>, vector<1x1x64x64xbf16>
    %268 = vector.shape_cast %267 : vector<1x1x64x64xbf16> to vector<64x64xbf16>
    %cst_230 = arith.constant dense<0.000000e+00> : vector<64x256xf32>
    %269 = tpu.matmul %268, %266, %cst_230 {dimension_numbers = #tpu.dot_dimension_numbers<[1], [0], [0], [1], [0, 0, 1, 1], [], []>} : vector<64x64xbf16>, vector<64x256xbf16>, vector<64x256xf32> -> vector<64x256xf32>
    %c16_i32_231 = arith.constant 16 : i32
    %270 = tpu.dynamic_rotate %261 by %c16_i32_231 dim 1 : vector<64x256xf32>, i32 -> vector<64x256xf32>
    %c1_232 = arith.constant 1 : index
    %c0_233 = arith.constant 0 : index
    %271 = vector.load %arg4[%c1_232, %c0_233] : memref<9x256xf32, #tpu.memory_space<vmem>>, vector<1x256xf32>
    %272 = vector.broadcast %271 : vector<1x256xf32> to vector<64x256xf32>
    %273 = arith.mulf %270, %272 : vector<64x256xf32>
    %274 = arith.truncf %273 : vector<64x256xf32> to vector<64x256xbf16>
    %c3_234 = arith.constant 3 : index
    %c1_235 = arith.constant 1 : index
    %c0_236 = arith.constant 0 : index
    %c0_237 = arith.constant 0 : index
    %275 = vector.load %arg2[%c3_234, %c1_235, %c0_236, %c0_237] : memref<4x9x64x64xbf16, #tpu.memory_space<vmem>>, vector<1x1x64x64xbf16>
    %276 = vector.shape_cast %275 : vector<1x1x64x64xbf16> to vector<64x64xbf16>
    %cst_238 = arith.constant dense<0.000000e+00> : vector<64x256xf32>
    %277 = tpu.matmul %276, %274, %cst_238 {dimension_numbers = #tpu.dot_dimension_numbers<[1], [0], [0], [1], [0, 0, 1, 1], [], []>} : vector<64x64xbf16>, vector<64x256xbf16>, vector<64x256xf32> -> vector<64x256xf32>
    %278 = arith.addf %269, %277 : vector<64x256xf32>
    %c15_i32_239 = arith.constant 15 : i32
    %279 = tpu.dynamic_rotate %261 by %c15_i32_239 dim 1 : vector<64x256xf32>, i32 -> vector<64x256xf32>
    %c2_240 = arith.constant 2 : index
    %c0_241 = arith.constant 0 : index
    %280 = vector.load %arg4[%c2_240, %c0_241] : memref<9x256xf32, #tpu.memory_space<vmem>>, vector<1x256xf32>
    %281 = vector.broadcast %280 : vector<1x256xf32> to vector<64x256xf32>
    %282 = arith.mulf %279, %281 : vector<64x256xf32>
    %283 = arith.truncf %282 : vector<64x256xf32> to vector<64x256xbf16>
    %c3_242 = arith.constant 3 : index
    %c2_243 = arith.constant 2 : index
    %c0_244 = arith.constant 0 : index
    %c0_245 = arith.constant 0 : index
    %284 = vector.load %arg2[%c3_242, %c2_243, %c0_244, %c0_245] : memref<4x9x64x64xbf16, #tpu.memory_space<vmem>>, vector<1x1x64x64xbf16>
    %285 = vector.shape_cast %284 : vector<1x1x64x64xbf16> to vector<64x64xbf16>
    %cst_246 = arith.constant dense<0.000000e+00> : vector<64x256xf32>
    %286 = tpu.matmul %285, %283, %cst_246 {dimension_numbers = #tpu.dot_dimension_numbers<[1], [0], [0], [1], [0, 0, 1, 1], [], []>} : vector<64x64xbf16>, vector<64x256xbf16>, vector<64x256xf32> -> vector<64x256xf32>
    %287 = arith.addf %278, %286 : vector<64x256xf32>
    %c1_i32_247 = arith.constant 1 : i32
    %288 = tpu.dynamic_rotate %261 by %c1_i32_247 dim 1 : vector<64x256xf32>, i32 -> vector<64x256xf32>
    %c3_248 = arith.constant 3 : index
    %c0_249 = arith.constant 0 : index
    %289 = vector.load %arg4[%c3_248, %c0_249] : memref<9x256xf32, #tpu.memory_space<vmem>>, vector<1x256xf32>
    %290 = vector.broadcast %289 : vector<1x256xf32> to vector<64x256xf32>
    %291 = arith.mulf %288, %290 : vector<64x256xf32>
    %292 = arith.truncf %291 : vector<64x256xf32> to vector<64x256xbf16>
    %c3_250 = arith.constant 3 : index
    %c3_251 = arith.constant 3 : index
    %c0_252 = arith.constant 0 : index
    %c0_253 = arith.constant 0 : index
    %293 = vector.load %arg2[%c3_250, %c3_251, %c0_252, %c0_253] : memref<4x9x64x64xbf16, #tpu.memory_space<vmem>>, vector<1x1x64x64xbf16>
    %294 = vector.shape_cast %293 : vector<1x1x64x64xbf16> to vector<64x64xbf16>
    %cst_254 = arith.constant dense<0.000000e+00> : vector<64x256xf32>
    %295 = tpu.matmul %294, %292, %cst_254 {dimension_numbers = #tpu.dot_dimension_numbers<[1], [0], [0], [1], [0, 0, 1, 1], [], []>} : vector<64x64xbf16>, vector<64x256xbf16>, vector<64x256xf32> -> vector<64x256xf32>
    %296 = arith.addf %287, %295 : vector<64x256xf32>
    %c3_255 = arith.constant 3 : index
    %c4_256 = arith.constant 4 : index
    %c0_257 = arith.constant 0 : index
    %c0_258 = arith.constant 0 : index
    %297 = vector.load %arg2[%c3_255, %c4_256, %c0_257, %c0_258] : memref<4x9x64x64xbf16, #tpu.memory_space<vmem>>, vector<1x1x64x64xbf16>
    %298 = vector.shape_cast %297 : vector<1x1x64x64xbf16> to vector<64x64xbf16>
    %cst_259 = arith.constant dense<0.000000e+00> : vector<64x256xf32>
    %299 = tpu.matmul %298, %260, %cst_259 {dimension_numbers = #tpu.dot_dimension_numbers<[1], [0], [0], [1], [0, 0, 1, 1], [], []>} : vector<64x64xbf16>, vector<64x256xbf16>, vector<64x256xf32> -> vector<64x256xf32>
    %300 = arith.addf %296, %299 : vector<64x256xf32>
    %c255_i32_260 = arith.constant 255 : i32
    %301 = tpu.dynamic_rotate %261 by %c255_i32_260 dim 1 : vector<64x256xf32>, i32 -> vector<64x256xf32>
    %c5_261 = arith.constant 5 : index
    %c0_262 = arith.constant 0 : index
    %302 = vector.load %arg4[%c5_261, %c0_262] : memref<9x256xf32, #tpu.memory_space<vmem>>, vector<1x256xf32>
    %303 = vector.broadcast %302 : vector<1x256xf32> to vector<64x256xf32>
    %304 = arith.mulf %301, %303 : vector<64x256xf32>
    %305 = arith.truncf %304 : vector<64x256xf32> to vector<64x256xbf16>
    %c3_263 = arith.constant 3 : index
    %c5_264 = arith.constant 5 : index
    %c0_265 = arith.constant 0 : index
    %c0_266 = arith.constant 0 : index
    %306 = vector.load %arg2[%c3_263, %c5_264, %c0_265, %c0_266] : memref<4x9x64x64xbf16, #tpu.memory_space<vmem>>, vector<1x1x64x64xbf16>
    %307 = vector.shape_cast %306 : vector<1x1x64x64xbf16> to vector<64x64xbf16>
    %cst_267 = arith.constant dense<0.000000e+00> : vector<64x256xf32>
    %308 = tpu.matmul %307, %305, %cst_267 {dimension_numbers = #tpu.dot_dimension_numbers<[1], [0], [0], [1], [0, 0, 1, 1], [], []>} : vector<64x64xbf16>, vector<64x256xbf16>, vector<64x256xf32> -> vector<64x256xf32>
    %309 = arith.addf %300, %308 : vector<64x256xf32>
    %c241_i32_268 = arith.constant 241 : i32
    %310 = tpu.dynamic_rotate %261 by %c241_i32_268 dim 1 : vector<64x256xf32>, i32 -> vector<64x256xf32>
    %c6_269 = arith.constant 6 : index
    %c0_270 = arith.constant 0 : index
    %311 = vector.load %arg4[%c6_269, %c0_270] : memref<9x256xf32, #tpu.memory_space<vmem>>, vector<1x256xf32>
    %312 = vector.broadcast %311 : vector<1x256xf32> to vector<64x256xf32>
    %313 = arith.mulf %310, %312 : vector<64x256xf32>
    %314 = arith.truncf %313 : vector<64x256xf32> to vector<64x256xbf16>
    %c3_271 = arith.constant 3 : index
    %c6_272 = arith.constant 6 : index
    %c0_273 = arith.constant 0 : index
    %c0_274 = arith.constant 0 : index
    %315 = vector.load %arg2[%c3_271, %c6_272, %c0_273, %c0_274] : memref<4x9x64x64xbf16, #tpu.memory_space<vmem>>, vector<1x1x64x64xbf16>
    %316 = vector.shape_cast %315 : vector<1x1x64x64xbf16> to vector<64x64xbf16>
    %cst_275 = arith.constant dense<0.000000e+00> : vector<64x256xf32>
    %317 = tpu.matmul %316, %314, %cst_275 {dimension_numbers = #tpu.dot_dimension_numbers<[1], [0], [0], [1], [0, 0, 1, 1], [], []>} : vector<64x64xbf16>, vector<64x256xbf16>, vector<64x256xf32> -> vector<64x256xf32>
    %318 = arith.addf %309, %317 : vector<64x256xf32>
    %c240_i32_276 = arith.constant 240 : i32
    %319 = tpu.dynamic_rotate %261 by %c240_i32_276 dim 1 : vector<64x256xf32>, i32 -> vector<64x256xf32>
    %c7_277 = arith.constant 7 : index
    %c0_278 = arith.constant 0 : index
    %320 = vector.load %arg4[%c7_277, %c0_278] : memref<9x256xf32, #tpu.memory_space<vmem>>, vector<1x256xf32>
    %321 = vector.broadcast %320 : vector<1x256xf32> to vector<64x256xf32>
    %322 = arith.mulf %319, %321 : vector<64x256xf32>
    %323 = arith.truncf %322 : vector<64x256xf32> to vector<64x256xbf16>
    %c3_279 = arith.constant 3 : index
    %c7_280 = arith.constant 7 : index
    %c0_281 = arith.constant 0 : index
    %c0_282 = arith.constant 0 : index
    %324 = vector.load %arg2[%c3_279, %c7_280, %c0_281, %c0_282] : memref<4x9x64x64xbf16, #tpu.memory_space<vmem>>, vector<1x1x64x64xbf16>
    %325 = vector.shape_cast %324 : vector<1x1x64x64xbf16> to vector<64x64xbf16>
    %cst_283 = arith.constant dense<0.000000e+00> : vector<64x256xf32>
    %326 = tpu.matmul %325, %323, %cst_283 {dimension_numbers = #tpu.dot_dimension_numbers<[1], [0], [0], [1], [0, 0, 1, 1], [], []>} : vector<64x64xbf16>, vector<64x256xbf16>, vector<64x256xf32> -> vector<64x256xf32>
    %327 = arith.addf %318, %326 : vector<64x256xf32>
    %c239_i32_284 = arith.constant 239 : i32
    %328 = tpu.dynamic_rotate %261 by %c239_i32_284 dim 1 : vector<64x256xf32>, i32 -> vector<64x256xf32>
    %c8_285 = arith.constant 8 : index
    %c0_286 = arith.constant 0 : index
    %329 = vector.load %arg4[%c8_285, %c0_286] : memref<9x256xf32, #tpu.memory_space<vmem>>, vector<1x256xf32>
    %330 = vector.broadcast %329 : vector<1x256xf32> to vector<64x256xf32>
    %331 = arith.mulf %328, %330 : vector<64x256xf32>
    %332 = arith.truncf %331 : vector<64x256xf32> to vector<64x256xbf16>
    %c3_287 = arith.constant 3 : index
    %c8_288 = arith.constant 8 : index
    %c0_289 = arith.constant 0 : index
    %c0_290 = arith.constant 0 : index
    %333 = vector.load %arg2[%c3_287, %c8_288, %c0_289, %c0_290] : memref<4x9x64x64xbf16, #tpu.memory_space<vmem>>, vector<1x1x64x64xbf16>
    %334 = vector.shape_cast %333 : vector<1x1x64x64xbf16> to vector<64x64xbf16>
    %cst_291 = arith.constant dense<0.000000e+00> : vector<64x256xf32>
    %335 = tpu.matmul %334, %332, %cst_291 {dimension_numbers = #tpu.dot_dimension_numbers<[1], [0], [0], [1], [0, 0, 1, 1], [], []>} : vector<64x64xbf16>, vector<64x256xbf16>, vector<64x256xf32> -> vector<64x256xf32>
    %336 = arith.addf %327, %335 : vector<64x256xf32>
    %c3_292 = arith.constant 3 : index
    %c0_293 = arith.constant 0 : index
    %c0_294 = arith.constant 0 : index
    %337 = vector.load %arg3[%c3_292, %c0_293, %c0_294] : memref<4x64x1xf32, #tpu.memory_space<vmem>>, vector<1x64x1xf32>
    %338 = vector.shape_cast %337 : vector<1x64x1xf32> to vector<64x1xf32>
    %339 = vector.broadcast %338 : vector<64x1xf32> to vector<64x256xf32>
    %340 = arith.addf %336, %339 : vector<64x256xf32>
    %341 = vector.extract_strided_slice %340 {offsets = [0, 0], sizes = [3, 256], strides = [1, 1]} : vector<64x256xf32> to vector<3x256xf32>
    %c0_295 = arith.constant 0 : index
    %c0_296 = arith.constant 0 : index
    %c0_297 = arith.constant 0 : index
    %342 = vector.load %arg5[%c0_295, %c0_296, %c0_297] : memref<1x3x256xf32, #tpu.memory_space<vmem>>, vector<1x3x256xf32>
    %343 = vector.shape_cast %342 : vector<1x3x256xf32> to vector<3x256xf32>
    %344 = vector.shape_cast %341 : vector<3x256xf32> to vector<1x3x256xf32>
    tpu.vector_store %arg5[%c0_295, %c0_296, %c0_297], %344 {strides = array<i32>} : memref<1x3x256xf32, #tpu.memory_space<vmem>>, vector<1x3x256xf32>,
    return
  }
  func.func @transform_0(%arg0: i32) -> (i32, i32, i32) {
    %c0_i32 = arith.constant 0 : i32
    %c0_i32_0 = arith.constant 0 : i32
    %c0_i32_1 = arith.constant 0 : i32
    return %arg0, %c0_i32, %c0_i32_0 : i32, i32, i32
  }
  func.func @transform_1(%arg0: i32) -> (i32, i32, i32, i32) {
    %c0_i32 = arith.constant 0 : i32
    %c0_i32_0 = arith.constant 0 : i32
    %c0_i32_1 = arith.constant 0 : i32
    %c0_i32_2 = arith.constant 0 : i32
    %c0_i32_3 = arith.constant 0 : i32
    return %c0_i32, %c0_i32_0, %c0_i32_1, %c0_i32_2 : i32, i32, i32, i32
  }
  func.func @transform_2(%arg0: i32) -> (i32, i32, i32) {
    %c0_i32 = arith.constant 0 : i32
    %c0_i32_0 = arith.constant 0 : i32
    %c0_i32_1 = arith.constant 0 : i32
    %c0_i32_2 = arith.constant 0 : i32
    return %c0_i32, %c0_i32_0, %c0_i32_1 : i32, i32, i32
  }
  func.func @transform_3(%arg0: i32) -> (i32, i32) {
    %c0_i32 = arith.constant 0 : i32
    %c0_i32_0 = arith.constant 0 : i32
    %c0_i32_1 = arith.constant 0 : i32
    return %c0_i32, %c0_i32_0 : i32, i32
  }
  func.func @transform_4(%arg0: i32) -> (i32, i32, i32) {
    %c0_i32 = arith.constant 0 : i32
    %c0_i32_0 = arith.constant 0 : i32
    %c0_i32_1 = arith.constant 0 : i32
    return %arg0, %c0_i32, %c0_i32_0 : i32, i32, i32
  }
}

</mosaic_0001>

<bundles_post_ra>
// kernel: tpu_custom_call.1
= control target key start
LH: loop header
LB: loop body
LE: loop exit
PB: predicated region body
PF: predicated region fallthrough
CT: control target
= control target key end

     0   :  { %9 = vsyncpa [#allocation4], 0  ;;  %s9998_s15 = smov 0   ;;  %s13860_s0 = inlined_call_operand.vmem [shape: bf16[2,4,256], index: 0, kind: input, shape index: {}]   ;;  %s13861_s1 = inlined_call_operand.hbm [shape: bf16[4,9,64,64], index: 1, kind: input, shape index: {}]   ;;  %s13862_s2 = inlined_call_operand.vmem [shape: f32[4,64,1], index: 2, kind: input, shape index: {}]   ;;  %s13863_s3 = inlined_call_operand.vmem [shape: f32[9,256], index: 3, kind: input, shape index: {}]   ;;  %s13864_s4 = inlined_call_operand.vmem [shape: f32[2,3,256], index: 4, kind: output, shape index: {}]  }
   0x1 LB: > { %s10004_s16 = sadd.s32 4294967295, %s9959_s15   ;;  %p8015_p0 = scmp.ge.s32.totalorder %s9959_s15, 1  ;;  %s9959_s15 = sphi %s9998_s15, %s15_s15  }
   0x2   : > { %p135_p1 = scmp.lt.s32.totalorder %s9959_s15, 3  ;;  %s9961_s17 = smov [#allocation3]  }
   0x3   : > { %s147_s18 = sshll.u32 %s9961_s17, 4  ;;  %p8450_p3 = scmp.eq.s32.totalorder %s10004_s16, 0  ;;  %s148_s18 = int_to_ptr.vmem [resolvable:$true] %s147_s18 }
   0x4   : > { %p10008_p2 = pnand %p8015_p0, %p135_p1  ;;  %s9934_s20 = scalar_lea.vmem %s148_s18, 18432 }
   0x5   : > { %p9935_p7 = scmp.ne.s32.totalorder %s148_s18, %s9934_s20  ;;  %p9942_p10 = scmp.lt.s32.totalorder %s148_s18, %s148_s18 }
   0x6   : > { %p8446_p4 = pneg %p10008_p2  ;;  %p9943_p11 = scmp.lt.s32.totalorder %s9934_s20, %s9934_s20 }
   0x8   : > { %p8447_p5 = pnand %p8450_p3, %p8446_p4  ;;  %p9944_p12 = por %p9943_p11, %p9942_p10 }
   0xa   : > { %p9925_p6 = pneg %p8447_p5 }
   0xc   : > { %p9937_p8 = pnand %p9935_p7, %p9925_p6 }
   0xe   : > { %p9938_p9 = pneg %p9937_p8 }
  0x10   : > { %p9945_p13 = pnand %p9944_p12, %p9938_p9 }
  0x12   : > { %9948 = shalt.err (!%p9945_p13)
}
  0x13   : > { %s9962_s21 = smov 64   ;;  %s9963_s22 = smov 4  }
  0x14   : > { %8449 = dma.hbm_to_vmem [thread:$0]  (!%p8447_p5), %s13861_s1, 18432, %s148_s18, [#allocation4], %s9962_s21, %s9962_s21, %s9963_s22  }
  0x15   : > { %177 = sbr.rel (%p10008_p2) target bundleno = 2022 (0x7e6), region = 36 }
  0x1a   : > { %9954 = dma.done.wait (%p8450_p3), [#allocation4], 18432  }
  0x1b   : > { %9956 = vsyncadd (%p8450_p3), [#allocation4], 4294948864  ;;  %p203_p0 = scmp.lt.s32.totalorder %s10004_s16, 1  ;;  %v13865_v0 = vmov 0   ;;  %s9965_s26 = smov 16   ;;  %v289_v11 = vlaneseq  ;;  %vm467_vm3 = vcmask 523264  }
  0x1c   : > { %v253_v1 = vunpack.c.l.bf16 %v13865_v0  ;;  %225 = vst [vmem:[#allocation2 + $0x30] sm:$0xcc] %v13865_v0  ;;  %v254_v2 = vunpack.c.h.bf16 %v13865_v0  ;;  %512 = vmatprep.mubr.bf16.mxu0 %v13865_v0  ;;  %617 = vmatprep.mubr.bf16.mxu1 %v13865_v0  ;;  %s9966_s30 = smov 17   ;;  %s9967_s5 = smov 15  }
  0x1d   : > { %s14017_s16 = smov (!%p203_p0, %s10004_s16), 1  ;;  %8793 = vset.pattern.permute.xlu1 %v13865_v0  ;;  %8792 = vset.pattern.permute.xlu0 %v13865_v0  ;;  %s9968_s6 = smov 1   ;;  %v311_v12 = vshrl.u32 %v289_v11, 7  ;;  %v10161_v15 = vand.u32 127, %v289_v11 }
  0x1e   : > { %v10037_v3 = vpack.i.bf16 %v253_v1, %v253_v1  ;;  %s8416_s25 = sshll.u32 %s14017_s16, 2  ;;  %v10044_v4 = vpack.i.bf16 %v254_v2, %v254_v2  ;;  %s9969_s7 = smov 127   ;;  %v8025_v18 = vld [vmem:[%s13863_s3 + $0x1] ss:$8 sm:$0x3] }
  0x1f   : > { %s207_s29 = scalar_lea.vmem %s13860_s0, %s8416_s25  ;;  %s9970_s8 = smov 113   ;;  %13893 = vst [vmem:[#allocation6_spill] sm:$0xff] %v10161_v15  ;;  %v10163_v16 = vsub.s32 1, %v311_v12  ;;  %v10165_v17 = vsub.s32 0, %v311_v12  ;;  %vm384_vm0 = vcmp.lt.s32.totalorder %v10161_v15, 16  ;;  %vm291_vm1 = vcmp.lt.s32.totalorder %v10161_v15, 17 }
  0x20   : > { %8473 = vrot.lane.b32.xlu0 %v10037_v3, %s9965_s26  ;;  %8483 = vrot.lane.b32.xlu1 %v10037_v3, %s9965_s26  ;;  %v8024_v5 = vld.sshfl [vmem:[%s207_s29] sm:$0x33 pattern:$0x76325410]  ;;  %s9971_s9 = smov 112   ;;  %s9972_s10 = smov 111  }
  0x21   : > { %224 = vst [vmem:[#allocation2 + $0x30] sm:$0x33] %v8024_v5  ;;  %13894 = vst [vmem:[#allocation7_spill] sm:$0xff] %v10163_v16  ;;  %v10176_v21 = vrot.slane %v8025_v18, %v10163_v16  ;;  %v10179_v22 = vrot.slane %v8025_v18, %v10165_v17  ;;  %v308_v63 = vld [vmem:[%s13863_s3] ss:$8 sm:$0x3] }
  0x22   : > { %13895 = vst [vmem:[#allocation8_spill] sm:$0xff] %v10165_v17  ;;  %vm690_vm2 = vcmp.lt.s32.totalorder %v10161_v15, 15  ;;  %v10235_v12 = vrot.slane %v308_v63, %v10163_v16  ;;  %vm906_vm4 = vcmp.lt.s32.totalorder %v10161_v15, 1  ;;  %vm1292_vm5 = vcmp.lt.s32.totalorder %v10161_v15, 127  ;;  %s8417_s23 = sshll.u32 %s14017_s16, 3 }
  0x23   : > { %vm1508_vm6 = vcmp.lt.s32.totalorder %v10161_v15, 113  ;;  %vm1724_vm7 = vcmp.lt.s32.totalorder %v10161_v15, 112  ;;  %vm1940_vm8 = vcmp.lt.s32.totalorder %v10161_v15, 111  ;;  %s212_s27 = scalar_lea.vmem %s13864_s4, %s8417_s23 }
  0x24   : > { %8478 = vrot.lane.b32.xlu0 %v10044_v4, %s9965_s26  ;;  %8488 = vrot.lane.b32.xlu1 %v10044_v4, %s9965_s26 }
  0x28   : > { %8498 = vrot.lane.b32.xlu1 %v10044_v4, %s9965_s26  ;;  %8493 = vrot.lane.b32.xlu0 %v10037_v3, %s9965_s26  ;;  %v233_v6 = vld [vmem:[#allocation2 + $0x30] sm:$0xff] }
  0x29   : > { %v242_v7 = vunpack.c.h.bf16 %v233_v6  ;;  %v241_v8 = vunpack.c.l.bf16 %v233_v6 }
  0x2b   : > { %v10057_v9 = vpack.i.bf16 %v254_v2, %v242_v7  ;;  %v10059_v10 = vpack.i.bf16 %v253_v1, %v241_v8 }
  0x2d   : > { %8513 = vrot.lane.b32.xlu1 %v10057_v9, %s9965_s26  ;;  %8503 = vrot.lane.b32.xlu0 %v10059_v10, %s9965_s26 }
  0x31   : > { %8518 = vrot.lane.b32.xlu1 %v10044_v4, %s9966_s30  ;;  %8508 = vrot.lane.b32.xlu0 %v10037_v3, %s9966_s30 }
  0x35   : > { %8528 = vrot.lane.b32.xlu1 %v10044_v4, %s9967_s5  ;;  %8523 = vrot.lane.b32.xlu0 %v10037_v3, %s9967_s5 }
  0x39   : > { %8538 = vrot.lane.b32.xlu1 %v10044_v4, %s9966_s30  ;;  %8533 = vrot.lane.b32.xlu0 %v10037_v3, %s9966_s30 }
  0x3d   : > { %8548 = vrot.lane.b32.xlu1 %v10044_v4, %s9967_s5  ;;  %8543 = vrot.lane.b32.xlu0 %v10037_v3, %s9967_s5 }
  0x41   : > { %8558 = vrot.lane.b32.xlu1 %v10044_v4, %s9966_s30  ;;  %8553 = vrot.lane.b32.xlu0 %v10037_v3, %s9966_s30 }
  0x45   : > { %8568 = vrot.lane.b32.xlu1 %v10044_v4, %s9967_s5  ;;  %8563 = vrot.lane.b32.xlu0 %v10037_v3, %s9967_s5 }
  0x49   : > { %8578 = vrot.lane.b32.xlu1 %v10057_v9, %s9966_s30  ;;  %8573 = vrot.lane.b32.xlu0 %v10059_v10, %s9966_s30 }
  0x4d   : > { %8588 = vrot.lane.b32.xlu1 %v10057_v9, %s9967_s5  ;;  %8583 = vrot.lane.b32.xlu0 %v10059_v10, %s9967_s5 }
  0x51   : > { %8598 = vrot.lane.b32.xlu1 %v10044_v4, %s9968_s6  ;;  %8593 = vrot.lane.b32.xlu0 %v10037_v3, %s9968_s6 }
  0x55   : > { %8608 = vrot.lane.b32.xlu1 %v10044_v4, %s9968_s6  ;;  %8603 = vrot.lane.b32.xlu0 %v10037_v3, %s9968_s6 }
  0x59   : > { %8618 = vrot.lane.b32.xlu1 %v10044_v4, %s9968_s6  ;;  %8613 = vrot.lane.b32.xlu0 %v10037_v3, %s9968_s6 }
  0x5d   : > { %8628 = vrot.lane.b32.xlu1 %v10057_v9, %s9968_s6  ;;  %8623 = vrot.lane.b32.xlu0 %v10059_v10, %s9968_s6 }
  0x61   : > { %8638 = vrot.lane.b32.xlu1 %v10044_v4, %s9969_s7  ;;  %8633 = vrot.lane.b32.xlu0 %v10037_v3, %s9969_s7 }
  0x65   : > { %8648 = vrot.lane.b32.xlu1 %v10044_v4, %s9970_s8  ;;  %8643 = vrot.lane.b32.xlu0 %v10037_v3, %s9970_s8 }
  0x69   : > { %8658 = vrot.lane.b32.xlu1 %v10044_v4, %s9969_s7  ;;  %8653 = vrot.lane.b32.xlu0 %v10037_v3, %s9969_s7 }
  0x6d   : > { %8668 = vrot.lane.b32.xlu1 %v10044_v4, %s9970_s8  ;;  %8663 = vrot.lane.b32.xlu0 %v10037_v3, %s9970_s8 }
  0x71   : > { %8678 = vrot.lane.b32.xlu1 %v10044_v4, %s9969_s7  ;;  %8673 = vrot.lane.b32.xlu0 %v10037_v3, %s9969_s7 }
  0x75   : > { %8688 = vrot.lane.b32.xlu1 %v10044_v4, %s9970_s8  ;;  %8683 = vrot.lane.b32.xlu0 %v10037_v3, %s9970_s8 }
  0x79   : > { %8698 = vrot.lane.b32.xlu1 %v10057_v9, %s9969_s7  ;;  %8693 = vrot.lane.b32.xlu0 %v10059_v10, %s9969_s7 }
  0x7d   : > { %8708 = vrot.lane.b32.xlu1 %v10057_v9, %s9970_s8  ;;  %8703 = vrot.lane.b32.xlu0 %v10059_v10, %s9970_s8 }
  0x81   : > { %8718 = vrot.lane.b32.xlu1 %v10044_v4, %s9971_s9  ;;  %8713 = vrot.lane.b32.xlu0 %v10037_v3, %s9971_s9 }
  0x85   : > { %8728 = vrot.lane.b32.xlu1 %v10044_v4, %s9972_s10  ;;  %8723 = vrot.lane.b32.xlu0 %v10037_v3, %s9972_s10 }
  0x89   : > { %8738 = vrot.lane.b32.xlu1 %v10044_v4, %s9971_s9  ;;  %8733 = vrot.lane.b32.xlu0 %v10037_v3, %s9971_s9 }
  0x8d   : > { %8748 = vrot.lane.b32.xlu1 %v10044_v4, %s9972_s10  ;;  %8743 = vrot.lane.b32.xlu0 %v10037_v3, %s9972_s10 }
  0x91   : > { %8758 = vrot.lane.b32.xlu1 %v10044_v4, %s9971_s9  ;;  %8753 = vrot.lane.b32.xlu0 %v10037_v3, %s9971_s9 }
  0x92   : > { %v8474_v13 = vpop.permute.xlu0 %8473  ;;  %v8484_v14 = vpop.permute.xlu1 %8483 }
  0x93   : > { %v8476_v23 = vunpack.i.h.bf16 %v8474_v13  ;;  %v8475_v24 = vunpack.i.l.bf16 %v8474_v13  ;;  %v8486_v27 = vunpack.i.h.bf16 %v8484_v14  ;;  %v8485_v28 = vunpack.i.l.bf16 %v8484_v14  ;;  %v8042_v13 = vld [vmem:[%s13863_s3 + $0x2] ss:$8 sm:$0x3] }
  0x95   : > { %8768 = vrot.lane.b32.xlu1 %v10044_v4, %s9972_s10  ;;  %8763 = vrot.lane.b32.xlu0 %v10037_v3, %s9972_s10 }
  0x96   : > { %v8479_v19 = vpop.permute.xlu0 %8478  ;;  %v8489_v20 = vpop.permute.xlu1 %8488 }
  0x97   : > { %v8481_v25 = vunpack.i.h.bf16 %v8479_v19  ;;  %v8480_v26 = vunpack.i.l.bf16 %v8479_v19  ;;  %v8491_v29 = vunpack.i.h.bf16 %v8489_v20  ;;  %v8490_v30 = vunpack.i.l.bf16 %v8489_v20 }
  0x99   : > { %v391_v31 = vsel %vm384_vm0, %v8475_v24, %v8480_v26  ;;  %v392_v32 = vsel %vm384_vm0, %v8476_v23, %v8481_v25  ;;  %v399_v33 = vsel %vm384_vm0, %v8480_v26, %v8475_v24  ;;  %v400_v34 = vsel %vm384_vm0, %v8481_v25, %v8476_v23  ;;  %8778 = vrot.lane.b32.xlu1 %v10057_v9, %s9971_s9 }
  0x9a   : > { %v8499_v35 = vpop.permute.xlu1 %8498  ;;  %v8494_v36 = vpop.permute.xlu0 %8493  ;;  %v427_v37 = vmul.f32 %v10176_v21, %v391_v31  ;;  %v429_v38 = vmul.f32 %v10176_v21, %v392_v32  ;;  %v426_v39 = vmul.f32 %v10179_v22, %v399_v33  ;;  %v428_v40 = vmul.f32 %v10179_v22, %v400_v34  ;;  %8773 = vrot.lane.b32.xlu0 %v10059_v10, %s9971_s9 }
  0x9b   : > { %v8501_v41 = vunpack.i.h.bf16 %v8499_v35  ;;  %v8500_v42 = vunpack.i.l.bf16 %v8499_v35  ;;  %v8496_v43 = vunpack.i.h.bf16 %v8494_v36  ;;  %v8495_v44 = vunpack.i.l.bf16 %v8494_v36 }
  0x9c   : > { %v437_v45 = vpack.c.bf16 %v429_v38, %v427_v37  ;;  %v436_v46 = vpack.c.bf16 %v428_v40, %v426_v39  ;;  %v389_v47 = vsel %vm384_vm0, %v8485_v28, %v8490_v30  ;;  %v390_v48 = vsel %vm384_vm0, %v8486_v27, %v8491_v29 }
  0x9d   : > { %v423_v49 = vmul.f32 %v10176_v21, %v389_v47  ;;  %v425_v50 = vmul.f32 %v10176_v21, %v390_v48  ;;  %v397_v51 = vsel %vm384_vm0, %v8490_v30, %v8485_v28  ;;  %v398_v52 = vsel %vm384_vm0, %v8491_v29, %v8486_v27  ;;  %8788 = vrot.lane.b32.xlu1 %v10057_v9, %s9972_s10 }
  0x9e   : > { %488 = vmatprep.subr.bf16.mxu0 %v437_v45  ;;  %v422_v53 = vmul.f32 %v10179_v22, %v397_v51  ;;  %v424_v54 = vmul.f32 %v10179_v22, %v398_v52  ;;  %v387_v55 = vsel %vm384_vm0, %v8495_v44, %v8500_v42  ;;  %v388_v56 = vsel %vm384_vm0, %v8496_v43, %v8501_v41 }
  0x9f   : > { %489 = vmatpush1.bf16.msra.mxu0 %v436_v46  ;;  %v435_v57 = vpack.c.bf16 %v425_v50, %v423_v49  ;;  %v419_v58 = vmul.f32 %v10176_v21, %v387_v55  ;;  %v421_v59 = vmul.f32 %v10176_v21, %v388_v56  ;;  %v395_v60 = vsel %vm384_vm0, %v8500_v42, %v8495_v44  ;;  %v8514_v1 = vpop.permute.xlu1 %8513  ;;  %v8504_v2 = vpop.permute.xlu0 %8503  ;;  %v9754_v49 = vld [vmem:[#allocation3 + $0x20] sm:$0xff]  }
  0xa0   : > { %v396_v61 = vsel %vm384_vm0, %v8501_v41, %v8496_v43  ;;  %v418_v62 = vmul.f32 %v10179_v22, %v395_v60  ;;  %8783 = vrot.lane.b32.xlu0 %v10059_v10, %s9972_s10  ;;  %v434_v3 = vpack.c.bf16 %v424_v54, %v422_v53  ;;  %v8516_v6 = vunpack.i.h.bf16 %v8514_v1 }
  0xa1   : > { %490 = vmatprep.subr.bf16.mxu0 %v435_v57  ;;  %v433_v4 = vpack.c.bf16 %v421_v59, %v419_v58  ;;  %v420_v5 = vmul.f32 %v10179_v22, %v396_v61  ;;  %v8515_v7 = vunpack.i.l.bf16 %v8514_v1  ;;  %v8506_v8 = vunpack.i.h.bf16 %v8504_v2 }
  0xa2   : > { %v8505_v11 = vunpack.i.l.bf16 %v8504_v2  ;;  %v10238_v10 = vrot.slane %v308_v63, %v10165_v17  ;;  %v10256_v33 = vrot.slane %v8042_v13, %v10165_v17  ;;  %v10259_v36 = vrot.slane %v8042_v13, %v10163_v16 }
  0xa3   : > { %491 = vmatpush1.bf16.msra.mxu0 %v434_v3  ;;  %v432_v9 = vpack.c.bf16 %v420_v5, %v418_v62  ;;  %v386_v18 = vsel %vm384_vm0, %v8506_v8, %v8516_v6  ;;  %v394_v20 = vsel %vm384_vm0, %v8516_v6, %v8506_v8  ;;  %v8519_v23 = vpop.permute.xlu1 %8518  ;;  %v8509_v24 = vpop.permute.xlu0 %8508 }
  0xa4   : > { %492 = vmatprep.subr.bf16.mxu0 %v433_v4  ;;  %v385_v14 = vsel %vm384_vm0, %v8505_v11, %v8515_v7  ;;  %v393_v19 = vsel %vm384_vm0, %v8515_v7, %v8505_v11  ;;  %v417_v26 = vmul.f32 %v10176_v21, %v386_v18  ;;  %v416_v28 = vmul.f32 %v10179_v22, %v394_v20 }
  0xa5   : > { %v415_v25 = vmul.f32 %v10176_v21, %v385_v14  ;;  %v414_v27 = vmul.f32 %v10179_v22, %v393_v19  ;;  %v8521_v29 = vunpack.i.h.bf16 %v8519_v23  ;;  %v8520_v30 = vunpack.i.l.bf16 %v8519_v23 }
  0xa6   : > { %v8511_v31 = vunpack.i.h.bf16 %v8509_v24  ;;  %v8510_v32 = vunpack.i.l.bf16 %v8509_v24 }
  0xa7   : > { %493 = vmatpush1.bf16.msra.mxu0 %v432_v9  ;;  %v431_v34 = vpack.c.bf16 %v417_v26, %v415_v25  ;;  %v430_v35 = vpack.c.bf16 %v416_v28, %v414_v27  ;;  %v8529_v39 = vpop.permute.xlu1 %8528  ;;  %v8524_v40 = vpop.permute.xlu0 %8523  ;;  %v9755_v26 = vld [vmem:[#allocation3 + $0x28] sm:$0xff]  }
  0xa8   : > { %v298_v21 = vsel %vm291_vm1, %v8510_v32, %v8520_v30  ;;  %v299_v37 = vsel %vm291_vm1, %v8511_v31, %v8521_v29  ;;  %v306_v22 = vsel %vm291_vm1, %v8520_v30, %v8510_v32  ;;  %v307_v38 = vsel %vm291_vm1, %v8521_v29, %v8511_v31 }
  0xa9   : > { %494 = vmatprep.subr.bf16.mxu0 %v431_v34  ;;  %v333_v41 = vmul.f32 %v10235_v12, %v298_v21  ;;  %v335_v42 = vmul.f32 %v10235_v12, %v299_v37  ;;  %v332_v43 = vmul.f32 %v10238_v10, %v306_v22  ;;  %v334_v44 = vmul.f32 %v10238_v10, %v307_v38 }
  0xaa   : > { %v8531_v45 = vunpack.i.h.bf16 %v8529_v39  ;;  %v8530_v46 = vunpack.i.l.bf16 %v8529_v39  ;;  %v8526_v47 = vunpack.i.h.bf16 %v8524_v40  ;;  %v8525_v48 = vunpack.i.l.bf16 %v8524_v40 }
  0xab   : > { %495 = vmatpush1.bf16.msra.mxu0 %v430_v35  ;;  %v343_v50 = vpack.c.bf16 %v335_v42, %v333_v41  ;;  %v342_v51 = vpack.c.bf16 %v334_v44, %v332_v43  ;;  %v8539_v58 = vpop.permute.xlu1 %8538  ;;  %v8534_v59 = vpop.permute.xlu0 %8533 }
  0xac   : > { %v706_v52 = vsel %vm690_vm2, %v8531_v45, %v8526_v47  ;;  %v705_v53 = vsel %vm690_vm2, %v8530_v46, %v8525_v48  ;;  %v697_v54 = vsel %vm690_vm2, %v8525_v48, %v8530_v46  ;;  %v698_v55 = vsel %vm690_vm2, %v8526_v47, %v8531_v45 }
  0xad   : > { %v734_v56 = vmul.f32 %v10256_v33, %v706_v52  ;;  %v732_v57 = vmul.f32 %v10256_v33, %v705_v53  ;;  %593 = vmatprep.subr.bf16.mxu1 %v343_v50  ;;  %v733_v60 = vmul.f32 %v10259_v36, %v697_v54  ;;  %v735_v61 = vmul.f32 %v10259_v36, %v698_v55 }
  0xae   : > { %v8541_v62 = vunpack.i.h.bf16 %v8539_v58  ;;  %v8540_v63 = vunpack.i.l.bf16 %v8539_v58  ;;  %v8536_v1 = vunpack.i.h.bf16 %v8534_v59  ;;  %v8535_v2 = vunpack.i.l.bf16 %v8534_v59  ;;  %8030 = vmatmul.mubr.msk.bf16.vlgmr.msra.gmra.mxu0 %vm467_vm3, %v9754_v49  ;;  %594 = vmatpush1.bf16.msra.mxu1 %v342_v51  ;;  %v9756_v59 = vld [vmem:[#allocation3 + $0x30] sm:$0xff]  }
  0xaf   : > { %v743_v3 = vpack.c.bf16 %v735_v61, %v733_v60  ;;  %v742_v4 = vpack.c.bf16 %v734_v56, %v732_v57  ;;  %522 = vmatprep.mubr.bf16.mxu0 %v13865_v0  ;;  %v8549_v11 = vpop.permute.xlu1 %8548  ;;  %v8544_v9 = vpop.permute.xlu0 %8543 }
  0xb0   : > { %v296_v5 = vsel %vm291_vm1, %v8535_v2, %v8540_v63  ;;  %v297_v6 = vsel %vm291_vm1, %v8536_v1, %v8541_v62  ;;  %v304_v7 = vsel %vm291_vm1, %v8540_v63, %v8535_v2  ;;  %v305_v8 = vsel %vm291_vm1, %v8541_v62, %v8536_v1 }
  0xb1   : > { %793 = vmatprep.subr.bf16.mxu0 %v743_v3  ;;  %v329_v13 = vmul.f32 %v10235_v12, %v296_v5  ;;  %v331_v14 = vmul.f32 %v10235_v12, %v297_v6  ;;  %v328_v18 = vmul.f32 %v10238_v10, %v304_v7  ;;  %v330_v19 = vmul.f32 %v10238_v10, %v305_v8 }
  0xb2   : > { %v8551_v20 = vunpack.i.h.bf16 %v8549_v11  ;;  %v8550_v23 = vunpack.i.l.bf16 %v8549_v11  ;;  %v8546_v24 = vunpack.i.h.bf16 %v8544_v9  ;;  %v8545_v25 = vunpack.i.l.bf16 %v8544_v9  ;;  %794 = vmatpush1.bf16.msra.mxu0 %v742_v4 }
  0xb3   : > { %v341_v27 = vpack.c.bf16 %v331_v14, %v329_v13  ;;  %v340_v28 = vpack.c.bf16 %v330_v19, %v328_v18  ;;  %v8559_v21 = vpop.permute.xlu1 %8558  ;;  %v8554_v37 = vpop.permute.xlu0 %8553 }
  0xb4   : > { %v704_v29 = vsel %vm690_vm2, %v8551_v20, %v8546_v24  ;;  %v703_v30 = vsel %vm690_vm2, %v8550_v23, %v8545_v25  ;;  %v695_v31 = vsel %vm690_vm2, %v8545_v25, %v8550_v23  ;;  %v696_v32 = vsel %vm690_vm2, %v8546_v24, %v8551_v20 }
  0xb5   : > { %v730_v34 = vmul.f32 %v10256_v33, %v704_v29  ;;  %v728_v35 = vmul.f32 %v10256_v33, %v703_v30  ;;  %595 = vmatprep.subr.bf16.mxu1 %v341_v27  ;;  %v729_v22 = vmul.f32 %v10259_v36, %v695_v31  ;;  %v731_v38 = vmul.f32 %v10259_v36, %v696_v32 }
  0xb6   : > { %v8561_v39 = vunpack.i.h.bf16 %v8559_v21  ;;  %v8560_v40 = vunpack.i.l.bf16 %v8559_v21  ;;  %v8556_v41 = vunpack.i.h.bf16 %v8554_v37  ;;  %v8555_v42 = vunpack.i.l.bf16 %v8554_v37  ;;  %8031 = vmatmul.mubr.msk.bf16.gmra.mxu0 %vm467_vm3, %v9755_v26  ;;  %596 = vmatpush1.bf16.msra.mxu1 %v340_v28  ;;  %v8051_v26 = vld [vmem:[%s13863_s3 + $0x3] ss:$8 sm:$0x3] }
  0xb7   : > { %v741_v43 = vpack.c.bf16 %v731_v38, %v729_v22  ;;  %v740_v44 = vpack.c.bf16 %v730_v34, %v728_v35  ;;  %532 = vmatprep.mubr.bf16.mxu0 %v13865_v0  ;;  %v8569_v49 = vpop.permute.xlu1 %8568  ;;  %v8564_v50 = vpop.permute.xlu0 %8563  ;;  %v9757_v22 = vld [vmem:[#allocation3 + $0x38] sm:$0xff]  }
  0xb8   : > { %v294_v45 = vsel %vm291_vm1, %v8555_v42, %v8560_v40  ;;  %v295_v46 = vsel %vm291_vm1, %v8556_v41, %v8561_v39  ;;  %v302_v47 = vsel %vm291_vm1, %v8560_v40, %v8555_v42  ;;  %v303_v48 = vsel %vm291_vm1, %v8561_v39, %v8556_v41 }
  0xb9   : > { %795 = vmatprep.subr.bf16.mxu0 %v741_v43  ;;  %v325_v51 = vmul.f32 %v10235_v12, %v294_v45  ;;  %v327_v52 = vmul.f32 %v10235_v12, %v295_v46  ;;  %v324_v53 = vmul.f32 %v10238_v10, %v302_v47  ;;  %v326_v54 = vmul.f32 %v10238_v10, %v303_v48  ;;  %v9758_v46 = vld [vmem:[#allocation3] sm:$0xff]  }
  0xba   : > { %v8571_v55 = vunpack.i.h.bf16 %v8569_v49  ;;  %v8570_v56 = vunpack.i.l.bf16 %v8569_v49  ;;  %v8566_v57 = vunpack.i.h.bf16 %v8564_v50  ;;  %v8565_v58 = vunpack.i.l.bf16 %v8564_v50  ;;  %796 = vmatpush1.bf16.msra.mxu0 %v740_v44 }
  0xbb   : > { %v339_v60 = vpack.c.bf16 %v327_v52, %v325_v51  ;;  %v338_v61 = vpack.c.bf16 %v326_v54, %v324_v53  ;;  %v8579_v5 = vpop.permute.xlu1 %8578  ;;  %v8574_v6 = vpop.permute.xlu0 %8573  ;;  %v10356_v40 = vrot.slane %v8051_v26, %v10165_v17  ;;  %v10359_v41 = vrot.slane %v8051_v26, %v10163_v16 }
  0xbc   : > { %v702_v62 = vsel %vm690_vm2, %v8571_v55, %v8566_v57  ;;  %v701_v63 = vsel %vm690_vm2, %v8570_v56, %v8565_v58  ;;  %v693_v1 = vsel %vm690_vm2, %v8565_v58, %v8570_v56  ;;  %v694_v2 = vsel %vm690_vm2, %v8566_v57, %v8571_v55  ;;  %v2131_v55 = vld [vmem:[%s13862_s2 + $0x38] sm:$0xff] }
  0xbd   : > { %v726_v3 = vmul.f32 %v10256_v33, %v702_v62  ;;  %v724_v4 = vmul.f32 %v10256_v33, %v701_v63  ;;  %597 = vmatprep.subr.bf16.mxu1 %v339_v60  ;;  %v725_v7 = vmul.f32 %v10259_v36, %v693_v1  ;;  %v727_v8 = vmul.f32 %v10259_v36, %v694_v2  ;;  %v2128_v62 = vld [vmem:[%s13862_s2 + $0x20] sm:$0xff] }
  0xbe   : > { %v8581_v11 = vunpack.i.h.bf16 %v8579_v5  ;;  %v8580_v9 = vunpack.i.l.bf16 %v8579_v5  ;;  %v8576_v13 = vunpack.i.h.bf16 %v8574_v6  ;;  %v8575_v14 = vunpack.i.l.bf16 %v8574_v6  ;;  %8032 = vmatmul.mubr.msk.bf16.gmra.mxu0 %vm467_vm3, %v9756_v59  ;;  %598 = vmatpush1.bf16.msra.mxu1 %v338_v61  ;;  %v9760_v5 = vld [vmem:[#allocation3 + $0x40] sm:$0xff]  }
  0xbf   : > { %v739_v18 = vpack.c.bf16 %v727_v8, %v725_v7  ;;  %v738_v19 = vpack.c.bf16 %v726_v3, %v724_v4  ;;  %542 = vmatprep.mubr.bf16.mxu0 %v13865_v0  ;;  %v8589_v27 = vpop.permute.xlu1 %8588  ;;  %v8584_v28 = vpop.permute.xlu0 %8583  ;;  %2169 = vperm.xlu1 %8793, %v2131_v55  }
  0xc0   : > { %v292_v20 = vsel %vm291_vm1, %v8575_v14, %v8580_v9  ;;  %v293_v23 = vsel %vm291_vm1, %v8576_v13, %v8581_v11  ;;  %v300_v24 = vsel %vm291_vm1, %v8580_v9, %v8575_v14  ;;  %v301_v25 = vsel %vm291_vm1, %v8581_v11, %v8576_v13 }
  0xc1   : > { %797 = vmatprep.subr.bf16.mxu0 %v739_v18  ;;  %v321_v29 = vmul.f32 %v10235_v12, %v292_v20  ;;  %v323_v30 = vmul.f32 %v10235_v12, %v293_v23  ;;  %v320_v31 = vmul.f32 %v10238_v10, %v300_v24  ;;  %v322_v32 = vmul.f32 %v10238_v10, %v301_v25  ;;  %v10418_v24 = vld [vmem:[%s13863_s3 + $0x5] ss:$8 sm:$0x3] }
  0xc2   : > { %v8591_v34 = vunpack.i.h.bf16 %v8589_v27  ;;  %v8590_v35 = vunpack.i.l.bf16 %v8589_v27  ;;  %v8586_v21 = vunpack.i.h.bf16 %v8584_v28  ;;  %v8585_v37 = vunpack.i.l.bf16 %v8584_v28  ;;  %798 = vmatpush1.bf16.msra.mxu0 %v738_v19  ;;  %v9759_v25 = vld [vmem:[#allocation3 + $0x8] sm:$0xff]  }
  0xc3   : > { %v337_v38 = vpack.c.bf16 %v323_v30, %v321_v29  ;;  %v336_v39 = vpack.c.bf16 %v322_v32, %v320_v31  ;;  %v8599_v49 = vpop.permute.xlu1 %8598  ;;  %v8594_v50 = vpop.permute.xlu0 %8593  ;;  %v10405_v14 = vcombine.low %v13865_v0, %v13865_v0  ;;  %2154 = vperm.xlu1 %8793, %v2128_v62  }
  0xc4   : > { %v700_v12 = vsel %vm690_vm2, %v8591_v34, %v8586_v21  ;;  %v699_v10 = vsel %vm690_vm2, %v8590_v35, %v8585_v37  ;;  %v691_v42 = vsel %vm690_vm2, %v8585_v37, %v8590_v35  ;;  %v692_v43 = vsel %vm690_vm2, %v8586_v21, %v8591_v34 }
  0xc5   : > { %v722_v44 = vmul.f32 %v10256_v33, %v700_v12  ;;  %v720_v45 = vmul.f32 %v10256_v33, %v699_v10  ;;  %599 = vmatprep.subr.bf16.mxu1 %v337_v38  ;;  %v721_v47 = vmul.f32 %v10259_v36, %v691_v42  ;;  %v723_v48 = vmul.f32 %v10259_v36, %v692_v43  ;;  %v2130_v33 = vld [vmem:[%s13862_s2 + $0x30] sm:$0xff]  ;;  %v10441_v43 = vld [vmem:[%s13863_s3 + $0x6] ss:$8 sm:$0x3] }
  0xc6   : > { %600 = vmatpush1.bf16.msra.mxu1 %v336_v39  ;;  %8033 = vmatmul.mubr.msk.bf16.gmra.mxu0 %vm467_vm3, %v9757_v22  ;;  %v8601_v51 = vunpack.i.h.bf16 %v8599_v49  ;;  %v8600_v52 = vunpack.i.l.bf16 %v8599_v49  ;;  %v8596_v53 = vunpack.i.h.bf16 %v8594_v50  ;;  %v8595_v54 = vunpack.i.l.bf16 %v8594_v50  ;;  %v9762_v50 = vld [vmem:[#allocation3 + $0x48] sm:$0xff]  }
  0xc7   : > { %v737_v56 = vpack.c.bf16 %v723_v48, %v721_v47  ;;  %v736_v57 = vpack.c.bf16 %v722_v44, %v720_v45  ;;  %817 = vmatprep.mubr.bf16.mxu0 %v13865_v0  ;;  %v10383_v36 = vcombine.high %v13865_v0, %v13865_v0  ;;  %2164 = vperm.xlu0 %8792, %v2130_v33   ;;  %v8609_v2 = vpop.permute.xlu1 %8608  ;;  %v8604_v3 = vpop.permute.xlu0 %8603 }
  0xc8   : > { %v922_v58 = vsel %vm906_vm4, %v8601_v51, %v8596_v53  ;;  %v921_v59 = vsel %vm906_vm4, %v8600_v52, %v8595_v54  ;;  %v913_v60 = vsel %vm906_vm4, %v8595_v54, %v8600_v52  ;;  %v914_v61 = vsel %vm906_vm4, %v8596_v53, %v8601_v51 }
  0xc9   : > { %8038 = vmatmul.mubr.msk.bf16.vlgmr.msra.gmra.mxu1 %vm467_vm3, %v9758_v46  ;;  %799 = vmatprep.subr.bf16.mxu0 %v737_v56  ;;  %v950_v63 = vmul.f32 %v10356_v40, %v922_v58  ;;  %v948_v1 = vmul.f32 %v10356_v40, %v921_v59  ;;  %v949_v4 = vmul.f32 %v10359_v41, %v913_v60  ;;  %v8611_v6 = vunpack.i.h.bf16 %v8609_v2 }
  0xca   : > { %800 = vmatpush1.bf16.msra.mxu0 %v736_v57  ;;  %627 = vmatprep.mubr.bf16.mxu1 %v13865_v0  ;;  %v8610_v7 = vunpack.i.l.bf16 %v8609_v2  ;;  %v8606_v8 = vunpack.i.h.bf16 %v8604_v3  ;;  %v8605_v11 = vunpack.i.l.bf16 %v8604_v3  ;;  %v951_v9 = vmul.f32 %v10359_v41, %v914_v61  ;;  %v9761_v61 = vld [vmem:[#allocation3 + $0x10] sm:$0xff]  }
  0xcb   : > { %v958_v13 = vpack.c.bf16 %v950_v63, %v948_v1  ;;  %1179 = vmatprep.subr.bf16.mxu0 %v10383_v36  ;;  %v8619_v28 = vpop.permute.xlu1 %8618  ;;  %v8614_v29 = vpop.permute.xlu0 %8613  ;;  %v10428_v38 = vrot.slane %v10418_v24, %v10165_v17  ;;  %v10454_v56 = vrot.slane %v10441_v43, %v10165_v17 }
  0xcc   : > { %v920_v18 = vsel %vm906_vm4, %v8611_v6, %v8606_v8  ;;  %v919_v19 = vsel %vm906_vm4, %v8610_v7, %v8605_v11  ;;  %v911_v20 = vsel %vm906_vm4, %v8605_v11, %v8610_v7  ;;  %v912_v23 = vsel %vm906_vm4, %v8606_v8, %v8611_v6 }
  0xcd   : > { %v946_v26 = vmul.f32 %v10356_v40, %v920_v18  ;;  %v944_v27 = vmul.f32 %v10356_v40, %v919_v19  ;;  %v959_v30 = vpack.c.bf16 %v951_v9, %v949_v4  ;;  %v945_v31 = vmul.f32 %v10359_v41, %v911_v20  ;;  %v9898_v9 = vld [vmem:[#allocation2 + $0x30] sm:$0xff] }
  0xce   : > { %8047 = vmatmul.mubr.msk.bf16.vlgmr.msra.gmra.mxu0 %vm467_vm3, %v9760_v5  ;;  %v8621_v32 = vunpack.i.h.bf16 %v8619_v28  ;;  %v8620_v34 = vunpack.i.l.bf16 %v8619_v28  ;;  %v8616_v35 = vunpack.i.h.bf16 %v8614_v29  ;;  %v8615_v21 = vunpack.i.l.bf16 %v8614_v29 }
  0xcf   : > { %827 = vmatprep.mubr.bf16.mxu0 %v13865_v0  ;;  %1009 = vmatprep.subr.bf16.mxu1 %v959_v30  ;;  %v947_v37 = vmul.f32 %v10359_v41, %v912_v23  ;;  %v956_v22 = vpack.c.bf16 %v946_v26, %v944_v27  ;;  %v8629_v46 = vpop.permute.xlu1 %8628  ;;  %v8624_v47 = vpop.permute.xlu0 %8623  ;;  %v8064_v26 = vcombine.low %v9898_v9, %v13865_v0  ;;  %v9764_v27 = vld [vmem:[#allocation3 + $0x50] sm:$0xff]  }
  0xd0   : > { %v918_v39 = vsel %vm906_vm4, %v8621_v32, %v8616_v35  ;;  %v917_v12 = vsel %vm906_vm4, %v8620_v34, %v8615_v21  ;;  %1010 = vmatpush1.bf16.msra.mxu1 %v958_v13  ;;  %v909_v10 = vsel %vm906_vm4, %v8615_v21, %v8620_v34  ;;  %v910_v42 = vsel %vm906_vm4, %v8616_v35, %v8621_v32 }
  0xd1   : > { %8039 = vmatmul.mubr.msk.bf16.gmra.mxu1 %vm467_vm3, %v9759_v25  ;;  %v942_v44 = vmul.f32 %v10356_v40, %v918_v39  ;;  %v940_v45 = vmul.f32 %v10356_v40, %v917_v12  ;;  %v957_v48 = vpack.c.bf16 %v947_v37, %v945_v31  ;;  %v941_v49 = vmul.f32 %v10359_v41, %v909_v10  ;;  %v9763_v39 = vld [vmem:[#allocation3 + $0x18] sm:$0xff]  }
  0xd2   : > { %637 = vmatprep.mubr.bf16.mxu1 %v13865_v0  ;;  %v8631_v51 = vunpack.i.h.bf16 %v8629_v46  ;;  %v8630_v52 = vunpack.i.l.bf16 %v8629_v46  ;;  %v8626_v53 = vunpack.i.h.bf16 %v8624_v47  ;;  %v8625_v54 = vunpack.i.l.bf16 %v8624_v47  ;;  %1180 = vmatpush1.bf16.msra.mxu0 %v10405_v14 }
  0xd3   : > { %1011 = vmatprep.subr.bf16.mxu1 %v957_v48  ;;  %v943_v55 = vmul.f32 %v10359_v41, %v910_v42  ;;  %v954_v33 = vpack.c.bf16 %v942_v44, %v940_v45  ;;  %1181 = vmatprep.subr.bf16.mxu0 %v10383_v36  ;;  %v8639_v2 = vpop.permute.xlu1 %8638  ;;  %v8634_v3 = vpop.permute.xlu0 %8633  ;;  %v8065_v13 = vcombine.high %v9898_v9, %v13865_v0 }
  0xd4   : > { %v916_v57 = vsel %vm906_vm4, %v8631_v51, %v8626_v53  ;;  %v915_v58 = vsel %vm906_vm4, %v8630_v52, %v8625_v54  ;;  %1012 = vmatpush1.bf16.msra.mxu1 %v956_v22  ;;  %v907_v59 = vsel %vm906_vm4, %v8625_v54, %v8630_v52  ;;  %v908_v60 = vsel %vm906_vm4, %v8626_v53, %v8631_v51 }
  0xd5   : > { %v938_v62 = vmul.f32 %v10356_v40, %v916_v57  ;;  %v936_v63 = vmul.f32 %v10356_v40, %v915_v58  ;;  %v955_v1 = vpack.c.bf16 %v943_v55, %v941_v49  ;;  %v937_v4 = vmul.f32 %v10359_v41, %v907_v59 }
  0xd6   : > { %8048 = vmatmul.mubr.msk.bf16.gmra.mxu0 %vm467_vm3, %v9762_v50  ;;  %v8641_v5 = vunpack.i.h.bf16 %v8639_v2  ;;  %v8640_v6 = vunpack.i.l.bf16 %v8639_v2  ;;  %v8636_v7 = vunpack.i.h.bf16 %v8634_v3  ;;  %v8635_v8 = vunpack.i.l.bf16 %v8634_v3 }
  0xd7   : > { %837 = vmatprep.mubr.bf16.mxu0 %v13865_v0  ;;  %1013 = vmatprep.subr.bf16.mxu1 %v955_v1  ;;  %v939_v11 = vmul.f32 %v10359_v41, %v908_v60  ;;  %v10473_v40 = vrot.slane %v10418_v24, %v10163_v16  ;;  %v952_v19 = vpack.c.bf16 %v938_v62, %v936_v63  ;;  %v8649_v24 = vpop.permute.xlu1 %8648  ;;  %v8644_v25 = vpop.permute.xlu0 %8643  ;;  %v9765_v62 = vld [vmem:[#allocation3 + $0x58] sm:$0xff]  }
  0xd8   : > { %1014 = vmatpush1.bf16.msra.mxu1 %v954_v33  ;;  %v1300_v18 = vsel %vm1292_vm5, %v8636_v7, %v8641_v5  ;;  %1182 = vmatpush1.bf16.msra.mxu0 %v10405_v14  ;;  %v1307_v20 = vsel %vm1292_vm5, %v8640_v6, %v8635_v8  ;;  %v1299_v41 = vsel %vm1292_vm5, %v8635_v8, %v8640_v6  ;;  %v8651_v28 = vunpack.i.h.bf16 %v8649_v24  ;;  %v9766_v8 = vld [vmem:[#allocation3 + $0x60] sm:$0xff]  }
  0xd9   : > { %8040 = vmatmul.mubr.msk.bf16.gmra.mxu1 %vm467_vm3, %v9761_v61  ;;  %v953_v23 = vpack.c.bf16 %v939_v11, %v937_v4  ;;  %1183 = vmatprep.subr.bf16.mxu0 %v10383_v36  ;;  %v8650_v29 = vunpack.i.l.bf16 %v8649_v24  ;;  %v8646_v30 = vunpack.i.h.bf16 %v8644_v25  ;;  %v8645_v31 = vunpack.i.l.bf16 %v8644_v25 }
  0xda   : > { %647 = vmatprep.mubr.bf16.mxu1 %v13865_v0  ;;  %v10488_v32 = vmul.f32 %v10428_v38, %v1300_v18  ;;  %v1308_v34 = vsel %vm1292_vm5, %v8641_v5, %v8636_v7  ;;  %v1335_v35 = vmul.f32 %v10473_v40, %v1307_v20  ;;  %v10495_v36 = vrot.slane %v10441_v43, %v10163_v16 }
  0xdb   : > { %1015 = vmatprep.subr.bf16.mxu1 %v953_v23  ;;  %v1516_v21 = vsel %vm1508_vm6, %v8646_v30, %v8651_v28  ;;  %v1515_v37 = vsel %vm1508_vm6, %v8645_v31, %v8650_v29  ;;  %v1337_v22 = vmul.f32 %v10473_v40, %v1308_v34  ;;  %v10504_v12 = vmul.f32 %v10428_v38, %v1299_v41  ;;  %v8659_v42 = vpop.permute.xlu1 %8658  ;;  %v8654_v43 = vpop.permute.xlu0 %8653 }
  0xdc   : > { %1016 = vmatpush1.bf16.msra.mxu1 %v952_v19  ;;  %1184 = vmatpush1.bf16.msra.mxu0 %v10405_v14  ;;  %v10507_v10 = vmul.f32 %v10454_v56, %v1516_v21  ;;  %v1523_v44 = vsel %vm1508_vm6, %v8650_v29, %v8645_v31  ;;  %v1524_v45 = vsel %vm1508_vm6, %v8651_v28, %v8646_v30  ;;  %v8661_v14 = vunpack.i.h.bf16 %v8659_v42 }
  0xdd   : > { %1185 = vmatprep.subr.bf16.mxu0 %v8065_v13  ;;  %v8660_v46 = vunpack.i.l.bf16 %v8659_v42  ;;  %v8656_v47 = vunpack.i.h.bf16 %v8654_v43  ;;  %v8655_v48 = vunpack.i.l.bf16 %v8654_v43  ;;  %v10516_v49 = vmul.f32 %v10454_v56, %v1515_v37 }
  0xde   : > { %8049 = vmatmul.mubr.msk.bf16.gmra.mxu0 %vm467_vm3, %v9764_v27  ;;  %v1345_v50 = vpack.c.bf16 %v1337_v22, %v1335_v35  ;;  %v1551_v51 = vmul.f32 %v10495_v36, %v1523_v44  ;;  %v1553_v52 = vmul.f32 %v10495_v36, %v1524_v45  ;;  %v1344_v9 = vpack.c.bf16 %v10488_v32, %v10504_v12 }
  0xdf   : > { %847 = vmatprep.mubr.bf16.mxu0 %v13865_v0  ;;  %v1298_v53 = vsel %vm1292_vm5, %v8656_v47, %v8661_v14  ;;  %v1297_v54 = vsel %vm1292_vm5, %v8655_v48, %v8660_v46  ;;  %v1305_v55 = vsel %vm1292_vm5, %v8660_v46, %v8655_v48  ;;  %v1306_v33 = vsel %vm1292_vm5, %v8661_v14, %v8656_v47  ;;  %v8669_v59 = vpop.permute.xlu1 %8668  ;;  %v8664_v60 = vpop.permute.xlu0 %8663 }
  0xe0   : > { %1186 = vmatpush1.bf16.msra.mxu0 %v8064_v26  ;;  %v10530_v57 = vmul.f32 %v10428_v38, %v1298_v53  ;;  %v10533_v58 = vmul.f32 %v10428_v38, %v1297_v54  ;;  %1395 = vmatprep.subr.bf16.mxu1 %v1345_v50  ;;  %v1561_v61 = vpack.c.bf16 %v1553_v52, %v1551_v51  ;;  %v8671_v63 = vunpack.i.h.bf16 %v8669_v59  ;;  %v9767_v53 = vld [vmem:[#allocation3 + $0x68] sm:$0xff]  }
  0xe1   : > { %8041 = vmatmul.mubr.msk.bf16.gmra.mxu1 %vm467_vm3, %v9763_v39  ;;  %v8670_v1 = vunpack.i.l.bf16 %v8669_v59  ;;  %v8666_v2 = vunpack.i.h.bf16 %v8664_v60  ;;  %v8665_v3 = vunpack.i.l.bf16 %v8664_v60  ;;  %v1331_v4 = vmul.f32 %v10473_v40, %v1305_v55 }
  0xe2   : > { %1033 = vmatprep.mubr.bf16.mxu1 %v13865_v0  ;;  %1611 = vmatprep.subr.bf16.mxu0 %v1561_v61  ;;  %v1333_v5 = vmul.f32 %v10473_v40, %v1306_v33  ;;  %v1560_v19 = vpack.c.bf16 %v10507_v10, %v10516_v49  ;;  %v1342_v20 = vpack.c.bf16 %v10530_v57, %v10533_v58  ;;  %v9768_v10 = vld [vmem:[#allocation3 + $0x80] sm:$0xff]  }
  0xe3   : > { %v1521_v6 = vsel %vm1508_vm6, %v8670_v1, %v8665_v3  ;;  %v1522_v7 = vsel %vm1508_vm6, %v8671_v63, %v8666_v2  ;;  %v1514_v11 = vsel %vm1508_vm6, %v8666_v2, %v8671_v63  ;;  %v8679_v13 = vpop.permute.xlu1 %8678  ;;  %v8674_v18 = vpop.permute.xlu0 %8673  ;;  %v1513_v26 = vsel %vm1508_vm6, %v8665_v3, %v8670_v1 }
  0xe4   : > { %v8681_v41 = vunpack.i.h.bf16 %v8679_v13  ;;  %v8680_v23 = vunpack.i.l.bf16 %v8679_v13  ;;  %v8676_v24 = vunpack.i.h.bf16 %v8674_v18  ;;  %v8675_v25 = vunpack.i.l.bf16 %v8674_v18 }
  0xe5   : > { %v1343_v27 = vpack.c.bf16 %v1333_v5, %v1331_v4  ;;  %v1547_v28 = vmul.f32 %v10495_v36, %v1521_v6  ;;  %v1549_v29 = vmul.f32 %v10495_v36, %v1522_v7  ;;  %v1548_v35 = vmul.f32 %v10454_v56, %v1514_v11  ;;  %v2126_v7 = vld [vmem:[%s13862_s2 + $0x10] sm:$0xff] }
  0xe6   : > { %8050 = vmatmul.mubr.msk.bf16.gmra.mxu0 %vm467_vm3, %v9765_v62  ;;  %v1296_v30 = vsel %vm1292_vm5, %v8676_v24, %v8681_v41  ;;  %v1295_v31 = vsel %vm1292_vm5, %v8675_v25, %v8680_v23  ;;  %v1303_v32 = vsel %vm1292_vm5, %v8680_v23, %v8675_v25  ;;  %v1304_v34 = vsel %vm1292_vm5, %v8681_v41, %v8676_v24 }
  0xe7   : > { %1203 = vmatprep.mubr.bf16.mxu0 %v13865_v0  ;;  %v1328_v21 = vmul.f32 %v10428_v38, %v1296_v30  ;;  %v1326_v37 = vmul.f32 %v10428_v38, %v1295_v31  ;;  %v8689_v22 = vpop.permute.xlu1 %8688  ;;  %v8684_v39 = vpop.permute.xlu0 %8683  ;;  %v1327_v12 = vmul.f32 %v10473_v40, %v1303_v32  ;;  %v1546_v14 = vmul.f32 %v10454_v56, %v1513_v26  ;;  %v2129_v26 = vld [vmem:[%s13862_s2 + $0x28] sm:$0xff] }
  0xe8   : > { %v8691_v42 = vunpack.i.h.bf16 %v8689_v22  ;;  %v8690_v43 = vunpack.i.l.bf16 %v8689_v22  ;;  %v8686_v44 = vunpack.i.h.bf16 %v8684_v39  ;;  %v8685_v45 = vunpack.i.l.bf16 %v8684_v39  ;;  %2144 = vperm.xlu1 %8793, %v2126_v7   ;;  %v8094_v31 = vld [vmem:[%s13863_s3 + $0x7] ss:$8 sm:$0x3]  ;;  %2159 = vperm.xlu0 %8792, %v2129_v26  }
  0xe9   : > { %8056 = vmatmul.mubr.msk.bf16.vlgmr.msra.gmra.mxu1 %vm467_vm3, %v9766_v8  ;;  %v1559_v46 = vpack.c.bf16 %v1549_v29, %v1547_v28  ;;  %v1329_v47 = vmul.f32 %v10473_v40, %v1304_v34  ;;  %v1340_v48 = vpack.c.bf16 %v1328_v21, %v1326_v37  ;;  %v1558_v1 = vpack.c.bf16 %v1548_v35, %v1546_v14 }
  0xea   : > { %1043 = vmatprep.mubr.bf16.mxu1 %v13865_v0  ;;  %1396 = vmatpush1.bf16.msra.mxu1 %v1344_v9  ;;  %v1512_v49 = vsel %vm1508_vm6, %v8686_v44, %v8691_v42  ;;  %v1511_v50 = vsel %vm1508_vm6, %v8685_v45, %v8690_v43  ;;  %v1519_v51 = vsel %vm1508_vm6, %v8690_v43, %v8685_v45  ;;  %v8103_v45 = vld [vmem:[%s13863_s3 + $0x10] ss:$8 sm:$0x3] }
  0xeb   : > { %1397 = vmatprep.subr.bf16.mxu1 %v1343_v27  ;;  %v1520_v52 = vsel %vm1508_vm6, %v8691_v42, %v8686_v44  ;;  %v10581_v54 = vmul.f32 %v10454_v56, %v1512_v49  ;;  %v10584_v55 = vmul.f32 %v10454_v56, %v1511_v50  ;;  %v8699_v33 = vpop.permute.xlu1 %8698  ;;  %v8694_v57 = vpop.permute.xlu0 %8693  ;;  %v1341_v58 = vpack.c.bf16 %v1329_v47, %v1327_v12 }
  0xec   : > { %v1543_v59 = vmul.f32 %v10495_v36, %v1519_v51  ;;  %v8701_v60 = vunpack.i.h.bf16 %v8699_v33  ;;  %v8700_v61 = vunpack.i.l.bf16 %v8699_v33  ;;  %v8696_v62 = vunpack.i.h.bf16 %v8694_v57  ;;  %v9772_v33 = vld [vmem:[#allocation3 + $0x90] sm:$0xff]  }
  0xed   : > { %v8695_v63 = vunpack.i.l.bf16 %v8694_v57  ;;  %v1545_v2 = vmul.f32 %v10495_v36, %v1520_v52  ;;  %v1556_v3 = vpack.c.bf16 %v10581_v54, %v10584_v55  ;;  %v10634_v14 = vrot.slane %v8094_v31, %v10163_v16 }
  0xee   : > { %8072 = vmatmul.mubr.msk.bf16.vlgmr.msra.gmra.mxu0 %vm467_vm3, %v9768_v10  ;;  %1398 = vmatpush1.bf16.msra.mxu1 %v1342_v20  ;;  %v1294_v4 = vsel %vm1292_vm5, %v8696_v62, %v8701_v60  ;;  %v9770_v20 = vld [vmem:[#allocation3 + $0x88] sm:$0xff]   ;;  %v10641_v47 = vrot.slane %v8094_v31, %v10165_v17  ;;  %v10654_v55 = vrot.slane %v8103_v45, %v10163_v16 }
  0xef   : > { %1612 = vmatpush1.bf16.msra.mxu0 %v1560_v19  ;;  %1213 = vmatprep.mubr.bf16.mxu0 %v13865_v0  ;;  %v1293_v5 = vsel %vm1292_vm5, %v8695_v63, %v8700_v61  ;;  %v1301_v6 = vsel %vm1292_vm5, %v8700_v61, %v8695_v63  ;;  %v1324_v8 = vmul.f32 %v10428_v38, %v1294_v4  ;;  %v8709_v9 = vpop.permute.xlu1 %8708  ;;  %v8704_v13 = vpop.permute.xlu0 %8703 }
  0xf0   : > { %1613 = vmatprep.subr.bf16.mxu0 %v1559_v46  ;;  %1399 = vmatprep.subr.bf16.mxu1 %v1341_v58  ;;  %v1322_v11 = vmul.f32 %v10428_v38, %v1293_v5  ;;  %v1557_v18 = vpack.c.bf16 %v1545_v2, %v1543_v59  ;;  %v1302_v19 = vsel %vm1292_vm5, %v8701_v60, %v8696_v62  ;;  %v8711_v41 = vunpack.i.h.bf16 %v8709_v9  ;;  %v2124_v46 = vld [vmem:[%s13862_s2] sm:$0xff]  ;;  %v9771_v5 = vld [vmem:[#allocation3 + $0x78] sm:$0xff]  }
  0xf1   : > { %8057 = vmatmul.mubr.msk.bf16.gmra.mxu1 %vm467_vm3, %v9767_v53  ;;  %v8710_v23 = vunpack.i.l.bf16 %v8709_v9  ;;  %v8706_v24 = vunpack.i.h.bf16 %v8704_v13  ;;  %v8705_v25 = vunpack.i.l.bf16 %v8704_v13  ;;  %v1323_v38 = vmul.f32 %v10473_v40, %v1301_v6  ;;  %2134 = vperm.xlu1 %8793, %v2124_v46  }
  0xf2   : > { %1053 = vmatprep.mubr.bf16.mxu1 %v13865_v0  ;;  %1400 = vmatpush1.bf16.msra.mxu1 %v1340_v48  ;;  %v1325_v27 = vmul.f32 %v10473_v40, %v1302_v19  ;;  %v1338_v28 = vpack.c.bf16 %v1324_v8, %v1322_v11  ;;  %v9769_v40 = vld [vmem:[#allocation3 + $0x70] sm:$0xff]   ;;  %v10658_v61 = vrot.slane %v8103_v45, %v10165_v17  ;;  %v9774_v45 = vld [vmem:[#allocation3 + $0xa0] sm:$0xff]  }
  0xf3   : > { %1614 = vmatpush1.bf16.msra.mxu0 %v1558_v1  ;;  %v1510_v29 = vsel %vm1508_vm6, %v8706_v24, %v8711_v41  ;;  %v1509_v30 = vsel %vm1508_vm6, %v8705_v25, %v8710_v23  ;;  %v1517_v32 = vsel %vm1508_vm6, %v8710_v23, %v8705_v25  ;;  %v1518_v34 = vsel %vm1508_vm6, %v8711_v41, %v8706_v24  ;;  %v8719_v37 = vpop.permute.xlu1 %8718  ;;  %v8714_v22 = vpop.permute.xlu0 %8713 }
  0xf4   : > { %1615 = vmatprep.subr.bf16.mxu0 %v1557_v18  ;;  %v1540_v35 = vmul.f32 %v10454_v56, %v1510_v29  ;;  %v1538_v21 = vmul.f32 %v10454_v56, %v1509_v30  ;;  %v1339_v39 = vpack.c.bf16 %v1325_v27, %v1323_v38  ;;  %v1539_v12 = vmul.f32 %v10495_v36, %v1517_v32  ;;  %v2125_v18 = vld [vmem:[%s13862_s2 + $0x8] sm:$0xff] }
  0xf5   : > { %v8721_v10 = vunpack.i.h.bf16 %v8719_v37  ;;  %v8720_v42 = vunpack.i.l.bf16 %v8719_v37  ;;  %v8716_v43 = vunpack.i.h.bf16 %v8714_v22  ;;  %v8715_v44 = vunpack.i.l.bf16 %v8714_v22 }
  0xf6   : > { %8073 = vmatmul.mubr.msk.bf16.gmra.mxu0 %vm467_vm3, %v9770_v20  ;;  %1401 = vmatprep.subr.bf16.mxu1 %v1339_v39  ;;  %v1541_v56 = vmul.f32 %v10495_v36, %v1518_v34  ;;  %v1554_v48 = vpack.c.bf16 %v1540_v35, %v1538_v21  ;;  %v2127_v36 = vld [vmem:[%s13862_s2 + $0x18] sm:$0xff] }
  0xf7   : > { %1223 = vmatprep.mubr.bf16.mxu0 %v13865_v0  ;;  %1616 = vmatpush1.bf16.msra.mxu0 %v1556_v3  ;;  %v1739_v49 = vsel %vm1724_vm7, %v8720_v42, %v8715_v44  ;;  %v1732_v50 = vsel %vm1724_vm7, %v8716_v43, %v8721_v10  ;;  %v8729_v51 = vpop.permute.xlu1 %8728  ;;  %v8724_v52 = vpop.permute.xlu0 %8723  ;;  %v1740_v54 = vsel %vm1724_vm7, %v8721_v10, %v8716_v43  ;;  %v9773_v21 = vld [vmem:[#allocation3 + $0x98] sm:$0xff]  }
  0xf8   : > { %1402 = vmatpush1.bf16.msra.mxu1 %v1338_v28  ;;  %v1555_v53 = vpack.c.bf16 %v1541_v56, %v1539_v12  ;;  %v8731_v57 = vunpack.i.h.bf16 %v8729_v51  ;;  %v8730_v58 = vunpack.i.l.bf16 %v8729_v51  ;;  %v8726_v59 = vunpack.i.h.bf16 %v8724_v52  ;;  %2149 = vperm.xlu0 %8792, %v2127_v36  }
  0xf9   : > { %8058 = vmatmul.mubr.msk.bf16.gmra.mxu1 %vm467_vm3, %v9769_v40  ;;  %v8725_v60 = vunpack.i.l.bf16 %v8724_v52  ;;  %v1767_v62 = vmul.f32 %v10634_v14, %v1739_v49  ;;  %v1769_v63 = vmul.f32 %v10634_v14, %v1740_v54  ;;  %v1731_v1 = vsel %vm1724_vm7, %v8715_v44, %v8720_v42 }
  0xfa   : > { %1063 = vmatprep.mubr.bf16.mxu1 %v13865_v0  ;;  %1617 = vmatprep.subr.bf16.mxu0 %v1555_v53  ;;  %v1948_v2 = vsel %vm1940_vm8, %v8726_v59, %v8731_v57  ;;  %v1956_v4 = vsel %vm1940_vm8, %v8731_v57, %v8726_v59  ;;  %v10671_v6 = vmul.f32 %v10641_v47, %v1732_v50 }
  0xfb   : > { %1618 = vmatpush1.bf16.msra.mxu0 %v1554_v48  ;;  %v1955_v3 = vsel %vm1940_vm8, %v8730_v58, %v8725_v60  ;;  %v1947_v7 = vsel %vm1940_vm8, %v8725_v60, %v8730_v58  ;;  %v8739_v8 = vpop.permute.xlu1 %8738  ;;  %v8734_v11 = vpop.permute.xlu0 %8733  ;;  %v1777_v9 = vpack.c.bf16 %v1769_v63, %v1767_v62  ;;  %v1766_v24 = vmul.f32 %v10641_v47, %v1731_v1 }
  0xfc   : > { %v1983_v13 = vmul.f32 %v10654_v55, %v1955_v3  ;;  %v8741_v19 = vunpack.i.h.bf16 %v8739_v8  ;;  %v8740_v20 = vunpack.i.l.bf16 %v8739_v8  ;;  %v8736_v41 = vunpack.i.h.bf16 %v8734_v11  ;;  %2139 = vperm.xlu0 %8792, %v2125_v18   ;;  %v9776_v8 = vld [vmem:[#allocation3 + $0xc0] sm:$0xff]  }
  0xfd   : > { %v8735_v23 = vunpack.i.l.bf16 %v8734_v11  ;;  %v10683_v25 = vmul.f32 %v10658_v61, %v1948_v2  ;;  %1827 = vmatprep.subr.bf16.mxu1 %v1777_v9  ;;  %v1985_v26 = vmul.f32 %v10654_v55, %v1956_v4  ;;  %v10696_v30 = vmul.f32 %v10658_v61, %v1947_v7 }
  0xfe   : > { %8074 = vmatmul.mubr.msk.bf16.gmra.mxu0 %vm467_vm3, %v9772_v33  ;;  %v1730_v38 = vsel %vm1724_vm7, %v8736_v41, %v8741_v19  ;;  %v1738_v29 = vsel %vm1724_vm7, %v8741_v19, %v8736_v41  ;;  %v1776_v46 = vpack.c.bf16 %v10671_v6, %v1766_v24 }
  0xff   : > { %1233 = vmatprep.mubr.bf16.mxu0 %v13865_v0  ;;  %v1729_v27 = vsel %vm1724_vm7, %v8735_v23, %v8740_v20  ;;  %v1737_v28 = vsel %vm1724_vm7, %v8740_v20, %v8735_v23  ;;  %v10699_v31 = vmul.f32 %v10641_v47, %v1730_v38  ;;  %v8749_v34 = vpop.permute.xlu1 %8748  ;;  %v8744_v40 = vpop.permute.xlu0 %8743  ;;  %v1993_v35 = vpack.c.bf16 %v1985_v26, %v1983_v13 }
 0x100   : > { %v10702_v32 = vmul.f32 %v10641_v47, %v1729_v27  ;;  %v8751_v37 = vunpack.i.h.bf16 %v8749_v34  ;;  %v8750_v22 = vunpack.i.l.bf16 %v8749_v34  ;;  %v8746_v39 = vunpack.i.h.bf16 %v8744_v40  ;;  %v9775_v27 = vld [vmem:[#allocation3 + $0xa8] sm:$0xff]  }
 0x101   : > { %8059 = vmatmul.mubr.msk.bf16.gmra.mxu1 %vm467_vm3, %v9771_v5  ;;  %v8745_v12 = vunpack.i.l.bf16 %v8744_v40  ;;  %2043 = vmatprep.subr.bf16.mxu0 %v1993_v35  ;;  %v1763_v10 = vmul.f32 %v10634_v14, %v1737_v28  ;;  %v1765_v42 = vmul.f32 %v10634_v14, %v1738_v29  ;;  %v1992_v36 = vpack.c.bf16 %v10683_v25, %v10696_v30 }
 0x102   : > { %1419 = vmatprep.mubr.bf16.mxu1 %v13865_v0  ;;  %v1954_v44 = vsel %vm1940_vm8, %v8751_v37, %v8746_v39  ;;  %v1946_v56 = vsel %vm1940_vm8, %v8746_v39, %v8751_v37  ;;  %v1774_v50 = vpack.c.bf16 %v10699_v31, %v10702_v32 }
 0x103   : > { %v1953_v43 = vsel %vm1940_vm8, %v8750_v22, %v8745_v12  ;;  %v8759_v48 = vpop.permute.xlu1 %8758  ;;  %v8754_v49 = vpop.permute.xlu0 %8753  ;;  %v1945_v33 = vsel %vm1940_vm8, %v8745_v12, %v8750_v22  ;;  %v1775_v57 = vpack.c.bf16 %v1765_v42, %v1763_v10  ;;  %v1981_v59 = vmul.f32 %v10654_v55, %v1954_v44 }
 0x104   : > { %v8761_v51 = vunpack.i.h.bf16 %v8759_v48  ;;  %v8760_v52 = vunpack.i.l.bf16 %v8759_v48  ;;  %v8756_v53 = vunpack.i.h.bf16 %v8754_v49  ;;  %v8755_v54 = vunpack.i.l.bf16 %v8754_v49 }
 0x105   : > { %v1979_v58 = vmul.f32 %v10654_v55, %v1953_v43  ;;  %v1980_v2 = vmul.f32 %v10658_v61, %v1946_v56  ;;  %v1978_v19 = vmul.f32 %v10658_v61, %v1945_v33 }
 0x106   : > { %8075 = vmatmul.mubr.msk.bf16.gmra.mxu0 %vm467_vm3, %v9773_v21  ;;  %v1728_v60 = vsel %vm1724_vm7, %v8756_v53, %v8761_v51  ;;  %v1727_v62 = vsel %vm1724_vm7, %v8755_v54, %v8760_v52  ;;  %v1735_v63 = vsel %vm1724_vm7, %v8760_v52, %v8755_v54  ;;  %v1736_v1 = vsel %vm1724_vm7, %v8761_v51, %v8756_v53 }
 0x107   : > { %1635 = vmatprep.mubr.bf16.mxu0 %v13865_v0  ;;  %v1760_v3 = vmul.f32 %v10641_v47, %v1728_v60  ;;  %v1758_v4 = vmul.f32 %v10641_v47, %v1727_v62  ;;  %v8769_v5 = vpop.permute.xlu1 %8768  ;;  %v8764_v6 = vpop.permute.xlu0 %8763  ;;  %v1759_v7 = vmul.f32 %v10634_v14, %v1735_v63  ;;  %v1991_v20 = vpack.c.bf16 %v1981_v59, %v1979_v58  ;;  %v9777_v58 = vld [vmem:[#allocation3 + $0xb0] sm:$0xff]  }
 0x108   : > { %v8771_v11 = vunpack.i.h.bf16 %v8769_v5  ;;  %v8770_v9 = vunpack.i.l.bf16 %v8769_v5  ;;  %v8766_v13 = vunpack.i.h.bf16 %v8764_v6  ;;  %v8765_v18 = vunpack.i.l.bf16 %v8764_v6  ;;  %v9780_v6 = vld [vmem:[#allocation3 + $0xd0] sm:$0xff]  }
 0x109   : > { %8081 = vmatmul.mubr.msk.bf16.vlgmr.msra.gmra.mxu1 %vm467_vm3, %v9774_v45  ;;  %v1761_v41 = vmul.f32 %v10634_v14, %v1736_v1  ;;  %v1772_v23 = vpack.c.bf16 %v1760_v3, %v1758_v4  ;;  %v1990_v22 = vpack.c.bf16 %v1980_v2, %v1978_v19  ;;  %v9787_v19 = vld [vmem:[#allocation3 + $0xf8] sm:$0xff]  }
 0x10a   : > { %1429 = vmatprep.mubr.bf16.mxu1 %v13865_v0  ;;  %1828 = vmatpush1.bf16.msra.mxu1 %v1776_v46  ;;  %v1944_v24 = vsel %vm1940_vm8, %v8766_v13, %v8771_v11  ;;  %v1943_v25 = vsel %vm1940_vm8, %v8765_v18, %v8770_v9  ;;  %v1951_v26 = vsel %vm1940_vm8, %v8770_v9, %v8765_v18  ;;  %v9778_v46 = vld [vmem:[#allocation3 + $0xc8] sm:$0xff]   ;;  %v9788_v18 = vld [vmem:[#allocation3 + $0x110] sm:$0xff]  }
 0x10b   : > { %1829 = vmatprep.subr.bf16.mxu1 %v1775_v57  ;;  %v1952_v38 = vsel %vm1940_vm8, %v8771_v11, %v8766_v13  ;;  %v1976_v28 = vmul.f32 %v10658_v61, %v1944_v24  ;;  %v1974_v29 = vmul.f32 %v10658_v61, %v1943_v25  ;;  %v8779_v30 = vpop.permute.xlu1 %8778  ;;  %v1773_v32 = vpack.c.bf16 %v1761_v41, %v1759_v7  ;;  %v9779_v7 = vld [vmem:[#allocation3 + $0xb8] sm:$0xff]   ;;  %v9783_v11 = vld [vmem:[#allocation3 + $0xe8] sm:$0xff]   ;;  %v9785_v13 = vld [vmem:[#allocation3 + $0xf0] sm:$0xff]  }
 0x10c   : > { %v8774_v31 = vpop.permute.xlu0 %8773  ;;  %v1975_v34 = vmul.f32 %v10654_v55, %v1951_v26  ;;  %v8781_v40 = vunpack.i.h.bf16 %v8779_v30  ;;  %v8780_v35 = vunpack.i.l.bf16 %v8779_v30  ;;  %v1977_v39 = vmul.f32 %v10654_v55, %v1952_v38  ;;  %v9786_v9 = vld [vmem:[#allocation3 + $0x108] sm:$0xff]  }
 0x10d   : > { %v8776_v21 = vunpack.i.h.bf16 %v8774_v31  ;;  %v8775_v37 = vunpack.i.l.bf16 %v8774_v31  ;;  %v1988_v51 = vpack.c.bf16 %v1976_v28, %v1974_v29 }
 0x10e   : > { %8090 = vmatmul.mubr.msk.bf16.vlgmr.msra.gmra.mxu0 %vm467_vm3, %v9776_v8  ;;  %1830 = vmatpush1.bf16.msra.mxu1 %v1774_v50  ;;  %v1989_v45 = vpack.c.bf16 %v1977_v39, %v1975_v34  ;;  %v9784_v8 = vld [vmem:[#allocation3 + $0x100] sm:$0xff]  }
 0x10f   : > { %2044 = vmatpush1.bf16.msra.mxu0 %v1992_v36  ;;  %1645 = vmatprep.mubr.bf16.mxu0 %v13865_v0  ;;  %v1726_v12 = vsel %vm1724_vm7, %v8776_v21, %v8781_v40  ;;  %v1725_v10 = vsel %vm1724_vm7, %v8775_v37, %v8780_v35  ;;  %v1733_v42 = vsel %vm1724_vm7, %v8780_v35, %v8775_v37  ;;  %v8789_v48 = vpop.permute.xlu1 %8788 }
 0x110   : > { %2045 = vmatprep.subr.bf16.mxu0 %v1991_v20  ;;  %1831 = vmatprep.subr.bf16.mxu1 %v1773_v32  ;;  %v1756_v43 = vmul.f32 %v10641_v47, %v1726_v12  ;;  %v1754_v44 = vmul.f32 %v10641_v47, %v1725_v10  ;;  %v1734_v56 = vsel %vm1724_vm7, %v8781_v40, %v8776_v21  ;;  %v8791_v52 = vunpack.i.h.bf16 %v8789_v48  ;;  %v9789_v20 = vld [vmem:[#allocation3 + $0x118] sm:$0xff]  }
 0x111   : > { %8082 = vmatmul.mubr.msk.bf16.gmra.mxu1 %vm467_vm3, %v9775_v27  ;;  %v1755_v36 = vmul.f32 %v10634_v14, %v1733_v42  ;;  %v1757_v50 = vmul.f32 %v10634_v14, %v1734_v56  ;;  %v8790_v53 = vunpack.i.l.bf16 %v8789_v48 }
 0x112   : > { %1439 = vmatprep.mubr.bf16.mxu1 %v13865_v0  ;;  %1832 = vmatpush1.bf16.msra.mxu1 %v1772_v23  ;;  %v8784_v49 = vpop.permute.xlu0 %8783  ;;  %v1770_v57 = vpack.c.bf16 %v1756_v43, %v1754_v44 }
 0x113   : > { %2046 = vmatpush1.bf16.msra.mxu0 %v1990_v22  ;;  %v8786_v54 = vunpack.i.h.bf16 %v8784_v49  ;;  %v8785_v47 = vunpack.i.l.bf16 %v8784_v49  ;;  %v1771_v33 = vpack.c.bf16 %v1757_v50, %v1755_v36 }
 0x114   : > { %2047 = vmatprep.subr.bf16.mxu0 %v1989_v45 }
 0x115   : > { %v1942_v59 = vsel %vm1940_vm8, %v8786_v54, %v8791_v52  ;;  %v1941_v60 = vsel %vm1940_vm8, %v8785_v47, %v8790_v53  ;;  %v1949_v62 = vsel %vm1940_vm8, %v8790_v53, %v8785_v47  ;;  %v1950_v14 = vsel %vm1940_vm8, %v8791_v52, %v8786_v54  ;;  %1833 = vmatprep.subr.bf16.mxu1 %v1771_v33 }
 0x116   : > { %8091 = vmatmul.mubr.msk.bf16.gmra.mxu0 %vm467_vm3, %v9778_v46  ;;  %v1972_v63 = vmul.f32 %v10658_v61, %v1942_v59  ;;  %v1970_v1 = vmul.f32 %v10658_v61, %v1941_v60  ;;  %v1971_v2 = vmul.f32 %v10654_v55, %v1949_v62  ;;  %v1973_v3 = vmul.f32 %v10654_v55, %v1950_v14  ;;  %v9781_v55 = vld [vmem:[#allocation3 + $0xd8] sm:$0xff]   ;;  %v9782_v61 = vld [vmem:[#allocation3 + $0xe0] sm:$0xff]  }
 0x117   : > { %1655 = vmatprep.mubr.bf16.mxu0 %v13865_v0  ;;  %2048 = vmatpush1.bf16.msra.mxu0 %v1988_v51 }
 0x118   : > { %1834 = vmatpush1.bf16.msra.mxu1 %v1770_v57  ;;  %v1986_v4 = vpack.c.bf16 %v1972_v63, %v1970_v1  ;;  %v1987_v5 = vpack.c.bf16 %v1973_v3, %v1971_v2 }
 0x119   : > { %8083 = vmatmul.mubr.msk.bf16.gmra.mxu1 %vm467_vm3, %v9777_v58 }
 0x11a   : > { %1449 = vmatprep.mubr.bf16.mxu1 %v13865_v0  ;;  %2049 = vmatprep.subr.bf16.mxu0 %v1987_v5 }
 0x11b   : > { %2050 = vmatpush1.bf16.msra.mxu0 %v1986_v4 }
 0x11e   : > { %8092 = vmatmul.mubr.msk.bf16.gmra.mxu0 %vm467_vm3, %v9780_v6 }
 0x11f   : > { %1665 = vmatprep.mubr.bf16.mxu0 %v13865_v0 }
 0x121   : > { %8084 = vmatmul.mubr.msk.bf16.gmra.mxu1 %vm467_vm3, %v9779_v7 }
 0x122   : > { %1851 = vmatprep.mubr.bf16.mxu1 %v13865_v0 }
 0x126   : > { %8093 = vmatmul.mubr.msk.bf16.gmra.mxu0 %vm467_vm3, %v9781_v55 }
 0x127   : > { %2067 = vmatprep.mubr.bf16.mxu0 %v13865_v0 }
 0x129   : > { %8099 = vmatmul.mubr.msk.bf16.vlgmr.msra.gmra.mxu1 %vm467_vm3, %v9782_v61 }
 0x12a   : > { %1861 = vmatprep.mubr.bf16.mxu1 %v13865_v0 }
 0x12e   : > { %8108 = vmatmul.mubr.msk.bf16.vlgmr.msra.gmra.mxu0 %vm467_vm3, %v9784_v8 }
 0x12f   : > { %2077 = vmatprep.mubr.bf16.mxu0 %v13865_v0 }
 0x131   : > { %8100 = vmatmul.mubr.msk.bf16.gmra.mxu1 %vm467_vm3, %v9783_v11 }
 0x132   : > { %1871 = vmatprep.mubr.bf16.mxu1 %v13865_v0 }
 0x136   : > { %8109 = vmatmul.mubr.msk.bf16.gmra.mxu0 %vm467_vm3, %v9786_v9 }
 0x137   : > { %2087 = vmatprep.mubr.bf16.mxu0 %v13865_v0 }
 0x139   : > { %8101 = vmatmul.mubr.msk.bf16.gmra.mxu1 %vm467_vm3, %v9785_v13 }
 0x13a   : > { %1881 = vmatprep.mubr.bf16.mxu1 %v13865_v0 }
 0x13e   : > { %8110 = vmatmul.mubr.msk.bf16.gmra.mxu0 %vm467_vm3, %v9788_v18 }
 0x13f   : > { %2097 = vmatprep.mubr.bf16.mxu0 %v13865_v0 }
 0x141   : > { %8102 = vmatmul.mubr.msk.bf16.gmra.mxu1 %vm467_vm3, %v9787_v19 }
 0x142   : > { %2534 = vmatprep.mubr.bf16.mxu1 %v13865_v0 }
 0x146   : > { %8111 = vmatmul.mubr.msk.bf16.gmra.mxu0 %vm467_vm3, %v9789_v20 }
 0x147   : > { %2639 = vmatprep.mubr.bf16.mxu0 %v13865_v0 }
 0x16e   : > { %v514_v41 = vpop.f32.mrf.mxu0 }
 0x170   : > { %v516_v23 = vpop.f32.mrf.mxu0 }
 0x172   : > { %v518_v24 = vpop.f32.mrf.mxu0 }
 0x174   : > { %v10806_v25 = vpop.f32.mrf.mxu0 }
 0x176   : > { %v524_v26 = vpop.f32.mrf.mxu0 }
 0x178   : > { %v526_v38 = vpop.f32.mrf.mxu0 }
 0x17a   : > { %v528_v27 = vpop.f32.mrf.mxu0 }
 0x17c   : > { %v10808_v28 = vpop.f32.mrf.mxu0 }
 0x17e   : > { %v534_v29 = vpop.f32.mrf.mxu0 }
 0x180   : > { %v536_v30 = vpop.f32.mrf.mxu0 }
 0x182   : > { %v538_v31 = vpop.f32.mrf.mxu0 }
 0x184   : > { %v10810_v32 = vpop.f32.mrf.mxu0 }
 0x186   : > { %v544_v34 = vpop.f32.mrf.mxu0 }
 0x188   : > { %v546_v40 = vpop.f32.mrf.mxu0 }
 0x189   : > { %v619_v35 = vpop.f32.mrf.mxu1 }
 0x18a   : > { %v620_v21 = vadd.f32 %v619_v35, %v514_v41  ;;  %v548_v37 = vpop.f32.mrf.mxu0 }
 0x18b   : > { %v621_v22 = vpop.f32.mrf.mxu1 }
 0x18c   : > { %v622_v39 = vadd.f32 %v621_v22, %v516_v23  ;;  %v10812_v12 = vpop.f32.mrf.mxu0 }
 0x18d   : > { %v623_v10 = vpop.f32.mrf.mxu1 }
 0x18e   : > { %v624_v42 = vadd.f32 %v623_v10, %v518_v24  ;;  %v819_v43 = vpop.f32.mrf.mxu0 }
 0x18f   : > { %v10814_v44 = vpop.f32.mrf.mxu1  ;;  %v858_v45 = vadd.f32 %v819_v43, %v620_v21 }
 0x190   : > { %v821_v56 = vpop.f32.mrf.mxu0 }
 0x191   : > { %v629_v46 = vpop.f32.mrf.mxu1  ;;  %v859_v48 = vadd.f32 %v821_v56, %v622_v39 }
 0x192   : > { %v630_v49 = vadd.f32 %v629_v46, %v524_v26  ;;  %v823_v36 = vpop.f32.mrf.mxu0 }
 0x193   : > { %v631_v50 = vpop.f32.mrf.mxu1  ;;  %v860_v51 = vadd.f32 %v823_v36, %v624_v42 }
 0x194   : > { %v632_v52 = vadd.f32 %v631_v50, %v526_v38  ;;  %v10816_v53 = vpop.f32.mrf.mxu0 }
 0x195   : > { %v633_v54 = vpop.f32.mrf.mxu1 }
 0x196   : > { %v634_v47 = vadd.f32 %v633_v54, %v528_v27  ;;  %v829_v33 = vpop.f32.mrf.mxu0 }
 0x197   : > { %v10818_v57 = vpop.f32.mrf.mxu1  ;;  %v862_v58 = vadd.f32 %v829_v33, %v630_v49 }
 0x198   : > { %v831_v59 = vpop.f32.mrf.mxu0 }
 0x199   : > { %v639_v60 = vpop.f32.mrf.mxu1  ;;  %v863_v62 = vadd.f32 %v831_v59, %v632_v52 }
 0x19a   : > { %v640_v14 = vadd.f32 %v639_v60, %v534_v29  ;;  %v833_v63 = vpop.f32.mrf.mxu0 }
 0x19b   : > { %v641_v1 = vpop.f32.mrf.mxu1  ;;  %v864_v2 = vadd.f32 %v833_v63, %v634_v47 }
 0x19c   : > { %v642_v3 = vadd.f32 %v641_v1, %v536_v30  ;;  %v10820_v4 = vpop.f32.mrf.mxu0 }
 0x19d   : > { %v643_v5 = vpop.f32.mrf.mxu1 }
 0x19e   : > { %v644_v6 = vadd.f32 %v643_v5, %v538_v31  ;;  %v839_v7 = vpop.f32.mrf.mxu0 }
 0x19f   : > { %v10822_v55 = vpop.f32.mrf.mxu1  ;;  %v866_v61 = vadd.f32 %v839_v7, %v640_v14 }
 0x1a0   : > { %v841_v8 = vpop.f32.mrf.mxu0 }
 0x1a1   : > { %v649_v11 = vpop.f32.mrf.mxu1  ;;  %v867_v9 = vadd.f32 %v841_v8, %v642_v3 }
 0x1a2   : > { %v650_v13 = vadd.f32 %v649_v11, %v544_v34  ;;  %v843_v18 = vpop.f32.mrf.mxu0 }
 0x1a3   : > { %v651_v19 = vpop.f32.mrf.mxu1  ;;  %v868_v20 = vadd.f32 %v843_v18, %v644_v6 }
 0x1a4   : > { %v652_v41 = vadd.f32 %v651_v19, %v546_v40  ;;  %v10824_v23 = vpop.f32.mrf.mxu0 }
 0x1a5   : > { %v653_v24 = vpop.f32.mrf.mxu1 }
 0x1a6   : > { %v654_v26 = vadd.f32 %v653_v24, %v548_v37  ;;  %v849_v38 = vpop.f32.mrf.mxu0 }
 0x1a7   : > { %v10826_v27 = vpop.f32.mrf.mxu1  ;;  %v10828_v29 = vadd.f32 %v849_v38, %v650_v13 }
 0x1a8   : > { %v851_v30 = vpop.f32.mrf.mxu0 }
 0x1a9   : > { %v1035_v31 = vpop.f32.mrf.mxu1  ;;  %v10830_v35 = vadd.f32 %v851_v30, %v652_v41 }
 0x1aa   : > { %v1074_v21 = vadd.f32 %v1035_v31, %v858_v45  ;;  %v853_v22 = vpop.f32.mrf.mxu0 }
 0x1ab   : > { %v1037_v34 = vpop.f32.mrf.mxu1  ;;  %v10832_v39 = vadd.f32 %v853_v22, %v654_v26 }
 0x1ac   : > { %v1075_v10 = vadd.f32 %v1037_v34, %v859_v48  ;;  %v10834_v40 = vpop.f32.mrf.mxu0 }
 0x1ad   : > { %v1039_v42 = vpop.f32.mrf.mxu1 }
 0x1ae   : > { %v1076_v43 = vadd.f32 %v1039_v42, %v860_v51  ;;  %v1205_v37 = vpop.f32.mrf.mxu0 }
 0x1af   : > { %v10836_v56 = vpop.f32.mrf.mxu1  ;;  %v1244_v46 = vadd.f32 %v1205_v37, %v1074_v21 }
 0x1b0   : > { %v1207_v49 = vpop.f32.mrf.mxu0 }
 0x1b1   : > { %v1045_v36 = vpop.f32.mrf.mxu1  ;;  %v1245_v50 = vadd.f32 %v1207_v49, %v1075_v10 }
 0x1b2   : > { %v1078_v52 = vadd.f32 %v1045_v36, %v862_v58  ;;  %v1209_v54 = vpop.f32.mrf.mxu0 }
 0x1b3   : > { %v1047_v47 = vpop.f32.mrf.mxu1  ;;  %v1246_v45 = vadd.f32 %v1209_v54, %v1076_v43 }
 0x1b4   : > { %v1079_v33 = vadd.f32 %v1047_v47, %v863_v62  ;;  %v10838_v59 = vpop.f32.mrf.mxu0 }
 0x1b5   : > { %v1049_v60 = vpop.f32.mrf.mxu1 }
 0x1b6   : > { %v1080_v48 = vadd.f32 %v1049_v60, %v864_v2  ;;  %v1215_v14 = vpop.f32.mrf.mxu0 }
 0x1b7   : > { %v10840_v63 = vpop.f32.mrf.mxu1  ;;  %v10842_v51 = vadd.f32 %v1215_v14, %v1078_v52 }
 0x1b8   : > { %v1217_v1 = vpop.f32.mrf.mxu0 }
 0x1b9   : > { %v1055_v3 = vpop.f32.mrf.mxu1  ;;  %v10844_v5 = vadd.f32 %v1217_v1, %v1079_v33 }
 0x1ba   : > { %v1082_v6 = vadd.f32 %v1055_v3, %v866_v61  ;;  %v1219_v7 = vpop.f32.mrf.mxu0 }
 0x1bb   : > { %v1057_v58 = vpop.f32.mrf.mxu1  ;;  %v10846_v8 = vadd.f32 %v1219_v7, %v1080_v48 }
 0x1bc   : > { %v1083_v11 = vadd.f32 %v1057_v58, %v867_v9  ;;  %v10848_v62 = vpop.f32.mrf.mxu0 }
 0x1bd   : > { %v1059_v13 = vpop.f32.mrf.mxu1 }
 0x1be   : > { %v1084_v18 = vadd.f32 %v1059_v13, %v868_v20  ;;  %v1225_v2 = vpop.f32.mrf.mxu0 }
 0x1bf   : > { %v10850_v19 = vpop.f32.mrf.mxu1  ;;  %v10852_v41 = vadd.f32 %v1225_v2, %v1082_v6 }
 0x1c0   : > { %v1227_v24 = vpop.f32.mrf.mxu0 }
 0x1c1   : > { %v10854_v26 = vpop.f32.mrf.mxu1  ;;  %v10856_v38 = vadd.f32 %v1227_v24, %v1083_v11 }
 0x1c2   : > { %v1229_v61 = vpop.f32.mrf.mxu0 }
 0x1c3   : > { %v10858_v30 = vpop.f32.mrf.mxu1  ;;  %v10860_v31 = vadd.f32 %v1229_v61, %v1084_v18  ;;  %v10894_v61 = vpop.permute.xlu1 %2169 }
 0x1c4   : > { %v10862_v9 = vpop.f32.mrf.mxu0  ;;  %13896 = vst [vmem:[#allocation9_spill] sm:$0xff] %v10894_v61  ;;  %v626_v61 = vadd.f32 %v10814_v44, %v10806_v25 }
 0x1c5   : > { %v10864_v21 = vpop.f32.mrf.mxu1 }
 0x1c6   : > { %v10866_v20 = vpop.f32.mrf.mxu0 }
 0x1c7   : > { %v10868_v22 = vpop.f32.mrf.mxu1 }
 0x1c8   : > { %v10870_v34 = vpop.f32.mrf.mxu0 }
 0x1c9   : > { %v1421_v10 = vpop.f32.mrf.mxu1 }
 0x1ca   : > { %v1460_v42 = vadd.f32 %v1421_v10, %v1244_v46  ;;  %v10872_v43 = vpop.f32.mrf.mxu0 }
 0x1cb   : > { %v1423_v37 = vpop.f32.mrf.mxu1 }
 0x1cc   : > { %v1461_v49 = vadd.f32 %v1423_v37, %v1245_v50  ;;  %v10874_v36 = vpop.f32.mrf.mxu0 }
 0x1cd   : > { %v1425_v52 = vpop.f32.mrf.mxu1 }
 0x1ce   : > { %v1462_v54 = vadd.f32 %v1425_v52, %v1246_v45  ;;  %v1637_v47 = vpop.f32.mrf.mxu0  ;;  %v10904_v52 = vpop.permute.xlu0 %2164 }
 0x1cf   : > { %v1427_v33 = vpop.f32.mrf.mxu1  ;;  %v1676_v60 = vadd.f32 %v1637_v47, %v1460_v42  ;;  %13898 = vst [vmem:[#allocation11_spill] sm:$0xff] %v10904_v52 }
 0x1d0   : > { %v1639_v48 = vpop.f32.mrf.mxu0 }
 0x1d1   : > { %v1431_v14 = vpop.f32.mrf.mxu1  ;;  %v1677_v1 = vadd.f32 %v1639_v48, %v1461_v49  ;;  %v10910_v48 = vpop.permute.xlu1 %2154 }
 0x1d2   : > { %v1641_v3 = vpop.f32.mrf.mxu0  ;;  %13900 = vst [vmem:[#allocation13_spill] sm:$0xff] %v10910_v48  ;;  %v10920_v17 = vpop.permute.xlu0 %2159 }
 0x1d3   : > { %v10876_v6 = vpop.f32.mrf.mxu1  ;;  %v1678_v7 = vadd.f32 %v1641_v3, %v1462_v54  ;;  %13905 = vst [vmem:[#allocation18_spill] sm:$0xff] %v10920_v17 }
 0x1d4   : > { %v1643_v58 = vpop.f32.mrf.mxu0 }
 0x1d5   : > { %v10878_v46 = vpop.f32.mrf.mxu1  ;;  %v10930_v48 = vpop.permute.xlu1 %2144 }
 0x1d6   : > { %v10880_v11 = vpop.f32.mrf.mxu0 }
 0x1d7   : > { %v10882_v50 = vpop.f32.mrf.mxu1 }
 0x1d8   : > { %v10884_v13 = vpop.f32.mrf.mxu0 }
 0x1d9   : > { %v10886_v45 = vpop.f32.mrf.mxu1 }
 0x1da   : > { %v10888_v18 = vpop.f32.mrf.mxu0 }
 0x1db   : > { %v10890_v2 = vpop.f32.mrf.mxu1 }
 0x1dc   : > { %v10892_v24 = vpop.f32.mrf.mxu0 }
 0x1dd   : > { %v10896_v10 = vpop.f32.mrf.mxu1 }
 0x1de   : > { %v10898_v42 = vpop.f32.mrf.mxu0 }
 0x1df   : > { %v10900_v37 = vpop.f32.mrf.mxu1 }
 0x1e0   : > { %v10902_v49 = vpop.f32.mrf.mxu0 }
 0x1e1   : > { %13897 = vst [vmem:[#allocation10_spill] sm:$0xff] %v10902_v49  ;;  %v10906_v54 = vpop.f32.mrf.mxu1 }
 0x1e2   : > { %v10908_v47 = vpop.f32.mrf.mxu0 }
 0x1e3   : > { %13899 = vst [vmem:[#allocation12_spill] sm:$0xff] %v10908_v47  ;;  %v10912_v3 = vpop.f32.mrf.mxu1  ;;  %v636_v47 = vadd.f32 %v10818_v57, %v10808_v28  ;;  %v656_v28 = vadd.f32 %v10826_v27, %v10812_v12  ;;  %v1086_v12 = vadd.f32 %v10854_v26, %v10828_v29 }
 0x1e4   : > { %13901 = vst [vmem:[#allocation14_spill] sm:$0xff] %v10912_v3  ;;  %v10914_v0 = vpop.f32.mrf.mxu0 }
 0x1e5   : > { %13902 = vst [vmem:[#allocation15_spill] sm:$0xff] %v10914_v0  ;;  %v10916_v15 = vpop.f32.mrf.mxu1  ;;  %v861_v0 = vadd.f32 %v10816_v53, %v626_v61  ;;  %v865_v17 = vadd.f32 %v10820_v4, %v636_v47  ;;  %v10945_v53 = vpop.permute.xlu0 %2149  ;;  %v873_v61 = vadd.f32 %v10834_v40, %v656_v28 }
 0x1e6   : > { %13903 = vst [vmem:[#allocation16_spill] sm:$0xff] %v10916_v15  ;;  %v10918_v16 = vpop.f32.mrf.mxu0 }
 0x1e7   : > { %13904 = vst [vmem:[#allocation17_spill] sm:$0xff] %v10918_v16  ;;  %v10924_v52 = vpop.f32.mrf.mxu1  ;;  %v646_v16 = vadd.f32 %v10822_v55, %v10810_v32  ;;  %v1077_v25 = vadd.f32 %v10836_v56, %v861_v0 }
 0x1e8   : > { %13906 = vst [vmem:[#allocation19_spill] sm:$0xff] %v10924_v52  ;;  %v10928_v49 = vpop.f32.mrf.mxu0 }
 0x1e9   : > { %13907 = vst [vmem:[#allocation20_spill] sm:$0xff] %v10928_v49  ;;  %v1853_v3 = vpop.f32.mrf.mxu1  ;;  %v869_v57 = vadd.f32 %v10824_v23, %v646_v16  ;;  %v1081_v49 = vadd.f32 %v10840_v63, %v865_v17  ;;  %v1247_v32 = vadd.f32 %v10838_v59, %v1077_v25  ;;  %v2135_v23 = vpop.permute.xlu1 %2134  ;;  %v1087_v17 = vadd.f32 %v10858_v30, %v10830_v35 }
 0x1ea   : > { %v10936_v15 = vpop.f32.mrf.mxu0  ;;  %v1892_v55 = vadd.f32 %v1853_v3, %v1676_v60  ;;  %v1088_v60 = vadd.f32 %v10864_v21, %v10832_v39  ;;  %v1089_v30 = vadd.f32 %v10868_v22, %v873_v61  ;;  %v1465_v39 = vadd.f32 %v10876_v6, %v10844_v5 }
 0x1eb   : > { %v1855_v44 = vpop.f32.mrf.mxu1  ;;  %v1085_v0 = vadd.f32 %v10850_v19, %v869_v57  ;;  %v1251_v56 = vadd.f32 %v10848_v62, %v1081_v49  ;;  %v1463_v27 = vadd.f32 %v1427_v33, %v1247_v32  ;;  %v1256_v19 = vadd.f32 %v10866_v20, %v1086_v12  ;;  %v2140_v20 = vpop.permute.xlu0 %2139 }
 0x1ec   : > { %v10943_v52 = vpop.f32.mrf.mxu0  ;;  %v1893_v63 = vadd.f32 %v1855_v44, %v1677_v1  ;;  %v1464_v62 = vadd.f32 %v1431_v14, %v10842_v51  ;;  %v1257_v33 = vadd.f32 %v10870_v34, %v1087_v17  ;;  %v10968_v51 = vadd.f32 %v10872_v43, %v1088_v60 }
 0x1ed   : > { %v1857_v4 = vpop.f32.mrf.mxu1  ;;  %v1255_v40 = vadd.f32 %v10862_v9, %v1085_v0  ;;  %v1679_v29 = vadd.f32 %v1643_v58, %v1463_v27  ;;  %v10971_v44 = vadd.f32 %v10874_v36, %v1089_v30  ;;  %v1466_v22 = vadd.f32 %v10878_v46, %v10846_v8 }
 0x1ee   : > { %v2069_v16 = vpop.f32.mrf.mxu0  ;;  %v1894_v26 = vadd.f32 %v1857_v4, %v1678_v7  ;;  %v1680_v9 = vadd.f32 %v10880_v11, %v1464_v62  ;;  %v1681_v34 = vadd.f32 %v10884_v13, %v1465_v39  ;;  %v1468_v4 = vadd.f32 %v10886_v45, %v10852_v41 }
 0x1ef   : > { %v1859_v47 = vpop.f32.mrf.mxu1  ;;  %v2108_v59 = vadd.f32 %v2069_v16, %v1892_v55  ;;  %v1467_v55 = vadd.f32 %v10882_v50, %v1251_v56  ;;  %v1469_v36 = vadd.f32 %v10890_v2, %v10856_v38  ;;  %v1682_v8 = vadd.f32 %v10888_v18, %v1466_v22 }
 0x1f0   : > { %v2071_v49 = vpop.f32.mrf.mxu0  ;;  %v1895_v14 = vadd.f32 %v1859_v47, %v1679_v29  ;;  %v1470_v16 = vadd.f32 %v10896_v10, %v10860_v31  ;;  %v1684_v50 = vadd.f32 %v10898_v42, %v1468_v4  ;;  %v1471_v2 = vadd.f32 %v10900_v37, %v1255_v40  ;;  %v13908_v47 = vld [vmem:[#allocation10_spill] sm:$0xff]  ;;  %v13909_v31 = vld [vmem:[#allocation12_spill] sm:$0xff] }
 0x1f1   : > { %v1863_v3 = vpop.f32.mrf.mxu1  ;;  %v10960_v25 = vadd.f32 %v2135_v23, %v2108_v59  ;;  %v2109_v35 = vadd.f32 %v2071_v49, %v1893_v63  ;;  %v1472_v63 = vadd.f32 %v10906_v54, %v1256_v19  ;;  %v1685_v59 = vadd.f32 %v13908_v47, %v1469_v36  ;;  %v13910_v29 = vld [vmem:[#allocation14_spill] sm:$0xff]  ;;  %v13913_v4 = vld [vmem:[#allocation16_spill] sm:$0xff] }
 0x1f2   : > { %v2073_v21 = vpop.f32.mrf.mxu0  ;;  %v1896_v5 = vadd.f32 %v1863_v3, %v1680_v9  ;;  %v1686_v10 = vadd.f32 %v13909_v31, %v1470_v16  ;;  %v1474_v36 = vadd.f32 %v13913_v4, %v10968_v51  ;;  %v8120_v4 = vld [vmem:[%s13863_s3 + $0x1] ss:$8 sm:$0x3] }
 0x1f3   : > { %v1865_v1 = vpop.f32.mrf.mxu1  ;;  %v2173_v7 = vadd.f32 %v2135_v23, %v2109_v35  ;;  %v2110_v58 = vadd.f32 %v2073_v21, %v1894_v26  ;;  %v2188_v11 = vmax.f32 %v10960_v25, 0.0  ;;  %v1683_v23 = vadd.f32 %v10892_v24, %v1467_v55 }
 0x1f4   : > { %v2075_v6 = vpop.f32.mrf.mxu0  ;;  %v1897_v13 = vadd.f32 %v1865_v1, %v1681_v34  ;;  %v1473_v26 = vadd.f32 %v13910_v29, %v1257_v33  ;;  %v13911_v33 = vld [vmem:[#allocation15_spill] sm:$0xff] }
 0x1f5   : > { %v2189_v28 = vmax.f32 %v2173_v7, 0.0  ;;  %v1867_v57 = vpop.f32.mrf.mxu1  ;;  %v2174_v43 = vadd.f32 %v2140_v20, %v2110_v58  ;;  %v2111_v32 = vadd.f32 %v2075_v6, %v1895_v14  ;;  %v1687_v1 = vadd.f32 %v13911_v33, %v1471_v2 }
 0x1f6   : > { %v2079_v46 = vpop.f32.mrf.mxu0  ;;  %v1898_v56 = vadd.f32 %v1867_v57, %v1682_v8 }
 0x1f7   : > { %v1869_v61 = vpop.f32.mrf.mxu1  ;;  %v2175_v0 = vadd.f32 %v2140_v20, %v2111_v32  ;;  %v2112_v12 = vadd.f32 %v2079_v46, %v1896_v5  ;;  %v2190_v41 = vmax.f32 %v2174_v43, 0.0  ;;  %v13912_v43 = vld [vmem:[#allocation13_spill] sm:$0xff] }
 0x1f8   : > { %v2081_v17 = vpop.f32.mrf.mxu0  ;;  %v1899_v60 = vadd.f32 %v1869_v61, %v1683_v23  ;;  %v13915_v46 = vld [vmem:[#allocation17_spill] sm:$0xff]  ;;  %v13916_v61 = vld [vmem:[#allocation20_spill] sm:$0xff] }
 0x1f9   : > { %v2191_v45 = vmax.f32 %v2175_v0, 0.0  ;;  %v1873_v27 = vpop.f32.mrf.mxu1  ;;  %v10988_v38 = vadd.f32 %v10930_v48, %v2112_v12  ;;  %v2113_v18 = vadd.f32 %v2081_v17, %v1897_v13  ;;  %v11000_v9 = vpack.c.bf16 %v2190_v41, %v2188_v11 }
 0x1fa   : > { %v2083_v24 = vpop.f32.mrf.mxu0  ;;  %v1900_v3 = vadd.f32 %v1873_v27, %v1684_v50  ;;  %v11006_v34 = vpack.i.bf16 %v2190_v41, %v2188_v11  ;;  %v1688_v13 = vadd.f32 %v13915_v46, %v1472_v63  ;;  %v1689_v0 = vadd.f32 %v13916_v61, %v1473_v26  ;;  %v13917_v27 = vld [vmem:[#allocation18_spill] sm:$0xff]  ;;  %v13918_v26 = vld [vmem:[#allocation11_spill] sm:$0xff] }
 0x1fb   : > { %v1875_v42 = vpop.f32.mrf.mxu1  ;;  %v2177_v62 = vadd.f32 %v10930_v48, %v2113_v18  ;;  %v2114_v49 = vadd.f32 %v2083_v24, %v1898_v56  ;;  %v2192_v25 = vmax.f32 %v10988_v38, 0.0  ;;  %v10998_v39 = vpack.c.bf16 %v2191_v45, %v2189_v28 }
 0x1fc   : > { %v2085_v35 = vpop.f32.mrf.mxu0  ;;  %v1901_v21 = vadd.f32 %v1875_v42, %v1685_v59  ;;  %v11004_v22 = vpack.i.bf16 %v2191_v45, %v2189_v28  ;;  %v1690_v50 = vadd.f32 %v10936_v15, %v1474_v36 }
 0x1fd   : > { %v2193_v30 = vmax.f32 %v2177_v62, 0.0  ;;  %v1877_v37 = vpop.f32.mrf.mxu1  ;;  %v2178_v54 = vadd.f32 %v10945_v53, %v2114_v49  ;;  %v2115_v40 = vadd.f32 %v2085_v35, %v1899_v60 }
 0x1fe   : > { %v2089_v19 = vpop.f32.mrf.mxu0  ;;  %v1902_v7 = vadd.f32 %v1877_v37, %v1686_v10 }
 0x1ff   : > { %v1879_v20 = vpop.f32.mrf.mxu1  ;;  %v2179_v48 = vadd.f32 %v10945_v53, %v2115_v40  ;;  %v2116_v14 = vadd.f32 %v2089_v19, %v1900_v3  ;;  %v2194_v5 = vmax.f32 %v2178_v54, 0.0  ;;  %v13914_v53 = vld [vmem:[#allocation19_spill] sm:$0xff] }
 0x200   : > { %v2091_v58 = vpop.f32.mrf.mxu0  ;;  %v1475_v8 = vadd.f32 %v13914_v53, %v10971_v44  ;;  %v1903_v12 = vadd.f32 %v1879_v20, %v1687_v1  ;;  %v13920_v53 = vld [vmem:[#allocation8_spill] sm:$0xff] }
 0x201   : > { %v2195_v6 = vmax.f32 %v2179_v48, 0.0  ;;  %v1883_v57 = vpop.f32.mrf.mxu1  ;;  %v2180_v32 = vadd.f32 %v13912_v43, %v2116_v14  ;;  %v2117_v55 = vadd.f32 %v2091_v58, %v1901_v21  ;;  %v11020_v63 = vpack.c.bf16 %v2194_v5, %v2192_v25  ;;  %v13919_v48 = vld [vmem:[#allocation9_spill] sm:$0xff] }
 0x202   : > { %v2093_v28 = vpop.f32.mrf.mxu0  ;;  %v1904_v56 = vadd.f32 %v1883_v57, %v1688_v13  ;;  %v1691_v10 = vadd.f32 %v10943_v52, %v1475_v8  ;;  %v11026_v62 = vpack.i.bf16 %v2194_v5, %v2192_v25  ;;  %v11128_v8 = vrot.slane %v8120_v4, %v13920_v53  ;;  %v13921_v13 = vld [vmem:[#allocation7_spill] sm:$0xff] }
 0x203   : > { %v1885_v11 = vpop.f32.mrf.mxu1  ;;  %v2181_v16 = vadd.f32 %v13912_v43, %v2117_v55  ;;  %v2118_v23 = vadd.f32 %v2093_v28, %v1902_v7  ;;  %v2196_v17 = vmax.f32 %v2180_v32, 0.0  ;;  %v11018_v2 = vpack.c.bf16 %v2195_v6, %v2193_v30 }
 0x204   : > { %v2095_v41 = vpop.f32.mrf.mxu0  ;;  %v1905_v47 = vadd.f32 %v1885_v11, %v1689_v0  ;;  %v11024_v42 = vpack.i.bf16 %v2195_v6, %v2193_v30  ;;  %v11131_v61 = vrot.slane %v8120_v4, %v13921_v13 }
 0x205   : > { %v2197_v45 = vmax.f32 %v2181_v16, 0.0  ;;  %v1887_v51 = vpop.f32.mrf.mxu1  ;;  %v2182_v38 = vadd.f32 %v13917_v27, %v2118_v23  ;;  %v2119_v44 = vadd.f32 %v2095_v41, %v1903_v12 }
 0x206   : > { %v2099_v18 = vpop.f32.mrf.mxu0  ;;  %v1906_v15 = vadd.f32 %v1887_v51, %v1690_v50 }
 0x207   : > { %v2183_v59 = vadd.f32 %v13917_v27, %v2119_v44  ;;  %v2120_v31 = vadd.f32 %v2099_v18, %v1904_v56  ;;  %v1889_v24 = vpop.f32.mrf.mxu1  ;;  %v2198_v49 = vmax.f32 %v2182_v38, 0.0 }
 0x208   : > { %v2101_v60 = vpop.f32.mrf.mxu0  ;;  %v1907_v54 = vadd.f32 %v1889_v24, %v1691_v10 }
 0x209   : > { %v2199_v29 = vmax.f32 %v2183_v59, 0.0  ;;  %v2184_v3 = vadd.f32 %v13918_v26, %v2120_v31  ;;  %v2121_v35 = vadd.f32 %v2101_v60, %v1905_v47  ;;  %v11033_v25 = vpack.c.bf16 %v2198_v49, %v2196_v17 }
 0x20a   : > { %v2103_v37 = vpop.f32.mrf.mxu0  ;;  %v8799_v58 = vpack.i.bf16 %v2198_v49, %v2196_v17 }
 0x20b   : > { %v2185_v40 = vadd.f32 %v13918_v26, %v2121_v35  ;;  %v2122_v19 = vadd.f32 %v2103_v37, %v1906_v15  ;;  %v2200_v21 = vmax.f32 %v2184_v3, 0.0  ;;  %v11031_v30 = vpack.c.bf16 %v2199_v29, %v2197_v45 }
 0x20c   : > { %v2105_v20 = vpop.f32.mrf.mxu0  ;;  %v8809_v7 = vpack.i.bf16 %v2199_v29, %v2197_v45 }
 0x20d   : > { %v2201_v52 = vmax.f32 %v2185_v40, 0.0  ;;  %v2186_v14 = vadd.f32 %v13919_v48, %v2122_v19  ;;  %v2123_v33 = vadd.f32 %v2105_v20, %v1907_v54 }
 0x20f   : > { %v2187_v1 = vadd.f32 %v13919_v48, %v2123_v33  ;;  %v2202_v5 = vmax.f32 %v2186_v14, 0.0  ;;  %v8214_v33 = vld [vmem:[%s13862_s2 + $0x78] sm:$0xff] }
 0x211   : > { %v2203_v6 = vmax.f32 %v2187_v1, 0.0  ;;  %v11038_v43 = vpack.c.bf16 %v2202_v5, %v2200_v21  ;;  %v8794_v55 = vpack.i.bf16 %v2202_v5, %v2200_v21  ;;  %v8213_v1 = vld [vmem:[%s13862_s2 + $0x70] sm:$0xff] }
 0x213   : > { %v11036_v57 = vpack.c.bf16 %v2203_v6, %v2201_v52  ;;  %v8804_v32 = vpack.i.bf16 %v2203_v6, %v2201_v52  ;;  %8795 = vrot.lane.b32.xlu1 %v8794_v55, %s9965_s26 }
 0x215   : > { %8805 = vrot.lane.b32.xlu0 %v8804_v32, %s9965_s26 }
 0x217   : > { %8800 = vrot.lane.b32.xlu1 %v8799_v58, %s9965_s26 }
 0x219   : > { %8810 = vrot.lane.b32.xlu0 %v8809_v7, %s9965_s26 }
 0x21b   : > { %8815 = vrot.lane.b32.xlu1 %v11026_v62, %s9965_s26 }
 0x21d   : > { %8820 = vrot.lane.b32.xlu0 %v11024_v42, %s9965_s26 }
 0x21f   : > { %8825 = vrot.lane.b32.xlu1 %v11006_v34, %s9965_s26 }
 0x221   : > { %8830 = vrot.lane.b32.xlu0 %v11004_v22, %s9965_s26 }
 0x223   : > { %8835 = vrot.lane.b32.xlu1 %v8799_v58, %s9966_s30 }
 0x225   : > { %8840 = vrot.lane.b32.xlu0 %v8809_v7, %s9966_s30 }
 0x227   : > { %8845 = vrot.lane.b32.xlu1 %v8799_v58, %s9967_s5 }
 0x229   : > { %8850 = vrot.lane.b32.xlu0 %v8809_v7, %s9967_s5 }
 0x22b   : > { %8855 = vrot.lane.b32.xlu1 %v11026_v62, %s9966_s30 }
 0x22d   : > { %8860 = vrot.lane.b32.xlu0 %v11024_v42, %s9966_s30 }
 0x22f   : > { %8865 = vrot.lane.b32.xlu1 %v8794_v55, %s9966_s30 }
 0x231   : > { %8870 = vrot.lane.b32.xlu0 %v8804_v32, %s9966_s30 }
 0x233   : > { %8875 = vrot.lane.b32.xlu1 %v8794_v55, %s9967_s5 }
 0x235   : > { %8885 = vrot.lane.b32.xlu0 %v8804_v32, %s9967_s5 }
 0x237   : > { %8880 = vrot.lane.b32.xlu1 %v11026_v62, %s9967_s5 }
 0x239   : > { %8890 = vrot.lane.b32.xlu0 %v11024_v42, %s9967_s5 }
 0x23b   : > { %8895 = vrot.lane.b32.xlu1 %v11006_v34, %s9966_s30 }
 0x23d   : > { %8900 = vrot.lane.b32.xlu0 %v11004_v22, %s9966_s30 }
 0x23f   : > { %8905 = vrot.lane.b32.xlu1 %v11006_v34, %s9967_s5 }
 0x241   : > { %8910 = vrot.lane.b32.xlu0 %v11004_v22, %s9967_s5 }
 0x243   : > { %8915 = vrot.lane.b32.xlu1 %v8794_v55, %s9968_s6 }
 0x245   : > { %8925 = vrot.lane.b32.xlu0 %v8804_v32, %s9968_s6 }
 0x247   : > { %8920 = vrot.lane.b32.xlu1 %v8799_v58, %s9968_s6 }
 0x249   : > { %8930 = vrot.lane.b32.xlu0 %v8809_v7, %s9968_s6 }
 0x24b   : > { %8935 = vrot.lane.b32.xlu1 %v11026_v62, %s9968_s6 }
 0x24d   : > { %8940 = vrot.lane.b32.xlu0 %v11024_v42, %s9968_s6 }
 0x24f   : > { %8945 = vrot.lane.b32.xlu1 %v11006_v34, %s9968_s6 }
 0x251   : > { %8950 = vrot.lane.b32.xlu0 %v11004_v22, %s9968_s6 }
 0x253   : > { %8955 = vrot.lane.b32.xlu1 %v8799_v58, %s9969_s7 }
 0x255   : > { %8960 = vrot.lane.b32.xlu0 %v8809_v7, %s9969_s7 }
 0x257   : > { %8965 = vrot.lane.b32.xlu1 %v8799_v58, %s9970_s8 }
 0x259   : > { %8970 = vrot.lane.b32.xlu0 %v8809_v7, %s9970_s8 }
 0x25b   : > { %8975 = vrot.lane.b32.xlu1 %v11026_v62, %s9969_s7 }
 0x25d   : > { %8980 = vrot.lane.b32.xlu0 %v11024_v42, %s9969_s7 }
 0x25f   : > { %8985 = vrot.lane.b32.xlu1 %v8794_v55, %s9969_s7 }
 0x261   : > { %8990 = vrot.lane.b32.xlu0 %v8804_v32, %s9969_s7 }
 0x263   : > { %8995 = vrot.lane.b32.xlu1 %v8794_v55, %s9970_s8 }
 0x265   : > { %9005 = vrot.lane.b32.xlu0 %v8804_v32, %s9970_s8 }
 0x267   : > { %9000 = vrot.lane.b32.xlu1 %v11026_v62, %s9970_s8 }
 0x269   : > { %9010 = vrot.lane.b32.xlu0 %v11024_v42, %s9970_s8 }
 0x26b   : > { %9015 = vrot.lane.b32.xlu1 %v11006_v34, %s9969_s7 }
 0x26d   : > { %9020 = vrot.lane.b32.xlu0 %v11004_v22, %s9969_s7 }
 0x26f   : > { %9025 = vrot.lane.b32.xlu1 %v11006_v34, %s9970_s8 }
 0x271   : > { %9030 = vrot.lane.b32.xlu0 %v11004_v22, %s9970_s8 }
 0x273   : > { %9035 = vrot.lane.b32.xlu1 %v8799_v58, %s9971_s9 }
 0x275   : > { %9040 = vrot.lane.b32.xlu0 %v8809_v7, %s9971_s9 }
 0x277   : > { %9045 = vrot.lane.b32.xlu1 %v8799_v58, %s9972_s10 }
 0x279   : > { %9050 = vrot.lane.b32.xlu0 %v8809_v7, %s9972_s10 }
 0x27b   : > { %9055 = vrot.lane.b32.xlu1 %v11026_v62, %s9971_s9 }
 0x27d   : > { %9060 = vrot.lane.b32.xlu0 %v11024_v42, %s9971_s9 }
 0x27f   : > { %9065 = vrot.lane.b32.xlu1 %v8794_v55, %s9971_s9 }
 0x281   : > { %9070 = vrot.lane.b32.xlu0 %v8804_v32, %s9971_s9 }
 0x283   : > { %9075 = vrot.lane.b32.xlu1 %v8794_v55, %s9972_s10 }
 0x285   : > { %9085 = vrot.lane.b32.xlu0 %v8804_v32, %s9972_s10  ;;  %v8796_v46 = vpop.permute.xlu1 %8795 }
 0x286   : > { %v8798_v12 = vunpack.i.h.bf16 %v8796_v46  ;;  %v8797_v11 = vunpack.i.l.bf16 %v8796_v46 }
 0x287   : > { %v8806_v36 = vpop.permute.xlu0 %8805  ;;  %9080 = vrot.lane.b32.xlu1 %v11026_v62, %s9972_s10 }
 0x288   : > { %v8808_v0 = vunpack.i.h.bf16 %v8806_v36  ;;  %v8807_v28 = vunpack.i.l.bf16 %v8806_v36 }
 0x289   : > { %9090 = vrot.lane.b32.xlu0 %v11024_v42, %s9972_s10  ;;  %v8801_v27 = vpop.permute.xlu1 %8800 }
 0x28a   : > { %v2424_v23 = vsel %vm384_vm0, %v8808_v0, %v8798_v12  ;;  %v2423_v50 = vsel %vm384_vm0, %v8807_v28, %v8797_v11  ;;  %v2415_v56 = vsel %vm384_vm0, %v8797_v11, %v8807_v28  ;;  %v2416_v17 = vsel %vm384_vm0, %v8798_v12, %v8808_v0 }
 0x28b   : > { %v2451_v41 = vmul.f32 %v11128_v8, %v2424_v23  ;;  %v2449_v45 = vmul.f32 %v11128_v8, %v2423_v50  ;;  %v8811_v51 = vpop.permute.xlu0 %8810  ;;  %v2450_v38 = vmul.f32 %v11131_v61, %v2415_v56  ;;  %v2452_v44 = vmul.f32 %v11131_v61, %v2416_v17  ;;  %9095 = vrot.lane.b32.xlu1 %v11006_v34, %s9971_s9  ;;  %v8212_v50 = vld [vmem:[%s13862_s2 + $0x68] sm:$0xff]  ;;  %v8211_v56 = vld [vmem:[%s13862_s2 + $0x60] sm:$0xff] }
 0x28c   : > { %v8813_v18 = vunpack.i.h.bf16 %v8811_v51  ;;  %v8812_v47 = vunpack.i.l.bf16 %v8811_v51  ;;  %v8803_v59 = vunpack.i.h.bf16 %v8801_v27  ;;  %v8802_v31 = vunpack.i.l.bf16 %v8801_v27 }
 0x28d   : > { %9100 = vrot.lane.b32.xlu0 %v11004_v22, %s9971_s9  ;;  %v2460_v10 = vpack.c.bf16 %v2452_v44, %v2450_v38  ;;  %v2459_v15 = vpack.c.bf16 %v2451_v41, %v2449_v45  ;;  %v8816_v3 = vpop.permute.xlu1 %8815  ;;  %v2332_v38 = vld [vmem:[%s13863_s3] ss:$8 sm:$0x3] }
 0x28e   : > { %v2422_v24 = vsel %vm384_vm0, %v8813_v18, %v8803_v59  ;;  %v2421_v60 = vsel %vm384_vm0, %v8812_v47, %v8802_v31  ;;  %v2413_v42 = vsel %vm384_vm0, %v8802_v31, %v8812_v47  ;;  %v2414_v62 = vsel %vm384_vm0, %v8803_v59, %v8813_v18 }
 0x28f   : > { %v2447_v49 = vmul.f32 %v11128_v8, %v2422_v24  ;;  %v2445_v29 = vmul.f32 %v11128_v8, %v2421_v60  ;;  %v8821_v26 = vpop.permute.xlu0 %8820  ;;  %2510 = vmatprep.subr.bf16.mxu1 %v2460_v10  ;;  %v2446_v35 = vmul.f32 %v11131_v61, %v2413_v42  ;;  %v2448_v37 = vmul.f32 %v11131_v61, %v2414_v62  ;;  %v8137_v42 = vld [vmem:[%s13863_s3 + $0x2] ss:$8 sm:$0x3]  ;;  %v8209_v62 = vld [vmem:[%s13862_s2 + $0x50] sm:$0xff] }
 0x290   : > { %v8823_v54 = vunpack.i.h.bf16 %v8821_v26  ;;  %v8822_v40 = vunpack.i.l.bf16 %v8821_v26  ;;  %v8818_v19 = vunpack.i.h.bf16 %v8816_v3  ;;  %v8817_v21 = vunpack.i.l.bf16 %v8816_v3  ;;  %2511 = vmatpush1.bf16.msra.mxu1 %v2459_v15  ;;  %9105 = vrot.lane.b32.xlu1 %v11006_v34, %s9972_s10 }
 0x291   : > { %9110 = vrot.lane.b32.xlu0 %v11004_v22, %s9972_s10  ;;  %v2458_v20 = vpack.c.bf16 %v2448_v37, %v2446_v35  ;;  %v2457_v52 = vpack.c.bf16 %v2447_v49, %v2445_v29  ;;  %v8826_v6 = vpop.permute.xlu1 %8825  ;;  %v11209_v60 = vrot.slane %v2332_v38, %v13920_v53  ;;  %v11221_v49 = vrot.slane %v2332_v38, %v13921_v13  ;;  %v9790_v37 = vld [vmem:[#allocation3 + $0x140] sm:$0xff]  }
 0x292   : > { %v2420_v48 = vsel %vm384_vm0, %v8823_v54, %v8818_v19  ;;  %v2419_v14 = vsel %vm384_vm0, %v8822_v40, %v8817_v21  ;;  %v2411_v22 = vsel %vm384_vm0, %v8817_v21, %v8822_v40  ;;  %v2412_v34 = vsel %vm384_vm0, %v8818_v19, %v8823_v54 }
 0x293   : > { %v2443_v7 = vmul.f32 %v11128_v8, %v2420_v48  ;;  %v2441_v58 = vmul.f32 %v11128_v8, %v2419_v14  ;;  %v8831_v5 = vpop.permute.xlu0 %8830  ;;  %2512 = vmatprep.subr.bf16.mxu1 %v2458_v20  ;;  %v2442_v32 = vmul.f32 %v11131_v61, %v2411_v22  ;;  %v2444_v55 = vmul.f32 %v11131_v61, %v2412_v34  ;;  %v8208_v22 = vld [vmem:[%s13862_s2 + $0x48] sm:$0xff]  ;;  %v8207_v34 = vld [vmem:[%s13862_s2 + $0x40] sm:$0xff] }
 0x294   : > { %v8833_v4 = vunpack.i.h.bf16 %v8831_v5  ;;  %v8832_v36 = vunpack.i.l.bf16 %v8831_v5  ;;  %v8828_v46 = vunpack.i.h.bf16 %v8826_v6  ;;  %v8827_v0 = vunpack.i.l.bf16 %v8826_v6  ;;  %2513 = vmatpush1.bf16.msra.mxu1 %v2457_v52  ;;  %4175 = vperm.xlu1 %8793, %v8213_v1   ;;  %v11258_v5 = vld [vmem:[%s13863_s3 + $0x3] ss:$8 sm:$0x3] }
 0x295   : > { %4180 = vperm.xlu0 %8792, %v8214_v33   ;;  %v2456_v28 = vpack.c.bf16 %v2444_v55, %v2442_v32  ;;  %v2455_v12 = vpack.c.bf16 %v2443_v7, %v2441_v58  ;;  %v8836_v44 = vpop.permute.xlu1 %8835  ;;  %v11232_v48 = vrot.slane %v8137_v42, %v13920_v53  ;;  %v11235_v14 = vrot.slane %v8137_v42, %v13921_v13 }
 0x296   : > { %v2418_v11 = vsel %vm384_vm0, %v8833_v4, %v8828_v46  ;;  %v2417_v23 = vsel %vm384_vm0, %v8832_v36, %v8827_v0  ;;  %v2409_v17 = vsel %vm384_vm0, %v8827_v0, %v8832_v36  ;;  %v2410_v41 = vsel %vm384_vm0, %v8828_v46, %v8833_v4 }
 0x297   : > { %v2439_v45 = vmul.f32 %v11128_v8, %v2418_v11  ;;  %v2437_v51 = vmul.f32 %v11128_v8, %v2417_v23  ;;  %v8841_v27 = vpop.permute.xlu0 %8840  ;;  %2514 = vmatprep.subr.bf16.mxu1 %v2456_v28  ;;  %v2438_v18 = vmul.f32 %v11131_v61, %v2409_v17  ;;  %v2440_v47 = vmul.f32 %v11131_v61, %v2410_v41  ;;  %v8210_v61 = vld [vmem:[%s13862_s2 + $0x58] sm:$0xff] }
 0x298   : > { %v8843_v59 = vunpack.i.h.bf16 %v8841_v27  ;;  %v8842_v31 = vunpack.i.l.bf16 %v8841_v27  ;;  %v8838_v10 = vunpack.i.h.bf16 %v8836_v44  ;;  %v8837_v15 = vunpack.i.l.bf16 %v8836_v44  ;;  %2515 = vmatpush1.bf16.msra.mxu1 %v2455_v12  ;;  %4165 = vperm.xlu1 %8793, %v8211_v56  }
 0x299   : > { %4170 = vperm.xlu0 %8792, %v8212_v50   ;;  %v2454_v24 = vpack.c.bf16 %v2440_v47, %v2438_v18  ;;  %v2453_v8 = vpack.c.bf16 %v2439_v45, %v2437_v51  ;;  %v8846_v35 = vpop.permute.xlu1 %8845  ;;  %v13923_v23 = vmov 0   ;;  %v11272_v50 = vrot.slane %v11258_v5, %v13920_v53  ;;  %v9791_v18 = vld [vmem:[#allocation3 + $0x148] sm:$0xff]  }
 0x29a   : > { %v2329_v29 = vsel %vm291_vm1, %v8843_v59, %v8838_v10  ;;  %v2328_v26 = vsel %vm291_vm1, %v8842_v31, %v8837_v15  ;;  %v2320_v54 = vsel %vm291_vm1, %v8837_v15, %v8842_v31  ;;  %v2321_v40 = vsel %vm291_vm1, %v8838_v10, %v8843_v59 }
 0x29b   : > { %v8851_v3 = vpop.permute.xlu0 %8850  ;;  %2516 = vmatprep.subr.bf16.mxu1 %v2454_v24  ;;  %v8848_v20 = vunpack.i.h.bf16 %v8846_v35  ;;  %v8847_v52 = vunpack.i.l.bf16 %v8846_v35  ;;  %v11238_v33 = vmul.f32 %v11209_v60, %v2329_v29  ;;  %v11241_v1 = vmul.f32 %v11209_v60, %v2328_v26 }
 0x29c   : > { %v8853_v19 = vunpack.i.h.bf16 %v8851_v3  ;;  %v8852_v21 = vunpack.i.l.bf16 %v8851_v3  ;;  %2517 = vmatpush1.bf16.msra.mxu1 %v2453_v8  ;;  %4155 = vperm.xlu1 %8793, %v8209_v62   ;;  %v11250_v7 = vmul.f32 %v11221_v49, %v2320_v54  ;;  %v11253_v58 = vmul.f32 %v11221_v49, %v2321_v40 }
 0x29d   : > { %4160 = vperm.xlu0 %8792, %v8210_v61   ;;  %v8856_v4 = vpop.permute.xlu1 %8855  ;;  %v2364_v45 = vpack.c.bf16 %v11238_v33, %v11241_v1 }
 0x29e   : > { %v2725_v6 = vsel %vm690_vm2, %v8853_v19, %v8848_v20  ;;  %v2724_v32 = vsel %vm690_vm2, %v8852_v21, %v8847_v52  ;;  %v2716_v36 = vsel %vm690_vm2, %v8847_v52, %v8852_v21  ;;  %v2717_v46 = vsel %vm690_vm2, %v8848_v20, %v8853_v19 }
 0x29f   : > { %v8861_v55 = vpop.permute.xlu0 %8860  ;;  %8125 = vmatmul.mubr.msk.bf16.vlgmr.msra.gmra.mxu1 %vm467_vm3, %v9790_v37  ;;  %v8858_v12 = vunpack.i.h.bf16 %v8856_v4  ;;  %v8857_v11 = vunpack.i.l.bf16 %v8856_v4  ;;  %v2365_v41 = vpack.c.bf16 %v11253_v58, %v11250_v7  ;;  %v11283_v51 = vmul.f32 %v11232_v48, %v2725_v6 }
 0x2a0   : > { %v8863_v0 = vunpack.i.h.bf16 %v8861_v55  ;;  %v8862_v28 = vunpack.i.l.bf16 %v8861_v55  ;;  %2544 = vmatprep.mubr.bf16.mxu1 %v13923_v23  ;;  %4145 = vperm.xlu1 %8793, %v8207_v34   ;;  %v11286_v27 = vmul.f32 %v11232_v48, %v2724_v32  ;;  %v11289_v47 = vmul.f32 %v11235_v14, %v2716_v36 }
 0x2a1   : > { %4150 = vperm.xlu0 %8792, %v8208_v22   ;;  %v8866_v44 = vpop.permute.xlu1 %8865  ;;  %v11292_v59 = vmul.f32 %v11235_v14, %v2717_v46 }
 0x2a2   : > { %v2327_v56 = vsel %vm291_vm1, %v8863_v0, %v8858_v12  ;;  %v2326_v17 = vsel %vm291_vm1, %v8862_v28, %v8857_v11  ;;  %v8868_v15 = vunpack.i.h.bf16 %v8866_v44  ;;  %v8867_v24 = vunpack.i.l.bf16 %v8866_v44 }
 0x2a3   : > { %v8871_v38 = vpop.permute.xlu0 %8870  ;;  %v11295_v8 = vmul.f32 %v11209_v60, %v2327_v56  ;;  %v11298_v42 = vmul.f32 %v11209_v60, %v2326_v17  ;;  %v2318_v61 = vsel %vm291_vm1, %v8857_v11, %v8862_v28  ;;  %v2319_v62 = vsel %vm291_vm1, %v8858_v12, %v8863_v0  ;;  %v9792_v17 = vld [vmem:[#allocation3 + $0x150] sm:$0xff]  }
 0x2a4   : > { %v8873_v31 = vunpack.i.h.bf16 %v8871_v38  ;;  %v8872_v10 = vunpack.i.l.bf16 %v8871_v38  ;;  %v2349_v32 = vmul.f32 %v11221_v49, %v2318_v61  ;;  %v2351_v55 = vmul.f32 %v11221_v49, %v2319_v62 }
 0x2a5   : > { %v8876_v19 = vpop.permute.xlu1 %8875  ;;  %v2761_v62 = vpack.c.bf16 %v11292_v59, %v11289_v47 }
 0x2a6   : > { %v2331_v29 = vsel %vm291_vm1, %v8873_v31, %v8868_v15  ;;  %v2330_v26 = vsel %vm291_vm1, %v8872_v10, %v8867_v24  ;;  %v2322_v3 = vsel %vm291_vm1, %v8867_v24, %v8872_v10  ;;  %v2323_v35 = vsel %vm291_vm1, %v8868_v15, %v8873_v31 }
 0x2a7   : > { %v2358_v37 = vmul.f32 %v11209_v60, %v2331_v29  ;;  %v2356_v54 = vmul.f32 %v11209_v60, %v2330_v26  ;;  %v8886_v40 = vpop.permute.xlu0 %8885  ;;  %8126 = vmatmul.mubr.msk.bf16.gmra.mxu1 %vm467_vm3, %v9791_v18  ;;  %v2357_v21 = vmul.f32 %v11221_v49, %v2322_v3  ;;  %v2359_v20 = vmul.f32 %v11221_v49, %v2323_v35 }
 0x2a8   : > { %v8888_v52 = vunpack.i.h.bf16 %v8886_v40  ;;  %v8887_v22 = vunpack.i.l.bf16 %v8886_v40  ;;  %v8878_v34 = vunpack.i.h.bf16 %v8876_v19  ;;  %v8877_v7 = vunpack.i.l.bf16 %v8876_v19  ;;  %2554 = vmatprep.mubr.bf16.mxu1 %v13923_v23 }
 0x2a9   : > { %v2367_v58 = vpack.c.bf16 %v2359_v20, %v2357_v21  ;;  %v2366_v6 = vpack.c.bf16 %v2358_v37, %v2356_v54  ;;  %v8881_v56 = vpop.permute.xlu1 %8880  ;;  %v2760_v29 = vpack.c.bf16 %v11283_v51, %v11286_v27  ;;  %v2363_v47 = vpack.c.bf16 %v2351_v55, %v2349_v32  ;;  %v9793_v32 = vld [vmem:[#allocation3 + $0x158] sm:$0xff]  }
 0x2aa   : > { %v2727_v4 = vsel %vm690_vm2, %v8888_v52, %v8878_v34  ;;  %v2726_v36 = vsel %vm690_vm2, %v8887_v22, %v8877_v7  ;;  %v2718_v46 = vsel %vm690_vm2, %v8877_v7, %v8887_v22  ;;  %v2719_v0 = vsel %vm690_vm2, %v8878_v34, %v8888_v52 }
 0x2ab   : > { %v2754_v28 = vmul.f32 %v11232_v48, %v2727_v4  ;;  %v2752_v12 = vmul.f32 %v11232_v48, %v2726_v36  ;;  %v8891_v11 = vpop.permute.xlu0 %8890  ;;  %2615 = vmatprep.subr.bf16.mxu0 %v2367_v58  ;;  %v2753_v38 = vmul.f32 %v11235_v14, %v2718_v46  ;;  %v2755_v44 = vmul.f32 %v11235_v14, %v2719_v0 }
 0x2ac   : > { %v8893_v18 = vunpack.i.h.bf16 %v8891_v11  ;;  %v8892_v31 = vunpack.i.l.bf16 %v8891_v11  ;;  %v8883_v10 = vunpack.i.h.bf16 %v8881_v56  ;;  %v8882_v15 = vunpack.i.l.bf16 %v8881_v56  ;;  %2616 = vmatpush1.bf16.msra.mxu0 %v2366_v6 }
 0x2ad   : > { %2617 = vmatprep.subr.bf16.mxu0 %v2365_v41  ;;  %v2763_v24 = vpack.c.bf16 %v2755_v44, %v2753_v38  ;;  %v2762_v61 = vpack.c.bf16 %v2754_v28, %v2752_v12  ;;  %v8896_v54 = vpop.permute.xlu1 %8895  ;;  %v2362_v51 = vpack.c.bf16 %v11295_v8, %v11298_v42 }
 0x2ae   : > { %v2723_v26 = vsel %vm690_vm2, %v8893_v18, %v8883_v10  ;;  %v2722_v3 = vsel %vm690_vm2, %v8892_v31, %v8882_v15  ;;  %v2714_v35 = vsel %vm690_vm2, %v8882_v15, %v8892_v31  ;;  %v2715_v41 = vsel %vm690_vm2, %v8883_v10, %v8893_v18 }
 0x2af   : > { %v8901_v37 = vpop.permute.xlu0 %8900  ;;  %8127 = vmatmul.mubr.msk.bf16.gmra.mxu1 %vm467_vm3, %v9792_v17  ;;  %2813 = vmatprep.subr.bf16.mxu1 %v2763_v24  ;;  %v2745_v27 = vmul.f32 %v11235_v14, %v2714_v35  ;;  %v8898_v19 = vunpack.i.h.bf16 %v8896_v54  ;;  %v8897_v21 = vunpack.i.l.bf16 %v8896_v54  ;;  %v2746_v20 = vmul.f32 %v11232_v48, %v2723_v26  ;;  %v9794_v26 = vld [vmem:[#allocation3 + $0x120] sm:$0xff]  }
 0x2b0   : > { %v8903_v59 = vunpack.i.h.bf16 %v8901_v37  ;;  %v8902_v40 = vunpack.i.l.bf16 %v8901_v37  ;;  %2618 = vmatpush1.bf16.msra.mxu0 %v2364_v45  ;;  %2814 = vmatpush1.bf16.msra.mxu1 %v2762_v61  ;;  %v2744_v52 = vmul.f32 %v11232_v48, %v2722_v3  ;;  %v2747_v22 = vmul.f32 %v11235_v14, %v2715_v41 }
 0x2b1   : > { %2619 = vmatprep.subr.bf16.mxu0 %v2363_v47  ;;  %2815 = vmatprep.subr.bf16.mxu1 %v2761_v62  ;;  %v8906_v58 = vpop.permute.xlu1 %8905  ;;  %v11396_v47 = vld [vmem:[%s13863_s3 + $0x5] ss:$8 sm:$0x3] }
 0x2b2   : > { %v2325_v8 = vsel %vm291_vm1, %v8903_v59, %v8898_v19  ;;  %v2324_v42 = vsel %vm291_vm1, %v8902_v40, %v8897_v21  ;;  %2564 = vmatprep.mubr.bf16.mxu1 %v13923_v23  ;;  %v2316_v33 = vsel %vm291_vm1, %v8897_v21, %v8902_v40  ;;  %v2317_v1 = vsel %vm291_vm1, %v8898_v19, %v8903_v59 }
 0x2b3   : > { %v2346_v45 = vmul.f32 %v11209_v60, %v2325_v8  ;;  %v2344_v34 = vmul.f32 %v11209_v60, %v2324_v42  ;;  %v8911_v7 = vpop.permute.xlu0 %8910  ;;  %v2759_v6 = vpack.c.bf16 %v2747_v22, %v2745_v27  ;;  %v2345_v55 = vmul.f32 %v11221_v49, %v2316_v33  ;;  %v9795_v8 = vld [vmem:[#allocation3 + $0x160] sm:$0xff]  }
 0x2b4   : > { %v8913_v4 = vunpack.i.h.bf16 %v8911_v7  ;;  %v8912_v36 = vunpack.i.l.bf16 %v8911_v7  ;;  %v8908_v46 = vunpack.i.h.bf16 %v8906_v58  ;;  %v8907_v0 = vunpack.i.l.bf16 %v8906_v58  ;;  %2620 = vmatpush1.bf16.msra.mxu0 %v2362_v51  ;;  %2816 = vmatpush1.bf16.msra.mxu1 %v2760_v29 }
 0x2b5   : > { %2817 = vmatprep.subr.bf16.mxu1 %v2759_v6  ;;  %v2347_v28 = vmul.f32 %v11221_v49, %v2317_v1  ;;  %v2360_v12 = vpack.c.bf16 %v2346_v45, %v2344_v34  ;;  %v2758_v11 = vpack.c.bf16 %v2746_v20, %v2744_v52  ;;  %v11369_v60 = vrot.slane %v11258_v5, %v13921_v13  ;;  %v8916_v10 = vpop.permute.xlu1 %8915 }
 0x2b6   : > { %v2721_v56 = vsel %vm690_vm2, %v8913_v4, %v8908_v46  ;;  %v2720_v17 = vsel %vm690_vm2, %v8912_v36, %v8907_v0  ;;  %v2712_v38 = vsel %vm690_vm2, %v8907_v0, %v8912_v36  ;;  %v2713_v44 = vsel %vm690_vm2, %v8908_v46, %v8913_v4 }
 0x2b7   : > { %v2742_v49 = vmul.f32 %v11232_v48, %v2721_v56  ;;  %v2740_v18 = vmul.f32 %v11232_v48, %v2720_v17  ;;  %v8926_v31 = vpop.permute.xlu0 %8925  ;;  %8128 = vmatmul.mubr.msk.bf16.gmra.mxu1 %vm467_vm3, %v9793_v32  ;;  %v2361_v5 = vpack.c.bf16 %v2347_v28, %v2345_v55  ;;  %v2741_v15 = vmul.f32 %v11235_v14, %v2712_v38 }
 0x2b8   : > { %v8928_v24 = vunpack.i.h.bf16 %v8926_v31  ;;  %v8927_v61 = vunpack.i.l.bf16 %v8926_v31  ;;  %v8918_v62 = vunpack.i.h.bf16 %v8916_v10  ;;  %v8917_v29 = vunpack.i.l.bf16 %v8916_v10  ;;  %2818 = vmatpush1.bf16.msra.mxu1 %v2758_v11  ;;  %2837 = vmatprep.mubr.bf16.mxu1 %v13923_v23  ;;  %v9796_v11 = vld [vmem:[#allocation3 + $0x128] sm:$0xff]  }
 0x2b9   : > { %2621 = vmatprep.subr.bf16.mxu0 %v2361_v5  ;;  %v2743_v3 = vmul.f32 %v11235_v14, %v2713_v44  ;;  %v2756_v35 = vpack.c.bf16 %v2742_v49, %v2740_v18  ;;  %v8921_v59 = vpop.permute.xlu1 %8920  ;;  %v11405_v1 = vrot.slane %v11396_v47, %v13920_v53 }
 0x2ba   : > { %v2941_v48 = vsel %vm906_vm4, %v8928_v24, %v8918_v62  ;;  %v2940_v41 = vsel %vm906_vm4, %v8927_v61, %v8917_v29  ;;  %2622 = vmatpush1.bf16.msra.mxu0 %v2360_v12  ;;  %v2932_v37 = vsel %vm906_vm4, %v8917_v29, %v8927_v61  ;;  %v2933_v54 = vsel %vm906_vm4, %v8918_v62, %v8928_v24 }
 0x2bb   : > { %v2968_v14 = vmul.f32 %v11272_v50, %v2941_v48  ;;  %v2966_v51 = vmul.f32 %v11272_v50, %v2940_v41  ;;  %v8931_v27 = vpop.permute.xlu0 %8930  ;;  %v2757_v40 = vpack.c.bf16 %v2743_v3, %v2741_v15  ;;  %v2967_v19 = vmul.f32 %v11369_v60, %v2932_v37  ;;  %v8180_v37 = vld [vmem:[%s13863_s3 + $0x6] ss:$8 sm:$0x3] }
 0x2bc   : > { %v8933_v21 = vunpack.i.h.bf16 %v8931_v27  ;;  %v8932_v20 = vunpack.i.l.bf16 %v8931_v27  ;;  %v8923_v52 = vunpack.i.h.bf16 %v8921_v59  ;;  %v8922_v22 = vunpack.i.l.bf16 %v8921_v59 }
 0x2bd   : > { %8133 = vmatmul.mubr.msk.bf16.vlgmr.msra.gmra.mxu0 %vm467_vm3, %v9794_v26  ;;  %2819 = vmatprep.subr.bf16.mxu1 %v2757_v40  ;;  %v2969_v42 = vmul.f32 %v11369_v60, %v2933_v54  ;;  %v2976_v33 = vpack.c.bf16 %v2968_v14, %v2966_v51  ;;  %v8936_v55 = vpop.permute.xlu1 %8935 }
 0x2be   : > { %v2939_v45 = vsel %vm906_vm4, %v8933_v21, %v8923_v52  ;;  %v2938_v34 = vsel %vm906_vm4, %v8932_v20, %v8922_v22  ;;  %2820 = vmatpush1.bf16.msra.mxu1 %v2756_v35  ;;  %2649 = vmatprep.mubr.bf16.mxu0 %v13923_v23  ;;  %v2930_v7 = vsel %vm906_vm4, %v8922_v22, %v8932_v20  ;;  %v8938_v28 = vunpack.i.h.bf16 %v8936_v55 }
 0x2bf   : > { %v2964_v58 = vmul.f32 %v11272_v50, %v2939_v45  ;;  %v2962_v6 = vmul.f32 %v11272_v50, %v2938_v34  ;;  %3197 = vmatprep.subr.bf16.mxu1 %v11036_v57  ;;  %v8941_v32 = vpop.permute.xlu0 %8940  ;;  %v2977_v4 = vpack.c.bf16 %v2969_v42, %v2967_v19  ;;  %v2931_v36 = vsel %vm906_vm4, %v8923_v52, %v8933_v21 }
 0x2c0   : > { %v8943_v46 = vunpack.i.h.bf16 %v8941_v32  ;;  %v8942_v0 = vunpack.i.l.bf16 %v8941_v32  ;;  %v8937_v12 = vunpack.i.l.bf16 %v8936_v55  ;;  %v2963_v56 = vmul.f32 %v11369_v60, %v2930_v7 }
 0x2c1   : > { %8142 = vmatmul.mubr.msk.bf16.vlgmr.msra.gmra.mxu1 %vm467_vm3, %v9795_v8  ;;  %3027 = vmatprep.subr.bf16.mxu0 %v2977_v4  ;;  %v2965_v17 = vmul.f32 %v11369_v60, %v2931_v36  ;;  %v2974_v38 = vpack.c.bf16 %v2964_v58, %v2962_v6  ;;  %v8946_v5 = vpop.permute.xlu1 %8945  ;;  %v11454_v52 = vrot.slane %v8180_v37, %v13920_v53  ;;  %v9799_v36 = vld [vmem:[#allocation3 + $0x170] sm:$0xff]  }
 0x2c2   : > { %v2937_v57 = vsel %vm906_vm4, %v8943_v46, %v8938_v28  ;;  %v2936_v44 = vsel %vm906_vm4, %v8942_v0, %v8937_v12  ;;  %3028 = vmatpush1.bf16.msra.mxu0 %v2976_v33  ;;  %3198 = vmatpush1.bf16.msra.mxu1 %v11038_v43  ;;  %v2928_v49 = vsel %vm906_vm4, %v8937_v12, %v8942_v0  ;;  %v8948_v62 = vunpack.i.h.bf16 %v8946_v5  ;;  %v9797_v43 = vld [vmem:[#allocation3 + $0x168] sm:$0xff]  }
 0x2c3   : > { %v2960_v18 = vmul.f32 %v11272_v50, %v2937_v57  ;;  %v2958_v31 = vmul.f32 %v11272_v50, %v2936_v44  ;;  %3199 = vmatprep.subr.bf16.mxu1 %v11031_v30  ;;  %v8951_v10 = vpop.permute.xlu0 %8950  ;;  %v2975_v15 = vpack.c.bf16 %v2965_v17, %v2963_v56  ;;  %2847 = vmatprep.mubr.bf16.mxu1 %v13923_v23  ;;  %v8947_v29 = vunpack.i.l.bf16 %v8946_v5 }
 0x2c4   : > { %v8953_v24 = vunpack.i.h.bf16 %v8951_v10  ;;  %v8952_v61 = vunpack.i.l.bf16 %v8951_v10  ;;  %v2929_v26 = vsel %vm906_vm4, %v8938_v28, %v8943_v46  ;;  %v2959_v3 = vmul.f32 %v11369_v60, %v2928_v49 }
 0x2c5   : > { %8134 = vmatmul.mubr.msk.bf16.gmra.mxu0 %vm467_vm3, %v9796_v11  ;;  %3029 = vmatprep.subr.bf16.mxu0 %v2975_v15  ;;  %v2972_v35 = vpack.c.bf16 %v2960_v18, %v2958_v31  ;;  %v2961_v41 = vmul.f32 %v11369_v60, %v2929_v26  ;;  %v8956_v27 = vpop.permute.xlu1 %8955  ;;  %v11466_v33 = vrot.slane %v11396_v47, %v13921_v13 }
 0x2c6   : > { %v2935_v30 = vsel %vm906_vm4, %v8953_v24, %v8948_v62  ;;  %v2934_v48 = vsel %vm906_vm4, %v8952_v61, %v8947_v29  ;;  %3030 = vmatpush1.bf16.msra.mxu0 %v2974_v38  ;;  %3200 = vmatpush1.bf16.msra.mxu1 %v11033_v25  ;;  %v2926_v59 = vsel %vm906_vm4, %v8947_v29, %v8952_v61  ;;  %v8958_v19 = vunpack.i.h.bf16 %v8956_v27 }
 0x2c7   : > { %v2956_v54 = vmul.f32 %v11272_v50, %v2935_v30  ;;  %v2954_v14 = vmul.f32 %v11272_v50, %v2934_v48  ;;  %3201 = vmatprep.subr.bf16.mxu1 %v11018_v2  ;;  %v8961_v51 = vpop.permute.xlu0 %8960  ;;  %2659 = vmatprep.mubr.bf16.mxu0 %v13923_v23  ;;  %v8957_v21 = vunpack.i.l.bf16 %v8956_v27  ;;  %v2973_v20 = vpack.c.bf16 %v2961_v41, %v2959_v3  ;;  %v9798_v50 = vld [vmem:[#allocation3 + $0x130] sm:$0xff]  }
 0x2c8   : > { %v8963_v25 = vunpack.i.h.bf16 %v8961_v51  ;;  %v8962_v40 = vunpack.i.l.bf16 %v8961_v51  ;;  %v2927_v2 = vsel %vm906_vm4, %v8948_v62, %v8953_v24  ;;  %v2955_v22 = vmul.f32 %v11369_v60, %v2926_v59  ;;  %v9800_v24 = vld [vmem:[#allocation3 + $0x138] sm:$0xff]  }
 0x2c9   : > { %8143 = vmatmul.mubr.msk.bf16.gmra.mxu1 %vm467_vm3, %v9797_v43  ;;  %v2957_v42 = vmul.f32 %v11369_v60, %v2927_v2  ;;  %3031 = vmatprep.subr.bf16.mxu0 %v2973_v20  ;;  %v8966_v7 = vpop.permute.xlu1 %8965  ;;  %v2970_v58 = vpack.c.bf16 %v2956_v54, %v2954_v14  ;;  %v11480_v46 = vrot.slane %v8180_v37, %v13921_v13  ;;  %v9801_v59 = vld [vmem:[#allocation3 + $0x178] sm:$0xff]  }
 0x2ca   : > { %v3315_v8 = vsel %vm1292_vm5, %v8958_v19, %v8963_v25  ;;  %3202 = vmatpush1.bf16.msra.mxu1 %v11020_v63  ;;  %2857 = vmatprep.mubr.bf16.mxu1 %v13923_v23  ;;  %v3314_v45 = vsel %vm1292_vm5, %v8957_v21, %v8962_v40  ;;  %v3322_v63 = vsel %vm1292_vm5, %v8962_v40, %v8957_v21  ;;  %v8968_v32 = vunpack.i.h.bf16 %v8966_v7 }
 0x2cb   : > { %3203 = vmatprep.subr.bf16.mxu1 %v10998_v39  ;;  %v8971_v34 = vpop.permute.xlu0 %8970  ;;  %3032 = vmatpush1.bf16.msra.mxu0 %v2972_v35  ;;  %v8967_v55 = vunpack.i.l.bf16 %v8966_v7  ;;  %v11474_v47 = vmul.f32 %v11405_v1, %v3315_v8  ;;  %v2971_v4 = vpack.c.bf16 %v2957_v42, %v2955_v22  ;;  %v3323_v39 = vsel %vm1292_vm5, %v8963_v25, %v8958_v19 }
 0x2cc   : > { %v8973_v60 = vunpack.i.h.bf16 %v8971_v34  ;;  %v8972_v6 = vunpack.i.l.bf16 %v8971_v34  ;;  %v11483_v0 = vmul.f32 %v11405_v1, %v3314_v45  ;;  %v11498_v57 = vmul.f32 %v11466_v33, %v3322_v63 }
 0x2cd   : > { %8135 = vmatmul.mubr.msk.bf16.gmra.mxu0 %vm467_vm3, %v9798_v50  ;;  %3033 = vmatprep.subr.bf16.mxu0 %v2971_v4  ;;  %v8976_v38 = vpop.permute.xlu1 %8975  ;;  %v11501_v44 = vmul.f32 %v11466_v33, %v3323_v39 }
 0x2ce   : > { %v3529_v28 = vsel %vm1508_vm6, %v8968_v32, %v8973_v60  ;;  %v3528_v12 = vsel %vm1508_vm6, %v8967_v55, %v8972_v6  ;;  %3204 = vmatpush1.bf16.msra.mxu1 %v11000_v9  ;;  %2669 = vmatprep.mubr.bf16.mxu0 %v13923_v23  ;;  %v11506_v9 = vld [vmem:[%s13863_s3 + $0x7] ss:$8 sm:$0x3]  ;;  %v8978_v18 = vunpack.i.h.bf16 %v8976_v38  ;;  %v3536_v31 = vsel %vm1508_vm6, %v8972_v6, %v8967_v55 }
 0x2cf   : > { %v11492_v11 = vmul.f32 %v11454_v52, %v3529_v28  ;;  %v11495_v56 = vmul.f32 %v11454_v52, %v3528_v12  ;;  %v8981_v17 = vpop.permute.xlu0 %8980  ;;  %3034 = vmatpush1.bf16.msra.mxu0 %v2970_v58  ;;  %v3537_v10 = vsel %vm1508_vm6, %v8973_v60, %v8968_v32  ;;  %v8977_v15 = vunpack.i.l.bf16 %v8976_v38  ;;  %v9802_v6 = vld [vmem:[#allocation3 + $0x180] sm:$0xff]  }
 0x2d0   : > { %v8983_v49 = vunpack.i.h.bf16 %v8981_v17  ;;  %v8982_v5 = vunpack.i.l.bf16 %v8981_v17  ;;  %v3358_v62 = vpack.c.bf16 %v11474_v47, %v11483_v0  ;;  %v11520_v29 = vrot.slane %v11506_v9, %v13920_v53  ;;  %v9805_v0 = vld [vmem:[#allocation3 + $0x1a8] sm:$0xff]  }
 0x2d1   : > { %8144 = vmatmul.mubr.msk.bf16.gmra.mxu1 %vm467_vm3, %v9799_v36  ;;  %v8986_v26 = vpop.permute.xlu1 %8985  ;;  %v3359_v3 = vpack.c.bf16 %v11501_v44, %v11498_v57  ;;  %v11525_v35 = vmul.f32 %v11480_v46, %v3536_v31  ;;  %v11528_v30 = vmul.f32 %v11480_v46, %v3537_v10  ;;  %v3572_v48 = vpack.c.bf16 %v11492_v11, %v11495_v56 }
 0x2d2   : > { %v3313_v61 = vsel %vm1292_vm5, %v8978_v18, %v8983_v49  ;;  %2867 = vmatprep.mubr.bf16.mxu1 %v13923_v23  ;;  %v8988_v54 = vunpack.i.h.bf16 %v8986_v26  ;;  %v8987_v14 = vunpack.i.l.bf16 %v8986_v26  ;;  %v3312_v27 = vsel %vm1292_vm5, %v8977_v15, %v8982_v5 }
 0x2d3   : > { %v8991_v43 = vpop.permute.xlu0 %8990  ;;  %v11533_v51 = vmul.f32 %v11405_v1, %v3313_v61  ;;  %v3320_v25 = vsel %vm1292_vm5, %v8982_v5, %v8977_v15  ;;  %v3321_v40 = vsel %vm1292_vm5, %v8983_v49, %v8978_v18  ;;  %v3342_v26 = vmul.f32 %v11405_v1, %v3312_v27 }
 0x2d4   : > { %v8993_v41 = vunpack.i.h.bf16 %v8991_v43  ;;  %v8992_v37 = vunpack.i.l.bf16 %v8991_v43  ;;  %v3343_v4 = vmul.f32 %v11466_v33, %v3320_v25  ;;  %v3345_v36 = vmul.f32 %v11466_v33, %v3321_v40 }
 0x2d5   : > { %8136 = vmatmul.mubr.msk.bf16.gmra.mxu0 %vm467_vm3, %v9800_v24  ;;  %v8996_v42 = vpop.permute.xlu1 %8995 }
 0x2d6   : > { %v3317_v19 = vsel %vm1292_vm5, %v8988_v54, %v8993_v41  ;;  %v3316_v21 = vsel %vm1292_vm5, %v8987_v14, %v8992_v37  ;;  %3051 = vmatprep.mubr.bf16.mxu0 %v13923_v23  ;;  %v3324_v20 = vsel %vm1292_vm5, %v8992_v37, %v8987_v14  ;;  %v3325_v50 = vsel %vm1292_vm5, %v8993_v41, %v8988_v54  ;;  %v9803_v41 = vld [vmem:[#allocation3 + $0x1a0] sm:$0xff]  }
 0x2d7   : > { %v3352_v2 = vmul.f32 %v11405_v1, %v3317_v19  ;;  %v3350_v22 = vmul.f32 %v11405_v1, %v3316_v21  ;;  %v9006_v8 = vpop.permute.xlu0 %9005  ;;  %v3351_v45 = vmul.f32 %v11466_v33, %v3324_v20  ;;  %v3353_v34 = vmul.f32 %v11466_v33, %v3325_v50 }
 0x2d8   : > { %v9008_v7 = vunpack.i.h.bf16 %v9006_v8  ;;  %v9007_v58 = vunpack.i.l.bf16 %v9006_v8  ;;  %v8998_v63 = vunpack.i.h.bf16 %v8996_v42  ;;  %v8997_v60 = vunpack.i.l.bf16 %v8996_v42 }
 0x2d9   : > { %8145 = vmatmul.mubr.msk.bf16.gmra.mxu1 %vm467_vm3, %v9801_v59  ;;  %v3361_v32 = vpack.c.bf16 %v3353_v34, %v3351_v45  ;;  %v3360_v55 = vpack.c.bf16 %v3352_v2, %v3350_v22  ;;  %v9001_v31 = vpop.permute.xlu1 %9000  ;;  %v3357_v14 = vpack.c.bf16 %v3345_v36, %v3343_v4  ;;  %v3573_v45 = vpack.c.bf16 %v11528_v30, %v11525_v35  ;;  %v9804_v34 = vld [vmem:[#allocation3 + $0x188] sm:$0xff]  }
 0x2da   : > { %v3531_v39 = vsel %vm1508_vm6, %v8998_v63, %v9008_v7  ;;  %v3530_v28 = vsel %vm1508_vm6, %v8997_v60, %v9007_v58  ;;  %3221 = vmatprep.mubr.bf16.mxu1 %v13923_v23  ;;  %v3538_v12 = vsel %vm1508_vm6, %v9007_v58, %v8997_v60  ;;  %v3539_v17 = vsel %vm1508_vm6, %v9008_v7, %v8998_v63 }
 0x2db   : > { %v3566_v38 = vmul.f32 %v11454_v52, %v3531_v39  ;;  %v3564_v49 = vmul.f32 %v11454_v52, %v3530_v28  ;;  %v9011_v18 = vpop.permute.xlu0 %9010  ;;  %3411 = vmatprep.subr.bf16.mxu0 %v3361_v32  ;;  %v3565_v10 = vmul.f32 %v11480_v46, %v3538_v12  ;;  %v3567_v5 = vmul.f32 %v11480_v46, %v3539_v17 }
 0x2dc   : > { %v9013_v15 = vunpack.i.h.bf16 %v9011_v18  ;;  %v9012_v24 = vunpack.i.l.bf16 %v9011_v18  ;;  %v9003_v61 = vunpack.i.h.bf16 %v9001_v31  ;;  %v9002_v43 = vunpack.i.l.bf16 %v9001_v31 }
 0x2dd   : > { %8151 = vmatmul.mubr.msk.bf16.vlgmr.msra.gmra.mxu0 %vm467_vm3, %v9802_v6  ;;  %v3575_v37 = vpack.c.bf16 %v3567_v5, %v3565_v10  ;;  %v3574_v54 = vpack.c.bf16 %v3566_v38, %v3564_v49  ;;  %v9016_v20 = vpop.permute.xlu1 %9015  ;;  %v3356_v7 = vpack.c.bf16 %v11533_v51, %v3342_v26  ;;  %v8198_v38 = vld [vmem:[%s13863_s3 + $0x10] ss:$8 sm:$0x3] }
 0x2de   : > { %v3527_v59 = vsel %vm1508_vm6, %v9003_v61, %v9013_v15  ;;  %v3526_v25 = vsel %vm1508_vm6, %v9002_v43, %v9012_v24  ;;  %3412 = vmatpush1.bf16.msra.mxu0 %v3360_v55  ;;  %3061 = vmatprep.mubr.bf16.mxu0 %v13923_v23  ;;  %v3534_v40 = vsel %vm1508_vm6, %v9012_v24, %v9002_v43  ;;  %v9018_v8 = vunpack.i.h.bf16 %v9016_v20 }
 0x2df   : > { %v11581_v27 = vmul.f32 %v11454_v52, %v3527_v59  ;;  %v3556_v19 = vmul.f32 %v11454_v52, %v3526_v25  ;;  %3413 = vmatprep.subr.bf16.mxu0 %v3359_v3  ;;  %v9021_v21 = vpop.permute.xlu0 %9020  ;;  %3625 = vmatprep.subr.bf16.mxu1 %v3575_v37  ;;  %v3535_v50 = vsel %vm1508_vm6, %v9013_v15, %v9003_v61  ;;  %v9017_v42 = vunpack.i.l.bf16 %v9016_v20  ;;  %v9806_v61 = vld [vmem:[#allocation3 + $0x190] sm:$0xff]  }
 0x2e0   : > { %v9023_v2 = vunpack.i.h.bf16 %v9021_v21  ;;  %v9022_v22 = vunpack.i.l.bf16 %v9021_v21  ;;  %v3557_v57 = vmul.f32 %v11480_v46, %v3534_v40  ;;  %v3559_v44 = vmul.f32 %v11480_v46, %v3535_v50  ;;  %v9807_v50 = vld [vmem:[#allocation3 + $0x1b0] sm:$0xff]  }
 0x2e1   : > { %8167 = vmatmul.mubr.msk.bf16.vlgmr.msra.gmra.mxu1 %vm467_vm3, %v9803_v41  ;;  %v9026_v60 = vpop.permute.xlu1 %9025  ;;  %v3570_v6 = vpack.c.bf16 %v11581_v27, %v3556_v19  ;;  %v11630_v24 = vrot.slane %v8198_v38, %v13920_v53  ;;  %v11639_v37 = vrot.slane %v11506_v9, %v13921_v13 }
 0x2e2   : > { %v3311_v3 = vsel %vm1292_vm5, %v9018_v8, %v9023_v2  ;;  %v3310_v58 = vsel %vm1292_vm5, %v9017_v42, %v9022_v22  ;;  %3414 = vmatpush1.bf16.msra.mxu0 %v3358_v62  ;;  %3626 = vmatpush1.bf16.msra.mxu1 %v3574_v54  ;;  %v3318_v35 = vsel %vm1292_vm5, %v9022_v22, %v9017_v42  ;;  %v9028_v4 = vunpack.i.h.bf16 %v9026_v60 }
 0x2e3   : > { %v3340_v30 = vmul.f32 %v11405_v1, %v3311_v3  ;;  %v3338_v51 = vmul.f32 %v11405_v1, %v3310_v58  ;;  %3415 = vmatprep.subr.bf16.mxu0 %v3357_v14  ;;  %3627 = vmatprep.subr.bf16.mxu1 %v3573_v45  ;;  %v9031_v63 = vpop.permute.xlu0 %9030  ;;  %v9027_v36 = vunpack.i.l.bf16 %v9026_v60  ;;  %v3571_v47 = vpack.c.bf16 %v3559_v44, %v3557_v57 }
 0x2e4   : > { %v9033_v32 = vunpack.i.h.bf16 %v9031_v63  ;;  %v9032_v55 = vunpack.i.l.bf16 %v9031_v63  ;;  %3231 = vmatprep.mubr.bf16.mxu1 %v13923_v23  ;;  %v3319_v62 = vsel %vm1292_vm5, %v9023_v2, %v9018_v8  ;;  %v3339_v1 = vmul.f32 %v11466_v33, %v3318_v35 }
 0x2e5   : > { %8152 = vmatmul.mubr.msk.bf16.gmra.mxu0 %vm467_vm3, %v9804_v34  ;;  %v3354_v39 = vpack.c.bf16 %v3340_v30, %v3338_v51  ;;  %v3341_v17 = vmul.f32 %v11466_v33, %v3319_v62  ;;  %v9036_v10 = vpop.permute.xlu1 %9035  ;;  %v11651_v2 = vrot.slane %v8198_v38, %v13921_v13 }
 0x2e6   : > { %v3525_v28 = vsel %vm1508_vm6, %v9028_v4, %v9033_v32  ;;  %v3524_v12 = vsel %vm1508_vm6, %v9027_v36, %v9032_v55  ;;  %3416 = vmatpush1.bf16.msra.mxu0 %v3356_v7  ;;  %3628 = vmatpush1.bf16.msra.mxu1 %v3572_v48  ;;  %v3532_v5 = vsel %vm1508_vm6, %v9032_v55, %v9027_v36  ;;  %v9038_v48 = vunpack.i.h.bf16 %v9036_v10 }
 0x2e7   : > { %v3554_v49 = vmul.f32 %v11454_v52, %v3525_v28  ;;  %v3552_v18 = vmul.f32 %v11454_v52, %v3524_v12  ;;  %3629 = vmatprep.subr.bf16.mxu1 %v3571_v47  ;;  %v9041_v31 = vpop.permute.xlu0 %9040  ;;  %3071 = vmatprep.mubr.bf16.mxu0 %v13923_v23  ;;  %v9037_v33 = vunpack.i.l.bf16 %v9036_v10  ;;  %v3355_v15 = vpack.c.bf16 %v3341_v17, %v3339_v1 }
 0x2e8   : > { %v9043_v11 = vunpack.i.h.bf16 %v9041_v31  ;;  %v9042_v56 = vunpack.i.l.bf16 %v9041_v31  ;;  %v3533_v52 = vsel %vm1508_vm6, %v9033_v32, %v9028_v4  ;;  %v3553_v43 = vmul.f32 %v11480_v46, %v3532_v5  ;;  %v9808_v32 = vld [vmem:[#allocation3 + $0x198] sm:$0xff]  }
 0x2e9   : > { %8168 = vmatmul.mubr.msk.bf16.gmra.mxu1 %vm467_vm3, %v9805_v0  ;;  %v3555_v26 = vmul.f32 %v11480_v46, %v3533_v52  ;;  %v3568_v41 = vpack.c.bf16 %v3554_v49, %v3552_v18  ;;  %3417 = vmatprep.subr.bf16.mxu0 %v3355_v15  ;;  %v9046_v25 = vpop.permute.xlu1 %9045  ;;  %v9809_v18 = vld [vmem:[#allocation3 + $0x1b8] sm:$0xff]  }
 0x2ea   : > { %3630 = vmatpush1.bf16.msra.mxu1 %v3570_v6  ;;  %3241 = vmatprep.mubr.bf16.mxu1 %v13923_v23  ;;  %v3743_v54 = vsel %vm1724_vm7, %v9038_v48, %v9043_v11  ;;  %v3742_v14 = vsel %vm1724_vm7, %v9037_v33, %v9042_v56  ;;  %v3750_v40 = vsel %vm1724_vm7, %v9042_v56, %v9037_v33  ;;  %v9048_v9 = vunpack.i.h.bf16 %v9046_v25 }
 0x2eb   : > { %v9051_v59 = vpop.permute.xlu0 %9050  ;;  %v3751_v46 = vsel %vm1724_vm7, %v9043_v11, %v9038_v48  ;;  %3418 = vmatpush1.bf16.msra.mxu0 %v3354_v39  ;;  %v9047_v21 = vunpack.i.l.bf16 %v9046_v25  ;;  %v3569_v20 = vpack.c.bf16 %v3555_v26, %v3553_v43  ;;  %v11654_v22 = vmul.f32 %v11520_v29, %v3743_v54  ;;  %v9810_v25 = vld [vmem:[#allocation3 + $0x1c0] sm:$0xff]  }
 0x2ec   : > { %v9053_v27 = vunpack.i.h.bf16 %v9051_v59  ;;  %v9052_v19 = vunpack.i.l.bf16 %v9051_v59  ;;  %v11657_v8 = vmul.f32 %v11520_v29, %v3742_v14  ;;  %v11671_v3 = vmul.f32 %v11639_v37, %v3750_v40 }
 0x2ed   : > { %8153 = vmatmul.mubr.msk.bf16.gmra.mxu0 %vm467_vm3, %v9806_v61  ;;  %3631 = vmatprep.subr.bf16.mxu1 %v3569_v20  ;;  %v9056_v44 = vpop.permute.xlu1 %9055  ;;  %v11674_v58 = vmul.f32 %v11639_v37, %v3751_v46 }
 0x2ee   : > { %v3957_v42 = vsel %vm1940_vm8, %v9048_v9, %v9053_v27  ;;  %v3956_v45 = vsel %vm1940_vm8, %v9047_v21, %v9052_v19  ;;  %3081 = vmatprep.mubr.bf16.mxu0 %v13923_v23  ;;  %3632 = vmatpush1.bf16.msra.mxu1 %v3568_v41  ;;  %v3964_v35 = vsel %vm1940_vm8, %v9052_v19, %v9047_v21  ;;  %v9058_v60 = vunpack.i.h.bf16 %v9056_v44 }
 0x2ef   : > { %v11665_v34 = vmul.f32 %v11630_v24, %v3957_v42  ;;  %v11668_v7 = vmul.f32 %v11630_v24, %v3956_v45  ;;  %v9061_v57 = vpop.permute.xlu0 %9060  ;;  %v3965_v30 = vsel %vm1940_vm8, %v9053_v27, %v9048_v9  ;;  %v9057_v6 = vunpack.i.l.bf16 %v9056_v44 }
 0x2f0   : > { %v9063_v51 = vunpack.i.h.bf16 %v9061_v57  ;;  %v9062_v63 = vunpack.i.l.bf16 %v9061_v57  ;;  %v3786_v55 = vpack.c.bf16 %v11654_v22, %v11657_v8  ;;  %v3787_v47 = vpack.c.bf16 %v11674_v58, %v11671_v3  ;;  %v9813_v8 = vld [vmem:[#allocation3 + $0x1e8] sm:$0xff]  }
 0x2f1   : > { %8169 = vmatmul.mubr.msk.bf16.gmra.mxu1 %vm467_vm3, %v9807_v50  ;;  %v9066_v36 = vpop.permute.xlu1 %9065  ;;  %v11687_v0 = vmul.f32 %v11651_v2, %v3964_v35  ;;  %v11690_v62 = vmul.f32 %v11651_v2, %v3965_v30  ;;  %v4000_v1 = vpack.c.bf16 %v11665_v34, %v11668_v7 }
 0x2f2   : > { %3251 = vmatprep.mubr.bf16.mxu1 %v13923_v23  ;;  %v9068_v12 = vunpack.i.h.bf16 %v9066_v36  ;;  %v9067_v17 = vunpack.i.l.bf16 %v9066_v36  ;;  %v3741_v38 = vsel %vm1724_vm7, %v9058_v60, %v9063_v51  ;;  %v3740_v49 = vsel %vm1724_vm7, %v9057_v6, %v9062_v63  ;;  %v9811_v36 = vld [vmem:[#allocation3 + $0x1e0] sm:$0xff]  }
 0x2f3   : > { %v9071_v4 = vpop.permute.xlu0 %9070  ;;  %v3748_v31 = vsel %vm1724_vm7, %v9062_v63, %v9057_v6  ;;  %v3749_v10 = vsel %vm1724_vm7, %v9063_v51, %v9058_v60 }
 0x2f4   : > { %v9073_v39 = vunpack.i.h.bf16 %v9071_v4  ;;  %v9072_v28 = vunpack.i.l.bf16 %v9071_v4  ;;  %v3771_v27 = vmul.f32 %v11639_v37, %v3748_v31  ;;  %v3773_v19 = vmul.f32 %v11639_v37, %v3749_v10 }
 0x2f5   : > { %8154 = vmatmul.mubr.msk.bf16.gmra.mxu0 %vm467_vm3, %v9808_v32  ;;  %v9076_v52 = vpop.permute.xlu1 %9075  ;;  %v3772_v32 = vmul.f32 %v11520_v29, %v3741_v38  ;;  %v3770_v4 = vmul.f32 %v11520_v29, %v3740_v49  ;;  %v4001_v10 = vpack.c.bf16 %v11690_v62, %v11687_v0 }
 0x2f6   : > { %v3745_v5 = vsel %vm1724_vm7, %v9068_v12, %v9073_v39  ;;  %v3744_v11 = vsel %vm1724_vm7, %v9067_v17, %v9072_v28  ;;  %3435 = vmatprep.mubr.bf16.mxu0 %v13923_v23  ;;  %v3752_v56 = vsel %vm1724_vm7, %v9072_v28, %v9067_v17  ;;  %v3753_v48 = vsel %vm1724_vm7, %v9073_v39, %v9068_v12 }
 0x2f7   : > { %v3780_v33 = vmul.f32 %v11520_v29, %v3745_v5  ;;  %v3778_v15 = vmul.f32 %v11520_v29, %v3744_v11  ;;  %v9086_v61 = vpop.permute.xlu0 %9085  ;;  %v3779_v43 = vmul.f32 %v11639_v37, %v3752_v56  ;;  %v3781_v26 = vmul.f32 %v11639_v37, %v3753_v48 }
 0x2f8   : > { %v9088_v41 = vunpack.i.h.bf16 %v9086_v61  ;;  %v9087_v54 = vunpack.i.l.bf16 %v9086_v61  ;;  %v9078_v14 = vunpack.i.h.bf16 %v9076_v52  ;;  %v9077_v59 = vunpack.i.l.bf16 %v9076_v52  ;;  %v9812_v61 = vld [vmem:[#allocation3 + $0x1c8] sm:$0xff]  }
 0x2f9   : > { %8170 = vmatmul.mubr.msk.bf16.gmra.mxu1 %vm467_vm3, %v9809_v18  ;;  %v3789_v40 = vpack.c.bf16 %v3781_v26, %v3779_v43  ;;  %v3788_v46 = vpack.c.bf16 %v3780_v33, %v3778_v15  ;;  %v9081_v44 = vpop.permute.xlu1 %9080  ;;  %v3785_v28 = vpack.c.bf16 %v3773_v19, %v3771_v27  ;;  %v3784_v3 = vpack.c.bf16 %v3772_v32, %v3770_v4  ;;  %v9822_v32 = vld [vmem:[#allocation3 + $0x210] sm:$0xff]  }
 0x2fa   : > { %v3959_v9 = vsel %vm1940_vm8, %v9078_v14, %v9088_v41  ;;  %v3958_v21 = vsel %vm1940_vm8, %v9077_v59, %v9087_v54  ;;  %3649 = vmatprep.mubr.bf16.mxu1 %v13923_v23  ;;  %v3966_v20 = vsel %vm1940_vm8, %v9087_v54, %v9077_v59  ;;  %v3967_v50 = vsel %vm1940_vm8, %v9088_v41, %v9078_v14  ;;  %v9823_v4 = vld [vmem:[#allocation3 + $0x230] sm:$0xff]  }
 0x2fb   : > { %v3994_v42 = vmul.f32 %v11630_v24, %v3959_v9  ;;  %v3992_v45 = vmul.f32 %v11630_v24, %v3958_v21  ;;  %v9091_v57 = vpop.permute.xlu0 %9090  ;;  %3839 = vmatprep.subr.bf16.mxu0 %v3789_v40  ;;  %v3993_v35 = vmul.f32 %v11651_v2, %v3966_v20  ;;  %v3995_v30 = vmul.f32 %v11651_v2, %v3967_v50 }
 0x2fc   : > { %v9093_v51 = vunpack.i.h.bf16 %v9091_v57  ;;  %v9092_v63 = vunpack.i.l.bf16 %v9091_v57  ;;  %v9083_v60 = vunpack.i.h.bf16 %v9081_v44  ;;  %v9082_v6 = vunpack.i.l.bf16 %v9081_v44 }
 0x2fd   : > { %8176 = vmatmul.mubr.msk.bf16.vlgmr.msra.gmra.mxu0 %vm467_vm3, %v9810_v25  ;;  %v4003_v39 = vpack.c.bf16 %v3995_v30, %v3993_v35  ;;  %v4002_v17 = vpack.c.bf16 %v3994_v42, %v3992_v45  ;;  %v9096_v31 = vpop.permute.xlu1 %9095  ;;  %v9815_v35 = vld [vmem:[#allocation3 + $0x1f0] sm:$0xff]   ;;  %v9816_v30 = vld [vmem:[#allocation3 + $0x1d8] sm:$0xff]  }
 0x2fe   : > { %v3955_v12 = vsel %vm1940_vm8, %v9083_v60, %v9093_v51  ;;  %3840 = vmatpush1.bf16.msra.mxu0 %v3788_v46  ;;  %3445 = vmatprep.mubr.bf16.mxu0 %v13923_v23  ;;  %v3962_v18 = vsel %vm1940_vm8, %v9092_v63, %v9082_v6  ;;  %v3954_v38 = vsel %vm1940_vm8, %v9082_v6, %v9092_v63  ;;  %v9098_v48 = vunpack.i.h.bf16 %v9096_v31  ;;  %v9819_v63 = vld [vmem:[#allocation3 + $0x220] sm:$0xff]   ;;  %v9821_v6 = vld [vmem:[#allocation3 + $0x228] sm:$0xff]  }
 0x2ff   : > { %3841 = vmatprep.subr.bf16.mxu0 %v3787_v47  ;;  %v9101_v49 = vpop.permute.xlu0 %9100  ;;  %4053 = vmatprep.subr.bf16.mxu1 %v4003_v39  ;;  %v3963_v5 = vsel %vm1940_vm8, %v9093_v51, %v9083_v60  ;;  %v9097_v33 = vunpack.i.l.bf16 %v9096_v31  ;;  %v3986_v15 = vmul.f32 %v11630_v24, %v3955_v12  ;;  %v3985_v58 = vmul.f32 %v11651_v2, %v3962_v18  ;;  %v9818_v51 = vld [vmem:[#allocation3 + $0x200] sm:$0xff]   ;;  %v9820_v60 = vld [vmem:[#allocation3 + $0x208] sm:$0xff]   ;;  %v9825_v39 = vld [vmem:[#allocation3 + $0x238] sm:$0xff]  }
 0x300   : > { %v9103_v11 = vunpack.i.h.bf16 %v9101_v49  ;;  %v9102_v56 = vunpack.i.l.bf16 %v9101_v49  ;;  %v3987_v47 = vmul.f32 %v11651_v2, %v3963_v5  ;;  %v3984_v43 = vmul.f32 %v11630_v24, %v3954_v38 }
 0x301   : > { %8185 = vmatmul.mubr.msk.bf16.vlgmr.msra.gmra.mxu1 %vm467_vm3, %v9811_v36  ;;  %v9824_v36 = vld [vmem:[#allocation3 + $0x218] sm:$0xff]  }
 0x302   : > { %v3739_v0 = vsel %vm1724_vm7, %v9098_v48, %v9103_v11  ;;  %v3738_v62 = vsel %vm1724_vm7, %v9097_v33, %v9102_v56  ;;  %3842 = vmatpush1.bf16.msra.mxu0 %v3786_v55  ;;  %4054 = vmatpush1.bf16.msra.mxu1 %v4002_v17  ;;  %v3746_v52 = vsel %vm1724_vm7, %v9102_v56, %v9097_v33  ;;  %v9106_v14 = vpop.permute.xlu1 %9105 }
 0x303   : > { %v3768_v26 = vmul.f32 %v11520_v29, %v3739_v0  ;;  %v3766_v41 = vmul.f32 %v11520_v29, %v3738_v62  ;;  %3843 = vmatprep.subr.bf16.mxu0 %v3785_v28  ;;  %4055 = vmatprep.subr.bf16.mxu1 %v4001_v10  ;;  %v9111_v54 = vpop.permute.xlu0 %9110  ;;  %v9108_v40 = vunpack.i.h.bf16 %v9106_v14  ;;  %v9107_v46 = vunpack.i.l.bf16 %v9106_v14 }
 0x304   : > { %v9113_v59 = vunpack.i.h.bf16 %v9111_v54  ;;  %v9112_v25 = vunpack.i.l.bf16 %v9111_v54  ;;  %3659 = vmatprep.mubr.bf16.mxu1 %v13923_v23  ;;  %v3999_v22 = vpack.c.bf16 %v3987_v47, %v3985_v58  ;;  %v3747_v55 = vsel %vm1724_vm7, %v9103_v11, %v9098_v48 }
 0x305   : > { %8177 = vmatmul.mubr.msk.bf16.gmra.mxu0 %vm467_vm3, %v9812_v61  ;;  %v3767_v27 = vmul.f32 %v11639_v37, %v3746_v52  ;;  %v3782_v29 = vpack.c.bf16 %v3768_v26, %v3766_v41  ;;  %v3769_v21 = vmul.f32 %v11639_v37, %v3747_v55  ;;  %v3998_v57 = vpack.c.bf16 %v3986_v15, %v3984_v43  ;;  %v9814_v37 = vld [vmem:[#allocation3 + $0x1d0] sm:$0xff]  }
 0x306   : > { %v3953_v19 = vsel %vm1940_vm8, %v9108_v40, %v9113_v59  ;;  %v3952_v9 = vsel %vm1940_vm8, %v9107_v46, %v9112_v25  ;;  %3844 = vmatpush1.bf16.msra.mxu0 %v3784_v3  ;;  %4056 = vmatpush1.bf16.msra.mxu1 %v4000_v1  ;;  %v3960_v42 = vsel %vm1940_vm8, %v9112_v25, %v9107_v46 }
 0x307   : > { %v3982_v20 = vmul.f32 %v11630_v24, %v3953_v19  ;;  %v3980_v50 = vmul.f32 %v11630_v24, %v3952_v9  ;;  %4057 = vmatprep.subr.bf16.mxu1 %v3999_v22  ;;  %3455 = vmatprep.mubr.bf16.mxu0 %v13923_v23  ;;  %v3783_v45 = vpack.c.bf16 %v3769_v21, %v3767_v27 }
 0x308   : > { %v3961_v44 = vsel %vm1940_vm8, %v9113_v59, %v9108_v40  ;;  %v3981_v34 = vmul.f32 %v11651_v2, %v3960_v42 }
 0x309   : > { %8186 = vmatmul.mubr.msk.bf16.gmra.mxu1 %vm467_vm3, %v9813_v8  ;;  %v3983_v7 = vmul.f32 %v11651_v2, %v3961_v44  ;;  %3845 = vmatprep.subr.bf16.mxu0 %v3783_v45  ;;  %v3996_v24 = vpack.c.bf16 %v3982_v20, %v3980_v50  ;;  %v9817_v2 = vld [vmem:[#allocation3 + $0x1f8] sm:$0xff]  }
 0x30a   : > { %4058 = vmatpush1.bf16.msra.mxu1 %v3998_v57  ;;  %3846 = vmatpush1.bf16.msra.mxu0 %v3782_v29 }
 0x30b   : > { %v3997_v1 = vpack.c.bf16 %v3983_v7, %v3981_v34  ;;  %3669 = vmatprep.mubr.bf16.mxu1 %v13923_v23 }
 0x30d   : > { %8178 = vmatmul.mubr.msk.bf16.gmra.mxu0 %vm467_vm3, %v9814_v37  ;;  %4059 = vmatprep.subr.bf16.mxu1 %v3997_v1 }
 0x30e   : > { %4060 = vmatpush1.bf16.msra.mxu1 %v3996_v24  ;;  %3465 = vmatprep.mubr.bf16.mxu0 %v13923_v23 }
 0x311   : > { %8187 = vmatmul.mubr.msk.bf16.gmra.mxu1 %vm467_vm3, %v9815_v35 }
 0x312   : > { %3679 = vmatprep.mubr.bf16.mxu1 %v13923_v23 }
 0x315   : > { %8179 = vmatmul.mubr.msk.bf16.gmra.mxu0 %vm467_vm3, %v9816_v30 }
 0x316   : > { %3863 = vmatprep.mubr.bf16.mxu0 %v13923_v23 }
 0x319   : > { %8188 = vmatmul.mubr.msk.bf16.gmra.mxu1 %vm467_vm3, %v9817_v2 }
 0x31a   : > { %4077 = vmatprep.mubr.bf16.mxu1 %v13923_v23 }
 0x31d   : > { %8194 = vmatmul.mubr.msk.bf16.vlgmr.msra.gmra.mxu0 %vm467_vm3, %v9818_v51 }
 0x31e   : > { %3873 = vmatprep.mubr.bf16.mxu0 %v13923_v23 }
 0x321   : > { %8203 = vmatmul.mubr.msk.bf16.vlgmr.msra.gmra.mxu1 %vm467_vm3, %v9819_v63 }
 0x322   : > { %4087 = vmatprep.mubr.bf16.mxu1 %v13923_v23 }
 0x325   : > { %8195 = vmatmul.mubr.msk.bf16.gmra.mxu0 %vm467_vm3, %v9820_v60 }
 0x326   : > { %3883 = vmatprep.mubr.bf16.mxu0 %v13923_v23 }
 0x329   : > { %8204 = vmatmul.mubr.msk.bf16.gmra.mxu1 %vm467_vm3, %v9821_v6 }
 0x32a   : > { %4097 = vmatprep.mubr.bf16.mxu1 %v13923_v23 }
 0x32d   : > { %8196 = vmatmul.mubr.msk.bf16.gmra.mxu0 %vm467_vm3, %v9822_v32 }
 0x32e   : > { %3893 = vmatprep.mubr.bf16.mxu0 %v13923_v23 }
 0x331   : > { %8205 = vmatmul.mubr.msk.bf16.gmra.mxu1 %vm467_vm3, %v9823_v4 }
 0x332   : > { %4107 = vmatprep.mubr.bf16.mxu1 %v13923_v23 }
 0x335   : > { %8197 = vmatmul.mubr.msk.bf16.gmra.mxu0 %vm467_vm3, %v9824_v36 }
 0x336   : > { %4545 = vmatprep.mubr.bf16.mxu0 %v13923_v23 }
 0x339   : > { %8206 = vmatmul.mubr.msk.bf16.gmra.mxu1 %vm467_vm3, %v9825_v39 }
 0x33a   : > { %4650 = vmatprep.mubr.bf16.mxu1 %v13923_v23 }
 0x35f   : > { %v2536_v28 = vpop.f32.mrf.mxu1 }
 0x361   : > { %v2538_v12 = vpop.f32.mrf.mxu1 }
 0x363   : > { %v2540_v17 = vpop.f32.mrf.mxu1 }
 0x365   : > { %v11813_v18 = vpop.f32.mrf.mxu1 }
 0x367   : > { %v2546_v38 = vpop.f32.mrf.mxu1 }
 0x369   : > { %v2548_v49 = vpop.f32.mrf.mxu1 }
 0x36b   : > { %v2550_v31 = vpop.f32.mrf.mxu1 }
 0x36d   : > { %v11815_v10 = vpop.f32.mrf.mxu1 }
 0x36f   : > { %v2556_v5 = vpop.f32.mrf.mxu1 }
 0x371   : > { %v2558_v11 = vpop.f32.mrf.mxu1 }
 0x373   : > { %v2560_v56 = vpop.f32.mrf.mxu1 }
 0x375   : > { %v11817_v48 = vpop.f32.mrf.mxu1 }
 0x377   : > { %v2566_v33 = vpop.f32.mrf.mxu1 }
 0x379   : > { %v2568_v15 = vpop.f32.mrf.mxu1 }
 0x37b   : > { %v2570_v61 = vpop.f32.mrf.mxu1 }
 0x37d   : > { %v2641_v3 = vpop.f32.mrf.mxu0  ;;  %v11819_v58 = vpop.f32.mrf.mxu1 }
 0x37e   : > { %v2642_v47 = vadd.f32 %v2641_v3, %v2536_v28 }
 0x37f   : > { %v2643_v0 = vpop.f32.mrf.mxu0 }
 0x380   : > { %v2644_v62 = vadd.f32 %v2643_v0, %v2538_v12 }
 0x381   : > { %v2645_v52 = vpop.f32.mrf.mxu0  ;;  %v2839_v43 = vpop.f32.mrf.mxu1 }
 0x382   : > { %v2646_v26 = vadd.f32 %v2645_v52, %v2540_v17  ;;  %v2878_v41 = vadd.f32 %v2839_v43, %v2642_v47 }
 0x383   : > { %v11821_v54 = vpop.f32.mrf.mxu0  ;;  %v2841_v14 = vpop.f32.mrf.mxu1 }
 0x384   : > { %v2879_v59 = vadd.f32 %v2841_v14, %v2644_v62 }
 0x385   : > { %v2651_v25 = vpop.f32.mrf.mxu0  ;;  %v2843_v40 = vpop.f32.mrf.mxu1 }
 0x386   : > { %v2652_v46 = vadd.f32 %v2651_v25, %v2546_v38  ;;  %v2880_v22 = vadd.f32 %v2843_v40, %v2646_v26 }
 0x387   : > { %v2653_v8 = vpop.f32.mrf.mxu0  ;;  %v11823_v55 = vpop.f32.mrf.mxu1 }
 0x388   : > { %v2654_v27 = vadd.f32 %v2653_v8, %v2548_v49 }
 0x389   : > { %v2655_v29 = vpop.f32.mrf.mxu0  ;;  %v2849_v19 = vpop.f32.mrf.mxu1 }
 0x38a   : > { %v2656_v9 = vadd.f32 %v2655_v29, %v2550_v31  ;;  %v2882_v21 = vadd.f32 %v2849_v19, %v2652_v46 }
 0x38b   : > { %v11825_v20 = vpop.f32.mrf.mxu0  ;;  %v2851_v50 = vpop.f32.mrf.mxu1 }
 0x38c   : > { %v2883_v42 = vadd.f32 %v2851_v50, %v2654_v27 }
 0x38d   : > { %v2661_v45 = vpop.f32.mrf.mxu0  ;;  %v2853_v57 = vpop.f32.mrf.mxu1 }
 0x38e   : > { %v2662_v44 = vadd.f32 %v2661_v45, %v2556_v5  ;;  %v2884_v34 = vadd.f32 %v2853_v57, %v2656_v9 }
 0x38f   : > { %v2663_v37 = vpop.f32.mrf.mxu0  ;;  %v11827_v7 = vpop.f32.mrf.mxu1 }
 0x390   : > { %v2664_v24 = vadd.f32 %v2663_v37, %v2558_v11 }
 0x391   : > { %v2665_v1 = vpop.f32.mrf.mxu0  ;;  %v2859_v35 = vpop.f32.mrf.mxu1 }
 0x392   : > { %v2666_v30 = vadd.f32 %v2665_v1, %v2560_v56  ;;  %v2886_v2 = vadd.f32 %v2859_v35, %v2662_v44 }
 0x393   : > { %v11829_v51 = vpop.f32.mrf.mxu0  ;;  %v2861_v63 = vpop.f32.mrf.mxu1 }
 0x394   : > { %v2887_v60 = vadd.f32 %v2861_v63, %v2664_v24 }
 0x395   : > { %v2671_v6 = vpop.f32.mrf.mxu0  ;;  %v2863_v32 = vpop.f32.mrf.mxu1 }
 0x396   : > { %v2672_v4 = vadd.f32 %v2671_v6, %v2566_v33  ;;  %v2888_v36 = vadd.f32 %v2863_v32, %v2666_v30 }
 0x397   : > { %v2673_v39 = vpop.f32.mrf.mxu0  ;;  %v11831_v28 = vpop.f32.mrf.mxu1 }
 0x398   : > { %v2674_v12 = vadd.f32 %v2673_v39, %v2568_v15 }
 0x399   : > { %v2675_v17 = vpop.f32.mrf.mxu0  ;;  %v2869_v38 = vpop.f32.mrf.mxu1 }
 0x39a   : > { %v2676_v49 = vadd.f32 %v2675_v17, %v2570_v61  ;;  %v11833_v31 = vadd.f32 %v2869_v38, %v2672_v4 }
 0x39b   : > { %v11835_v5 = vpop.f32.mrf.mxu0  ;;  %v2871_v11 = vpop.f32.mrf.mxu1 }
 0x39c   : > { %v11837_v56 = vadd.f32 %v2871_v11, %v2674_v12 }
 0x39d   : > { %v2873_v3 = vpop.f32.mrf.mxu1  ;;  %v3053_v47 = vpop.f32.mrf.mxu0 }
 0x39e   : > { %v11839_v0 = vadd.f32 %v2873_v3, %v2676_v49  ;;  %v3092_v33 = vadd.f32 %v3053_v47, %v2878_v41 }
 0x39f   : > { %v11841_v62 = vpop.f32.mrf.mxu1  ;;  %v3055_v52 = vpop.f32.mrf.mxu0 }
 0x3a0   : > { %v3093_v43 = vadd.f32 %v3055_v52, %v2879_v59 }
 0x3a1   : > { %v3057_v15 = vpop.f32.mrf.mxu0  ;;  %v3223_v26 = vpop.f32.mrf.mxu1 }
 0x3a2   : > { %v3094_v14 = vadd.f32 %v3057_v15, %v2880_v22  ;;  %v3262_v61 = vadd.f32 %v3223_v26, %v3092_v33 }
 0x3a3   : > { %v11843_v25 = vpop.f32.mrf.mxu0  ;;  %v3225_v40 = vpop.f32.mrf.mxu1 }
 0x3a4   : > { %v3263_v46 = vadd.f32 %v3225_v40, %v3093_v43 }
 0x3a5   : > { %v3063_v8 = vpop.f32.mrf.mxu0  ;;  %v3227_v27 = vpop.f32.mrf.mxu1 }
 0x3a6   : > { %v3096_v29 = vadd.f32 %v3063_v8, %v2882_v21  ;;  %v3264_v19 = vadd.f32 %v3227_v27, %v3094_v14 }
 0x3a7   : > { %v3065_v9 = vpop.f32.mrf.mxu0  ;;  %v11845_v50 = vpop.f32.mrf.mxu1 }
 0x3a8   : > { %v3097_v41 = vadd.f32 %v3065_v9, %v2883_v42 }
 0x3a9   : > { %v3067_v45 = vpop.f32.mrf.mxu0  ;;  %v3233_v57 = vpop.f32.mrf.mxu1 }
 0x3aa   : > { %v3098_v44 = vadd.f32 %v3067_v45, %v2884_v34  ;;  %v11847_v59 = vadd.f32 %v3233_v57, %v3096_v29 }
 0x3ab   : > { %v11849_v37 = vpop.f32.mrf.mxu0  ;;  %v3235_v22 = vpop.f32.mrf.mxu1 }
 0x3ac   : > { %v11851_v24 = vadd.f32 %v3235_v22, %v3097_v41 }
 0x3ad   : > { %v3073_v1 = vpop.f32.mrf.mxu0  ;;  %v3237_v35 = vpop.f32.mrf.mxu1 }
 0x3ae   : > { %v3100_v30 = vadd.f32 %v3073_v1, %v2886_v2  ;;  %v11853_v63 = vadd.f32 %v3237_v35, %v3098_v44 }
 0x3af   : > { %v3075_v21 = vpop.f32.mrf.mxu0  ;;  %v11855_v6 = vpop.f32.mrf.mxu1 }
 0x3b0   : > { %v3101_v32 = vadd.f32 %v3075_v21, %v2887_v60 }
 0x3b1   : > { %v3077_v42 = vpop.f32.mrf.mxu0  ;;  %v3243_v4 = vpop.f32.mrf.mxu1 }
 0x3b2   : > { %v3102_v39 = vadd.f32 %v3077_v42, %v2888_v36  ;;  %v11857_v34 = vadd.f32 %v3243_v4, %v3100_v30 }
 0x3b3   : > { %v11859_v12 = vpop.f32.mrf.mxu0  ;;  %v3245_v17 = vpop.f32.mrf.mxu1 }
 0x3b4   : > { %v11861_v38 = vadd.f32 %v3245_v17, %v3101_v32 }
 0x3b5   : > { %v11863_v49 = vpop.f32.mrf.mxu0  ;;  %v3247_v11 = vpop.f32.mrf.mxu1 }
 0x3b6   : > { %v11865_v2 = vadd.f32 %v3247_v11, %v3102_v39  ;;  %v11903_v11 = vpop.permute.xlu1 %4175 }
 0x3b7   : > { %v11867_v3 = vpop.f32.mrf.mxu0  ;;  %v11869_v47 = vpop.f32.mrf.mxu1  ;;  %13924 = vst [vmem:[#allocation10_spill] sm:$0xff] %v11903_v11  ;;  %v2648_v11 = vadd.f32 %v11821_v54, %v11813_v18 }
 0x3b9   : > { %v11871_v60 = vpop.f32.mrf.mxu0  ;;  %v11873_v33 = vpop.f32.mrf.mxu1 }
 0x3bb   : > { %v11875_v36 = vpop.f32.mrf.mxu0  ;;  %v11877_v52 = vpop.f32.mrf.mxu1 }
 0x3bd   : > { %v11879_v43 = vpop.f32.mrf.mxu1  ;;  %v3437_v15 = vpop.f32.mrf.mxu0 }
 0x3be   : > { %v3476_v26 = vadd.f32 %v3437_v15, %v3262_v61 }
 0x3bf   : > { %v11881_v14 = vpop.f32.mrf.mxu1  ;;  %v3439_v40 = vpop.f32.mrf.mxu0 }
 0x3c0   : > { %v3477_v8 = vadd.f32 %v3439_v40, %v3263_v46 }
 0x3c1   : > { %v3441_v27 = vpop.f32.mrf.mxu0  ;;  %v3651_v29 = vpop.f32.mrf.mxu1 }
 0x3c2   : > { %v3478_v9 = vadd.f32 %v3441_v27, %v3264_v19  ;;  %v3690_v41 = vadd.f32 %v3651_v29, %v3476_v26  ;;  %v11913_v27 = vpop.permute.xlu0 %4180 }
 0x3c3   : > { %v3443_v45 = vpop.f32.mrf.mxu0  ;;  %v3653_v57 = vpop.f32.mrf.mxu1  ;;  %13925 = vst [vmem:[#allocation12_spill] sm:$0xff] %v11913_v27 }
 0x3c4   : > { %v3691_v44 = vadd.f32 %v3653_v57, %v3477_v8  ;;  %v11919_v57 = vpop.permute.xlu1 %4165 }
 0x3c5   : > { %v11883_v22 = vpop.f32.mrf.mxu0  ;;  %v3655_v1 = vpop.f32.mrf.mxu1  ;;  %13928 = vst [vmem:[#allocation13_spill] sm:$0xff] %v11919_v57  ;;  %v2881_v57 = vadd.f32 %v11823_v55, %v2648_v11 }
 0x3c6   : > { %v3692_v35 = vadd.f32 %v3655_v1, %v3478_v9  ;;  %v11929_v53 = vpop.permute.xlu0 %4170 }
 0x3c7   : > { %v11885_v30 = vpop.f32.mrf.mxu0  ;;  %v3657_v21 = vpop.f32.mrf.mxu1  ;;  %13933 = vst [vmem:[#allocation18_spill] sm:$0xff] %v11929_v53  ;;  %v3095_v18 = vadd.f32 %v11843_v25, %v2881_v57 }
 0x3c9   : > { %v11887_v32 = vpop.f32.mrf.mxu0  ;;  %v11889_v61 = vpop.f32.mrf.mxu1 }
 0x3ca   : > { %v11953_v11 = vpop.permute.xlu0 %4160 }
 0x3cb   : > { %v11891_v42 = vpop.f32.mrf.mxu0  ;;  %v11893_v46 = vpop.f32.mrf.mxu1 }
 0x3cd   : > { %v11895_v19 = vpop.f32.mrf.mxu0  ;;  %v11897_v4 = vpop.f32.mrf.mxu1 }
 0x3cf   : > { %v11899_v39 = vpop.f32.mrf.mxu0  ;;  %v11901_v17 = vpop.f32.mrf.mxu1 }
 0x3d1   : > { %v11905_v15 = vpop.f32.mrf.mxu0  ;;  %v11907_v26 = vpop.f32.mrf.mxu1 }
 0x3d3   : > { %v11909_v40 = vpop.f32.mrf.mxu0  ;;  %v11911_v8 = vpop.f32.mrf.mxu1 }
 0x3d5   : > { %v11915_v29 = vpop.f32.mrf.mxu0  ;;  %v11917_v9 = vpop.f32.mrf.mxu1 }
 0x3d6   : > { %13926 = vst [vmem:[#allocation14_spill] sm:$0xff] %v11915_v29  ;;  %13927 = vst [vmem:[#allocation15_spill] sm:$0xff] %v11917_v9  ;;  %v11937_v9 = vpop.permute.xlu1 %4155 }
 0x3d7   : > { %v11921_v1 = vpop.f32.mrf.mxu0  ;;  %v11923_v23 = vpop.f32.mrf.mxu1 }
 0x3d8   : > { %13929 = vst [vmem:[#allocation16_spill] sm:$0xff] %v11921_v1  ;;  %13930 = vst [vmem:[#allocation19_spill] sm:$0xff] %v11923_v23  ;;  %v2658_v23 = vadd.f32 %v11825_v20, %v11815_v10  ;;  %v3265_v10 = vadd.f32 %v11845_v50, %v3095_v18  ;;  %v3105_v50 = vadd.f32 %v11867_v3, %v11837_v56 }
 0x3d9   : > { %v11925_v16 = vpop.f32.mrf.mxu0  ;;  %v11927_v13 = vpop.f32.mrf.mxu1  ;;  %v3480_v56 = vadd.f32 %v11883_v22, %v11847_v59  ;;  %v3481_v3 = vadd.f32 %v11885_v30, %v11851_v24 }
 0x3da   : > { %13931 = vst [vmem:[#allocation17_spill] sm:$0xff] %v11925_v16  ;;  %13932 = vst [vmem:[#allocation20_spill] sm:$0xff] %v11927_v13  ;;  %v2668_v16 = vadd.f32 %v11829_v51, %v11817_v48  ;;  %v2885_v1 = vadd.f32 %v11827_v7, %v2658_v23  ;;  %v3479_v25 = vadd.f32 %v3443_v45, %v3265_v10 }
 0x3db   : > { %v11933_v27 = vpop.f32.mrf.mxu0  ;;  %v11935_v29 = vpop.f32.mrf.mxu1  ;;  %v3694_v59 = vadd.f32 %v11889_v61, %v3480_v56  ;;  %v3485_v61 = vadd.f32 %v11899_v39, %v11861_v38 }
 0x3dc   : > { %13934 = vst [vmem:[#allocation11_spill] sm:$0xff] %v11933_v27  ;;  %13935 = vst [vmem:[#allocation9_spill] sm:$0xff] %v11935_v29  ;;  %v2889_v54 = vadd.f32 %v11831_v28, %v2668_v16  ;;  %v2678_v29 = vadd.f32 %v11835_v5, %v11819_v58  ;;  %v3099_v48 = vadd.f32 %v11849_v37, %v2885_v1  ;;  %v4146_v58 = vpop.permute.xlu1 %4145 }
 0x3dd   : > { %v11944_v13 = vpop.f32.mrf.mxu1  ;;  %v3865_v53 = vpop.f32.mrf.mxu0  ;;  %v3104_v16 = vadd.f32 %v11863_v49, %v11833_v31  ;;  %v3693_v49 = vadd.f32 %v3657_v21, %v3479_v25  ;;  %v3699_v38 = vadd.f32 %v11911_v8, %v3485_v61  ;;  %v13937_v39 = vld [vmem:[#allocation14_spill] sm:$0xff] }
 0x3de   : > { %v3904_v20 = vadd.f32 %v3865_v53, %v3690_v41  ;;  %v2893_v51 = vadd.f32 %v11841_v62, %v2678_v29  ;;  %v3103_v23 = vadd.f32 %v11859_v12, %v2889_v54  ;;  %v3269_v5 = vadd.f32 %v11855_v6, %v3099_v48 }
 0x3df   : > { %v11951_v27 = vpop.f32.mrf.mxu1  ;;  %v3867_v55 = vpop.f32.mrf.mxu0  ;;  %v3106_v62 = vadd.f32 %v11871_v60, %v11839_v0  ;;  %v3274_v37 = vadd.f32 %v11873_v33, %v3104_v16 }
 0x3e0   : > { %13936 = vst [vmem:[#allocation21_spill] sm:$0xff] %v11951_v27  ;;  %v3905_v57 = vadd.f32 %v3867_v55, %v3691_v44  ;;  %v3273_v53 = vadd.f32 %v11869_v47, %v3103_v23  ;;  %v3107_v45 = vadd.f32 %v11875_v36, %v2893_v51  ;;  %v3275_v44 = vadd.f32 %v11877_v52, %v3105_v50  ;;  %v4151_v60 = vpop.permute.xlu0 %4150 }
 0x3e1   : > { %v3869_v7 = vpop.f32.mrf.mxu0  ;;  %v4079_v28 = vpop.f32.mrf.mxu1  ;;  %v11977_v33 = vadd.f32 %v11879_v43, %v3106_v62  ;;  %v3482_v36 = vadd.f32 %v11887_v32, %v11853_v63  ;;  %v3695_v52 = vadd.f32 %v11893_v46, %v3481_v3  ;;  %v3483_v55 = vadd.f32 %v11891_v42, %v3269_v5  ;;  %v13938_v62 = vld [vmem:[#allocation15_spill] sm:$0xff]  ;;  %v13939_v3 = vld [vmem:[#allocation16_spill] sm:$0xff] }
 0x3e2   : > { %v4118_v27 = vadd.f32 %v4079_v28, %v3904_v20  ;;  %v3906_v41 = vadd.f32 %v3869_v7, %v3692_v35  ;;  %v11980_v1 = vadd.f32 %v11881_v14, %v3107_v45  ;;  %v3484_v14 = vadd.f32 %v11895_v19, %v11857_v34 }
 0x3e3   : > { %v3871_v12 = vpop.f32.mrf.mxu0  ;;  %v4081_v31 = vpop.f32.mrf.mxu1  ;;  %v3696_v10 = vadd.f32 %v11897_v4, %v3482_v36  ;;  %v3697_v51 = vadd.f32 %v11901_v17, %v3483_v55  ;;  %v3486_v23 = vadd.f32 %v11905_v15, %v11865_v2  ;;  %v3487_v5 = vadd.f32 %v11909_v40, %v3273_v53  ;;  %v13941_v55 = vld [vmem:[#allocation17_spill] sm:$0xff] }
 0x3e4   : > { %v11968_v29 = vadd.f32 %v4146_v58, %v4118_v27  ;;  %v4119_v6 = vadd.f32 %v4081_v31, %v3905_v57  ;;  %v3907_v35 = vadd.f32 %v3871_v12, %v3693_v49  ;;  %v3698_v42 = vadd.f32 %v11907_v26, %v3484_v14 }
 0x3e5   : > { %v3875_v0 = vpop.f32.mrf.mxu0  ;;  %v4083_v47 = vpop.f32.mrf.mxu1  ;;  %v3488_v25 = vadd.f32 %v13937_v39, %v3274_v37  ;;  %v3700_v12 = vadd.f32 %v13938_v62, %v3486_v23  ;;  %v3490_v14 = vadd.f32 %v13941_v55, %v11977_v33 }
 0x3e6   : > { %v4184_v21 = vadd.f32 %v4146_v58, %v4119_v6  ;;  %v4120_v27 = vadd.f32 %v4083_v47, %v3906_v41  ;;  %v4199_v30 = vmax.f32 %v11968_v29, 0.0  ;;  %v3908_v48 = vadd.f32 %v3875_v0, %v3694_v59 }
 0x3e7   : > { %v3877_v24 = vpop.f32.mrf.mxu0  ;;  %v4085_v22 = vpop.f32.mrf.mxu1  ;;  %v3489_v0 = vadd.f32 %v13939_v3, %v3275_v44  ;;  %v13942_v44 = vld [vmem:[#allocation20_spill] sm:$0xff]  ;;  %v3704_v39 = vadd.f32 %v11944_v13, %v3490_v14 }
 0x3e8   : > { %v4200_v18 = vmax.f32 %v4184_v21, 0.0  ;;  %v4185_v43 = vadd.f32 %v4151_v60, %v4120_v27  ;;  %v4121_v54 = vadd.f32 %v4085_v22, %v3907_v35  ;;  %v3909_v46 = vadd.f32 %v3877_v24, %v3695_v52 }
 0x3e9   : > { %v3879_v63 = vpop.f32.mrf.mxu0  ;;  %v4089_v32 = vpop.f32.mrf.mxu1 }
 0x3ea   : > { %v4186_v20 = vadd.f32 %v4151_v60, %v4121_v54  ;;  %v4122_v16 = vadd.f32 %v4089_v32, %v3908_v48  ;;  %v4201_v19 = vmax.f32 %v4185_v43, 0.0  ;;  %v3910_v28 = vadd.f32 %v3879_v63, %v3696_v10  ;;  %v13940_v60 = vld [vmem:[#allocation19_spill] sm:$0xff]  ;;  %v13944_v63 = vld [vmem:[#allocation13_spill] sm:$0xff] }
 0x3eb   : > { %v3881_v7 = vpop.f32.mrf.mxu0  ;;  %v4091_v34 = vpop.f32.mrf.mxu1  ;;  %v3701_v35 = vadd.f32 %v13940_v60, %v3487_v5  ;;  %v3702_v10 = vadd.f32 %v13942_v44, %v3488_v25 }
 0x3ec   : > { %v4202_v4 = vmax.f32 %v4186_v20, 0.0  ;;  %v4123_v58 = vadd.f32 %v4091_v34, %v3909_v46  ;;  %v4187_v17 = vadd.f32 %v11937_v9, %v4122_v16  ;;  %v3911_v2 = vadd.f32 %v3881_v7, %v3697_v51  ;;  %v13945_v51 = vld [vmem:[#allocation9_spill] sm:$0xff] }
 0x3ed   : > { %v3885_v57 = vpop.f32.mrf.mxu0  ;;  %v4093_v50 = vpop.f32.mrf.mxu1  ;;  %v12006_v56 = vpack.c.bf16 %v4201_v19, %v4199_v30  ;;  %v12013_v52 = vpack.i.bf16 %v4201_v19, %v4199_v30  ;;  %v3703_v23 = vadd.f32 %v13945_v51, %v3489_v0  ;;  %v13946_v19 = vld [vmem:[#allocation18_spill] sm:$0xff] }
 0x3ee   : > { %v4188_v15 = vadd.f32 %v11937_v9, %v4123_v58  ;;  %v4124_v26 = vadd.f32 %v4093_v50, %v3910_v28  ;;  %v3912_v31 = vadd.f32 %v3885_v57, %v3698_v42  ;;  %v4203_v29 = vmax.f32 %v4187_v17, 0.0  ;;  %v13947_v57 = vld [vmem:[#allocation21_spill] sm:$0xff] }
 0x3ef   : > { %v3887_v49 = vpop.f32.mrf.mxu0  ;;  %v4095_v41 = vpop.f32.mrf.mxu1  ;;  %v12004_v45 = vpack.c.bf16 %v4202_v4, %v4200_v18  ;;  %v12011_v59 = vpack.i.bf16 %v4202_v4, %v4200_v18 }
 0x3f0   : > { %v4204_v6 = vmax.f32 %v4188_v15, 0.0  ;;  %v4189_v40 = vadd.f32 %v11953_v11, %v4124_v26  ;;  %v4125_v8 = vadd.f32 %v4095_v41, %v3911_v2  ;;  %v3913_v9 = vadd.f32 %v3887_v49, %v3699_v38 }
 0x3f1   : > { %v3889_v53 = vpop.f32.mrf.mxu0  ;;  %v4099_v37 = vpop.f32.mrf.mxu1 }
 0x3f2   : > { %v4190_v47 = vadd.f32 %v11953_v11, %v4125_v8  ;;  %v4126_v21 = vadd.f32 %v4099_v37, %v3912_v31  ;;  %v4205_v24 = vmax.f32 %v4189_v40, 0.0  ;;  %v3914_v43 = vadd.f32 %v3889_v53, %v3700_v12  ;;  %v13943_v11 = vld [vmem:[#allocation11_spill] sm:$0xff]  ;;  %v13948_v8 = vld [vmem:[#allocation10_spill] sm:$0xff] }
 0x3f3   : > { %v3891_v27 = vpop.f32.mrf.mxu0  ;;  %v4101_v36 = vpop.f32.mrf.mxu1  ;;  %v3491_v48 = vadd.f32 %v13943_v11, %v11980_v1  ;;  %v8223_v11 = vld [vmem:[%s13863_s3 + $0x1] ss:$8 sm:$0x3] }
 0x3f4   : > { %v4206_v22 = vmax.f32 %v4190_v47, 0.0  ;;  %v4127_v54 = vadd.f32 %v4101_v36, %v3913_v9  ;;  %v4191_v32 = vadd.f32 %v13944_v63, %v4126_v21  ;;  %v3915_v18 = vadd.f32 %v3891_v27, %v3701_v35  ;;  %v13949_v35 = vld [vmem:[#allocation12_spill] sm:$0xff] }
 0x3f5   : > { %v3895_v61 = vpop.f32.mrf.mxu0  ;;  %v4103_v46 = vpop.f32.mrf.mxu1  ;;  %v12026_v38 = vpack.c.bf16 %v4205_v24, %v4203_v29  ;;  %v3705_v50 = vadd.f32 %v13947_v57, %v3491_v48  ;;  %v12033_v12 = vpack.i.bf16 %v4205_v24, %v4203_v29 }
 0x3f6   : > { %v4192_v30 = vadd.f32 %v13944_v63, %v4127_v54  ;;  %v4128_v20 = vadd.f32 %v4103_v46, %v3914_v43  ;;  %v3916_v42 = vadd.f32 %v3895_v61, %v3702_v10  ;;  %v4207_v34 = vmax.f32 %v4191_v32, 0.0  ;;  %v13950_v63 = vld [vmem:[#allocation8_spill] sm:$0xff]  ;;  %v13951_v46 = vld [vmem:[#allocation7_spill] sm:$0xff] }
 0x3f7   : > { %v3897_v16 = vpop.f32.mrf.mxu0  ;;  %v4105_v7 = vpop.f32.mrf.mxu1  ;;  %v12024_v5 = vpack.c.bf16 %v4206_v22, %v4204_v6  ;;  %v12031_v62 = vpack.i.bf16 %v4206_v22, %v4204_v6  ;;  %v12135_v32 = vrot.slane %v8223_v11, %v13950_v63 }
 0x3f8   : > { %v4208_v33 = vmax.f32 %v4192_v30, 0.0  ;;  %v4193_v4 = vadd.f32 %v13946_v19, %v4128_v20  ;;  %v4129_v28 = vadd.f32 %v4105_v7, %v3915_v18  ;;  %v3917_v25 = vadd.f32 %v3897_v16, %v3703_v23 }
 0x3f9   : > { %v3899_v58 = vpop.f32.mrf.mxu0  ;;  %v4109_v1 = vpop.f32.mrf.mxu1  ;;  %v12138_v18 = vrot.slane %v8223_v11, %v13951_v46 }
 0x3fa   : > { %v4194_v17 = vadd.f32 %v13946_v19, %v4129_v28  ;;  %v4130_v2 = vadd.f32 %v4109_v1, %v3916_v42  ;;  %v4209_v31 = vmax.f32 %v4193_v4, 0.0  ;;  %v3918_v41 = vadd.f32 %v3899_v58, %v3704_v39 }
 0x3fb   : > { %v3901_v15 = vpop.f32.mrf.mxu0  ;;  %v4111_v26 = vpop.f32.mrf.mxu1 }
 0x3fc   : > { %v4210_v49 = vmax.f32 %v4194_v17, 0.0  ;;  %v4131_v40 = vadd.f32 %v4111_v26, %v3917_v25  ;;  %v4195_v53 = vadd.f32 %v13948_v8, %v4130_v2  ;;  %v3919_v13 = vadd.f32 %v3901_v15, %v3705_v50 }
 0x3fd   : > { %v4113_v37 = vpop.f32.mrf.mxu1  ;;  %v12040_v29 = vpack.c.bf16 %v4209_v31, %v4207_v34  ;;  %v9119_v22 = vpack.i.bf16 %v4209_v31, %v4207_v34 }
 0x3fe   : > { %v4196_v3 = vadd.f32 %v13948_v8, %v4131_v40  ;;  %v4132_v0 = vadd.f32 %v4113_v37, %v3918_v41  ;;  %v4211_v9 = vmax.f32 %v4195_v53, 0.0  ;;  %v12038_v27 = vpack.c.bf16 %v4210_v49, %v4208_v33 }
 0x3ff   : > { %v4115_v47 = vpop.f32.mrf.mxu1  ;;  %v9129_v24 = vpack.i.bf16 %v4210_v49, %v4208_v33 }
 0x400   : > { %v4212_v60 = vmax.f32 %v4196_v3, 0.0  ;;  %v4197_v21 = vadd.f32 %v13949_v35, %v4132_v0  ;;  %v4133_v6 = vadd.f32 %v4115_v47, %v3919_v13 }
 0x402   : > { %v4198_v36 = vadd.f32 %v13949_v35, %v4133_v6  ;;  %v4213_v43 = vmax.f32 %v4197_v21, 0.0  ;;  %v8317_v6 = vld [vmem:[%s13862_s2 + $0xb8] sm:$0xff] }
 0x404   : > { %v4214_v54 = vmax.f32 %v4198_v36, 0.0  ;;  %v12045_v14 = vpack.c.bf16 %v4213_v43, %v4211_v9  ;;  %v9114_v10 = vpack.i.bf16 %v4213_v43, %v4211_v9  ;;  %v8316_v36 = vld [vmem:[%s13862_s2 + $0xb0] sm:$0xff] }
 0x406   : > { %v12043_v55 = vpack.c.bf16 %v4214_v54, %v4212_v60  ;;  %v9124_v44 = vpack.i.bf16 %v4214_v54, %v4212_v60  ;;  %9115 = vrot.lane.b32.xlu1 %v9114_v10, %s9965_s26 }
 0x408   : > { %9125 = vrot.lane.b32.xlu0 %v9124_v44, %s9965_s26 }
 0x40a   : > { %9120 = vrot.lane.b32.xlu1 %v9119_v22, %s9965_s26 }
 0x40c   : > { %9130 = vrot.lane.b32.xlu0 %v9129_v24, %s9965_s26 }
 0x40e   : > { %9135 = vrot.lane.b32.xlu1 %v12033_v12, %s9965_s26 }
 0x410   : > { %9140 = vrot.lane.b32.xlu0 %v12031_v62, %s9965_s26 }
 0x412   : > { %9145 = vrot.lane.b32.xlu1 %v12013_v52, %s9965_s26 }
 0x414   : > { %9150 = vrot.lane.b32.xlu0 %v12011_v59, %s9965_s26 }
 0x416   : > { %9155 = vrot.lane.b32.xlu1 %v9119_v22, %s9966_s30 }
 0x418   : > { %9160 = vrot.lane.b32.xlu0 %v9129_v24, %s9966_s30 }
 0x41a   : > { %9165 = vrot.lane.b32.xlu1 %v9119_v22, %s9967_s5 }
 0x41c   : > { %9170 = vrot.lane.b32.xlu0 %v9129_v24, %s9967_s5 }
 0x41e   : > { %9175 = vrot.lane.b32.xlu1 %v12033_v12, %s9966_s30 }
 0x420   : > { %9180 = vrot.lane.b32.xlu0 %v12031_v62, %s9966_s30 }
 0x422   : > { %9185 = vrot.lane.b32.xlu1 %v9114_v10, %s9966_s30 }
 0x424   : > { %9190 = vrot.lane.b32.xlu0 %v9124_v44, %s9966_s30 }
 0x426   : > { %9195 = vrot.lane.b32.xlu1 %v9114_v10, %s9967_s5 }
 0x428   : > { %9205 = vrot.lane.b32.xlu0 %v9124_v44, %s9967_s5 }
 0x42a   : > { %9200 = vrot.lane.b32.xlu1 %v12033_v12, %s9967_s5 }
 0x42c   : > { %9210 = vrot.lane.b32.xlu0 %v12031_v62, %s9967_s5 }
 0x42e   : > { %9215 = vrot.lane.b32.xlu1 %v12013_v52, %s9966_s30 }
 0x430   : > { %9220 = vrot.lane.b32.xlu0 %v12011_v59, %s9966_s30 }
 0x432   : > { %9225 = vrot.lane.b32.xlu1 %v12013_v52, %s9967_s5 }
 0x434   : > { %9230 = vrot.lane.b32.xlu0 %v12011_v59, %s9967_s5 }
 0x436   : > { %9235 = vrot.lane.b32.xlu1 %v9114_v10, %s9968_s6 }
 0x438   : > { %9245 = vrot.lane.b32.xlu0 %v9124_v44, %s9968_s6 }
 0x43a   : > { %9240 = vrot.lane.b32.xlu1 %v9119_v22, %s9968_s6 }
 0x43c   : > { %9250 = vrot.lane.b32.xlu0 %v9129_v24, %s9968_s6 }
 0x43e   : > { %9255 = vrot.lane.b32.xlu1 %v12033_v12, %s9968_s6 }
 0x440   : > { %9260 = vrot.lane.b32.xlu0 %v12031_v62, %s9968_s6 }
 0x442   : > { %9265 = vrot.lane.b32.xlu1 %v12013_v52, %s9968_s6 }
 0x444   : > { %9270 = vrot.lane.b32.xlu0 %v12011_v59, %s9968_s6 }
 0x446   : > { %9275 = vrot.lane.b32.xlu1 %v9119_v22, %s9969_s7 }
 0x448   : > { %9280 = vrot.lane.b32.xlu0 %v9129_v24, %s9969_s7 }
 0x44a   : > { %9285 = vrot.lane.b32.xlu1 %v9119_v22, %s9970_s8 }
 0x44c   : > { %9290 = vrot.lane.b32.xlu0 %v9129_v24, %s9970_s8 }
 0x44e   : > { %9295 = vrot.lane.b32.xlu1 %v12033_v12, %s9969_s7 }
 0x450   : > { %9300 = vrot.lane.b32.xlu0 %v12031_v62, %s9969_s7 }
 0x452   : > { %9305 = vrot.lane.b32.xlu1 %v9114_v10, %s9969_s7 }
 0x454   : > { %9310 = vrot.lane.b32.xlu0 %v9124_v44, %s9969_s7 }
 0x456   : > { %9315 = vrot.lane.b32.xlu1 %v9114_v10, %s9970_s8 }
 0x458   : > { %9325 = vrot.lane.b32.xlu0 %v9124_v44, %s9970_s8 }
 0x45a   : > { %9320 = vrot.lane.b32.xlu1 %v12033_v12, %s9970_s8 }
 0x45c   : > { %9330 = vrot.lane.b32.xlu0 %v12031_v62, %s9970_s8 }
 0x45e   : > { %9335 = vrot.lane.b32.xlu1 %v12013_v52, %s9969_s7 }
 0x460   : > { %9340 = vrot.lane.b32.xlu0 %v12011_v59, %s9969_s7 }
 0x462   : > { %9345 = vrot.lane.b32.xlu1 %v12013_v52, %s9970_s8 }
 0x464   : > { %9350 = vrot.lane.b32.xlu0 %v12011_v59, %s9970_s8 }
 0x466   : > { %9355 = vrot.lane.b32.xlu1 %v9119_v22, %s9971_s9 }
 0x468   : > { %9360 = vrot.lane.b32.xlu0 %v9129_v24, %s9971_s9 }
 0x46a   : > { %9365 = vrot.lane.b32.xlu1 %v9119_v22, %s9972_s10 }
 0x46c   : > { %9370 = vrot.lane.b32.xlu0 %v9129_v24, %s9972_s10 }
 0x46e   : > { %9375 = vrot.lane.b32.xlu1 %v12033_v12, %s9971_s9 }
 0x470   : > { %9380 = vrot.lane.b32.xlu0 %v12031_v62, %s9971_s9 }
 0x472   : > { %9385 = vrot.lane.b32.xlu1 %v9114_v10, %s9971_s9 }
 0x474   : > { %9390 = vrot.lane.b32.xlu0 %v9124_v44, %s9971_s9 }
 0x476   : > { %9395 = vrot.lane.b32.xlu1 %v9114_v10, %s9972_s10 }
 0x478   : > { %9405 = vrot.lane.b32.xlu0 %v9124_v44, %s9972_s10  ;;  %v9116_v61 = vpop.permute.xlu1 %9115 }
 0x479   : > { %v9118_v51 = vunpack.i.h.bf16 %v9116_v61  ;;  %v9117_v23 = vunpack.i.l.bf16 %v9116_v61 }
 0x47a   : > { %v9126_v48 = vpop.permute.xlu0 %9125  ;;  %9400 = vrot.lane.b32.xlu1 %v12033_v12, %s9972_s10 }
 0x47b   : > { %v9128_v30 = vunpack.i.h.bf16 %v9126_v48  ;;  %v9127_v20 = vunpack.i.l.bf16 %v9126_v48 }
 0x47c   : > { %9410 = vrot.lane.b32.xlu0 %v12031_v62, %s9972_s10  ;;  %v9121_v58 = vpop.permute.xlu1 %9120 }
 0x47d   : > { %v4435_v16 = vsel %vm384_vm0, %v9128_v30, %v9118_v51  ;;  %v4434_v7 = vsel %vm384_vm0, %v9127_v20, %v9117_v23  ;;  %v4426_v34 = vsel %vm384_vm0, %v9117_v23, %v9127_v20  ;;  %v4427_v33 = vsel %vm384_vm0, %v9118_v51, %v9128_v30 }
 0x47e   : > { %v4462_v19 = vmul.f32 %v12135_v32, %v4435_v16  ;;  %v4460_v4 = vmul.f32 %v12135_v32, %v4434_v7  ;;  %v9131_v28 = vpop.permute.xlu0 %9130  ;;  %v4461_v1 = vmul.f32 %v12138_v18, %v4426_v34  ;;  %v4463_v39 = vmul.f32 %v12138_v18, %v4427_v33  ;;  %9415 = vrot.lane.b32.xlu1 %v12013_v52, %s9971_s9  ;;  %v8315_v7 = vld [vmem:[%s13862_s2 + $0xa8] sm:$0xff]  ;;  %v8314_v34 = vld [vmem:[%s13862_s2 + $0xa0] sm:$0xff] }
 0x47f   : > { %v9133_v25 = vunpack.i.h.bf16 %v9131_v28  ;;  %v9132_v17 = vunpack.i.l.bf16 %v9131_v28  ;;  %v9123_v57 = vunpack.i.h.bf16 %v9121_v58  ;;  %v9122_v50 = vunpack.i.l.bf16 %v9121_v58 }
 0x480   : > { %9420 = vrot.lane.b32.xlu0 %v12011_v59, %s9971_s9  ;;  %v4471_v2 = vpack.c.bf16 %v4463_v39, %v4461_v1  ;;  %v4470_v15 = vpack.c.bf16 %v4462_v19, %v4460_v4  ;;  %v9136_v8 = vpop.permute.xlu1 %9135  ;;  %v4343_v1 = vld [vmem:[%s13863_s3] ss:$8 sm:$0x3] }
 0x481   : > { %v4433_v26 = vsel %vm384_vm0, %v9133_v25, %v9123_v57  ;;  %v4432_v62 = vsel %vm384_vm0, %v9132_v17, %v9122_v50  ;;  %v4424_v12 = vsel %vm384_vm0, %v9122_v50, %v9132_v17  ;;  %v4425_v31 = vsel %vm384_vm0, %v9123_v57, %v9133_v25 }
 0x482   : > { %v4458_v49 = vmul.f32 %v12135_v32, %v4433_v26  ;;  %v4456_v41 = vmul.f32 %v12135_v32, %v4432_v62  ;;  %v9141_v40 = vpop.permute.xlu0 %9140  ;;  %4521 = vmatprep.subr.bf16.mxu0 %v4471_v2  ;;  %v4457_v53 = vmul.f32 %v12138_v18, %v4424_v12  ;;  %v4459_v37 = vmul.f32 %v12138_v18, %v4425_v31  ;;  %v8240_v12 = vld [vmem:[%s13863_s3 + $0x2] ss:$8 sm:$0x3]  ;;  %v8312_v31 = vld [vmem:[%s13862_s2 + $0x90] sm:$0xff] }
 0x483   : > { %v9143_v13 = vunpack.i.h.bf16 %v9141_v40  ;;  %v9142_v3 = vunpack.i.l.bf16 %v9141_v40  ;;  %v9138_v0 = vunpack.i.h.bf16 %v9136_v8  ;;  %v9137_v9 = vunpack.i.l.bf16 %v9136_v8  ;;  %4522 = vmatpush1.bf16.msra.mxu0 %v4470_v15  ;;  %9425 = vrot.lane.b32.xlu1 %v12013_v52, %s9972_s10 }
 0x484   : > { %9430 = vrot.lane.b32.xlu0 %v12011_v59, %s9972_s10  ;;  %v4469_v47 = vpack.c.bf16 %v4459_v37, %v4457_v53  ;;  %v4468_v60 = vpack.c.bf16 %v4458_v49, %v4456_v41  ;;  %v9146_v54 = vpop.permute.xlu1 %9145  ;;  %v12216_v62 = vrot.slane %v4343_v1, %v13950_v63  ;;  %v12228_v49 = vrot.slane %v4343_v1, %v13951_v46  ;;  %v9826_v37 = vld [vmem:[#allocation3 + $0x260] sm:$0xff]  }
 0x485   : > { %v4431_v35 = vsel %vm384_vm0, %v9143_v13, %v9138_v0  ;;  %v4430_v21 = vsel %vm384_vm0, %v9142_v3, %v9137_v9  ;;  %v4422_v59 = vsel %vm384_vm0, %v9137_v9, %v9142_v3  ;;  %v4423_v52 = vsel %vm384_vm0, %v9138_v0, %v9143_v13 }
 0x486   : > { %v4454_v24 = vmul.f32 %v12135_v32, %v4431_v35  ;;  %v4452_v22 = vmul.f32 %v12135_v32, %v4430_v21  ;;  %v9151_v43 = vpop.permute.xlu0 %9150  ;;  %4523 = vmatprep.subr.bf16.mxu0 %v4469_v47  ;;  %v4453_v44 = vmul.f32 %v12138_v18, %v4422_v59  ;;  %v4455_v10 = vmul.f32 %v12138_v18, %v4423_v52  ;;  %v8311_v59 = vld [vmem:[%s13862_s2 + $0x88] sm:$0xff]  ;;  %v8310_v52 = vld [vmem:[%s13862_s2 + $0x80] sm:$0xff] }
 0x487   : > { %v9153_v11 = vunpack.i.h.bf16 %v9151_v43  ;;  %v9152_v48 = vunpack.i.l.bf16 %v9151_v43  ;;  %v9148_v61 = vunpack.i.h.bf16 %v9146_v54  ;;  %v9147_v30 = vunpack.i.l.bf16 %v9146_v54  ;;  %4524 = vmatpush1.bf16.msra.mxu0 %v4468_v60  ;;  %6186 = vperm.xlu1 %8793, %v8316_v36   ;;  %v12265_v43 = vld [vmem:[%s13863_s3 + $0x3] ss:$8 sm:$0x3] }
 0x488   : > { %6191 = vperm.xlu0 %8792, %v8317_v6   ;;  %v4467_v20 = vpack.c.bf16 %v4455_v10, %v4453_v44  ;;  %v4466_v51 = vpack.c.bf16 %v4454_v24, %v4452_v22  ;;  %v9156_v39 = vpop.permute.xlu1 %9155  ;;  %v12239_v35 = vrot.slane %v8240_v12, %v13950_v63  ;;  %v12242_v21 = vrot.slane %v8240_v12, %v13951_v46 }
 0x489   : > { %v4429_v23 = vsel %vm384_vm0, %v9153_v11, %v9148_v61  ;;  %v4428_v16 = vsel %vm384_vm0, %v9152_v48, %v9147_v30  ;;  %v4420_v33 = vsel %vm384_vm0, %v9147_v30, %v9152_v48  ;;  %v4421_v19 = vsel %vm384_vm0, %v9148_v61, %v9153_v11 }
 0x48a   : > { %v4450_v4 = vmul.f32 %v12135_v32, %v4429_v23  ;;  %v4448_v28 = vmul.f32 %v12135_v32, %v4428_v16  ;;  %v9161_v58 = vpop.permute.xlu0 %9160  ;;  %4525 = vmatprep.subr.bf16.mxu0 %v4467_v20  ;;  %v4449_v25 = vmul.f32 %v12138_v18, %v4420_v33  ;;  %v4451_v17 = vmul.f32 %v12138_v18, %v4421_v19  ;;  %v8313_v18 = vld [vmem:[%s13862_s2 + $0x98] sm:$0xff] }
 0x48b   : > { %v9163_v57 = vunpack.i.h.bf16 %v9161_v58  ;;  %v9162_v50 = vunpack.i.l.bf16 %v9161_v58  ;;  %v9158_v2 = vunpack.i.h.bf16 %v9156_v39  ;;  %v9157_v15 = vunpack.i.l.bf16 %v9156_v39  ;;  %4526 = vmatpush1.bf16.msra.mxu0 %v4466_v51  ;;  %6176 = vperm.xlu1 %8793, %v8314_v34  }
 0x48c   : > { %6181 = vperm.xlu0 %8792, %v8315_v7   ;;  %v4465_v26 = vpack.c.bf16 %v4451_v17, %v4449_v25  ;;  %v4464_v32 = vpack.c.bf16 %v4450_v4, %v4448_v28  ;;  %v9166_v53 = vpop.permute.xlu1 %9165  ;;  %v13953_v16 = vmov 0   ;;  %v12279_v7 = vrot.slane %v12265_v43, %v13950_v63  ;;  %v9827_v25 = vld [vmem:[#allocation3 + $0x268] sm:$0xff]  }
 0x48d   : > { %v4340_v41 = vsel %vm291_vm1, %v9163_v57, %v9158_v2  ;;  %v4339_v40 = vsel %vm291_vm1, %v9162_v50, %v9157_v15  ;;  %v4331_v13 = vsel %vm291_vm1, %v9157_v15, %v9162_v50  ;;  %v4332_v3 = vsel %vm291_vm1, %v9158_v2, %v9163_v57 }
 0x48e   : > { %v9171_v8 = vpop.permute.xlu0 %9170  ;;  %4527 = vmatprep.subr.bf16.mxu0 %v4465_v26  ;;  %v9168_v47 = vunpack.i.h.bf16 %v9166_v53  ;;  %v9167_v60 = vunpack.i.l.bf16 %v9166_v53  ;;  %v12245_v6 = vmul.f32 %v12216_v62, %v4340_v41  ;;  %v12248_v36 = vmul.f32 %v12216_v62, %v4339_v40 }
 0x48f   : > { %v9173_v0 = vunpack.i.h.bf16 %v9171_v8  ;;  %v9172_v9 = vunpack.i.l.bf16 %v9171_v8  ;;  %4528 = vmatpush1.bf16.msra.mxu0 %v4464_v32  ;;  %6166 = vperm.xlu1 %8793, %v8312_v31   ;;  %v12257_v24 = vmul.f32 %v12228_v49, %v4331_v13  ;;  %v12260_v22 = vmul.f32 %v12228_v49, %v4332_v3 }
 0x490   : > { %6171 = vperm.xlu0 %8792, %v8313_v18   ;;  %v9176_v11 = vpop.permute.xlu1 %9175  ;;  %v4375_v4 = vpack.c.bf16 %v12245_v6, %v12248_v36 }
 0x491   : > { %v4736_v54 = vsel %vm690_vm2, %v9173_v0, %v9168_v47  ;;  %v4735_v44 = vsel %vm690_vm2, %v9172_v9, %v9167_v60  ;;  %v4727_v48 = vsel %vm690_vm2, %v9167_v60, %v9172_v9  ;;  %v4728_v61 = vsel %vm690_vm2, %v9168_v47, %v9173_v0 }
 0x492   : > { %v9181_v10 = vpop.permute.xlu0 %9180  ;;  %8228 = vmatmul.mubr.msk.bf16.vlgmr.msra.gmra.mxu0 %vm467_vm3, %v9826_v37  ;;  %v9178_v51 = vunpack.i.h.bf16 %v9176_v11  ;;  %v9177_v23 = vunpack.i.l.bf16 %v9176_v11  ;;  %v4376_v19 = vpack.c.bf16 %v12260_v22, %v12257_v24  ;;  %v12290_v28 = vmul.f32 %v12239_v35, %v4736_v54 }
 0x493   : > { %v9183_v30 = vunpack.i.h.bf16 %v9181_v10  ;;  %v9182_v20 = vunpack.i.l.bf16 %v9181_v10  ;;  %4555 = vmatprep.mubr.bf16.mxu0 %v13953_v16  ;;  %6156 = vperm.xlu1 %8793, %v8310_v52   ;;  %v12293_v58 = vmul.f32 %v12239_v35, %v4735_v44  ;;  %v12296_v17 = vmul.f32 %v12242_v21, %v4727_v48 }
 0x494   : > { %6161 = vperm.xlu0 %8792, %v8311_v59   ;;  %v9186_v39 = vpop.permute.xlu1 %9185  ;;  %v12299_v57 = vmul.f32 %v12242_v21, %v4728_v61 }
 0x495   : > { %v4338_v34 = vsel %vm291_vm1, %v9183_v30, %v9178_v51  ;;  %v4337_v33 = vsel %vm291_vm1, %v9182_v20, %v9177_v23  ;;  %v9188_v15 = vunpack.i.h.bf16 %v9186_v39  ;;  %v9187_v26 = vunpack.i.l.bf16 %v9186_v39 }
 0x496   : > { %v9191_v1 = vpop.permute.xlu0 %9190  ;;  %v12302_v32 = vmul.f32 %v12216_v62, %v4338_v34  ;;  %v12305_v12 = vmul.f32 %v12216_v62, %v4337_v33  ;;  %v4329_v18 = vsel %vm291_vm1, %v9177_v23, %v9182_v20  ;;  %v4330_v31 = vsel %vm291_vm1, %v9178_v51, %v9183_v30  ;;  %v9828_v33 = vld [vmem:[#allocation3 + $0x270] sm:$0xff]  }
 0x497   : > { %v9193_v50 = vunpack.i.h.bf16 %v9191_v1  ;;  %v9192_v2 = vunpack.i.l.bf16 %v9191_v1  ;;  %v4360_v44 = vmul.f32 %v12228_v49, %v4329_v18  ;;  %v4362_v10 = vmul.f32 %v12228_v49, %v4330_v31 }
 0x498   : > { %v9196_v0 = vpop.permute.xlu1 %9195  ;;  %v4772_v31 = vpack.c.bf16 %v12299_v57, %v12296_v17 }
 0x499   : > { %v4342_v41 = vsel %vm291_vm1, %v9193_v50, %v9188_v15  ;;  %v4341_v40 = vsel %vm291_vm1, %v9192_v2, %v9187_v26  ;;  %v4333_v8 = vsel %vm291_vm1, %v9187_v26, %v9192_v2  ;;  %v4334_v53 = vsel %vm291_vm1, %v9188_v15, %v9193_v50 }
 0x49a   : > { %v4369_v37 = vmul.f32 %v12216_v62, %v4342_v41  ;;  %v4367_v13 = vmul.f32 %v12216_v62, %v4341_v40  ;;  %v9206_v3 = vpop.permute.xlu0 %9205  ;;  %8229 = vmatmul.mubr.msk.bf16.gmra.mxu0 %vm467_vm3, %v9827_v25  ;;  %v4368_v9 = vmul.f32 %v12228_v49, %v4333_v8  ;;  %v4370_v47 = vmul.f32 %v12228_v49, %v4334_v53 }
 0x49b   : > { %v9208_v60 = vunpack.i.h.bf16 %v9206_v3  ;;  %v9207_v59 = vunpack.i.l.bf16 %v9206_v3  ;;  %v9198_v52 = vunpack.i.h.bf16 %v9196_v0  ;;  %v9197_v24 = vunpack.i.l.bf16 %v9196_v0  ;;  %4565 = vmatprep.mubr.bf16.mxu0 %v13953_v16 }
 0x49c   : > { %v4378_v22 = vpack.c.bf16 %v4370_v47, %v4368_v9  ;;  %v4377_v54 = vpack.c.bf16 %v4369_v37, %v4367_v13  ;;  %v9201_v34 = vpop.permute.xlu1 %9200  ;;  %v4771_v41 = vpack.c.bf16 %v12290_v28, %v12293_v58  ;;  %v4374_v17 = vpack.c.bf16 %v4362_v10, %v4360_v44  ;;  %v9829_v44 = vld [vmem:[#allocation3 + $0x278] sm:$0xff]  }
 0x49d   : > { %v4738_v11 = vsel %vm690_vm2, %v9208_v60, %v9198_v52  ;;  %v4737_v48 = vsel %vm690_vm2, %v9207_v59, %v9197_v24  ;;  %v4729_v61 = vsel %vm690_vm2, %v9197_v24, %v9207_v59  ;;  %v4730_v30 = vsel %vm690_vm2, %v9198_v52, %v9208_v60 }
 0x49e   : > { %v4765_v20 = vmul.f32 %v12239_v35, %v4738_v11  ;;  %v4763_v51 = vmul.f32 %v12239_v35, %v4737_v48  ;;  %v9211_v23 = vpop.permute.xlu0 %9210  ;;  %4626 = vmatprep.subr.bf16.mxu1 %v4378_v22  ;;  %v4764_v1 = vmul.f32 %v12242_v21, %v4729_v61  ;;  %v4766_v39 = vmul.f32 %v12242_v21, %v4730_v30 }
 0x49f   : > { %v9213_v25 = vunpack.i.h.bf16 %v9211_v23  ;;  %v9212_v50 = vunpack.i.l.bf16 %v9211_v23  ;;  %v9203_v2 = vunpack.i.h.bf16 %v9201_v34  ;;  %v9202_v15 = vunpack.i.l.bf16 %v9201_v34  ;;  %4627 = vmatpush1.bf16.msra.mxu1 %v4377_v54 }
 0x4a0   : > { %4628 = vmatprep.subr.bf16.mxu1 %v4376_v19  ;;  %v4774_v26 = vpack.c.bf16 %v4766_v39, %v4764_v1  ;;  %v4773_v18 = vpack.c.bf16 %v4765_v20, %v4763_v51  ;;  %v9216_v13 = vpop.permute.xlu1 %9215  ;;  %v4373_v28 = vpack.c.bf16 %v12302_v32, %v12305_v12 }
 0x4a1   : > { %v4734_v40 = vsel %vm690_vm2, %v9213_v25, %v9203_v2  ;;  %v4733_v8 = vsel %vm690_vm2, %v9212_v50, %v9202_v15  ;;  %v4725_v53 = vsel %vm690_vm2, %v9202_v15, %v9212_v50  ;;  %v4726_v19 = vsel %vm690_vm2, %v9203_v2, %v9213_v25 }
 0x4a2   : > { %v9221_v37 = vpop.permute.xlu0 %9220  ;;  %8230 = vmatmul.mubr.msk.bf16.gmra.mxu0 %vm467_vm3, %v9828_v33  ;;  %4824 = vmatprep.subr.bf16.mxu0 %v4774_v26  ;;  %v4756_v58 = vmul.f32 %v12242_v21, %v4725_v53  ;;  %v9218_v0 = vunpack.i.h.bf16 %v9216_v13  ;;  %v9217_v9 = vunpack.i.l.bf16 %v9216_v13  ;;  %v4757_v47 = vmul.f32 %v12239_v35, %v4734_v40  ;;  %v9830_v40 = vld [vmem:[#allocation3 + $0x240] sm:$0xff]  }
 0x4a3   : > { %v9223_v57 = vunpack.i.h.bf16 %v9221_v37  ;;  %v9222_v3 = vunpack.i.l.bf16 %v9221_v37  ;;  %4629 = vmatpush1.bf16.msra.mxu1 %v4375_v4  ;;  %4825 = vmatpush1.bf16.msra.mxu0 %v4773_v18  ;;  %v4755_v60 = vmul.f32 %v12239_v35, %v4733_v8  ;;  %v4758_v59 = vmul.f32 %v12242_v21, %v4726_v19 }
 0x4a4   : > { %4630 = vmatprep.subr.bf16.mxu1 %v4374_v17  ;;  %4826 = vmatprep.subr.bf16.mxu0 %v4772_v31  ;;  %v9226_v22 = vpop.permute.xlu1 %9225 }
 0x4a5   : > { %v4336_v32 = vsel %vm291_vm1, %v9223_v57, %v9218_v0  ;;  %v4335_v12 = vsel %vm291_vm1, %v9222_v3, %v9217_v9  ;;  %4575 = vmatprep.mubr.bf16.mxu0 %v13953_v16  ;;  %v4327_v6 = vsel %vm291_vm1, %v9217_v9, %v9222_v3  ;;  %v4328_v36 = vsel %vm291_vm1, %v9218_v0, %v9223_v57 }
 0x4a6   : > { %v4357_v4 = vmul.f32 %v12216_v62, %v4336_v32  ;;  %v4355_v52 = vmul.f32 %v12216_v62, %v4335_v12  ;;  %v9231_v24 = vpop.permute.xlu0 %9230  ;;  %v4770_v54 = vpack.c.bf16 %v4758_v59, %v4756_v58  ;;  %v4356_v10 = vmul.f32 %v12228_v49, %v4327_v6  ;;  %v9831_v59 = vld [vmem:[#allocation3 + $0x280] sm:$0xff]  }
 0x4a7   : > { %v9233_v11 = vunpack.i.h.bf16 %v9231_v24  ;;  %v9232_v48 = vunpack.i.l.bf16 %v9231_v24  ;;  %v9228_v61 = vunpack.i.h.bf16 %v9226_v22  ;;  %v9227_v30 = vunpack.i.l.bf16 %v9226_v22  ;;  %4631 = vmatpush1.bf16.msra.mxu1 %v4373_v28  ;;  %4827 = vmatpush1.bf16.msra.mxu0 %v4771_v41 }
 0x4a8   : > { %4828 = vmatprep.subr.bf16.mxu0 %v4770_v54  ;;  %v4358_v20 = vmul.f32 %v12228_v49, %v4328_v36  ;;  %v4371_v51 = vpack.c.bf16 %v4357_v4, %v4355_v52  ;;  %v4769_v23 = vpack.c.bf16 %v4757_v47, %v4755_v60  ;;  %v12376_v62 = vrot.slane %v12265_v43, %v13951_v46  ;;  %v9236_v2 = vpop.permute.xlu1 %9235 }
 0x4a9   : > { %v4732_v34 = vsel %vm690_vm2, %v9233_v11, %v9228_v61  ;;  %v4731_v33 = vsel %vm690_vm2, %v9232_v48, %v9227_v30  ;;  %v4723_v1 = vsel %vm690_vm2, %v9227_v30, %v9232_v48  ;;  %v4724_v39 = vsel %vm690_vm2, %v9228_v61, %v9233_v11 }
 0x4aa   : > { %v4753_v49 = vmul.f32 %v12239_v35, %v4732_v34  ;;  %v4751_v25 = vmul.f32 %v12239_v35, %v4731_v33  ;;  %v9246_v50 = vpop.permute.xlu0 %9245  ;;  %8231 = vmatmul.mubr.msk.bf16.gmra.mxu0 %vm467_vm3, %v9829_v44  ;;  %v4372_v43 = vpack.c.bf16 %v4358_v20, %v4356_v10  ;;  %v4752_v15 = vmul.f32 %v12242_v21, %v4723_v1  ;;  %v9832_v20 = vld [vmem:[#allocation3 + $0x248] sm:$0xff]  }
 0x4ab   : > { %v9248_v26 = vunpack.i.h.bf16 %v9246_v50  ;;  %v9247_v18 = vunpack.i.l.bf16 %v9246_v50  ;;  %v9238_v31 = vunpack.i.h.bf16 %v9236_v2  ;;  %v9237_v41 = vunpack.i.l.bf16 %v9236_v2  ;;  %4829 = vmatpush1.bf16.msra.mxu0 %v4769_v23  ;;  %4848 = vmatprep.mubr.bf16.mxu0 %v13953_v16 }
 0x4ac   : > { %4632 = vmatprep.subr.bf16.mxu1 %v4372_v43  ;;  %v4754_v8 = vmul.f32 %v12242_v21, %v4724_v39  ;;  %v4767_v53 = vpack.c.bf16 %v4753_v49, %v4751_v25  ;;  %v9241_v21 = vpop.permute.xlu1 %9240 }
 0x4ad   : > { %v4952_v35 = vsel %vm906_vm4, %v9248_v26, %v9238_v31  ;;  %v4951_v19 = vsel %vm906_vm4, %v9247_v18, %v9237_v41  ;;  %4633 = vmatpush1.bf16.msra.mxu1 %v4371_v51  ;;  %v4943_v37 = vsel %vm906_vm4, %v9237_v41, %v9247_v18  ;;  %v4944_v13 = vsel %vm906_vm4, %v9238_v31, %v9248_v26 }
 0x4ae   : > { %v4979_v17 = vmul.f32 %v12279_v7, %v4952_v35  ;;  %v4977_v28 = vmul.f32 %v12279_v7, %v4951_v19  ;;  %v9251_v58 = vpop.permute.xlu0 %9250  ;;  %v4768_v57 = vpack.c.bf16 %v4754_v8, %v4752_v15  ;;  %v4978_v3 = vmul.f32 %v12376_v62, %v4943_v37 }
 0x4af   : > { %v9253_v0 = vunpack.i.h.bf16 %v9251_v58  ;;  %v9252_v9 = vunpack.i.l.bf16 %v9251_v58  ;;  %v9243_v47 = vunpack.i.h.bf16 %v9241_v21  ;;  %v9242_v60 = vunpack.i.l.bf16 %v9241_v21 }
 0x4b0   : > { %8236 = vmatmul.mubr.msk.bf16.vlgmr.msra.gmra.mxu1 %vm467_vm3, %v9830_v40  ;;  %4830 = vmatprep.subr.bf16.mxu0 %v4768_v57  ;;  %v4980_v32 = vmul.f32 %v12376_v62, %v4944_v13  ;;  %v4987_v12 = vpack.c.bf16 %v4979_v17, %v4977_v28  ;;  %v9256_v54 = vpop.permute.xlu1 %9255 }
 0x4b1   : > { %v4950_v6 = vsel %vm906_vm4, %v9253_v0, %v9243_v47  ;;  %v4949_v36 = vsel %vm906_vm4, %v9252_v9, %v9242_v60  ;;  %4831 = vmatpush1.bf16.msra.mxu0 %v4767_v53  ;;  %4660 = vmatprep.mubr.bf16.mxu1 %v13953_v16  ;;  %v4941_v4 = vsel %vm906_vm4, %v9242_v60, %v9252_v9  ;;  %v9258_v61 = vunpack.i.h.bf16 %v9256_v54  ;;  %v8274_v53 = vld [vmem:[%s13863_s3 + $0x5] ss:$8 sm:$0x3] }
 0x4b2   : > { %v4975_v52 = vmul.f32 %v12279_v7, %v4950_v6  ;;  %v4973_v24 = vmul.f32 %v12279_v7, %v4949_v36  ;;  %5208 = vmatprep.subr.bf16.mxu0 %v12043_v55  ;;  %v9261_v22 = vpop.permute.xlu0 %9260  ;;  %v4988_v44 = vpack.c.bf16 %v4980_v32, %v4978_v3  ;;  %v4942_v10 = vsel %vm906_vm4, %v9243_v47, %v9253_v0 }
 0x4b3   : > { %v9263_v11 = vunpack.i.h.bf16 %v9261_v22  ;;  %v9262_v48 = vunpack.i.l.bf16 %v9261_v22  ;;  %v9257_v30 = vunpack.i.l.bf16 %v9256_v54  ;;  %v4974_v51 = vmul.f32 %v12376_v62, %v4941_v4 }
 0x4b4   : > { %8245 = vmatmul.mubr.msk.bf16.vlgmr.msra.gmra.mxu0 %vm467_vm3, %v9831_v59  ;;  %5038 = vmatprep.subr.bf16.mxu1 %v4988_v44  ;;  %v4976_v23 = vmul.f32 %v12376_v62, %v4942_v10  ;;  %v4985_v34 = vpack.c.bf16 %v4975_v52, %v4973_v24  ;;  %v9266_v50 = vpop.permute.xlu1 %9265  ;;  %v12451_v3 = vrot.slane %v8274_v53, %v13950_v63  ;;  %v9835_v44 = vld [vmem:[#allocation3 + $0x290] sm:$0xff]  }
 0x4b5   : > { %v4948_v55 = vsel %vm906_vm4, %v9263_v11, %v9258_v61  ;;  %v4947_v33 = vsel %vm906_vm4, %v9262_v48, %v9257_v30  ;;  %5039 = vmatpush1.bf16.msra.mxu1 %v4987_v12  ;;  %5209 = vmatpush1.bf16.msra.mxu0 %v12045_v14  ;;  %v4939_v1 = vsel %vm906_vm4, %v9257_v30, %v9262_v48  ;;  %v9268_v26 = vunpack.i.h.bf16 %v9266_v50  ;;  %v9833_v14 = vld [vmem:[#allocation3 + $0x288] sm:$0xff]  }
 0x4b6   : > { %v4971_v39 = vmul.f32 %v12279_v7, %v4948_v55  ;;  %v4969_v49 = vmul.f32 %v12279_v7, %v4947_v33  ;;  %5210 = vmatprep.subr.bf16.mxu0 %v12038_v27  ;;  %v9271_v25 = vpop.permute.xlu0 %9270  ;;  %v4986_v2 = vpack.c.bf16 %v4976_v23, %v4974_v51  ;;  %4858 = vmatprep.mubr.bf16.mxu0 %v13953_v16  ;;  %v9267_v18 = vunpack.i.l.bf16 %v9266_v50 }
 0x4b7   : > { %v9273_v43 = vunpack.i.h.bf16 %v9271_v25  ;;  %v9272_v15 = vunpack.i.l.bf16 %v9271_v25  ;;  %v4940_v31 = vsel %vm906_vm4, %v9258_v61, %v9263_v11  ;;  %v4970_v41 = vmul.f32 %v12376_v62, %v4939_v1 }
 0x4b8   : > { %8237 = vmatmul.mubr.msk.bf16.gmra.mxu1 %vm467_vm3, %v9832_v20  ;;  %5040 = vmatprep.subr.bf16.mxu1 %v4986_v2  ;;  %v4983_v40 = vpack.c.bf16 %v4971_v39, %v4969_v49  ;;  %v4972_v35 = vmul.f32 %v12376_v62, %v4940_v31  ;;  %v9276_v17 = vpop.permute.xlu1 %9275  ;;  %v12461_v59 = vrot.slane %v8274_v53, %v13951_v46  ;;  %v9836_v2 = vld [vmem:[#allocation3 + $0x258] sm:$0xff]  }
 0x4b9   : > { %v4946_v27 = vsel %vm906_vm4, %v9273_v43, %v9268_v26  ;;  %v4945_v8 = vsel %vm906_vm4, %v9272_v15, %v9267_v18  ;;  %5041 = vmatpush1.bf16.msra.mxu1 %v4985_v34  ;;  %5211 = vmatpush1.bf16.msra.mxu0 %v12040_v29  ;;  %v4937_v28 = vsel %vm906_vm4, %v9267_v18, %v9272_v15  ;;  %v9278_v21 = vunpack.i.h.bf16 %v9276_v17 }
 0x4ba   : > { %v4967_v19 = vmul.f32 %v12279_v7, %v4946_v27  ;;  %v4965_v37 = vmul.f32 %v12279_v7, %v4945_v8  ;;  %5212 = vmatprep.subr.bf16.mxu0 %v12024_v5  ;;  %v9281_v13 = vpop.permute.xlu0 %9280  ;;  %4670 = vmatprep.mubr.bf16.mxu1 %v13953_v16  ;;  %v9277_v57 = vunpack.i.l.bf16 %v9276_v17  ;;  %v4984_v0 = vpack.c.bf16 %v4972_v35, %v4970_v41  ;;  %v9834_v7 = vld [vmem:[#allocation3 + $0x250] sm:$0xff]   ;;  %v9837_v17 = vld [vmem:[#allocation3 + $0x298] sm:$0xff]  }
 0x4bb   : > { %v9283_v29 = vunpack.i.h.bf16 %v9281_v13  ;;  %v9282_v58 = vunpack.i.l.bf16 %v9281_v13  ;;  %v4938_v5 = vsel %vm906_vm4, %v9268_v26, %v9273_v43  ;;  %v4966_v9 = vmul.f32 %v12376_v62, %v4937_v28 }
 0x4bc   : > { %8246 = vmatmul.mubr.msk.bf16.gmra.mxu0 %vm467_vm3, %v9833_v14  ;;  %v4968_v47 = vmul.f32 %v12376_v62, %v4938_v5  ;;  %v4981_v60 = vpack.c.bf16 %v4967_v19, %v4965_v37  ;;  %5042 = vmatprep.subr.bf16.mxu1 %v4984_v0  ;;  %v9286_v62 = vpop.permute.xlu1 %9285 }
 0x4bd   : > { %5213 = vmatpush1.bf16.msra.mxu0 %v12026_v38  ;;  %4868 = vmatprep.mubr.bf16.mxu0 %v13953_v16  ;;  %v5326_v32 = vsel %vm1292_vm5, %v9278_v21, %v9283_v29  ;;  %v5325_v12 = vsel %vm1292_vm5, %v9277_v57, %v9282_v58  ;;  %v8283_v38 = vld [vmem:[%s13863_s3 + $0x6] ss:$8 sm:$0x3]  ;;  %v5333_v36 = vsel %vm1292_vm5, %v9282_v58, %v9277_v57  ;;  %v9288_v24 = vunpack.i.h.bf16 %v9286_v62 }
 0x4be   : > { %5214 = vmatprep.subr.bf16.mxu0 %v12004_v45  ;;  %v9291_v6 = vpop.permute.xlu0 %9290  ;;  %5043 = vmatpush1.bf16.msra.mxu1 %v4983_v40  ;;  %v9287_v22 = vunpack.i.l.bf16 %v9286_v62  ;;  %v4982_v54 = vpack.c.bf16 %v4968_v47, %v4966_v9  ;;  %v5334_v45 = vsel %vm1292_vm5, %v9283_v29, %v9278_v21  ;;  %v12477_v10 = vmul.f32 %v12451_v3, %v5326_v32 }
 0x4bf   : > { %v9293_v4 = vunpack.i.h.bf16 %v9291_v6  ;;  %v9292_v52 = vunpack.i.l.bf16 %v9291_v6  ;;  %v12480_v11 = vmul.f32 %v12451_v3, %v5325_v12  ;;  %v12483_v48 = vrot.slane %v8283_v38, %v13950_v63 }
 0x4c0   : > { %8238 = vmatmul.mubr.msk.bf16.gmra.mxu1 %vm467_vm3, %v9834_v7  ;;  %5044 = vmatprep.subr.bf16.mxu1 %v4982_v54  ;;  %v9296_v20 = vpop.permute.xlu1 %9295  ;;  %v12490_v51 = vmul.f32 %v12461_v59, %v5333_v36  ;;  %v12493_v23 = vmul.f32 %v12461_v59, %v5334_v45  ;;  %v12496_v34 = vrot.slane %v8283_v38, %v13951_v46  ;;  %v9838_v36 = vld [vmem:[#allocation3 + $0x2a0] sm:$0xff]  }
 0x4c1   : > { %5215 = vmatpush1.bf16.msra.mxu0 %v12006_v56  ;;  %4680 = vmatprep.mubr.bf16.mxu1 %v13953_v16  ;;  %v5540_v61 = vsel %vm1508_vm6, %v9288_v24, %v9293_v4  ;;  %v12501_v56 = vld [vmem:[%s13863_s3 + $0x7] ss:$8 sm:$0x3]  ;;  %v5539_v55 = vsel %vm1508_vm6, %v9287_v22, %v9292_v52  ;;  %v5547_v33 = vsel %vm1508_vm6, %v9292_v52, %v9287_v22  ;;  %v9298_v25 = vunpack.i.h.bf16 %v9296_v20 }
 0x4c2   : > { %v9301_v30 = vpop.permute.xlu0 %9300  ;;  %5045 = vmatpush1.bf16.msra.mxu1 %v4981_v60  ;;  %v5548_v1 = vsel %vm1508_vm6, %v9293_v4, %v9288_v24  ;;  %v9297_v50 = vunpack.i.l.bf16 %v9296_v20  ;;  %v12511_v43 = vmul.f32 %v12483_v48, %v5540_v61  ;;  %v5369_v15 = vpack.c.bf16 %v12477_v10, %v12480_v11  ;;  %v9841_v11 = vld [vmem:[#allocation3 + $0x2c8] sm:$0xff]  }
 0x4c3   : > { %v9303_v39 = vunpack.i.h.bf16 %v9301_v30  ;;  %v9302_v49 = vunpack.i.l.bf16 %v9301_v30  ;;  %v12518_v26 = vrot.slane %v12501_v56, %v13950_v63  ;;  %v12521_v18 = vmul.f32 %v12483_v48, %v5539_v55 }
 0x4c4   : > { %8247 = vmatmul.mubr.msk.bf16.gmra.mxu0 %vm467_vm3, %v9835_v44  ;;  %v9306_v31 = vpop.permute.xlu1 %9305  ;;  %v5370_v41 = vpack.c.bf16 %v12493_v23, %v12490_v51  ;;  %v12526_v40 = vmul.f32 %v12496_v34, %v5547_v33  ;;  %v12529_v27 = vmul.f32 %v12496_v34, %v5548_v1 }
 0x4c5   : > { %4878 = vmatprep.mubr.bf16.mxu0 %v13953_v16  ;;  %v9308_v35 = vunpack.i.h.bf16 %v9306_v31  ;;  %v9307_v19 = vunpack.i.l.bf16 %v9306_v31  ;;  %v5324_v37 = vsel %vm1292_vm5, %v9298_v25, %v9303_v39  ;;  %v5323_v13 = vsel %vm1292_vm5, %v9297_v50, %v9302_v49 }
 0x4c6   : > { %v9311_v14 = vpop.permute.xlu0 %9310  ;;  %v5331_v28 = vsel %vm1292_vm5, %v9302_v49, %v9297_v50  ;;  %v5332_v29 = vsel %vm1292_vm5, %v9303_v39, %v9298_v25  ;;  %v5353_v31 = vmul.f32 %v12451_v3, %v5323_v13 }
 0x4c7   : > { %v9313_v8 = vunpack.i.h.bf16 %v9311_v14  ;;  %v9312_v53 = vunpack.i.l.bf16 %v9311_v14  ;;  %v5354_v24 = vmul.f32 %v12461_v59, %v5331_v28  ;;  %v5356_v22 = vmul.f32 %v12461_v59, %v5332_v29 }
 0x4c8   : > { %8239 = vmatmul.mubr.msk.bf16.gmra.mxu1 %vm467_vm3, %v9836_v2  ;;  %v9316_v47 = vpop.permute.xlu1 %9315  ;;  %v5355_v14 = vmul.f32 %v12451_v3, %v5324_v37 }
 0x4c9   : > { %v5328_v58 = vsel %vm1292_vm5, %v9308_v35, %v9313_v8  ;;  %v5327_v21 = vsel %vm1292_vm5, %v9307_v19, %v9312_v53  ;;  %5062 = vmatprep.mubr.bf16.mxu1 %v13953_v16  ;;  %v5335_v57 = vsel %vm1292_vm5, %v9312_v53, %v9307_v19  ;;  %v5336_v0 = vsel %vm1292_vm5, %v9313_v8, %v9308_v35  ;;  %v9839_v8 = vld [vmem:[#allocation3 + $0x2c0] sm:$0xff]  }
 0x4ca   : > { %v5363_v7 = vmul.f32 %v12451_v3, %v5328_v58  ;;  %v5361_v5 = vmul.f32 %v12451_v3, %v5327_v21  ;;  %v9326_v9 = vpop.permute.xlu0 %9325  ;;  %v5362_v60 = vmul.f32 %v12461_v59, %v5335_v57  ;;  %v5364_v32 = vmul.f32 %v12461_v59, %v5336_v0 }
 0x4cb   : > { %v9328_v12 = vunpack.i.h.bf16 %v9326_v9  ;;  %v9327_v6 = vunpack.i.l.bf16 %v9326_v9  ;;  %v9318_v38 = vunpack.i.h.bf16 %v9316_v47  ;;  %v9317_v62 = vunpack.i.l.bf16 %v9316_v47  ;;  %v9840_v9 = vld [vmem:[#allocation3 + $0x2a8] sm:$0xff]  }
 0x4cc   : > { %8248 = vmatmul.mubr.msk.bf16.gmra.mxu0 %vm467_vm3, %v9837_v17  ;;  %v5372_v4 = vpack.c.bf16 %v5364_v32, %v5362_v60  ;;  %v5371_v52 = vpack.c.bf16 %v5363_v7, %v5361_v5  ;;  %v9321_v33 = vpop.permute.xlu1 %9320  ;;  %v5583_v35 = vpack.c.bf16 %v12511_v43, %v12521_v18  ;;  %v5368_v37 = vpack.c.bf16 %v5356_v22, %v5354_v24 }
 0x4cd   : > { %v5542_v54 = vsel %vm1508_vm6, %v9318_v38, %v9328_v12  ;;  %v5550_v44 = vsel %vm1508_vm6, %v9328_v12, %v9318_v38  ;;  %v5541_v45 = vsel %vm1508_vm6, %v9317_v62, %v9327_v6  ;;  %v5549_v61 = vsel %vm1508_vm6, %v9327_v6, %v9317_v62  ;;  %5232 = vmatprep.mubr.bf16.mxu0 %v13953_v16 }
 0x4ce   : > { %v5577_v30 = vmul.f32 %v12483_v48, %v5542_v54  ;;  %v5575_v20 = vmul.f32 %v12483_v48, %v5541_v45  ;;  %v9331_v55 = vpop.permute.xlu0 %9330  ;;  %5422 = vmatprep.subr.bf16.mxu1 %v5372_v4  ;;  %v5576_v1 = vmul.f32 %v12496_v34, %v5549_v61  ;;  %v5578_v39 = vmul.f32 %v12496_v34, %v5550_v44 }
 0x4cf   : > { %v9333_v49 = vunpack.i.h.bf16 %v9331_v55  ;;  %v9332_v25 = vunpack.i.l.bf16 %v9331_v55  ;;  %v9323_v50 = vunpack.i.h.bf16 %v9321_v33  ;;  %v9322_v2 = vunpack.i.l.bf16 %v9321_v33 }
 0x4d0   : > { %8254 = vmatmul.mubr.msk.bf16.vlgmr.msra.gmra.mxu1 %vm467_vm3, %v9838_v36  ;;  %v5586_v53 = vpack.c.bf16 %v5578_v39, %v5576_v1  ;;  %v9336_v43 = vpop.permute.xlu1 %9335  ;;  %v5585_v18 = vpack.c.bf16 %v5577_v30, %v5575_v20  ;;  %v5584_v58 = vpack.c.bf16 %v12529_v27, %v12526_v40  ;;  %v5367_v51 = vpack.c.bf16 %v5355_v14, %v5353_v31 }
 0x4d1   : > { %v5538_v19 = vsel %vm1508_vm6, %v9323_v50, %v9333_v49  ;;  %v5546_v17 = vsel %vm1508_vm6, %v9333_v49, %v9323_v50  ;;  %v5545_v28 = vsel %vm1508_vm6, %v9332_v25, %v9322_v2  ;;  %5423 = vmatpush1.bf16.msra.mxu1 %v5371_v52  ;;  %v5537_v13 = vsel %vm1508_vm6, %v9322_v2, %v9332_v25  ;;  %v9842_v2 = vld [vmem:[#allocation3 + $0x2b0] sm:$0xff]  }
 0x4d2   : > { %5424 = vmatprep.subr.bf16.mxu1 %v5370_v41  ;;  %v9341_v29 = vpop.permute.xlu0 %9340  ;;  %5636 = vmatprep.subr.bf16.mxu0 %v5586_v53  ;;  %v9338_v0 = vunpack.i.h.bf16 %v9336_v43  ;;  %v9337_v7 = vunpack.i.l.bf16 %v9336_v43  ;;  %v5569_v5 = vmul.f32 %v12483_v48, %v5538_v19  ;;  %v5568_v23 = vmul.f32 %v12496_v34, %v5545_v28  ;;  %v8301_v28 = vld [vmem:[%s13863_s3 + $0x10] ss:$8 sm:$0x3] }
 0x4d3   : > { %v9343_v21 = vunpack.i.h.bf16 %v9341_v29  ;;  %v9342_v57 = vunpack.i.l.bf16 %v9341_v29  ;;  %5072 = vmatprep.mubr.bf16.mxu1 %v13953_v16  ;;  %v5570_v41 = vmul.f32 %v12496_v34, %v5546_v17  ;;  %v5567_v32 = vmul.f32 %v12483_v48, %v5537_v13 }
 0x4d4   : > { %8270 = vmatmul.mubr.msk.bf16.vlgmr.msra.gmra.mxu0 %vm467_vm3, %v9839_v8  ;;  %v9346_v62 = vpop.permute.xlu1 %9345 }
 0x4d5   : > { %v5322_v47 = vsel %vm1292_vm5, %v9338_v0, %v9343_v21  ;;  %v5330_v40 = vsel %vm1292_vm5, %v9343_v21, %v9338_v0  ;;  %v5321_v27 = vsel %vm1292_vm5, %v9337_v7, %v9342_v57  ;;  %v5329_v60 = vsel %vm1292_vm5, %v9342_v57, %v9337_v7  ;;  %5425 = vmatpush1.bf16.msra.mxu1 %v5369_v15 }
 0x4d6   : > { %v5351_v12 = vmul.f32 %v12451_v3, %v5322_v47  ;;  %v5349_v6 = vmul.f32 %v12451_v3, %v5321_v27  ;;  %5637 = vmatpush1.bf16.msra.mxu0 %v5585_v18  ;;  %5426 = vmatprep.subr.bf16.mxu1 %v5368_v37  ;;  %v9351_v38 = vpop.permute.xlu0 %9350  ;;  %v9348_v52 = vunpack.i.h.bf16 %v9346_v62  ;;  %v9347_v24 = vunpack.i.l.bf16 %v9346_v62 }
 0x4d7   : > { %5638 = vmatprep.subr.bf16.mxu0 %v5584_v58  ;;  %v9353_v36 = vunpack.i.h.bf16 %v9351_v38  ;;  %v9352_v4 = vunpack.i.l.bf16 %v9351_v38  ;;  %5242 = vmatprep.mubr.bf16.mxu0 %v13953_v16  ;;  %v5582_v10 = vpack.c.bf16 %v5570_v41, %v5568_v23  ;;  %v5350_v15 = vmul.f32 %v12461_v59, %v5329_v60  ;;  %v9843_v58 = vld [vmem:[#allocation3 + $0x2d0] sm:$0xff]   ;;  %v9844_v38 = vld [vmem:[#allocation3 + $0x2b8] sm:$0xff]  }
 0x4d8   : > { %8255 = vmatmul.mubr.msk.bf16.gmra.mxu1 %vm467_vm3, %v9840_v9  ;;  %v5352_v22 = vmul.f32 %v12461_v59, %v5330_v40  ;;  %v5365_v3 = vpack.c.bf16 %v5351_v12, %v5349_v6  ;;  %v9356_v55 = vpop.permute.xlu1 %9355  ;;  %v5581_v50 = vpack.c.bf16 %v5569_v5, %v5567_v32  ;;  %v12648_v0 = vrot.slane %v8301_v28, %v13950_v63 }
 0x4d9   : > { %v5536_v54 = vsel %vm1508_vm6, %v9348_v52, %v9353_v36  ;;  %v5544_v44 = vsel %vm1508_vm6, %v9353_v36, %v9348_v52  ;;  %v5535_v45 = vsel %vm1508_vm6, %v9347_v24, %v9352_v4  ;;  %v5543_v61 = vsel %vm1508_vm6, %v9352_v4, %v9347_v24  ;;  %5427 = vmatpush1.bf16.msra.mxu1 %v5367_v51 }
 0x4da   : > { %v5565_v30 = vmul.f32 %v12483_v48, %v5536_v54  ;;  %v5563_v20 = vmul.f32 %v12483_v48, %v5535_v45  ;;  %5639 = vmatpush1.bf16.msra.mxu0 %v5583_v35  ;;  %v9361_v59 = vpop.permute.xlu0 %9360  ;;  %v5366_v33 = vpack.c.bf16 %v5352_v22, %v5350_v15  ;;  %5082 = vmatprep.mubr.bf16.mxu1 %v13953_v16  ;;  %v9358_v49 = vunpack.i.h.bf16 %v9356_v55 }
 0x4db   : > { %5640 = vmatprep.subr.bf16.mxu0 %v5582_v10  ;;  %v9363_v1 = vunpack.i.h.bf16 %v9361_v59  ;;  %v9362_v39 = vunpack.i.l.bf16 %v9361_v59  ;;  %v9357_v25 = vunpack.i.l.bf16 %v9356_v55  ;;  %v5564_v14 = vmul.f32 %v12496_v34, %v5543_v61  ;;  %v9845_v59 = vld [vmem:[#allocation3 + $0x2d8] sm:$0xff]  }
 0x4dc   : > { %8271 = vmatmul.mubr.msk.bf16.gmra.mxu0 %vm467_vm3, %v9841_v11  ;;  %5428 = vmatprep.subr.bf16.mxu1 %v5366_v33  ;;  %v5566_v48 = vmul.f32 %v12496_v34, %v5544_v44  ;;  %v5579_v53 = vpack.c.bf16 %v5565_v30, %v5563_v20  ;;  %v12630_v35 = vrot.slane %v12501_v56, %v13951_v46  ;;  %v9366_v37 = vpop.permute.xlu1 %9365 }
 0x4dd   : > { %v5754_v31 = vsel %vm1724_vm7, %v9358_v49, %v9363_v1  ;;  %v5762_v8 = vsel %vm1724_vm7, %v9363_v1, %v9358_v49  ;;  %5429 = vmatpush1.bf16.msra.mxu1 %v5365_v3  ;;  %v5753_v19 = vsel %vm1724_vm7, %v9357_v25, %v9362_v39  ;;  %v5761_v17 = vsel %vm1724_vm7, %v9362_v39, %v9357_v25 }
 0x4de   : > { %5641 = vmatpush1.bf16.msra.mxu0 %v5581_v50  ;;  %v9371_v34 = vpop.permute.xlu0 %9370  ;;  %v5580_v13 = vpack.c.bf16 %v5566_v48, %v5564_v14  ;;  %5252 = vmatprep.mubr.bf16.mxu0 %v13953_v16  ;;  %v9368_v56 = vunpack.i.h.bf16 %v9366_v37  ;;  %v9367_v18 = vunpack.i.l.bf16 %v9366_v37  ;;  %v12642_v21 = vmul.f32 %v12518_v26, %v5754_v31 }
 0x4df   : > { %v9373_v29 = vunpack.i.h.bf16 %v9371_v34  ;;  %v9372_v43 = vunpack.i.l.bf16 %v9371_v34  ;;  %v12645_v57 = vmul.f32 %v12518_v26, %v5753_v19  ;;  %v12654_v51 = vmul.f32 %v12630_v35, %v5761_v17  ;;  %v9846_v17 = vld [vmem:[#allocation3 + $0x2e0] sm:$0xff]  }
 0x4e0   : > { %8256 = vmatmul.mubr.msk.bf16.gmra.mxu1 %vm467_vm3, %v9842_v2  ;;  %5642 = vmatprep.subr.bf16.mxu0 %v5580_v13  ;;  %v9376_v9 = vpop.permute.xlu1 %9375  ;;  %v12657_v23 = vmul.f32 %v12630_v35, %v5762_v8  ;;  %v12660_v41 = vrot.slane %v8301_v28, %v13951_v46 }
 0x4e1   : > { %5092 = vmatprep.mubr.bf16.mxu1 %v13953_v16  ;;  %v5968_v7 = vsel %vm1940_vm8, %v9368_v56, %v9373_v29  ;;  %v5976_v47 = vsel %vm1940_vm8, %v9373_v29, %v9368_v56  ;;  %v5967_v40 = vsel %vm1940_vm8, %v9367_v18, %v9372_v43  ;;  %v5975_v27 = vsel %vm1940_vm8, %v9372_v43, %v9367_v18 }
 0x4e2   : > { %5643 = vmatpush1.bf16.msra.mxu0 %v5579_v53  ;;  %v9381_v5 = vpop.permute.xlu0 %9380  ;;  %v9378_v12 = vunpack.i.h.bf16 %v9376_v9  ;;  %v9377_v6 = vunpack.i.l.bf16 %v9376_v9  ;;  %v12670_v62 = vmul.f32 %v12648_v0, %v5968_v7  ;;  %v5797_v36 = vpack.c.bf16 %v12642_v21, %v12645_v57  ;;  %v9849_v57 = vld [vmem:[#allocation3 + $0x308] sm:$0xff]  }
 0x4e3   : > { %v9383_v60 = vunpack.i.h.bf16 %v9381_v5  ;;  %v9382_v32 = vunpack.i.l.bf16 %v9381_v5  ;;  %v12676_v4 = vmul.f32 %v12648_v0, %v5967_v40  ;;  %v5798_v10 = vpack.c.bf16 %v12657_v23, %v12654_v51 }
 0x4e4   : > { %8272 = vmatmul.mubr.msk.bf16.gmra.mxu0 %vm467_vm3, %v9843_v58  ;;  %v9386_v24 = vpop.permute.xlu1 %9385  ;;  %v12681_v11 = vmul.f32 %v12660_v41, %v5975_v27  ;;  %v12684_v15 = vmul.f32 %v12660_v41, %v5976_v47 }
 0x4e5   : > { %5262 = vmatprep.mubr.bf16.mxu0 %v13953_v16  ;;  %v9388_v54 = vunpack.i.h.bf16 %v9386_v24  ;;  %v9387_v44 = vunpack.i.l.bf16 %v9386_v24  ;;  %v5752_v45 = vsel %vm1724_vm7, %v9378_v12, %v9383_v60  ;;  %v5760_v61 = vsel %vm1724_vm7, %v9383_v60, %v9378_v12 }
 0x4e6   : > { %v9391_v52 = vpop.permute.xlu0 %9390  ;;  %v5751_v30 = vsel %vm1724_vm7, %v9377_v6, %v9382_v32  ;;  %v5759_v20 = vsel %vm1724_vm7, %v9382_v32, %v9377_v6  ;;  %v5784_v13 = vmul.f32 %v12630_v35, %v5760_v61  ;;  %v5783_v6 = vmul.f32 %v12518_v26, %v5752_v45 }
 0x4e7   : > { %v9393_v22 = vunpack.i.h.bf16 %v9391_v52  ;;  %v9392_v3 = vunpack.i.l.bf16 %v9391_v52  ;;  %v5782_v37 = vmul.f32 %v12630_v35, %v5759_v20  ;;  %v9847_v52 = vld [vmem:[#allocation3 + $0x300] sm:$0xff]   ;;  %v6012_v20 = vpack.c.bf16 %v12684_v15, %v12681_v11 }
 0x4e8   : > { %8257 = vmatmul.mubr.msk.bf16.gmra.mxu1 %vm467_vm3, %v9844_v38  ;;  %v9396_v2 = vpop.permute.xlu1 %9395  ;;  %v5781_v38 = vmul.f32 %v12518_v26, %v5751_v30 }
 0x4e9   : > { %v5756_v55 = vsel %vm1724_vm7, %v9388_v54, %v9393_v22  ;;  %v5764_v33 = vsel %vm1724_vm7, %v9393_v22, %v9388_v54  ;;  %v5755_v1 = vsel %vm1724_vm7, %v9387_v44, %v9392_v3  ;;  %v5763_v39 = vsel %vm1724_vm7, %v9392_v3, %v9387_v44  ;;  %5446 = vmatprep.mubr.bf16.mxu1 %v13953_v16 }
 0x4ea   : > { %v5791_v49 = vmul.f32 %v12518_v26, %v5756_v55  ;;  %v5789_v25 = vmul.f32 %v12518_v26, %v5755_v1  ;;  %v9406_v50 = vpop.permute.xlu0 %9405  ;;  %v5790_v14 = vmul.f32 %v12630_v35, %v5763_v39  ;;  %v5792_v48 = vmul.f32 %v12630_v35, %v5764_v33 }
 0x4eb   : > { %v9408_v31 = vunpack.i.h.bf16 %v9406_v50  ;;  %v9407_v8 = vunpack.i.l.bf16 %v9406_v50  ;;  %v9398_v53 = vunpack.i.h.bf16 %v9396_v2  ;;  %v9397_v19 = vunpack.i.l.bf16 %v9396_v2 }
 0x4ec   : > { %8273 = vmatmul.mubr.msk.bf16.gmra.mxu0 %vm467_vm3, %v9845_v59  ;;  %v5800_v34 = vpack.c.bf16 %v5792_v48, %v5790_v14  ;;  %v5799_v28 = vpack.c.bf16 %v5791_v49, %v5789_v25  ;;  %v9401_v9 = vpop.permute.xlu1 %9400  ;;  %v6011_v22 = vpack.c.bf16 %v12670_v62, %v12676_v4  ;;  %v5796_v45 = vpack.c.bf16 %v5784_v13, %v5782_v37  ;;  %v9848_v49 = vld [vmem:[#allocation3 + $0x2e8] sm:$0xff]  }
 0x4ed   : > { %v5970_v29 = vsel %vm1940_vm8, %v9398_v53, %v9408_v31  ;;  %v5978_v43 = vsel %vm1940_vm8, %v9408_v31, %v9398_v53  ;;  %v5969_v56 = vsel %vm1940_vm8, %v9397_v19, %v9407_v8  ;;  %v5977_v18 = vsel %vm1940_vm8, %v9407_v8, %v9397_v19  ;;  %5660 = vmatprep.mubr.bf16.mxu0 %v13953_v16 }
 0x4ee   : > { %v6005_v58 = vmul.f32 %v12648_v0, %v5970_v29  ;;  %v6003_v7 = vmul.f32 %v12648_v0, %v5969_v56  ;;  %v9411_v5 = vpop.permute.xlu0 %9410  ;;  %5850 = vmatprep.subr.bf16.mxu1 %v5800_v34  ;;  %v6004_v47 = vmul.f32 %v12660_v41, %v5977_v18  ;;  %v6006_v40 = vmul.f32 %v12660_v41, %v5978_v43 }
 0x4ef   : > { %v9413_v27 = vunpack.i.h.bf16 %v9411_v5  ;;  %v9412_v60 = vunpack.i.l.bf16 %v9411_v5  ;;  %v9403_v32 = vunpack.i.h.bf16 %v9401_v9  ;;  %v9402_v12 = vunpack.i.l.bf16 %v9401_v9  ;;  %v9850_v9 = vld [vmem:[#allocation3 + $0x2f0] sm:$0xff]  }
 0x4f0   : > { %8279 = vmatmul.mubr.msk.bf16.vlgmr.msra.gmra.mxu1 %vm467_vm3, %v9846_v17  ;;  %v6014_v24 = vpack.c.bf16 %v6006_v40, %v6004_v47  ;;  %v9416_v62 = vpop.permute.xlu1 %9415  ;;  %v6013_v4 = vpack.c.bf16 %v6005_v58, %v6003_v7  ;;  %v5795_v51 = vpack.c.bf16 %v5783_v6, %v5781_v38  ;;  %v9851_v40 = vld [vmem:[#allocation3 + $0x310] sm:$0xff]   ;;  %v9857_v6 = vld [vmem:[#allocation3 + $0x348] sm:$0xff]  }
 0x4f1   : > { %v5966_v3 = vsel %vm1940_vm8, %v9403_v32, %v9413_v27  ;;  %v5974_v54 = vsel %vm1940_vm8, %v9413_v27, %v9403_v32  ;;  %v5973_v44 = vsel %vm1940_vm8, %v9412_v60, %v9402_v12  ;;  %5851 = vmatpush1.bf16.msra.mxu1 %v5799_v28  ;;  %v5965_v61 = vsel %vm1940_vm8, %v9402_v12, %v9412_v60  ;;  %v9853_v27 = vld [vmem:[#allocation3 + $0x318] sm:$0xff]   ;;  %v9854_v60 = vld [vmem:[#allocation3 + $0x320] sm:$0xff]   ;;  %v9856_v12 = vld [vmem:[#allocation3 + $0x328] sm:$0xff]  }
 0x4f2   : > { %5852 = vmatprep.subr.bf16.mxu1 %v5798_v10  ;;  %v9421_v30 = vpop.permute.xlu0 %9420  ;;  %6064 = vmatprep.subr.bf16.mxu0 %v6014_v24  ;;  %v9418_v33 = vunpack.i.h.bf16 %v9416_v62  ;;  %v9417_v1 = vunpack.i.l.bf16 %v9416_v62  ;;  %v5997_v39 = vmul.f32 %v12648_v0, %v5966_v3  ;;  %v5996_v23 = vmul.f32 %v12660_v41, %v5973_v44  ;;  %v9855_v32 = vld [vmem:[#allocation3 + $0x340] sm:$0xff]   ;;  %v9858_v38 = vld [vmem:[#allocation3 + $0x330] sm:$0xff]   ;;  %v9860_v24 = vld [vmem:[#allocation3 + $0x338] sm:$0xff]  }
 0x4f3   : > { %v9423_v59 = vunpack.i.h.bf16 %v9421_v30  ;;  %v9422_v55 = vunpack.i.l.bf16 %v9421_v30  ;;  %5456 = vmatprep.mubr.bf16.mxu1 %v13953_v16  ;;  %v5998_v10 = vmul.f32 %v12660_v41, %v5974_v54  ;;  %v5995_v2 = vmul.f32 %v12648_v0, %v5965_v61 }
 0x4f4   : > { %8288 = vmatmul.mubr.msk.bf16.vlgmr.msra.gmra.mxu0 %vm467_vm3, %v9847_v52  ;;  %v9859_v52 = vld [vmem:[#allocation3 + $0x350] sm:$0xff]  }
 0x4f5   : > { %v5750_v25 = vsel %vm1724_vm7, %v9418_v33, %v9423_v59  ;;  %v5758_v11 = vsel %vm1724_vm7, %v9423_v59, %v9418_v33  ;;  %v5749_v15 = vsel %vm1724_vm7, %v9417_v1, %v9422_v55  ;;  %v5757_v50 = vsel %vm1724_vm7, %v9422_v55, %v9417_v1  ;;  %5853 = vmatpush1.bf16.msra.mxu1 %v5797_v36  ;;  %v9426_v8 = vpop.permute.xlu1 %9425 }
 0x4f6   : > { %v5779_v14 = vmul.f32 %v12518_v26, %v5750_v25  ;;  %v5777_v48 = vmul.f32 %v12518_v26, %v5749_v15  ;;  %6065 = vmatpush1.bf16.msra.mxu0 %v6013_v4  ;;  %5854 = vmatprep.subr.bf16.mxu1 %v5796_v45  ;;  %v9431_v31 = vpop.permute.xlu0 %9430  ;;  %v9428_v17 = vunpack.i.h.bf16 %v9426_v8  ;;  %v9427_v34 = vunpack.i.l.bf16 %v9426_v8 }
 0x4f7   : > { %6066 = vmatprep.subr.bf16.mxu0 %v6012_v20  ;;  %v9433_v53 = vunpack.i.h.bf16 %v9431_v31  ;;  %v9432_v19 = vunpack.i.l.bf16 %v9431_v31  ;;  %5670 = vmatprep.mubr.bf16.mxu0 %v13953_v16  ;;  %v6010_v21 = vpack.c.bf16 %v5998_v10, %v5996_v23  ;;  %v5778_v36 = vmul.f32 %v12630_v35, %v5757_v50 }
 0x4f8   : > { %8280 = vmatmul.mubr.msk.bf16.gmra.mxu1 %vm467_vm3, %v9848_v49  ;;  %v5780_v28 = vmul.f32 %v12630_v35, %v5758_v11  ;;  %v5793_v26 = vpack.c.bf16 %v5779_v14, %v5777_v48  ;;  %v6009_v5 = vpack.c.bf16 %v5997_v39, %v5995_v2 }
 0x4f9   : > { %v5964_v37 = vsel %vm1940_vm8, %v9428_v17, %v9433_v53  ;;  %v5972_v13 = vsel %vm1940_vm8, %v9433_v53, %v9428_v17  ;;  %v5963_v29 = vsel %vm1940_vm8, %v9427_v34, %v9432_v19  ;;  %v5971_v43 = vsel %vm1940_vm8, %v9432_v19, %v9427_v34  ;;  %5855 = vmatpush1.bf16.msra.mxu1 %v5795_v51 }
 0x4fa   : > { %v5993_v56 = vmul.f32 %v12648_v0, %v5964_v37  ;;  %v5991_v18 = vmul.f32 %v12648_v0, %v5963_v29  ;;  %6067 = vmatpush1.bf16.msra.mxu0 %v6011_v22  ;;  %v5794_v35 = vpack.c.bf16 %v5780_v28, %v5778_v36  ;;  %5466 = vmatprep.mubr.bf16.mxu1 %v13953_v16  ;;  %v9861_v22 = vld [vmem:[#allocation3 + $0x358] sm:$0xff]  }
 0x4fb   : > { %6068 = vmatprep.subr.bf16.mxu0 %v6010_v21  ;;  %v5992_v58 = vmul.f32 %v12660_v41, %v5971_v43  ;;  %v5994_v7 = vmul.f32 %v12660_v41, %v5972_v13  ;;  %v9852_v41 = vld [vmem:[#allocation3 + $0x2f8] sm:$0xff]  }
 0x4fc   : > { %8289 = vmatmul.mubr.msk.bf16.gmra.mxu0 %vm467_vm3, %v9849_v57  ;;  %5856 = vmatprep.subr.bf16.mxu1 %v5794_v35  ;;  %v6007_v0 = vpack.c.bf16 %v5993_v56, %v5991_v18 }
 0x4fd   : > { %5857 = vmatpush1.bf16.msra.mxu1 %v5793_v26  ;;  %v6008_v47 = vpack.c.bf16 %v5994_v7, %v5992_v58  ;;  %5680 = vmatprep.mubr.bf16.mxu0 %v13953_v16 }
 0x4fe   : > { %6069 = vmatpush1.bf16.msra.mxu0 %v6009_v5 }
 0x4ff   : > { %6070 = vmatprep.subr.bf16.mxu0 %v6008_v47 }
 0x500   : > { %8281 = vmatmul.mubr.msk.bf16.gmra.mxu1 %vm467_vm3, %v9850_v9 }
 0x501   : > { %5476 = vmatprep.mubr.bf16.mxu1 %v13953_v16 }
 0x502   : > { %6071 = vmatpush1.bf16.msra.mxu0 %v6007_v0 }
 0x504   : > { %8290 = vmatmul.mubr.msk.bf16.gmra.mxu0 %vm467_vm3, %v9851_v40 }
 0x505   : > { %5690 = vmatprep.mubr.bf16.mxu0 %v13953_v16 }
 0x508   : > { %8282 = vmatmul.mubr.msk.bf16.gmra.mxu1 %vm467_vm3, %v9852_v41 }
 0x509   : > { %5874 = vmatprep.mubr.bf16.mxu1 %v13953_v16 }
 0x50c   : > { %8291 = vmatmul.mubr.msk.bf16.gmra.mxu0 %vm467_vm3, %v9853_v27 }
 0x50d   : > { %6088 = vmatprep.mubr.bf16.mxu0 %v13953_v16 }
 0x510   : > { %8297 = vmatmul.mubr.msk.bf16.vlgmr.msra.gmra.mxu1 %vm467_vm3, %v9854_v60 }
 0x511   : > { %5884 = vmatprep.mubr.bf16.mxu1 %v13953_v16 }
 0x514   : > { %8306 = vmatmul.mubr.msk.bf16.vlgmr.msra.gmra.mxu0 %vm467_vm3, %v9855_v32 }
 0x515   : > { %6098 = vmatprep.mubr.bf16.mxu0 %v13953_v16 }
 0x518   : > { %8298 = vmatmul.mubr.msk.bf16.gmra.mxu1 %vm467_vm3, %v9856_v12 }
 0x519   : > { %5894 = vmatprep.mubr.bf16.mxu1 %v13953_v16 }
 0x51c   : > { %8307 = vmatmul.mubr.msk.bf16.gmra.mxu0 %vm467_vm3, %v9857_v6 }
 0x51d   : > { %6108 = vmatprep.mubr.bf16.mxu0 %v13953_v16 }
 0x520   : > { %8299 = vmatmul.mubr.msk.bf16.gmra.mxu1 %vm467_vm3, %v9858_v38 }
 0x521   : > { %5904 = vmatprep.mubr.bf16.mxu1 %v13953_v16 }
 0x524   : > { %8308 = vmatmul.mubr.msk.bf16.gmra.mxu0 %vm467_vm3, %v9859_v52 }
 0x525   : > { %6118 = vmatprep.mubr.bf16.mxu0 %v13953_v16 }
 0x528   : > { %8300 = vmatmul.mubr.msk.bf16.gmra.mxu1 %vm467_vm3, %v9860_v24 }
 0x529   : > { %6556 = vmatprep.mubr.bf16.mxu1 %v13953_v16 }
 0x52c   : > { %8309 = vmatmul.mubr.msk.bf16.gmra.mxu0 %vm467_vm3, %v9861_v22 }
 0x52d   : > { %6647 = vmatprep.mubr.bf16.mxu0 %v13953_v16 }
 0x552   : > { %v4547_v3 = vpop.f32.mrf.mxu0 }
 0x554   : > { %v4549_v54 = vpop.f32.mrf.mxu0 }
 0x556   : > { %v4551_v44 = vpop.f32.mrf.mxu0 }
 0x558   : > { %v12804_v45 = vpop.f32.mrf.mxu0 }
 0x55a   : > { %v4557_v61 = vpop.f32.mrf.mxu0 }
 0x55c   : > { %v4559_v30 = vpop.f32.mrf.mxu0 }
 0x55e   : > { %v4561_v62 = vpop.f32.mrf.mxu0 }
 0x560   : > { %v12806_v4 = vpop.f32.mrf.mxu0 }
 0x562   : > { %v4567_v20 = vpop.f32.mrf.mxu0 }
 0x564   : > { %v4569_v59 = vpop.f32.mrf.mxu0 }
 0x566   : > { %v4571_v55 = vpop.f32.mrf.mxu0 }
 0x568   : > { %v12808_v33 = vpop.f32.mrf.mxu0 }
 0x56a   : > { %v4577_v1 = vpop.f32.mrf.mxu0 }
 0x56c   : > { %v4579_v39 = vpop.f32.mrf.mxu0 }
 0x56e   : > { %v4581_v49 = vpop.f32.mrf.mxu0 }
 0x570   : > { %v4652_v51 = vpop.f32.mrf.mxu1  ;;  %v12810_v23 = vpop.f32.mrf.mxu0 }
 0x571   : > { %v4653_v10 = vadd.f32 %v4652_v51, %v4547_v3 }
 0x572   : > { %v4654_v25 = vpop.f32.mrf.mxu1 }
 0x573   : > { %v4655_v11 = vadd.f32 %v4654_v25, %v4549_v54 }
 0x574   : > { %v4656_v15 = vpop.f32.mrf.mxu1  ;;  %v4850_v50 = vpop.f32.mrf.mxu0 }
 0x575   : > { %v4657_v2 = vadd.f32 %v4656_v15, %v4551_v44  ;;  %v12812_v14 = vadd.f32 %v4850_v50, %v4653_v10 }
 0x576   : > { %v12814_v48 = vpop.f32.mrf.mxu1  ;;  %v4852_v31 = vpop.f32.mrf.mxu0 }
 0x577   : > { %v12816_v8 = vadd.f32 %v4852_v31, %v4655_v11 }
 0x578   : > { %v4662_v53 = vpop.f32.mrf.mxu1  ;;  %v4854_v19 = vpop.f32.mrf.mxu0 }
 0x579   : > { %v4663_v17 = vadd.f32 %v4662_v53, %v4557_v61  ;;  %v12818_v34 = vadd.f32 %v4854_v19, %v4657_v2 }
 0x57a   : > { %v4664_v21 = vpop.f32.mrf.mxu1  ;;  %v12820_v57 = vpop.f32.mrf.mxu0 }
 0x57b   : > { %v4665_v36 = vadd.f32 %v4664_v21, %v4559_v30 }
 0x57c   : > { %v4666_v28 = vpop.f32.mrf.mxu1  ;;  %v4860_v26 = vpop.f32.mrf.mxu0 }
 0x57d   : > { %v4667_v37 = vadd.f32 %v4666_v28, %v4561_v62  ;;  %v12822_v13 = vadd.f32 %v4860_v26, %v4663_v17 }
 0x57e   : > { %v12824_v29 = vpop.f32.mrf.mxu1  ;;  %v4862_v43 = vpop.f32.mrf.mxu0 }
 0x57f   : > { %v12826_v56 = vadd.f32 %v4862_v43, %v4665_v36 }
 0x580   : > { %v4672_v18 = vpop.f32.mrf.mxu1  ;;  %v4864_v35 = vpop.f32.mrf.mxu0 }
 0x581   : > { %v4673_v58 = vadd.f32 %v4672_v18, %v4567_v20  ;;  %v12828_v7 = vadd.f32 %v4864_v35, %v4667_v37 }
 0x582   : > { %v4674_v5 = vpop.f32.mrf.mxu1  ;;  %v12830_v9 = vpop.f32.mrf.mxu0 }
 0x583   : > { %v4675_v47 = vadd.f32 %v4674_v5, %v4569_v59 }
 0x584   : > { %v4676_v0 = vpop.f32.mrf.mxu1  ;;  %v4870_v40 = vpop.f32.mrf.mxu0 }
 0x585   : > { %v4677_v41 = vadd.f32 %v4676_v0, %v4571_v55  ;;  %v12832_v27 = vadd.f32 %v4870_v40, %v4673_v58 }
 0x586   : > { %v12834_v60 = vpop.f32.mrf.mxu1  ;;  %v4872_v32 = vpop.f32.mrf.mxu0 }
 0x587   : > { %v12836_v12 = vadd.f32 %v4872_v32, %v4675_v47 }
 0x588   : > { %v4682_v6 = vpop.f32.mrf.mxu1  ;;  %v4874_v38 = vpop.f32.mrf.mxu0 }
 0x589   : > { %v4683_v52 = vadd.f32 %v4682_v6, %v4577_v1  ;;  %v12838_v24 = vadd.f32 %v4874_v38, %v4677_v41 }
 0x58a   : > { %v4684_v22 = vpop.f32.mrf.mxu1  ;;  %v12840_v3 = vpop.f32.mrf.mxu0 }
 0x58b   : > { %v4685_v54 = vadd.f32 %v4684_v22, %v4579_v39 }
 0x58c   : > { %v4686_v44 = vpop.f32.mrf.mxu1  ;;  %v4880_v61 = vpop.f32.mrf.mxu0 }
 0x58d   : > { %v4687_v30 = vadd.f32 %v4686_v44, %v4581_v49  ;;  %v12842_v62 = vadd.f32 %v4880_v61, %v4683_v52 }
 0x58e   : > { %v12844_v20 = vpop.f32.mrf.mxu1  ;;  %v4882_v59 = vpop.f32.mrf.mxu0 }
 0x58f   : > { %v12846_v55 = vadd.f32 %v4882_v59, %v4685_v54 }
 0x590   : > { %v4884_v51 = vpop.f32.mrf.mxu0  ;;  %v12848_v10 = vpop.f32.mrf.mxu1 }
 0x591   : > { %13954 = vst [vmem:[#allocation14_spill] sm:$0xff] %v12846_v55  ;;  %v12850_v1 = vadd.f32 %v4884_v51, %v4687_v30  ;;  %v12946_v55 = vpop.permute.xlu1 %6186 }
 0x592   : > { %v12852_v25 = vpop.f32.mrf.mxu0  ;;  %v12854_v11 = vpop.f32.mrf.mxu1  ;;  %13974 = vst [vmem:[#allocation29_spill] sm:$0xff] %v12946_v55 }
 0x593   : > { %13955 = vst [vmem:[#allocation15_spill] sm:$0xff] %v12850_v1 }
 0x594   : > { %v12856_v39 = vpop.f32.mrf.mxu1  ;;  %v12858_v15 = vpop.f32.mrf.mxu0 }
 0x596   : > { %v12860_v49 = vpop.f32.mrf.mxu1  ;;  %v12862_v50 = vpop.f32.mrf.mxu0 }
 0x598   : > { %v12864_v2 = vpop.f32.mrf.mxu1  ;;  %v12866_v31 = vpop.f32.mrf.mxu0 }
 0x59a   : > { %v12868_v53 = vpop.f32.mrf.mxu1  ;;  %v12870_v19 = vpop.f32.mrf.mxu0 }
 0x59c   : > { %v12872_v17 = vpop.f32.mrf.mxu1  ;;  %v12874_v21 = vpop.f32.mrf.mxu0 }
 0x59e   : > { %v12876_v36 = vpop.f32.mrf.mxu1  ;;  %v12878_v28 = vpop.f32.mrf.mxu0 }
 0x5a0   : > { %v12880_v26 = vpop.f32.mrf.mxu1  ;;  %v12882_v37 = vpop.f32.mrf.mxu0 }
 0x5a2   : > { %v12884_v43 = vpop.f32.mrf.mxu1  ;;  %v12886_v18 = vpop.f32.mrf.mxu0 }
 0x5a4   : > { %v12888_v35 = vpop.f32.mrf.mxu1  ;;  %v12890_v58 = vpop.f32.mrf.mxu0 }
 0x5a6   : > { %v12892_v5 = vpop.f32.mrf.mxu1  ;;  %v12894_v47 = vpop.f32.mrf.mxu0 }
 0x5a8   : > { %v12896_v0 = vpop.f32.mrf.mxu1  ;;  %v12898_v40 = vpop.f32.mrf.mxu0 }
 0x5aa   : > { %v12900_v41 = vpop.f32.mrf.mxu1  ;;  %v12902_v32 = vpop.f32.mrf.mxu0 }
 0x5ab   : > { %13956 = vst [vmem:[#allocation16_spill] sm:$0xff] %v12900_v41  ;;  %13957 = vst [vmem:[#allocation19_spill] sm:$0xff] %v12902_v32 }
 0x5ac   : > { %v12904_v6 = vpop.f32.mrf.mxu1  ;;  %v12906_v38 = vpop.f32.mrf.mxu0 }
 0x5ad   : > { %13958 = vst [vmem:[#allocation17_spill] sm:$0xff] %v12904_v6  ;;  %13959 = vst [vmem:[#allocation20_spill] sm:$0xff] %v12906_v38 }
 0x5ae   : > { %v12908_v52 = vpop.f32.mrf.mxu1  ;;  %v12910_v22 = vpop.f32.mrf.mxu0 }
 0x5af   : > { %13960 = vst [vmem:[#allocation11_spill] sm:$0xff] %v12908_v52  ;;  %13961 = vst [vmem:[#allocation13_spill] sm:$0xff] %v12910_v22 }
 0x5b0   : > { %v12912_v54 = vpop.f32.mrf.mxu0  ;;  %v5448_v44 = vpop.f32.mrf.mxu1 }
 0x5b1   : > { %13962 = vst [vmem:[#allocation9_spill] sm:$0xff] %v12912_v54 }
 0x5b2   : > { %v12914_v61 = vpop.f32.mrf.mxu0  ;;  %v5450_v30 = vpop.f32.mrf.mxu1 }
 0x5b3   : > { %13963 = vst [vmem:[#allocation18_spill] sm:$0xff] %v12914_v61 }
 0x5b4   : > { %v12916_v59 = vpop.f32.mrf.mxu1  ;;  %v5662_v51 = vpop.f32.mrf.mxu0 }
 0x5b6   : > { %v12918_v16 = vpop.f32.mrf.mxu1  ;;  %v12920_v42 = vpop.f32.mrf.mxu0 }
 0x5b8   : > { %v12922_v46 = vpop.f32.mrf.mxu1  ;;  %v12924_v63 = vpop.f32.mrf.mxu0 }
 0x5b9   : > { %13964 = vst [vmem:[#allocation21_spill] sm:$0xff] %v12922_v46 }
 0x5ba   : > { %v12926_v52 = vpop.f32.mrf.mxu1  ;;  %v12928_v22 = vpop.f32.mrf.mxu0 }
 0x5bb   : > { %13965 = vst [vmem:[#allocation10_spill] sm:$0xff] %v12926_v52  ;;  %13966 = vst [vmem:[#allocation12_spill] sm:$0xff] %v12928_v22 }
 0x5bc   : > { %v12930_v54 = vpop.f32.mrf.mxu1  ;;  %v12932_v38 = vpop.f32.mrf.mxu0 }
 0x5bd   : > { %13967 = vst [vmem:[#allocation22_spill] sm:$0xff] %v12930_v54  ;;  %13968 = vst [vmem:[#allocation23_spill] sm:$0xff] %v12932_v38 }
 0x5be   : > { %v12934_v61 = vpop.f32.mrf.mxu1  ;;  %v12936_v6 = vpop.f32.mrf.mxu0 }
 0x5bf   : > { %13969 = vst [vmem:[#allocation24_spill] sm:$0xff] %v12934_v61  ;;  %13970 = vst [vmem:[#allocation25_spill] sm:$0xff] %v12936_v6  ;;  %v12956_v61 = vpop.permute.xlu0 %6191 }
 0x5c0   : > { %v12938_v1 = vpop.f32.mrf.mxu1  ;;  %v12940_v32 = vpop.f32.mrf.mxu0  ;;  %13978 = vst [vmem:[#allocation33_spill] sm:$0xff] %v12956_v61 }
 0x5c1   : > { %13971 = vst [vmem:[#allocation26_spill] sm:$0xff] %v12938_v1  ;;  %13972 = vst [vmem:[#allocation27_spill] sm:$0xff] %v12940_v32  ;;  %v12962_v32 = vpop.permute.xlu1 %6176 }
 0x5c2   : > { %v12942_v41 = vpop.f32.mrf.mxu1  ;;  %v12944_v46 = vpop.f32.mrf.mxu0  ;;  %13981 = vst [vmem:[#allocation36_spill] sm:$0xff] %v12962_v32  ;;  %v4689_v32 = vadd.f32 %v12844_v20, %v12810_v23 }
 0x5c3   : > { %13973 = vst [vmem:[#allocation28_spill] sm:$0xff] %v12944_v46  ;;  %v4659_v46 = vadd.f32 %v12814_v48, %v12804_v45  ;;  %v12983_v48 = vpop.permute.xlu0 %6181 }
 0x5c4   : > { %v12948_v52 = vpop.f32.mrf.mxu1  ;;  %v12950_v22 = vpop.f32.mrf.mxu0  ;;  %v4904_v23 = vadd.f32 %v12852_v25, %v4689_v32  ;;  %v5109_v25 = vadd.f32 %v12872_v17, %v12828_v7 }
 0x5c5   : > { %13975 = vst [vmem:[#allocation30_spill] sm:$0xff] %v12948_v52  ;;  %v4892_v61 = vadd.f32 %v12820_v57, %v4659_v46  ;;  %v5105_v46 = vadd.f32 %v12856_v39, %v12818_v34  ;;  %v13000_v20 = vpop.permute.xlu1 %6166 }
 0x5c6   : > { %v12952_v54 = vpop.f32.mrf.mxu1  ;;  %v12954_v38 = vpop.f32.mrf.mxu0 }
 0x5c7   : > { %13976 = vst [vmem:[#allocation31_spill] sm:$0xff] %v12952_v54  ;;  %13977 = vst [vmem:[#allocation32_spill] sm:$0xff] %v12954_v38  ;;  %v4669_v54 = vadd.f32 %v12824_v29, %v12806_v4  ;;  %v5103_v38 = vadd.f32 %v12848_v10, %v12812_v14  ;;  %v5104_v4 = vadd.f32 %v12854_v11, %v12816_v8 }
 0x5c8   : > { %v12958_v6 = vpop.f32.mrf.mxu1  ;;  %v12960_v1 = vpop.f32.mrf.mxu0  ;;  %v5106_v57 = vadd.f32 %v12860_v49, %v4892_v61  ;;  %v5107_v29 = vadd.f32 %v12864_v2, %v12822_v13  ;;  %v5275_v34 = vadd.f32 %v12866_v31, %v5105_v46  ;;  %v5279_v31 = vadd.f32 %v12882_v37, %v5109_v25  ;;  %v13984_v61 = vld [vmem:[#allocation16_spill] sm:$0xff]  ;;  %v13993_v25 = vld [vmem:[#allocation10_spill] sm:$0xff] }
 0x5c9   : > { %13979 = vst [vmem:[#allocation34_spill] sm:$0xff] %v12958_v6  ;;  %13980 = vst [vmem:[#allocation35_spill] sm:$0xff] %v12960_v1  ;;  %v4679_v1 = vadd.f32 %v12834_v60, %v12808_v33  ;;  %v5273_v14 = vadd.f32 %v12858_v15, %v5103_v38  ;;  %v5274_v8 = vadd.f32 %v12862_v50, %v5104_v4  ;;  %v6157_v38 = vpop.permute.xlu1 %6156 }
 0x5ca   : > { %v12966_v55 = vpop.f32.mrf.mxu1  ;;  %v12968_v52 = vpop.f32.mrf.mxu0  ;;  %v5277_v13 = vadd.f32 %v12874_v21, %v5107_v29  ;;  %v5111_v50 = vadd.f32 %v12880_v26, %v12832_v27  ;;  %v5489_v27 = vadd.f32 %v12916_v59, %v5275_v34  ;;  %v13991_v34 = vld [vmem:[#allocation13_spill] sm:$0xff] }
 0x5cb   : > { %13982 = vst [vmem:[#allocation37_spill] sm:$0xff] %v12968_v52  ;;  %v4896_v52 = vadd.f32 %v12830_v9, %v4669_v54  ;;  %v4900_v33 = vadd.f32 %v12840_v3, %v4679_v1  ;;  %v5108_v3 = vadd.f32 %v12868_v53, %v12826_v56  ;;  %v5487_v10 = vadd.f32 %v5448_v44, %v5273_v14  ;;  %v13989_v14 = vld [vmem:[#allocation12_spill] sm:$0xff] }
 0x5cc   : > { %v12979_v6 = vpop.f32.mrf.mxu1  ;;  %v12981_v45 = vpop.f32.mrf.mxu0  ;;  %v5276_v1 = vadd.f32 %v12870_v19, %v5106_v57  ;;  %v5488_v2 = vadd.f32 %v5450_v30, %v5274_v8  ;;  %v5112_v53 = vadd.f32 %v12884_v43, %v12836_v12  ;;  %v5113_v19 = vadd.f32 %v12888_v35, %v12838_v24 }
 0x5cd   : > { %v5110_v11 = vadd.f32 %v12876_v36, %v4896_v52  ;;  %v5278_v49 = vadd.f32 %v12878_v28, %v5108_v3  ;;  %v5701_v56 = vadd.f32 %v5662_v51, %v5487_v10  ;;  %v13024_v36 = vpop.permute.xlu0 %6171  ;;  %v5281_v28 = vadd.f32 %v12890_v58, %v5111_v50  ;;  %v13987_v51 = vld [vmem:[#allocation17_spill] sm:$0xff] }
 0x5ce   : > { %v12996_v60 = vpop.f32.mrf.mxu1  ;;  %v12998_v9 = vpop.f32.mrf.mxu0  ;;  %v5702_v26 = vadd.f32 %v12920_v42, %v5488_v2  ;;  %v5114_v32 = vadd.f32 %v12892_v5, %v4900_v33  ;;  %v5282_v12 = vadd.f32 %v12894_v47, %v5112_v53  ;;  %v5115_v43 = vadd.f32 %v12896_v0, %v12842_v62  ;;  %v13983_v42 = vld [vmem:[#allocation14_spill] sm:$0xff]  ;;  %v13985_v5 = vld [vmem:[#allocation19_spill] sm:$0xff]  ;;  %v13988_v62 = vld [vmem:[#allocation20_spill] sm:$0xff] }
 0x5cf   : > { %v5280_v7 = vadd.f32 %v12886_v18, %v5110_v11  ;;  %v5283_v24 = vadd.f32 %v12898_v40, %v5113_v19  ;;  %v5490_v52 = vadd.f32 %v12918_v16, %v5276_v1  ;;  %v5703_v58 = vadd.f32 %v12924_v63, %v5489_v27  ;;  %v13986_v47 = vld [vmem:[#allocation15_spill] sm:$0xff]  ;;  %v13992_v10 = vld [vmem:[#allocation21_spill] sm:$0xff] }
 0x5d0   : > { %v13011_v39 = vpop.f32.mrf.mxu0  ;;  %v5876_v15 = vpop.f32.mrf.mxu1  ;;  %v5116_v30 = vadd.f32 %v13984_v61, %v13983_v42  ;;  %v5284_v59 = vadd.f32 %v13985_v5, %v5114_v32  ;;  %v5117_v4 = vadd.f32 %v13987_v51, %v13986_v47  ;;  %v5285_v0 = vadd.f32 %v13988_v62, %v5115_v43  ;;  %v13990_v63 = vld [vmem:[#allocation11_spill] sm:$0xff]  ;;  %v13996_v32 = vld [vmem:[#allocation22_spill] sm:$0xff]  ;;  %v13999_v61 = vld [vmem:[#allocation24_spill] sm:$0xff] }
 0x5d1   : > { %v5915_v37 = vadd.f32 %v5876_v15, %v5701_v56  ;;  %v5704_v33 = vadd.f32 %v13989_v14, %v5490_v52  ;;  %v5118_v8 = vadd.f32 %v13990_v63, %v4904_v23  ;;  %v5491_v1 = vadd.f32 %v13992_v10, %v5277_v13  ;;  %v6162_v2 = vpop.permute.xlu0 %6161  ;;  %v13994_v56 = vld [vmem:[#allocation9_spill] sm:$0xff]  ;;  %v13997_v43 = vld [vmem:[#allocation23_spill] sm:$0xff]  ;;  %v14000_v5 = vld [vmem:[#allocation26_spill] sm:$0xff] }
 0x5d2   : > { %v13022_v17 = vpop.f32.mrf.mxu0  ;;  %v5878_v21 = vpop.f32.mrf.mxu1  ;;  %v5286_v3 = vadd.f32 %v13991_v34, %v5116_v30  ;;  %v5492_v11 = vadd.f32 %v13993_v25, %v5278_v49  ;;  %v13048_v53 = vadd.f32 %v13994_v56, %v5117_v4  ;;  %v5493_v23 = vadd.f32 %v13996_v32, %v5279_v31  ;;  %v14001_v47 = vld [vmem:[#allocation27_spill] sm:$0xff]  ;;  %v14006_v56 = vld [vmem:[#allocation34_spill] sm:$0xff] }
 0x5d3   : > { %v5916_v54 = vadd.f32 %v5878_v21, %v5702_v26  ;;  %v13995_v26 = vld [vmem:[#allocation18_spill] sm:$0xff]  ;;  %v5494_v30 = vadd.f32 %v13999_v61, %v5280_v7  ;;  %v5496_v31 = vadd.f32 %v12942_v41, %v5282_v12  ;;  %v14005_v41 = vld [vmem:[#allocation32_spill] sm:$0xff]  ;;  %v14007_v32 = vld [vmem:[#allocation35_spill] sm:$0xff] }
 0x5d4   : > { %v5880_v18 = vpop.f32.mrf.mxu1  ;;  %v6090_v35 = vpop.f32.mrf.mxu0  ;;  %v5707_v51 = vadd.f32 %v14001_v47, %v5493_v23 }
 0x5d5   : > { %v6129_v44 = vadd.f32 %v6090_v35, %v5915_v37  ;;  %v5917_v57 = vadd.f32 %v5880_v18, %v5703_v58  ;;  %v13051_v37 = vadd.f32 %v13995_v26, %v5118_v8  ;;  %v5705_v18 = vadd.f32 %v13997_v43, %v5491_v1  ;;  %v13998_v35 = vld [vmem:[#allocation25_spill] sm:$0xff] }
 0x5d6   : > { %v5882_v40 = vpop.f32.mrf.mxu1  ;;  %v6092_v46 = vpop.f32.mrf.mxu0  ;;  %v5706_v13 = vadd.f32 %v13998_v35, %v5492_v11  ;;  %v5710_v12 = vadd.f32 %v14005_v41, %v5496_v31 }
 0x5d7   : > { %v6194_v16 = vadd.f32 %v6157_v38, %v6129_v44  ;;  %v6130_v29 = vadd.f32 %v6092_v46, %v5916_v54  ;;  %v5918_v19 = vadd.f32 %v5882_v40, %v5704_v33 }
 0x5d8   : > { %v5886_v15 = vpop.f32.mrf.mxu1  ;;  %v6094_v50 = vpop.f32.mrf.mxu0 }
 0x5d9   : > { %v6195_v21 = vadd.f32 %v6157_v38, %v6130_v29  ;;  %v6131_v27 = vadd.f32 %v6094_v50, %v5917_v57  ;;  %v6210_v58 = vmax.f32 %v6194_v16, 0.0  ;;  %v5495_v38 = vadd.f32 %v14000_v5, %v5281_v28  ;;  %v14002_v57 = vld [vmem:[#allocation28_spill] sm:$0xff]  ;;  %v14003_v16 = vld [vmem:[#allocation30_spill] sm:$0xff] }
 0x5da   : > { %v5888_v52 = vpop.f32.mrf.mxu1  ;;  %v6096_v49 = vpop.f32.mrf.mxu0  ;;  %v5919_v4 = vadd.f32 %v5886_v15, %v5705_v18  ;;  %v5708_v29 = vadd.f32 %v14002_v57, %v5494_v30  ;;  %v5497_v63 = vadd.f32 %v14003_v16, %v5283_v24  ;;  %v14004_v15 = vld [vmem:[#allocation31_spill] sm:$0xff]  ;;  %v5500_v30 = vadd.f32 %v12966_v55, %v5286_v3  ;;  %v14009_v3 = vld [vmem:[#allocation36_spill] sm:$0xff] }
 0x5db   : > { %v6211_v54 = vmax.f32 %v6195_v21, 0.0  ;;  %v6196_v44 = vadd.f32 %v6162_v2, %v6131_v27  ;;  %v6132_v42 = vadd.f32 %v6096_v49, %v5918_v19  ;;  %v5920_v14 = vadd.f32 %v5888_v52, %v5706_v13 }
 0x5dc   : > { %v5890_v62 = vpop.f32.mrf.mxu1  ;;  %v6100_v40 = vpop.f32.mrf.mxu0  ;;  %v5709_v8 = vadd.f32 %v12950_v22, %v5495_v38  ;;  %v5498_v50 = vadd.f32 %v14004_v15, %v5284_v59  ;;  %v5711_v23 = vadd.f32 %v14007_v32, %v5497_v63  ;;  %v14008_v38 = vld [vmem:[#allocation37_spill] sm:$0xff] }
 0x5dd   : > { %v8434_v46 = vpack.c.bf16 %v6211_v54, %v6210_v58  ;;  %v6197_v33 = vadd.f32 %v6162_v2, %v6132_v42  ;;  %v6133_v34 = vadd.f32 %v6100_v40, %v5919_v4  ;;  %v6212_v28 = vmax.f32 %v6196_v44, 0.0 }
 0x5de   : > { %v5892_v7 = vpop.f32.mrf.mxu1  ;;  %v6102_v10 = vpop.f32.mrf.mxu0  ;;  %v5921_v25 = vadd.f32 %v5890_v62, %v5707_v51  ;;  %v5499_v2 = vadd.f32 %v14006_v56, %v5285_v0  ;;  %v5712_v47 = vadd.f32 %v14008_v38, %v5498_v50 }
 0x5df   : > { %6274 = vst [vmem:[#allocation2 + $0x30] sm:$0xff] %v8434_v46  ;;  %v6213_v1 = vmax.f32 %v6197_v33, 0.0  ;;  %v6134_v11 = vadd.f32 %v6102_v10, %v5920_v14  ;;  %v6198_v19 = vadd.f32 %v13000_v20, %v6133_v34  ;;  %v5922_v27 = vadd.f32 %v5892_v7, %v5708_v29 }
 0x5e0   : > { %v5896_v21 = vpop.f32.mrf.mxu1  ;;  %v6104_v24 = vpop.f32.mrf.mxu0  ;;  %v13072_v61 = vpack.c.bf16 %v6212_v28, %v6210_v58  ;;  %v13079_v31 = vpack.i.bf16 %v6212_v28, %v6210_v58  ;;  %v5501_v29 = vadd.f32 %v12979_v6, %v13048_v53  ;;  %v5713_v55 = vadd.f32 %v12981_v45, %v5499_v2 }
 0x5e1   : > { %v6199_v22 = vadd.f32 %v13000_v20, %v6134_v11  ;;  %v6135_v26 = vadd.f32 %v6104_v24, %v5921_v25  ;;  %v5923_v43 = vadd.f32 %v5896_v21, %v5709_v8  ;;  %v6214_v13 = vmax.f32 %v6198_v19, 0.0 }
 0x5e2   : > { %v5898_v18 = vpop.f32.mrf.mxu1  ;;  %v6106_v35 = vpop.f32.mrf.mxu0  ;;  %v13070_v42 = vpack.c.bf16 %v6213_v1, %v6211_v54  ;;  %v13077_v40 = vpack.i.bf16 %v6213_v1, %v6211_v54  ;;  %v5714_v7 = vadd.f32 %v12998_v9, %v5500_v30  ;;  %v5715_v50 = vadd.f32 %v13011_v39, %v5501_v29  ;;  %v14012_v29 = vld [vmem:[#allocation8_spill] sm:$0xff] }
 0x5e3   : > { %v6215_v52 = vmax.f32 %v6199_v22, 0.0  ;;  %v6200_v59 = vadd.f32 %v13024_v36, %v6135_v26  ;;  %v6136_v49 = vadd.f32 %v6106_v35, %v5922_v27  ;;  %v5924_v20 = vadd.f32 %v5898_v18, %v5710_v12 }
 0x5e4   : > { %v5900_v44 = vpop.f32.mrf.mxu1  ;;  %v6110_v0 = vpop.f32.mrf.mxu0 }
 0x5e5   : > { %v6201_v5 = vadd.f32 %v13024_v36, %v6136_v49  ;;  %v6137_v51 = vadd.f32 %v6110_v0, %v5923_v43  ;;  %v6216_v46 = vmax.f32 %v6200_v59, 0.0  ;;  %v5925_v33 = vadd.f32 %v5900_v44, %v5711_v23  ;;  %v14010_v23 = vld [vmem:[#allocation29_spill] sm:$0xff] }
 0x5e6   : > { %v5902_v4 = vpop.f32.mrf.mxu1  ;;  %v6112_v62 = vpop.f32.mrf.mxu0  ;;  %v5502_v36 = vadd.f32 %v12996_v60, %v13051_v37  ;;  %v14011_v44 = vld [vmem:[#allocation33_spill] sm:$0xff] }
 0x5e7   : > { %v6217_v14 = vmax.f32 %v6201_v5, 0.0  ;;  %v6138_v57 = vadd.f32 %v6112_v62, %v5924_v20  ;;  %v6202_v16 = vadd.f32 %v14009_v3, %v6137_v51  ;;  %v5926_v54 = vadd.f32 %v5902_v4, %v5712_v47 }
 0x5e8   : > { %v5906_v63 = vpop.f32.mrf.mxu1  ;;  %v6114_v8 = vpop.f32.mrf.mxu0  ;;  %v13092_v15 = vpack.c.bf16 %v6216_v46, %v6214_v13  ;;  %v5716_v9 = vadd.f32 %v13022_v17, %v5502_v36  ;;  %v13099_v24 = vpack.i.bf16 %v6216_v46, %v6214_v13 }
 0x5e9   : > { %v6203_v58 = vadd.f32 %v14009_v3, %v6138_v57  ;;  %v6139_v34 = vadd.f32 %v6114_v8, %v5925_v33  ;;  %v5927_v10 = vadd.f32 %v5906_v63, %v5713_v55  ;;  %v6218_v25 = vmax.f32 %v6202_v16, 0.0  ;;  %v8326_v33 = vld [vmem:[%s13863_s3 + $0x1] ss:$8 sm:$0x3] }
 0x5ea   : > { %v5908_v28 = vpop.f32.mrf.mxu1  ;;  %v6116_v1 = vpop.f32.mrf.mxu0  ;;  %v13090_v37 = vpack.c.bf16 %v6217_v14, %v6215_v52  ;;  %v13097_v21 = vpack.i.bf16 %v6217_v14, %v6215_v52  ;;  %v13201_v55 = vrot.slane %v8326_v33, %v14012_v29  ;;  %v14013_v3 = vld [vmem:[#allocation7_spill] sm:$0xff] }
 0x5eb   : > { %v6219_v6 = vmax.f32 %v6203_v58, 0.0  ;;  %v6204_v45 = vadd.f32 %v12983_v48, %v6139_v34  ;;  %v6140_v53 = vadd.f32 %v6116_v1, %v5926_v54  ;;  %v5928_v41 = vadd.f32 %v5908_v28, %v5714_v7  ;;  %v9886_v34 = vld [vmem:[#allocation3 + $0x410] sm:$0xff]  }
 0x5ec   : > { %v5910_v11 = vpop.f32.mrf.mxu1  ;;  %v6120_v60 = vpop.f32.mrf.mxu0  ;;  %v13204_v16 = vrot.slane %v8326_v33, %v14013_v3 }
 0x5ed   : > { %v6205_v12 = vadd.f32 %v12983_v48, %v6140_v53  ;;  %v6141_v56 = vadd.f32 %v6120_v60, %v5927_v10  ;;  %v6220_v27 = vmax.f32 %v6204_v45, 0.0  ;;  %v5929_v26 = vadd.f32 %v5910_v11, %v5715_v50 }
 0x5ee   : > { %v5912_v2 = vpop.f32.mrf.mxu1  ;;  %v6122_v19 = vpop.f32.mrf.mxu0 }
 0x5ef   : > { %v6221_v22 = vmax.f32 %v6205_v12, 0.0  ;;  %v6142_v32 = vadd.f32 %v6122_v19, %v5928_v41  ;;  %v6206_v43 = vadd.f32 %v14010_v23, %v6141_v56  ;;  %v5930_v39 = vadd.f32 %v5912_v2, %v5716_v9 }
 0x5f0   : > { %v6124_v18 = vpop.f32.mrf.mxu0  ;;  %v13106_v13 = vpack.c.bf16 %v6220_v27, %v6218_v25  ;;  %v9439_v38 = vpack.i.bf16 %v6220_v27, %v6218_v25 }
 0x5f1   : > { %v6207_v35 = vadd.f32 %v14010_v23, %v6142_v32  ;;  %v6143_v48 = vadd.f32 %v6124_v18, %v5929_v26  ;;  %v6222_v59 = vmax.f32 %v6206_v43, 0.0  ;;  %v13104_v30 = vpack.c.bf16 %v6221_v22, %v6219_v6 }
 0x5f2   : > { %v6126_v17 = vpop.f32.mrf.mxu0  ;;  %v9449_v5 = vpack.i.bf16 %v6221_v22, %v6219_v6 }
 0x5f3   : > { %v6223_v49 = vmax.f32 %v6207_v35, 0.0  ;;  %v6208_v0 = vadd.f32 %v14011_v44, %v6143_v48  ;;  %v6144_v52 = vadd.f32 %v6126_v17, %v5930_v39 }
 0x5f5   : > { %v6209_v20 = vadd.f32 %v14011_v44, %v6144_v52  ;;  %v6224_v47 = vmax.f32 %v6208_v0, 0.0 }
 0x5f7   : > { %v6225_v51 = vmax.f32 %v6209_v20, 0.0  ;;  %v13111_v62 = vpack.c.bf16 %v6224_v47, %v6222_v59  ;;  %v9434_v14 = vpack.i.bf16 %v6224_v47, %v6222_v59 }
 0x5f9   : > { %v13109_v4 = vpack.c.bf16 %v6225_v51, %v6223_v49  ;;  %v9444_v46 = vpack.i.bf16 %v6225_v51, %v6223_v49  ;;  %9435 = vrot.lane.b32.xlu1 %v9434_v14, %s9965_s26 }
 0x5fb   : > { %9445 = vrot.lane.b32.xlu0 %v9444_v46, %s9965_s26 }
 0x5fd   : > { %9440 = vrot.lane.b32.xlu1 %v9439_v38, %s9965_s26 }
 0x5ff   : > { %9450 = vrot.lane.b32.xlu0 %v9449_v5, %s9965_s26 }
 0x601   : > { %9455 = vrot.lane.b32.xlu1 %v13099_v24, %s9965_s26 }
 0x603   : > { %9460 = vrot.lane.b32.xlu0 %v13097_v21, %s9965_s26 }
 0x605   : > { %9465 = vrot.lane.b32.xlu1 %v13079_v31, %s9965_s26 }
 0x607   : > { %9470 = vrot.lane.b32.xlu0 %v13077_v40, %s9965_s26 }
 0x609   : > { %9475 = vrot.lane.b32.xlu1 %v9439_v38, %s9966_s30 }
 0x60b   : > { %9480 = vrot.lane.b32.xlu0 %v9449_v5, %s9966_s30 }
 0x60d   : > { %9485 = vrot.lane.b32.xlu1 %v9439_v38, %s9967_s5 }
 0x60f   : > { %9490 = vrot.lane.b32.xlu0 %v9449_v5, %s9967_s5 }
 0x611   : > { %9495 = vrot.lane.b32.xlu1 %v13099_v24, %s9966_s30 }
 0x613   : > { %9500 = vrot.lane.b32.xlu0 %v13097_v21, %s9966_s30 }
 0x615   : > { %9505 = vrot.lane.b32.xlu1 %v9434_v14, %s9966_s30 }
 0x617   : > { %9510 = vrot.lane.b32.xlu0 %v9444_v46, %s9966_s30 }
 0x619   : > { %9515 = vrot.lane.b32.xlu1 %v9434_v14, %s9967_s5 }
 0x61b   : > { %9525 = vrot.lane.b32.xlu0 %v9444_v46, %s9967_s5 }
 0x61d   : > { %9520 = vrot.lane.b32.xlu1 %v13099_v24, %s9967_s5 }
 0x61f   : > { %9530 = vrot.lane.b32.xlu0 %v13097_v21, %s9967_s5 }
 0x621   : > { %9535 = vrot.lane.b32.xlu1 %v13079_v31, %s9966_s30 }
 0x623   : > { %9540 = vrot.lane.b32.xlu0 %v13077_v40, %s9966_s30 }
 0x625   : > { %9545 = vrot.lane.b32.xlu1 %v13079_v31, %s9967_s5 }
 0x627   : > { %9550 = vrot.lane.b32.xlu0 %v13077_v40, %s9967_s5 }
 0x629   : > { %9555 = vrot.lane.b32.xlu1 %v9434_v14, %s9968_s6 }
 0x62b   : > { %9565 = vrot.lane.b32.xlu0 %v9444_v46, %s9968_s6 }
 0x62d   : > { %9560 = vrot.lane.b32.xlu1 %v9439_v38, %s9968_s6 }
 0x62f   : > { %9570 = vrot.lane.b32.xlu0 %v9449_v5, %s9968_s6 }
 0x631   : > { %9575 = vrot.lane.b32.xlu1 %v13099_v24, %s9968_s6 }
 0x633   : > { %9580 = vrot.lane.b32.xlu0 %v13097_v21, %s9968_s6 }
 0x635   : > { %9585 = vrot.lane.b32.xlu1 %v13079_v31, %s9968_s6 }
 0x637   : > { %9590 = vrot.lane.b32.xlu0 %v13077_v40, %s9968_s6 }
 0x639   : > { %9595 = vrot.lane.b32.xlu1 %v9439_v38, %s9969_s7 }
 0x63b   : > { %9600 = vrot.lane.b32.xlu0 %v9449_v5, %s9969_s7 }
 0x63d   : > { %9605 = vrot.lane.b32.xlu1 %v9439_v38, %s9970_s8 }
 0x63f   : > { %9610 = vrot.lane.b32.xlu0 %v9449_v5, %s9970_s8 }
 0x641   : > { %9615 = vrot.lane.b32.xlu1 %v13099_v24, %s9969_s7 }
 0x643   : > { %9620 = vrot.lane.b32.xlu0 %v13097_v21, %s9969_s7 }
 0x645   : > { %9625 = vrot.lane.b32.xlu1 %v9434_v14, %s9969_s7 }
 0x647   : > { %9630 = vrot.lane.b32.xlu0 %v9444_v46, %s9969_s7 }
 0x649   : > { %9635 = vrot.lane.b32.xlu1 %v9434_v14, %s9970_s8 }
 0x64b   : > { %9645 = vrot.lane.b32.xlu0 %v9444_v46, %s9970_s8 }
 0x64d   : > { %9640 = vrot.lane.b32.xlu1 %v13099_v24, %s9970_s8 }
 0x64f   : > { %9650 = vrot.lane.b32.xlu0 %v13097_v21, %s9970_s8 }
 0x651   : > { %9655 = vrot.lane.b32.xlu1 %v13079_v31, %s9969_s7 }
 0x653   : > { %9660 = vrot.lane.b32.xlu0 %v13077_v40, %s9969_s7 }
 0x655   : > { %9665 = vrot.lane.b32.xlu1 %v13079_v31, %s9970_s8 }
 0x657   : > { %9670 = vrot.lane.b32.xlu0 %v13077_v40, %s9970_s8 }
 0x659   : > { %9675 = vrot.lane.b32.xlu1 %v9439_v38, %s9971_s9 }
 0x65b   : > { %9680 = vrot.lane.b32.xlu0 %v9449_v5, %s9971_s9 }
 0x65d   : > { %9685 = vrot.lane.b32.xlu1 %v9439_v38, %s9972_s10 }
 0x65f   : > { %9690 = vrot.lane.b32.xlu0 %v9449_v5, %s9972_s10 }
 0x661   : > { %9695 = vrot.lane.b32.xlu1 %v13099_v24, %s9971_s9 }
 0x663   : > { %9700 = vrot.lane.b32.xlu0 %v13097_v21, %s9971_s9 }
 0x665   : > { %9705 = vrot.lane.b32.xlu1 %v9434_v14, %s9971_s9 }
 0x667   : > { %9710 = vrot.lane.b32.xlu0 %v9444_v46, %s9971_s9 }
 0x669   : > { %9715 = vrot.lane.b32.xlu1 %v9434_v14, %s9972_s10 }
 0x66b   : > { %9725 = vrot.lane.b32.xlu0 %v9444_v46, %s9972_s10  ;;  %v9436_v36 = vpop.permute.xlu1 %9435 }
 0x66c   : > { %v9438_v54 = vunpack.i.h.bf16 %v9436_v36  ;;  %v9437_v58 = vunpack.i.l.bf16 %v9436_v36 }
 0x66d   : > { %v9446_v57 = vpop.permute.xlu0 %9445  ;;  %9720 = vrot.lane.b32.xlu1 %v13099_v24, %s9972_s10 }
 0x66e   : > { %v9448_v63 = vunpack.i.h.bf16 %v9446_v57  ;;  %v9447_v8 = vunpack.i.l.bf16 %v9446_v57 }
 0x66f   : > { %9730 = vrot.lane.b32.xlu0 %v13097_v21, %s9972_s10  ;;  %v9441_v53 = vpop.permute.xlu1 %9440 }
 0x670   : > { %v6438_v7 = vsel %vm384_vm0, %v9438_v54, %v9448_v63  ;;  %v6446_v10 = vsel %vm384_vm0, %v9448_v63, %v9438_v54  ;;  %v6437_v28 = vsel %vm384_vm0, %v9437_v58, %v9447_v8  ;;  %v6445_v1 = vsel %vm384_vm0, %v9447_v8, %v9437_v58 }
 0x671   : > { %v6473_v25 = vmul.f32 %v13201_v55, %v6446_v10  ;;  %v6471_v6 = vmul.f32 %v13201_v55, %v6445_v1  ;;  %v9451_v45 = vpop.permute.xlu0 %9450  ;;  %v6472_v11 = vmul.f32 %v13204_v16, %v6437_v28  ;;  %v6474_v60 = vmul.f32 %v13204_v16, %v6438_v7  ;;  %9735 = vrot.lane.b32.xlu1 %v13079_v31, %s9971_s9 }
 0x672   : > { %v9453_v50 = vunpack.i.h.bf16 %v9451_v45  ;;  %v9452_v41 = vunpack.i.l.bf16 %v9451_v45  ;;  %v9443_v12 = vunpack.i.h.bf16 %v9441_v53  ;;  %v9442_v9 = vunpack.i.l.bf16 %v9441_v53 }
 0x673   : > { %9740 = vrot.lane.b32.xlu0 %v13077_v40, %s9971_s9  ;;  %v6482_v56 = vpack.c.bf16 %v6474_v60, %v6472_v11  ;;  %v6481_v2 = vpack.c.bf16 %v6473_v25, %v6471_v6  ;;  %v9456_v23 = vpop.permute.xlu1 %9455  ;;  %v6354_v6 = vld [vmem:[%s13863_s3] ss:$8 sm:$0x3] }
 0x674   : > { %v6436_v19 = vsel %vm384_vm0, %v9443_v12, %v9453_v50  ;;  %v6444_v21 = vsel %vm384_vm0, %v9453_v50, %v9443_v12  ;;  %v6435_v24 = vsel %vm384_vm0, %v9442_v9, %v9452_v41  ;;  %v6443_v27 = vsel %vm384_vm0, %v9452_v41, %v9442_v9 }
 0x675   : > { %v6469_v22 = vmul.f32 %v13201_v55, %v6444_v21  ;;  %v6467_v26 = vmul.f32 %v13201_v55, %v6443_v27  ;;  %v9461_v32 = vpop.permute.xlu0 %9460  ;;  %6532 = vmatprep.subr.bf16.mxu1 %v6482_v56  ;;  %v6468_v43 = vmul.f32 %v13204_v16, %v6435_v24  ;;  %v6470_v18 = vmul.f32 %v13204_v16, %v6436_v19 }
 0x676   : > { %v9463_v39 = vunpack.i.h.bf16 %v9461_v32  ;;  %v9462_v35 = vunpack.i.l.bf16 %v9461_v32  ;;  %v9458_v48 = vunpack.i.h.bf16 %v9456_v23  ;;  %v9457_v59 = vunpack.i.l.bf16 %v9456_v23  ;;  %6533 = vmatpush1.bf16.msra.mxu1 %v6481_v2  ;;  %9745 = vrot.lane.b32.xlu1 %v13079_v31, %s9972_s10  ;;  %v8343_v2 = vld [vmem:[%s13863_s3 + $0x2] ss:$8 sm:$0x3] }
 0x677   : > { %9750 = vrot.lane.b32.xlu0 %v13077_v40, %s9972_s10  ;;  %v6480_v17 = vpack.c.bf16 %v6470_v18, %v6468_v43  ;;  %v6479_v49 = vpack.c.bf16 %v6469_v22, %v6467_v26  ;;  %v8413_v40 = vld [vmem:[%s13862_s2 + $0xc0] sm:$0xff]  ;;  %v9466_v47 = vpop.permute.xlu1 %9465  ;;  %v13279_v19 = vrot.slane %v6354_v6, %v14013_v3 }
 0x678   : > { %v6434_v44 = vsel %vm384_vm0, %v9458_v48, %v9463_v39  ;;  %v6442_v0 = vsel %vm384_vm0, %v9463_v39, %v9458_v48  ;;  %v6433_v52 = vsel %vm384_vm0, %v9457_v59, %v9462_v35  ;;  %v6441_v20 = vsel %vm384_vm0, %v9462_v35, %v9457_v59  ;;  %v9862_v32 = vld [vmem:[#allocation3 + $0x380] sm:$0xff]  }
 0x679   : > { %v6465_v31 = vmul.f32 %v13201_v55, %v6442_v0  ;;  %v6463_v5 = vmul.f32 %v13201_v55, %v6441_v20  ;;  %v9471_v38 = vpop.permute.xlu0 %9470  ;;  %6534 = vmatprep.subr.bf16.mxu1 %v6480_v17  ;;  %v6464_v51 = vmul.f32 %v13204_v16, %v6433_v52  ;;  %v6466_v46 = vmul.f32 %v13204_v16, %v6434_v44  ;;  %v13310_v0 = vld [vmem:[%s13863_s3 + $0x3] ss:$8 sm:$0x3] }
 0x67a   : > { %v9473_v14 = vunpack.i.h.bf16 %v9471_v38  ;;  %v9472_v33 = vunpack.i.l.bf16 %v9471_v38  ;;  %v9468_v57 = vunpack.i.h.bf16 %v9466_v47  ;;  %v9467_v36 = vunpack.i.l.bf16 %v9466_v47  ;;  %6535 = vmatpush1.bf16.msra.mxu1 %v6479_v49  ;;  %7936 = vperm.xlu1 %8793, %v8413_v40  }
 0x67b   : > { %v6478_v63 = vpack.c.bf16 %v6466_v46, %v6464_v51  ;;  %v6477_v8 = vpack.c.bf16 %v6465_v31, %v6463_v5  ;;  %v9476_v45 = vpop.permute.xlu1 %9475  ;;  %v13290_v35 = vrot.slane %v8343_v2, %v14012_v29  ;;  %v13293_v48 = vrot.slane %v8343_v2, %v14013_v3 }
 0x67c   : > { %v6432_v54 = vsel %vm384_vm0, %v9468_v57, %v9473_v14  ;;  %v6440_v58 = vsel %vm384_vm0, %v9473_v14, %v9468_v57  ;;  %v6431_v7 = vsel %vm384_vm0, %v9467_v36, %v9472_v33  ;;  %v6439_v10 = vsel %vm384_vm0, %v9472_v33, %v9467_v36 }
 0x67d   : > { %v6461_v28 = vmul.f32 %v13201_v55, %v6440_v58  ;;  %v6459_v1 = vmul.f32 %v13201_v55, %v6439_v10  ;;  %v9481_v25 = vpop.permute.xlu0 %9480  ;;  %6536 = vmatprep.subr.bf16.mxu1 %v6478_v63  ;;  %v6460_v53 = vmul.f32 %v13204_v16, %v6431_v7  ;;  %v6462_v11 = vmul.f32 %v13204_v16, %v6432_v54 }
 0x67e   : > { %v9483_v60 = vunpack.i.h.bf16 %v9481_v25  ;;  %v9482_v50 = vunpack.i.l.bf16 %v9481_v25  ;;  %v9478_v41 = vunpack.i.h.bf16 %v9476_v45  ;;  %v9477_v12 = vunpack.i.l.bf16 %v9476_v45  ;;  %6537 = vmatpush1.bf16.msra.mxu1 %v6477_v8 }
 0x67f   : > { %v6476_v9 = vpack.c.bf16 %v6462_v11, %v6460_v53  ;;  %v6475_v56 = vpack.c.bf16 %v6461_v28, %v6459_v1  ;;  %v13273_v55 = vrot.slane %v6354_v6, %v14012_v29  ;;  %v9486_v26 = vpop.permute.xlu1 %9485  ;;  %v14015_v33 = vmov 0   ;;  %v9863_v1 = vld [vmem:[#allocation3 + $0x388] sm:$0xff]  }
 0x680   : > { %v6343_v16 = vsel %vm291_vm1, %v9478_v41, %v9483_v60  ;;  %v6351_v21 = vsel %vm291_vm1, %v9483_v60, %v9478_v41  ;;  %v6342_v24 = vsel %vm291_vm1, %v9477_v12, %v9482_v50  ;;  %v6350_v27 = vsel %vm291_vm1, %v9482_v50, %v9477_v12 }
 0x681   : > { %v9491_v22 = vpop.permute.xlu0 %9490  ;;  %6538 = vmatprep.subr.bf16.mxu1 %v6476_v9  ;;  %v9488_v18 = vunpack.i.h.bf16 %v9486_v26  ;;  %v9487_v39 = vunpack.i.l.bf16 %v9486_v26  ;;  %v13296_v59 = vmul.f32 %v13273_v55, %v6351_v21  ;;  %v13299_v17 = vmul.f32 %v13273_v55, %v6350_v27 }
 0x682   : > { %v9493_v23 = vunpack.i.h.bf16 %v9491_v22  ;;  %v9492_v43 = vunpack.i.l.bf16 %v9491_v22  ;;  %6539 = vmatpush1.bf16.msra.mxu1 %v6475_v56  ;;  %v13302_v49 = vmul.f32 %v13279_v19, %v6342_v24  ;;  %v13305_v44 = vmul.f32 %v13279_v19, %v6343_v16 }
 0x683   : > { %v9496_v38 = vpop.permute.xlu1 %9495  ;;  %v13324_v57 = vrot.slane %v13310_v0, %v14012_v29  ;;  %v6386_v54 = vpack.c.bf16 %v13296_v59, %v13299_v17 }
 0x684   : > { %v6711_v52 = vsel %vm690_vm2, %v9488_v18, %v9493_v23  ;;  %v6719_v20 = vsel %vm690_vm2, %v9493_v23, %v9488_v18  ;;  %v6710_v40 = vsel %vm690_vm2, %v9487_v39, %v9492_v43  ;;  %v6718_v31 = vsel %vm690_vm2, %v9492_v43, %v9487_v39 }
 0x685   : > { %v9501_v5 = vpop.permute.xlu0 %9500  ;;  %8331 = vmatmul.mubr.msk.bf16.vlgmr.msra.gmra.mxu1 %vm467_vm3, %v9862_v32  ;;  %v9498_v46 = vunpack.i.h.bf16 %v9496_v38  ;;  %v9497_v14 = vunpack.i.l.bf16 %v9496_v38  ;;  %v6387_v8 = vpack.c.bf16 %v13305_v44, %v13302_v49  ;;  %v13335_v58 = vmul.f32 %v13290_v35, %v6719_v20 }
 0x686   : > { %v9503_v47 = vunpack.i.h.bf16 %v9501_v5  ;;  %v9502_v51 = vunpack.i.l.bf16 %v9501_v5  ;;  %6564 = vmatprep.mubr.bf16.mxu1 %v14015_v33  ;;  %v13338_v7 = vmul.f32 %v13290_v35, %v6718_v31  ;;  %v13341_v25 = vmul.f32 %v13293_v48, %v6710_v40 }
 0x687   : > { %v9506_v28 = vpop.permute.xlu1 %9505  ;;  %v13344_v6 = vmul.f32 %v13293_v48, %v6711_v52 }
 0x688   : > { %v6349_v36 = vsel %vm291_vm1, %v9503_v47, %v9498_v46  ;;  %v6348_v63 = vsel %vm291_vm1, %v9502_v51, %v9497_v14  ;;  %v9508_v11 = vunpack.i.h.bf16 %v9506_v28  ;;  %v9507_v60 = vunpack.i.l.bf16 %v9506_v28 }
 0x689   : > { %v9511_v10 = vpop.permute.xlu0 %9510  ;;  %v6341_v50 = vsel %vm291_vm1, %v9498_v46, %v9503_v47  ;;  %v13349_v41 = vmul.f32 %v13273_v55, %v6349_v36  ;;  %v6340_v12 = vsel %vm291_vm1, %v9497_v14, %v9502_v51  ;;  %v13354_v9 = vmul.f32 %v13273_v55, %v6348_v63  ;;  %v9864_v63 = vld [vmem:[#allocation3 + $0x390] sm:$0xff]  }
 0x68a   : > { %v9513_v45 = vunpack.i.h.bf16 %v9511_v10  ;;  %v9512_v53 = vunpack.i.l.bf16 %v9511_v10  ;;  %v6371_v20 = vmul.f32 %v13279_v19, %v6340_v12  ;;  %v6373_v40 = vmul.f32 %v13279_v19, %v6341_v50 }
 0x68b   : > { %v9516_v26 = vpop.permute.xlu1 %9515  ;;  %v6755_v12 = vpack.c.bf16 %v13344_v6, %v13341_v25 }
 0x68c   : > { %v6345_v56 = vsel %vm291_vm1, %v9508_v11, %v9513_v45  ;;  %v6353_v2 = vsel %vm291_vm1, %v9513_v45, %v9508_v11  ;;  %v6344_v16 = vsel %vm291_vm1, %v9507_v60, %v9512_v53  ;;  %v6352_v21 = vsel %vm291_vm1, %v9512_v53, %v9507_v60 }
 0x68d   : > { %v6380_v24 = vmul.f32 %v13273_v55, %v6353_v2  ;;  %v6378_v27 = vmul.f32 %v13273_v55, %v6352_v21  ;;  %v9526_v22 = vpop.permute.xlu0 %9525  ;;  %8332 = vmatmul.mubr.msk.bf16.gmra.mxu1 %vm467_vm3, %v9863_v1  ;;  %v6379_v32 = vmul.f32 %v13279_v19, %v6344_v16  ;;  %v6381_v23 = vmul.f32 %v13279_v19, %v6345_v56 }
 0x68e   : > { %v9528_v43 = vunpack.i.h.bf16 %v9526_v22  ;;  %v9527_v18 = vunpack.i.l.bf16 %v9526_v22  ;;  %v9518_v39 = vunpack.i.h.bf16 %v9516_v26  ;;  %v9517_v49 = vunpack.i.l.bf16 %v9516_v26  ;;  %6570 = vmatprep.mubr.bf16.mxu1 %v14015_v33 }
 0x68f   : > { %v6389_v44 = vpack.c.bf16 %v6381_v23, %v6379_v32  ;;  %v6388_v52 = vpack.c.bf16 %v6380_v24, %v6378_v27  ;;  %v9521_v36 = vpop.permute.xlu1 %9520  ;;  %v6754_v56 = vpack.c.bf16 %v13335_v58, %v13338_v7  ;;  %v6385_v25 = vpack.c.bf16 %v6373_v40, %v6371_v20  ;;  %v9865_v20 = vld [vmem:[#allocation3 + $0x398] sm:$0xff]  }
 0x690   : > { %v6713_v31 = vsel %vm690_vm2, %v9518_v39, %v9528_v43  ;;  %v6721_v5 = vsel %vm690_vm2, %v9528_v43, %v9518_v39  ;;  %v6712_v38 = vsel %vm690_vm2, %v9517_v49, %v9527_v18  ;;  %v6720_v47 = vsel %vm690_vm2, %v9527_v18, %v9517_v49 }
 0x691   : > { %v6748_v51 = vmul.f32 %v13290_v35, %v6721_v5  ;;  %v6746_v46 = vmul.f32 %v13290_v35, %v6720_v47  ;;  %v9531_v14 = vpop.permute.xlu0 %9530  ;;  %6623 = vmatprep.subr.bf16.mxu0 %v6389_v44  ;;  %v6747_v10 = vmul.f32 %v13293_v48, %v6712_v38  ;;  %v6749_v28 = vmul.f32 %v13293_v48, %v6713_v31 }
 0x692   : > { %v9533_v1 = vunpack.i.h.bf16 %v9531_v14  ;;  %v9532_v45 = vunpack.i.l.bf16 %v9531_v14  ;;  %v9523_v53 = vunpack.i.h.bf16 %v9521_v36  ;;  %v9522_v11 = vunpack.i.l.bf16 %v9521_v36  ;;  %6624 = vmatpush1.bf16.msra.mxu0 %v6388_v52 }
 0x693   : > { %6625 = vmatprep.subr.bf16.mxu0 %v6387_v8  ;;  %v6757_v60 = vpack.c.bf16 %v6749_v28, %v6747_v10  ;;  %v6756_v50 = vpack.c.bf16 %v6748_v51, %v6746_v46  ;;  %v9536_v27 = vpop.permute.xlu1 %9535  ;;  %v6384_v58 = vpack.c.bf16 %v13349_v41, %v13354_v9 }
 0x694   : > { %v6709_v2 = vsel %vm690_vm2, %v9523_v53, %v9533_v1  ;;  %v6717_v16 = vsel %vm690_vm2, %v9533_v1, %v9523_v53  ;;  %v6708_v21 = vsel %vm690_vm2, %v9522_v11, %v9532_v45  ;;  %v6716_v8 = vsel %vm690_vm2, %v9532_v45, %v9522_v11 }
 0x695   : > { %v9541_v24 = vpop.permute.xlu0 %9540  ;;  %8333 = vmatmul.mubr.msk.bf16.gmra.mxu1 %vm467_vm3, %v9864_v63  ;;  %6807 = vmatprep.subr.bf16.mxu1 %v6757_v60  ;;  %v6739_v7 = vmul.f32 %v13293_v48, %v6708_v21  ;;  %v9538_v26 = vunpack.i.h.bf16 %v9536_v27  ;;  %v9537_v32 = vunpack.i.l.bf16 %v9536_v27  ;;  %v6740_v23 = vmul.f32 %v13290_v35, %v6717_v16 }
 0x696   : > { %v9543_v6 = vunpack.i.h.bf16 %v9541_v24  ;;  %v9542_v22 = vunpack.i.l.bf16 %v9541_v24  ;;  %6626 = vmatpush1.bf16.msra.mxu0 %v6386_v54  ;;  %6808 = vmatpush1.bf16.msra.mxu1 %v6756_v50  ;;  %v6738_v43 = vmul.f32 %v13290_v35, %v6716_v8  ;;  %v6741_v18 = vmul.f32 %v13293_v48, %v6709_v2  ;;  %v9866_v2 = vld [vmem:[#allocation3 + $0x360] sm:$0xff]  }
 0x697   : > { %6627 = vmatprep.subr.bf16.mxu0 %v6385_v25  ;;  %6809 = vmatprep.subr.bf16.mxu1 %v6755_v12  ;;  %v9546_v44 = vpop.permute.xlu1 %9545 }
 0x698   : > { %v6339_v41 = vsel %vm291_vm1, %v9538_v26, %v9543_v6  ;;  %v6347_v9 = vsel %vm291_vm1, %v9543_v6, %v9538_v26  ;;  %v6338_v39 = vsel %vm291_vm1, %v9537_v32, %v9542_v22  ;;  %v6346_v59 = vsel %vm291_vm1, %v9542_v22, %v9537_v32  ;;  %6576 = vmatprep.mubr.bf16.mxu1 %v14015_v33 }
 0x699   : > { %v6368_v17 = vmul.f32 %v13273_v55, %v6347_v9  ;;  %v6366_v54 = vmul.f32 %v13273_v55, %v6346_v59  ;;  %v9551_v49 = vpop.permute.xlu0 %9550  ;;  %v6753_v52 = vpack.c.bf16 %v6741_v18, %v6739_v7  ;;  %v6367_v40 = vmul.f32 %v13279_v19, %v6338_v39  ;;  %v9867_v18 = vld [vmem:[#allocation3 + $0x3a0] sm:$0xff]  }
 0x69a   : > { %v9553_v31 = vunpack.i.h.bf16 %v9551_v49  ;;  %v9552_v5 = vunpack.i.l.bf16 %v9551_v49  ;;  %v9548_v38 = vunpack.i.h.bf16 %v9546_v44  ;;  %v9547_v47 = vunpack.i.l.bf16 %v9546_v44  ;;  %6628 = vmatpush1.bf16.msra.mxu0 %v6384_v58  ;;  %6810 = vmatpush1.bf16.msra.mxu1 %v6754_v56 }
 0x69b   : > { %6811 = vmatprep.subr.bf16.mxu1 %v6753_v52  ;;  %v6369_v51 = vmul.f32 %v13279_v19, %v6339_v41  ;;  %v6382_v46 = vpack.c.bf16 %v6368_v17, %v6366_v54  ;;  %v6752_v14 = vpack.c.bf16 %v6740_v23, %v6738_v43  ;;  %v13421_v55 = vrot.slane %v13310_v0, %v14013_v3  ;;  %v9556_v53 = vpop.permute.xlu1 %9555 }
 0x69c   : > { %v6707_v36 = vsel %vm690_vm2, %v9548_v38, %v9553_v31  ;;  %v6715_v63 = vsel %vm690_vm2, %v9553_v31, %v9548_v38  ;;  %v6706_v10 = vsel %vm690_vm2, %v9547_v47, %v9552_v5  ;;  %v6714_v28 = vsel %vm690_vm2, %v9552_v5, %v9547_v47 }
 0x69d   : > { %v6736_v19 = vmul.f32 %v13290_v35, %v6715_v63  ;;  %v6734_v1 = vmul.f32 %v13290_v35, %v6714_v28  ;;  %v9566_v45 = vpop.permute.xlu0 %9565  ;;  %8334 = vmatmul.mubr.msk.bf16.gmra.mxu1 %vm467_vm3, %v9865_v20  ;;  %v6383_v0 = vpack.c.bf16 %v6369_v51, %v6367_v40  ;;  %v6735_v11 = vmul.f32 %v13293_v48, %v6706_v10  ;;  %v9868_v51 = vld [vmem:[#allocation3 + $0x368] sm:$0xff]  }
 0x69e   : > { %v9568_v60 = vunpack.i.h.bf16 %v9566_v45  ;;  %v9567_v50 = vunpack.i.l.bf16 %v9566_v45  ;;  %v9558_v12 = vunpack.i.h.bf16 %v9556_v53  ;;  %v9557_v56 = vunpack.i.l.bf16 %v9556_v53  ;;  %6812 = vmatpush1.bf16.msra.mxu1 %v6752_v14  ;;  %6831 = vmatprep.mubr.bf16.mxu1 %v14015_v33 }
 0x69f   : > { %6629 = vmatprep.subr.bf16.mxu0 %v6383_v0  ;;  %v6737_v16 = vmul.f32 %v13293_v48, %v6707_v36  ;;  %v6750_v21 = vpack.c.bf16 %v6736_v19, %v6734_v1  ;;  %v9561_v48 = vpop.permute.xlu1 %9560 }
 0x6a0   : > { %v6899_v35 = vsel %vm906_vm4, %v9558_v12, %v9568_v60  ;;  %v6907_v8 = vsel %vm906_vm4, %v9568_v60, %v9558_v12  ;;  %v6898_v24 = vsel %vm906_vm4, %v9557_v56, %v9567_v50  ;;  %v6906_v27 = vsel %vm906_vm4, %v9567_v50, %v9557_v56  ;;  %6630 = vmatpush1.bf16.msra.mxu0 %v6382_v46  ;;  %v9869_v56 = vld [vmem:[#allocation3 + $0x3a8] sm:$0xff]  }
 0x6a1   : > { %v6934_v25 = vmul.f32 %v13324_v57, %v6907_v8  ;;  %v6932_v58 = vmul.f32 %v13324_v57, %v6906_v27  ;;  %v9571_v7 = vpop.permute.xlu0 %9570  ;;  %v6751_v6 = vpack.c.bf16 %v6737_v16, %v6735_v11  ;;  %v6933_v22 = vmul.f32 %v13421_v55, %v6898_v24  ;;  %v8377_v24 = vld [vmem:[%s13863_s3 + $0x5] ss:$8 sm:$0x3] }
 0x6a2   : > { %v9573_v26 = vunpack.i.h.bf16 %v9571_v7  ;;  %v9572_v32 = vunpack.i.l.bf16 %v9571_v7  ;;  %v9563_v23 = vunpack.i.h.bf16 %v9561_v48  ;;  %v9562_v43 = vunpack.i.l.bf16 %v9561_v48 }
 0x6a3   : > { %8339 = vmatmul.mubr.msk.bf16.vlgmr.msra.gmra.mxu0 %vm467_vm3, %v9866_v2  ;;  %6813 = vmatprep.subr.bf16.mxu1 %v6751_v6  ;;  %v6935_v41 = vmul.f32 %v13421_v55, %v6899_v35  ;;  %v6942_v9 = vpack.c.bf16 %v6934_v25, %v6932_v58  ;;  %v9576_v20 = vpop.permute.xlu1 %9575 }
 0x6a4   : > { %v6897_v39 = vsel %vm906_vm4, %v9563_v23, %v9573_v26  ;;  %v6905_v59 = vsel %vm906_vm4, %v9573_v26, %v9563_v23  ;;  %v6896_v17 = vsel %vm906_vm4, %v9562_v43, %v9572_v32  ;;  %v6904_v54 = vsel %vm906_vm4, %v9572_v32, %v9562_v43  ;;  %6814 = vmatpush1.bf16.msra.mxu1 %v6750_v21 }
 0x6a5   : > { %v6930_v49 = vmul.f32 %v13324_v57, %v6905_v59  ;;  %v6928_v44 = vmul.f32 %v13324_v57, %v6904_v54  ;;  %7135 = vmatprep.subr.bf16.mxu1 %v13109_v4  ;;  %v9581_v52 = vpop.permute.xlu0 %9580  ;;  %v6943_v40 = vpack.c.bf16 %v6935_v41, %v6933_v22  ;;  %6655 = vmatprep.mubr.bf16.mxu0 %v14015_v33  ;;  %v9578_v38 = vunpack.i.h.bf16 %v9576_v20 }
 0x6a6   : > { %v9583_v31 = vunpack.i.h.bf16 %v9581_v52  ;;  %v9582_v5 = vunpack.i.l.bf16 %v9581_v52  ;;  %v9577_v47 = vunpack.i.l.bf16 %v9576_v20  ;;  %v6929_v46 = vmul.f32 %v13421_v55, %v6896_v17  ;;  %v8386_v17 = vld [vmem:[%s13863_s3 + $0x6] ss:$8 sm:$0x3] }
 0x6a7   : > { %8348 = vmatmul.mubr.msk.bf16.vlgmr.msra.gmra.mxu1 %vm467_vm3, %v9867_v18  ;;  %6993 = vmatprep.subr.bf16.mxu0 %v6943_v40  ;;  %v6931_v14 = vmul.f32 %v13421_v55, %v6897_v39  ;;  %v6940_v36 = vpack.c.bf16 %v6930_v49, %v6928_v44  ;;  %v9586_v53 = vpop.permute.xlu1 %9585  ;;  %v13498_v23 = vrot.slane %v8377_v24, %v14012_v29 }
 0x6a8   : > { %v6895_v4 = vsel %vm906_vm4, %v9578_v38, %v9583_v31  ;;  %v6903_v63 = vsel %vm906_vm4, %v9583_v31, %v9578_v38  ;;  %v6894_v10 = vsel %vm906_vm4, %v9577_v47, %v9582_v5  ;;  %v6902_v28 = vsel %vm906_vm4, %v9582_v5, %v9577_v47  ;;  %6994 = vmatpush1.bf16.msra.mxu0 %v6942_v9  ;;  %v9871_v31 = vld [vmem:[#allocation3 + $0x3b0] sm:$0xff]  }
 0x6a9   : > { %v6926_v19 = vmul.f32 %v13324_v57, %v6903_v63  ;;  %v6924_v1 = vmul.f32 %v13324_v57, %v6902_v28  ;;  %7136 = vmatpush1.bf16.msra.mxu1 %v13111_v62  ;;  %v9591_v45 = vpop.permute.xlu0 %9590  ;;  %v6941_v0 = vpack.c.bf16 %v6931_v14, %v6929_v46  ;;  %6839 = vmatprep.mubr.bf16.mxu1 %v14015_v33  ;;  %v9588_v50 = vunpack.i.h.bf16 %v9586_v53 }
 0x6aa   : > { %7137 = vmatprep.subr.bf16.mxu1 %v13104_v30  ;;  %v9593_v11 = vunpack.i.h.bf16 %v9591_v45  ;;  %v9592_v60 = vunpack.i.l.bf16 %v9591_v45  ;;  %v9587_v12 = vunpack.i.l.bf16 %v9586_v53  ;;  %v6925_v2 = vmul.f32 %v13421_v55, %v6894_v10  ;;  %v9872_v53 = vld [vmem:[#allocation3 + $0x378] sm:$0xff]  }
 0x6ab   : > { %8340 = vmatmul.mubr.msk.bf16.gmra.mxu0 %vm467_vm3, %v9868_v51  ;;  %6995 = vmatprep.subr.bf16.mxu0 %v6941_v0  ;;  %v6927_v16 = vmul.f32 %v13421_v55, %v6895_v4  ;;  %v6938_v62 = vpack.c.bf16 %v6926_v19, %v6924_v1  ;;  %v9596_v7 = vpop.permute.xlu1 %9595  ;;  %v13508_v9 = vrot.slane %v8377_v24, %v14013_v3  ;;  %v13546_v4 = vld [vmem:[%s13863_s3 + $0x7] ss:$8 sm:$0x3] }
 0x6ac   : > { %v6893_v21 = vsel %vm906_vm4, %v9588_v50, %v9593_v11  ;;  %v6901_v35 = vsel %vm906_vm4, %v9593_v11, %v9588_v50  ;;  %v6892_v30 = vsel %vm906_vm4, %v9587_v12, %v9592_v60  ;;  %v6900_v8 = vsel %vm906_vm4, %v9592_v60, %v9587_v12  ;;  %6996 = vmatpush1.bf16.msra.mxu0 %v6940_v36 }
 0x6ad   : > { %v6922_v27 = vmul.f32 %v13324_v57, %v6901_v35  ;;  %v6920_v25 = vmul.f32 %v13324_v57, %v6900_v8  ;;  %7138 = vmatpush1.bf16.msra.mxu1 %v13106_v13  ;;  %v9601_v58 = vpop.permute.xlu0 %9600  ;;  %v6939_v48 = vpack.c.bf16 %v6927_v16, %v6925_v2  ;;  %6661 = vmatprep.mubr.bf16.mxu0 %v14015_v33  ;;  %v9598_v26 = vunpack.i.h.bf16 %v9596_v7  ;;  %v9870_v57 = vld [vmem:[#allocation3 + $0x370] sm:$0xff]  }
 0x6ae   : > { %7139 = vmatprep.subr.bf16.mxu1 %v13090_v37  ;;  %v9603_v6 = vunpack.i.h.bf16 %v9601_v58  ;;  %v9602_v22 = vunpack.i.l.bf16 %v9601_v58  ;;  %v9597_v32 = vunpack.i.l.bf16 %v9596_v7  ;;  %v6921_v13 = vmul.f32 %v13421_v55, %v6892_v30  ;;  %v9873_v7 = vld [vmem:[#allocation3 + $0x3b8] sm:$0xff]  }
 0x6af   : > { %8349 = vmatmul.mubr.msk.bf16.gmra.mxu1 %vm467_vm3, %v9869_v56  ;;  %6997 = vmatprep.subr.bf16.mxu0 %v6939_v48  ;;  %v6923_v43 = vmul.f32 %v13421_v55, %v6893_v21  ;;  %v6936_v41 = vpack.c.bf16 %v6922_v27, %v6920_v25  ;;  %v9606_v54 = vpop.permute.xlu1 %9605  ;;  %v13528_v38 = vrot.slane %v8386_v17, %v14012_v29 }
 0x6b0   : > { %v7225_v18 = vsel %vm1292_vm5, %v9598_v26, %v9603_v6  ;;  %v7233_v37 = vsel %vm1292_vm5, %v9603_v6, %v9598_v26  ;;  %6998 = vmatpush1.bf16.msra.mxu0 %v6938_v62  ;;  %v7224_v39 = vsel %vm1292_vm5, %v9597_v32, %v9602_v22  ;;  %v7232_v59 = vsel %vm1292_vm5, %v9602_v22, %v9597_v32 }
 0x6b1   : > { %7140 = vmatpush1.bf16.msra.mxu1 %v13092_v15  ;;  %v9611_v55 = vpop.permute.xlu0 %9610  ;;  %v6937_v49 = vpack.c.bf16 %v6923_v43, %v6921_v13  ;;  %6845 = vmatprep.mubr.bf16.mxu1 %v14015_v33  ;;  %v9608_v20 = vunpack.i.h.bf16 %v9606_v54  ;;  %v9607_v40 = vunpack.i.l.bf16 %v9606_v54  ;;  %v13522_v15 = vmul.f32 %v13498_v23, %v7225_v18 }
 0x6b2   : > { %7141 = vmatprep.subr.bf16.mxu1 %v13070_v42  ;;  %v9613_v44 = vunpack.i.h.bf16 %v9611_v55  ;;  %v9612_v52 = vunpack.i.l.bf16 %v9611_v55  ;;  %v13525_v5 = vmul.f32 %v13498_v23, %v7224_v39  ;;  %v13531_v42 = vrot.slane %v8386_v17, %v14013_v3  ;;  %v9874_v17 = vld [vmem:[#allocation3 + $0x3c0] sm:$0xff]  }
 0x6b3   : > { %8341 = vmatmul.mubr.msk.bf16.gmra.mxu0 %vm467_vm3, %v9870_v57  ;;  %6999 = vmatprep.subr.bf16.mxu0 %v6937_v49  ;;  %v9616_v46 = vpop.permute.xlu1 %9615  ;;  %v13538_v14 = vmul.f32 %v13508_v9, %v7232_v59  ;;  %v13541_v36 = vmul.f32 %v13508_v9, %v7233_v37  ;;  %v13563_v60 = vrot.slane %v13546_v4, %v14012_v29 }
 0x6b4   : > { %7000 = vmatpush1.bf16.msra.mxu0 %v6936_v41  ;;  %v7411_v47 = vsel %vm1508_vm6, %v9608_v20, %v9613_v44  ;;  %6667 = vmatprep.mubr.bf16.mxu0 %v14015_v33  ;;  %v7419_v63 = vsel %vm1508_vm6, %v9613_v44, %v9608_v20  ;;  %v7418_v10 = vsel %vm1508_vm6, %v9612_v52, %v9607_v40  ;;  %v9618_v1 = vunpack.i.h.bf16 %v9616_v46 }
 0x6b5   : > { %7142 = vmatpush1.bf16.msra.mxu1 %v13072_v61  ;;  %v9621_v51 = vpop.permute.xlu0 %9620  ;;  %v7410_v61 = vsel %vm1508_vm6, %v9607_v40, %v9612_v52  ;;  %v9617_v45 = vunpack.i.l.bf16 %v9616_v46  ;;  %v13556_v0 = vmul.f32 %v13528_v38, %v7411_v47  ;;  %v7268_v11 = vpack.c.bf16 %v13522_v15, %v13525_v5  ;;  %v9877_v5 = vld [vmem:[#allocation3 + $0x3e8] sm:$0xff]  }
 0x6b6   : > { %v9623_v28 = vunpack.i.h.bf16 %v9621_v51  ;;  %v9622_v19 = vunpack.i.l.bf16 %v9621_v51  ;;  %v13566_v50 = vmul.f32 %v13528_v38, %v7410_v61  ;;  %v7269_v2 = vpack.c.bf16 %v13541_v36, %v13538_v14 }
 0x6b7   : > { %8350 = vmatmul.mubr.msk.bf16.gmra.mxu1 %vm467_vm3, %v9871_v31  ;;  %v9626_v56 = vpop.permute.xlu1 %9625  ;;  %v13571_v16 = vmul.f32 %v13531_v42, %v7418_v10  ;;  %v13574_v62 = vmul.f32 %v13531_v42, %v7419_v63 }
 0x6b8   : > { %6851 = vmatprep.mubr.bf16.mxu1 %v14015_v33  ;;  %v9628_v30 = vunpack.i.h.bf16 %v9626_v56  ;;  %v9627_v8 = vunpack.i.l.bf16 %v9626_v56  ;;  %v7223_v24 = vsel %vm1292_vm5, %v9618_v1, %v9623_v28  ;;  %v7231_v27 = vsel %vm1292_vm5, %v9623_v28, %v9618_v1 }
 0x6b9   : > { %v9631_v12 = vpop.permute.xlu0 %9630  ;;  %v7222_v25 = vsel %vm1292_vm5, %v9617_v45, %v9622_v19  ;;  %v7230_v58 = vsel %vm1292_vm5, %v9622_v19, %v9617_v45  ;;  %v7255_v52 = vmul.f32 %v13508_v9, %v7231_v27 }
 0x6ba   : > { %v9633_v21 = vunpack.i.h.bf16 %v9631_v12  ;;  %v9632_v35 = vunpack.i.l.bf16 %v9631_v12  ;;  %v7253_v44 = vmul.f32 %v13508_v9, %v7230_v58  ;;  %v7254_v12 = vmul.f32 %v13498_v23, %v7223_v24 }
 0x6bb   : > { %8342 = vmatmul.mubr.msk.bf16.gmra.mxu0 %vm467_vm3, %v9872_v53  ;;  %v9636_v43 = vpop.permute.xlu1 %9635  ;;  %v7252_v56 = vmul.f32 %v13498_v23, %v7222_v25 }
 0x6bc   : > { %v7227_v48 = vsel %vm1292_vm5, %v9628_v30, %v9633_v21  ;;  %v7235_v6 = vsel %vm1292_vm5, %v9633_v21, %v9628_v30  ;;  %v7226_v22 = vsel %vm1292_vm5, %v9627_v8, %v9632_v35  ;;  %v7234_v26 = vsel %vm1292_vm5, %v9632_v35, %v9627_v8  ;;  %7017 = vmatprep.mubr.bf16.mxu0 %v14015_v33  ;;  %v9875_v21 = vld [vmem:[#allocation3 + $0x3e0] sm:$0xff]  }
 0x6bd   : > { %v7262_v32 = vmul.f32 %v13498_v23, %v7227_v48  ;;  %v7260_v57 = vmul.f32 %v13498_v23, %v7226_v22  ;;  %v9646_v13 = vpop.permute.xlu0 %9645  ;;  %v7261_v18 = vmul.f32 %v13508_v9, %v7234_v26  ;;  %v7263_v37 = vmul.f32 %v13508_v9, %v7235_v6 }
 0x6be   : > { %v9648_v41 = vunpack.i.h.bf16 %v9646_v13  ;;  %v9647_v39 = vunpack.i.l.bf16 %v9646_v13  ;;  %v9638_v59 = vunpack.i.h.bf16 %v9636_v43  ;;  %v9637_v55 = vunpack.i.l.bf16 %v9636_v43  ;;  %v9876_v13 = vld [vmem:[#allocation3 + $0x3c8] sm:$0xff]  }
 0x6bf   : > { %8351 = vmatmul.mubr.msk.bf16.gmra.mxu1 %vm467_vm3, %v9873_v7  ;;  %v7271_v54 = vpack.c.bf16 %v7263_v37, %v7261_v18  ;;  %v7270_v49 = vpack.c.bf16 %v7262_v32, %v7260_v57  ;;  %v9641_v61 = vpop.permute.xlu1 %9640  ;;  %v7454_v30 = vpack.c.bf16 %v13556_v0, %v13566_v50  ;;  %v7267_v24 = vpack.c.bf16 %v7255_v52, %v7253_v44 }
 0x6c0   : > { %v7413_v20 = vsel %vm1508_vm6, %v9638_v59, %v9648_v41  ;;  %v7421_v40 = vsel %vm1508_vm6, %v9648_v41, %v9638_v59  ;;  %v7412_v31 = vsel %vm1508_vm6, %v9637_v55, %v9647_v39  ;;  %v7420_v47 = vsel %vm1508_vm6, %v9647_v39, %v9637_v55  ;;  %7159 = vmatprep.mubr.bf16.mxu1 %v14015_v33 }
 0x6c1   : > { %v7448_v51 = vmul.f32 %v13528_v38, %v7413_v20  ;;  %v7446_v46 = vmul.f32 %v13528_v38, %v7412_v31  ;;  %v9651_v63 = vpop.permute.xlu0 %9650  ;;  %7321 = vmatprep.subr.bf16.mxu0 %v7271_v54  ;;  %v7447_v10 = vmul.f32 %v13531_v42, %v7420_v47  ;;  %v7449_v28 = vmul.f32 %v13531_v42, %v7421_v40 }
 0x6c2   : > { %v9653_v19 = vunpack.i.h.bf16 %v9651_v63  ;;  %v9652_v1 = vunpack.i.l.bf16 %v9651_v63  ;;  %v9643_v45 = vunpack.i.h.bf16 %v9641_v61  ;;  %v9642_v53 = vunpack.i.l.bf16 %v9641_v61 }
 0x6c3   : > { %8357 = vmatmul.mubr.msk.bf16.vlgmr.msra.gmra.mxu0 %vm467_vm3, %v9874_v17  ;;  %v7457_v35 = vpack.c.bf16 %v7449_v28, %v7447_v10  ;;  %v9656_v0 = vpop.permute.xlu1 %9655  ;;  %v7456_v50 = vpack.c.bf16 %v7448_v51, %v7446_v46  ;;  %v7455_v48 = vpack.c.bf16 %v13574_v62, %v13571_v16  ;;  %v7266_v14 = vpack.c.bf16 %v7254_v12, %v7252_v56 }
 0x6c4   : > { %v7409_v8 = vsel %vm1508_vm6, %v9643_v45, %v9653_v19  ;;  %v7417_v27 = vsel %vm1508_vm6, %v9653_v19, %v9643_v45  ;;  %v7416_v58 = vsel %vm1508_vm6, %v9652_v1, %v9642_v53  ;;  %7322 = vmatpush1.bf16.msra.mxu0 %v7270_v49  ;;  %v7408_v25 = vsel %vm1508_vm6, %v9642_v53, %v9652_v1  ;;  %v9878_v53 = vld [vmem:[#allocation3 + $0x3d0] sm:$0xff]  }
 0x6c5   : > { %7323 = vmatprep.subr.bf16.mxu0 %v7269_v2  ;;  %v9661_v7 = vpop.permute.xlu0 %9660  ;;  %7507 = vmatprep.subr.bf16.mxu1 %v7457_v35  ;;  %v9658_v26 = vunpack.i.h.bf16 %v9656_v0  ;;  %v9657_v32 = vunpack.i.l.bf16 %v9656_v0  ;;  %v7440_v57 = vmul.f32 %v13528_v38, %v7409_v8  ;;  %v7439_v36 = vmul.f32 %v13531_v42, %v7416_v58  ;;  %v8404_v58 = vld [vmem:[%s13863_s3 + $0x10] ss:$8 sm:$0x3] }
 0x6c6   : > { %v9663_v6 = vunpack.i.h.bf16 %v9661_v7  ;;  %v9662_v22 = vunpack.i.l.bf16 %v9661_v7  ;;  %7025 = vmatprep.mubr.bf16.mxu0 %v14015_v33  ;;  %v7441_v2 = vmul.f32 %v13531_v42, %v7417_v27  ;;  %v7438_v37 = vmul.f32 %v13528_v38, %v7408_v25 }
 0x6c7   : > { %8373 = vmatmul.mubr.msk.bf16.vlgmr.msra.gmra.mxu1 %vm467_vm3, %v9875_v21  ;;  %v9666_v55 = vpop.permute.xlu1 %9665 }
 0x6c8   : > { %v7221_v43 = vsel %vm1292_vm5, %v9658_v26, %v9663_v6  ;;  %v7229_v16 = vsel %vm1292_vm5, %v9663_v6, %v9658_v26  ;;  %v7220_v62 = vsel %vm1292_vm5, %v9657_v32, %v9662_v22  ;;  %v7228_v18 = vsel %vm1292_vm5, %v9662_v22, %v9657_v32  ;;  %7324 = vmatpush1.bf16.msra.mxu0 %v7268_v11 }
 0x6c9   : > { %v7250_v41 = vmul.f32 %v13498_v23, %v7221_v43  ;;  %v7248_v39 = vmul.f32 %v13498_v23, %v7220_v62  ;;  %7508 = vmatpush1.bf16.msra.mxu1 %v7456_v50  ;;  %7325 = vmatprep.subr.bf16.mxu0 %v7267_v24  ;;  %v9671_v59 = vpop.permute.xlu0 %9670  ;;  %v9668_v49 = vunpack.i.h.bf16 %v9666_v55  ;;  %v9667_v44 = vunpack.i.l.bf16 %v9666_v55 }
 0x6ca   : > { %7509 = vmatprep.subr.bf16.mxu1 %v7455_v48  ;;  %v9673_v17 = vunpack.i.h.bf16 %v9671_v59  ;;  %v9672_v54 = vunpack.i.l.bf16 %v9671_v59  ;;  %7167 = vmatprep.mubr.bf16.mxu1 %v14015_v33  ;;  %v7453_v15 = vpack.c.bf16 %v7441_v2, %v7439_v36  ;;  %v7249_v11 = vmul.f32 %v13508_v9, %v7228_v18  ;;  %v9879_v48 = vld [vmem:[#allocation3 + $0x3f0] sm:$0xff]  }
 0x6cb   : > { %8358 = vmatmul.mubr.msk.bf16.gmra.mxu0 %vm467_vm3, %v9876_v13  ;;  %v7251_v52 = vmul.f32 %v13508_v9, %v7229_v16  ;;  %v7264_v23 = vpack.c.bf16 %v7250_v41, %v7248_v39  ;;  %v9676_v63 = vpop.permute.xlu1 %9675  ;;  %v7452_v45 = vpack.c.bf16 %v7440_v57, %v7438_v37  ;;  %v13693_v26 = vrot.slane %v8404_v58, %v14012_v29  ;;  %v9880_v39 = vld [vmem:[#allocation3 + $0x3d8] sm:$0xff]  }
 0x6cc   : > { %v7407_v20 = vsel %vm1508_vm6, %v9668_v49, %v9673_v17  ;;  %v7415_v40 = vsel %vm1508_vm6, %v9673_v17, %v9668_v49  ;;  %v7406_v31 = vsel %vm1508_vm6, %v9667_v44, %v9672_v54  ;;  %v7414_v47 = vsel %vm1508_vm6, %v9672_v54, %v9667_v44  ;;  %7326 = vmatpush1.bf16.msra.mxu0 %v7266_v14 }
 0x6cd   : > { %v7436_v51 = vmul.f32 %v13528_v38, %v7407_v20  ;;  %v7434_v46 = vmul.f32 %v13528_v38, %v7406_v31  ;;  %7510 = vmatpush1.bf16.msra.mxu1 %v7454_v30  ;;  %v9681_v9 = vpop.permute.xlu0 %9680  ;;  %v7265_v61 = vpack.c.bf16 %v7251_v52, %v7249_v11  ;;  %7031 = vmatprep.mubr.bf16.mxu0 %v14015_v33  ;;  %v9678_v19 = vunpack.i.h.bf16 %v9676_v63 }
 0x6ce   : > { %7511 = vmatprep.subr.bf16.mxu1 %v7453_v15  ;;  %v9683_v10 = vunpack.i.h.bf16 %v9681_v9  ;;  %v9682_v28 = vunpack.i.l.bf16 %v9681_v9  ;;  %v9677_v1 = vunpack.i.l.bf16 %v9676_v63  ;;  %v7435_v12 = vmul.f32 %v13531_v42, %v7414_v47 }
 0x6cf   : > { %8374 = vmatmul.mubr.msk.bf16.gmra.mxu1 %vm467_vm3, %v9877_v5  ;;  %7327 = vmatprep.subr.bf16.mxu0 %v7265_v61  ;;  %v7437_v38 = vmul.f32 %v13531_v42, %v7415_v40  ;;  %v7450_v35 = vpack.c.bf16 %v7436_v51, %v7434_v46  ;;  %v13675_v30 = vrot.slane %v13546_v4, %v14013_v3  ;;  %v9686_v24 = vpop.permute.xlu1 %9685  ;;  %v9881_v51 = vld [vmem:[#allocation3 + $0x3f8] sm:$0xff]  }
 0x6d0   : > { %v7597_v56 = vsel %vm1724_vm7, %v9678_v19, %v9683_v10  ;;  %v7605_v21 = vsel %vm1724_vm7, %v9683_v10, %v9678_v19  ;;  %7328 = vmatpush1.bf16.msra.mxu0 %v7264_v23  ;;  %v7596_v8 = vsel %vm1724_vm7, %v9677_v1, %v9682_v28  ;;  %v7604_v27 = vsel %vm1724_vm7, %v9682_v28, %v9677_v1 }
 0x6d1   : > { %7512 = vmatpush1.bf16.msra.mxu1 %v7452_v45  ;;  %v9691_v42 = vpop.permute.xlu0 %9690  ;;  %v7451_v25 = vpack.c.bf16 %v7437_v38, %v7435_v12  ;;  %7173 = vmatprep.mubr.bf16.mxu1 %v14015_v33  ;;  %v9688_v4 = vunpack.i.h.bf16 %v9686_v24  ;;  %v9687_v50 = vunpack.i.l.bf16 %v9686_v24  ;;  %v13687_v6 = vmul.f32 %v13563_v60, %v7597_v56 }
 0x6d2   : > { %v9693_v7 = vunpack.i.h.bf16 %v9691_v42  ;;  %v9692_v0 = vunpack.i.l.bf16 %v9691_v42  ;;  %v13690_v22 = vmul.f32 %v13563_v60, %v7596_v8  ;;  %v13699_v14 = vmul.f32 %v13675_v30, %v7604_v27 }
 0x6d3   : > { %8359 = vmatmul.mubr.msk.bf16.gmra.mxu0 %vm467_vm3, %v9878_v53  ;;  %7513 = vmatprep.subr.bf16.mxu1 %v7451_v25  ;;  %v9696_v13 = vpop.permute.xlu1 %9695  ;;  %v13702_v36 = vmul.f32 %v13675_v30, %v7605_v21  ;;  %v13705_v2 = vrot.slane %v8404_v58, %v14013_v3 }
 0x6d4   : > { %7037 = vmatprep.mubr.bf16.mxu0 %v14015_v33  ;;  %v7783_v32 = vsel %vm1940_vm8, %v9688_v4, %v9693_v7  ;;  %v7791_v29 = vsel %vm1940_vm8, %v9693_v7, %v9688_v4  ;;  %v7782_v43 = vsel %vm1940_vm8, %v9687_v50, %v9692_v0  ;;  %v7790_v16 = vsel %vm1940_vm8, %v9692_v0, %v9687_v50 }
 0x6d5   : > { %7514 = vmatpush1.bf16.msra.mxu1 %v7450_v35  ;;  %v9701_v57 = vpop.permute.xlu0 %9700  ;;  %v9698_v37 = vunpack.i.h.bf16 %v9696_v13  ;;  %v9697_v41 = vunpack.i.l.bf16 %v9696_v13  ;;  %v13715_v59 = vmul.f32 %v13693_v26, %v7783_v32  ;;  %v7640_v3 = vpack.c.bf16 %v13687_v6, %v13690_v22  ;;  %v9882_v35 = vld [vmem:[#allocation3 + $0x400] sm:$0xff]   ;;  %v9885_v22 = vld [vmem:[#allocation3 + $0x428] sm:$0xff]  }
 0x6d6   : > { %v9703_v62 = vunpack.i.h.bf16 %v9701_v57  ;;  %v9702_v18 = vunpack.i.l.bf16 %v9701_v57  ;;  %v13721_v55 = vmul.f32 %v13693_v26, %v7782_v43  ;;  %v7641_v49 = vpack.c.bf16 %v13702_v36, %v13699_v14 }
 0x6d7   : > { %8375 = vmatmul.mubr.msk.bf16.gmra.mxu1 %vm467_vm3, %v9879_v48  ;;  %v9706_v54 = vpop.permute.xlu1 %9705  ;;  %v13726_v44 = vmul.f32 %v13705_v2, %v7790_v16  ;;  %v13729_v15 = vmul.f32 %v13705_v2, %v7791_v29 }
 0x6d8   : > { %7179 = vmatprep.mubr.bf16.mxu1 %v14015_v33  ;;  %v9708_v52 = vunpack.i.h.bf16 %v9706_v54  ;;  %v9707_v23 = vunpack.i.l.bf16 %v9706_v54  ;;  %v7595_v20 = vsel %vm1724_vm7, %v9698_v37, %v9703_v62  ;;  %v7603_v40 = vsel %vm1724_vm7, %v9703_v62, %v9698_v37 }
 0x6d9   : > { %v9711_v17 = vpop.permute.xlu0 %9710  ;;  %v7594_v31 = vsel %vm1724_vm7, %v9697_v41, %v9702_v18  ;;  %v7602_v47 = vsel %vm1724_vm7, %v9702_v18, %v9697_v41  ;;  %v7627_v58 = vmul.f32 %v13675_v30, %v7603_v40  ;;  %v7626_v18 = vmul.f32 %v13563_v60, %v7595_v20  ;;  %v9883_v41 = vld [vmem:[#allocation3 + $0x420] sm:$0xff]  }
 0x6da   : > { %v9713_v5 = vunpack.i.h.bf16 %v9711_v17  ;;  %v9712_v11 = vunpack.i.l.bf16 %v9711_v17  ;;  %v7625_v42 = vmul.f32 %v13675_v30, %v7602_v47  ;;  %v7624_v37 = vmul.f32 %v13563_v60, %v7594_v31 }
 0x6db   : > { %8360 = vmatmul.mubr.msk.bf16.gmra.mxu0 %vm467_vm3, %v9880_v39  ;;  %v9716_v1 = vpop.permute.xlu1 %9715  ;;  %v7826_v17 = vpack.c.bf16 %v13715_v59, %v13721_v55  ;;  %v7827_v40 = vpack.c.bf16 %v13729_v15, %v13726_v44 }
 0x6dc   : > { %v7599_v46 = vsel %vm1724_vm7, %v9708_v52, %v9713_v5  ;;  %v7607_v9 = vsel %vm1724_vm7, %v9713_v5, %v9708_v52  ;;  %v7598_v63 = vsel %vm1724_vm7, %v9707_v23, %v9712_v11  ;;  %v7606_v61 = vsel %vm1724_vm7, %v9712_v11, %v9707_v23  ;;  %7345 = vmatprep.mubr.bf16.mxu0 %v14015_v33 }
 0x6dd   : > { %v7634_v10 = vmul.f32 %v13563_v60, %v7599_v46  ;;  %v7632_v28 = vmul.f32 %v13563_v60, %v7598_v63  ;;  %v9726_v19 = vpop.permute.xlu0 %9725  ;;  %v7633_v45 = vmul.f32 %v13675_v30, %v7606_v61  ;;  %v7635_v53 = vmul.f32 %v13675_v30, %v7607_v9  ;;  %v9884_v63 = vld [vmem:[#allocation3 + $0x408] sm:$0xff]  }
 0x6de   : > { %v9728_v12 = vunpack.i.h.bf16 %v9726_v19  ;;  %v9727_v38 = vunpack.i.l.bf16 %v9726_v19  ;;  %v9718_v56 = vunpack.i.h.bf16 %v9716_v1  ;;  %v9717_v21 = vunpack.i.l.bf16 %v9716_v1 }
 0x6df   : > { %8376 = vmatmul.mubr.msk.bf16.gmra.mxu1 %vm467_vm3, %v9881_v51  ;;  %v7643_v8 = vpack.c.bf16 %v7635_v53, %v7633_v45  ;;  %v7642_v27 = vpack.c.bf16 %v7634_v10, %v7632_v28  ;;  %v9721_v32 = vpop.permute.xlu1 %9720  ;;  %v7639_v52 = vpack.c.bf16 %v7627_v58, %v7625_v42  ;;  %v7638_v14 = vpack.c.bf16 %v7626_v18, %v7624_v37  ;;  %v9896_v18 = vld [vmem:[#allocation3 + $0x458] sm:$0xff]  }
 0x6e0   : > { %v7785_v24 = vsel %vm1940_vm8, %v9718_v56, %v9728_v12  ;;  %v7793_v25 = vsel %vm1940_vm8, %v9728_v12, %v9718_v56  ;;  %v7784_v7 = vsel %vm1940_vm8, %v9717_v21, %v9727_v38  ;;  %v7792_v0 = vsel %vm1940_vm8, %v9727_v38, %v9717_v21  ;;  %7531 = vmatprep.mubr.bf16.mxu1 %v14015_v33  ;;  %v9897_v37 = vld [vmem:[#allocation3 + $0x478] sm:$0xff]  }
 0x6e1   : > { %v7820_v4 = vmul.f32 %v13693_v26, %v7785_v24  ;;  %v7818_v50 = vmul.f32 %v13693_v26, %v7784_v7  ;;  %v9731_v48 = vpop.permute.xlu0 %9730  ;;  %7693 = vmatprep.subr.bf16.mxu0 %v7643_v8  ;;  %v7819_v57 = vmul.f32 %v13705_v2, %v7792_v0  ;;  %v7821_v13 = vmul.f32 %v13705_v2, %v7793_v25 }
 0x6e2   : > { %v9733_v29 = vunpack.i.h.bf16 %v9731_v48  ;;  %v9732_v43 = vunpack.i.l.bf16 %v9731_v48  ;;  %v9723_v16 = vunpack.i.h.bf16 %v9721_v32  ;;  %v9722_v62 = vunpack.i.l.bf16 %v9721_v32  ;;  %v9887_v48 = vld [vmem:[#allocation3 + $0x430] sm:$0xff]   ;;  %v9889_v32 = vld [vmem:[#allocation3 + $0x438] sm:$0xff]  }
 0x6e3   : > { %8382 = vmatmul.mubr.msk.bf16.vlgmr.msra.gmra.mxu0 %vm467_vm3, %v9882_v35  ;;  %v7829_v39 = vpack.c.bf16 %v7821_v13, %v7819_v57  ;;  %v9736_v59 = vpop.permute.xlu1 %9735  ;;  %v7828_v55 = vpack.c.bf16 %v7820_v4, %v7818_v50  ;;  %v9890_v57 = vld [vmem:[#allocation3 + $0x440] sm:$0xff]  }
 0x6e4   : > { %v7781_v54 = vsel %vm1940_vm8, %v9723_v16, %v9733_v29  ;;  %v7789_v5 = vsel %vm1940_vm8, %v9733_v29, %v9723_v16  ;;  %v7788_v11 = vsel %vm1940_vm8, %v9732_v43, %v9722_v62  ;;  %7694 = vmatpush1.bf16.msra.mxu0 %v7642_v27  ;;  %v7780_v23 = vsel %vm1940_vm8, %v9722_v62, %v9732_v43  ;;  %v9891_v13 = vld [vmem:[#allocation3 + $0x460] sm:$0xff]   ;;  %v9892_v29 = vld [vmem:[#allocation3 + $0x448] sm:$0xff]   ;;  %v9894_v16 = vld [vmem:[#allocation3 + $0x450] sm:$0xff]  }
 0x6e5   : > { %7695 = vmatprep.subr.bf16.mxu0 %v7641_v49  ;;  %v9741_v20 = vpop.permute.xlu0 %9740  ;;  %7879 = vmatprep.subr.bf16.mxu1 %v7829_v39  ;;  %v9738_v51 = vunpack.i.h.bf16 %v9736_v59  ;;  %v9737_v46 = vunpack.i.l.bf16 %v9736_v59  ;;  %v7812_v9 = vmul.f32 %v13693_v26, %v7781_v54  ;;  %v7811_v36 = vmul.f32 %v13705_v2, %v7788_v11  ;;  %v9893_v43 = vld [vmem:[#allocation3 + $0x468] sm:$0xff]   ;;  %v9895_v62 = vld [vmem:[#allocation3 + $0x470] sm:$0xff]  }
 0x6e6   : > { %v9743_v31 = vunpack.i.h.bf16 %v9741_v20  ;;  %v9742_v47 = vunpack.i.l.bf16 %v9741_v20  ;;  %7353 = vmatprep.mubr.bf16.mxu0 %v14015_v33  ;;  %v7813_v49 = vmul.f32 %v13705_v2, %v7789_v5  ;;  %v7810_v28 = vmul.f32 %v13693_v26, %v7780_v23 }
 0x6e7   : > { %8391 = vmatmul.mubr.msk.bf16.vlgmr.msra.gmra.mxu1 %vm467_vm3, %v9883_v41 }
 0x6e8   : > { %v7593_v61 = vsel %vm1724_vm7, %v9738_v51, %v9743_v31  ;;  %v7601_v44 = vsel %vm1724_vm7, %v9743_v31, %v9738_v51  ;;  %v7592_v15 = vsel %vm1724_vm7, %v9737_v46, %v9742_v47  ;;  %v7600_v10 = vsel %vm1724_vm7, %v9742_v47, %v9737_v46  ;;  %7696 = vmatpush1.bf16.msra.mxu0 %v7640_v3  ;;  %v9746_v53 = vpop.permute.xlu1 %9745 }
 0x6e9   : > { %v7622_v19 = vmul.f32 %v13563_v60, %v7593_v61  ;;  %v7620_v1 = vmul.f32 %v13563_v60, %v7592_v15  ;;  %7880 = vmatpush1.bf16.msra.mxu1 %v7828_v55  ;;  %7697 = vmatprep.subr.bf16.mxu0 %v7639_v52  ;;  %v9751_v45 = vpop.permute.xlu0 %9750  ;;  %v9748_v56 = vunpack.i.h.bf16 %v9746_v53  ;;  %v9747_v21 = vunpack.i.l.bf16 %v9746_v53 }
 0x6ea   : > { %7881 = vmatprep.subr.bf16.mxu1 %v7827_v40  ;;  %v9753_v12 = vunpack.i.h.bf16 %v9751_v45  ;;  %v9752_v38 = vunpack.i.l.bf16 %v9751_v45  ;;  %7539 = vmatprep.mubr.bf16.mxu1 %v14015_v33  ;;  %v7825_v6 = vpack.c.bf16 %v7813_v49, %v7811_v36  ;;  %v7621_v3 = vmul.f32 %v13675_v30, %v7600_v10 }
 0x6eb   : > { %8383 = vmatmul.mubr.msk.bf16.gmra.mxu0 %vm467_vm3, %v9884_v63  ;;  %v7623_v35 = vmul.f32 %v13675_v30, %v7601_v44  ;;  %v7636_v60 = vpack.c.bf16 %v7622_v19, %v7620_v1  ;;  %v7824_v4 = vpack.c.bf16 %v7812_v9, %v7810_v28 }
 0x6ec   : > { %v7779_v8 = vsel %vm1940_vm8, %v9748_v56, %v9753_v12  ;;  %v7787_v27 = vsel %vm1940_vm8, %v9753_v12, %v9748_v56  ;;  %v7778_v42 = vsel %vm1940_vm8, %v9747_v21, %v9752_v38  ;;  %v7786_v58 = vsel %vm1940_vm8, %v9752_v38, %v9747_v21  ;;  %7698 = vmatpush1.bf16.msra.mxu0 %v7638_v14 }
 0x6ed   : > { %v7808_v24 = vmul.f32 %v13693_v26, %v7779_v8  ;;  %v7806_v25 = vmul.f32 %v13693_v26, %v7778_v42  ;;  %7882 = vmatpush1.bf16.msra.mxu1 %v7826_v17  ;;  %v7637_v30 = vpack.c.bf16 %v7623_v35, %v7621_v3  ;;  %7359 = vmatprep.mubr.bf16.mxu0 %v14015_v33 }
 0x6ee   : > { %7883 = vmatprep.subr.bf16.mxu1 %v7825_v6  ;;  %v7807_v7 = vmul.f32 %v13705_v2, %v7786_v58  ;;  %v7809_v0 = vmul.f32 %v13705_v2, %v7787_v27  ;;  %v9888_v2 = vld [vmem:[#allocation3 + $0x418] sm:$0xff]  }
 0x6ef   : > { %8392 = vmatmul.mubr.msk.bf16.gmra.mxu1 %vm467_vm3, %v9885_v22  ;;  %7699 = vmatprep.subr.bf16.mxu0 %v7637_v30  ;;  %v7822_v26 = vpack.c.bf16 %v7808_v24, %v7806_v25 }
 0x6f0   : > { %7700 = vmatpush1.bf16.msra.mxu0 %v7636_v60  ;;  %v7823_v50 = vpack.c.bf16 %v7809_v0, %v7807_v7  ;;  %7545 = vmatprep.mubr.bf16.mxu1 %v14015_v33 }
 0x6f1   : > { %7884 = vmatpush1.bf16.msra.mxu1 %v7824_v4 }
 0x6f2   : > { %7885 = vmatprep.subr.bf16.mxu1 %v7823_v50 }
 0x6f3   : > { %8384 = vmatmul.mubr.msk.bf16.gmra.mxu0 %vm467_vm3, %v9886_v34 }
 0x6f4   : > { %7365 = vmatprep.mubr.bf16.mxu0 %v14015_v33 }
 0x6f5   : > { %7886 = vmatpush1.bf16.msra.mxu1 %v7822_v26 }
 0x6f7   : > { %8393 = vmatmul.mubr.msk.bf16.gmra.mxu1 %vm467_vm3, %v9887_v48 }
 0x6f8   : > { %7551 = vmatprep.mubr.bf16.mxu1 %v14015_v33 }
 0x6fb   : > { %8385 = vmatmul.mubr.msk.bf16.gmra.mxu0 %vm467_vm3, %v9888_v2 }
 0x6fc   : > { %7717 = vmatprep.mubr.bf16.mxu0 %v14015_v33 }
 0x6ff   : > { %8394 = vmatmul.mubr.msk.bf16.gmra.mxu1 %vm467_vm3, %v9889_v32 }
 0x700   : > { %7903 = vmatprep.mubr.bf16.mxu1 %v14015_v33 }
 0x703   : > { %8400 = vmatmul.mubr.msk.bf16.vlgmr.msra.gmra.mxu0 %vm467_vm3, %v9890_v57 }
 0x704   : > { %7725 = vmatprep.mubr.bf16.mxu0 %v14015_v33 }
 0x707   : > { %8409 = vmatmul.mubr.msk.bf16.vlgmr.msra.gmra.mxu1 %vm467_vm3, %v9891_v13 }
 0x708   : > { %7911 = vmatprep.mubr.bf16.mxu1 %v14015_v33 }
 0x70b   : > { %8401 = vmatmul.mubr.msk.bf16.gmra.mxu0 %vm467_vm3, %v9892_v29 }
 0x70c   : > { %7731 = vmatprep.mubr.bf16.mxu0 %v14015_v33 }
 0x70f   : > { %8410 = vmatmul.mubr.msk.bf16.gmra.mxu1 %vm467_vm3, %v9893_v43 }
 0x710   : > { %7917 = vmatprep.mubr.bf16.mxu1 %v14015_v33 }
 0x713   : > { %8402 = vmatmul.mubr.msk.bf16.gmra.mxu0 %vm467_vm3, %v9894_v16 }
 0x714   : > { %7737 = vmatprep.mubr.bf16.mxu0 %v14015_v33 }
 0x717   : > { %8411 = vmatmul.mubr.msk.bf16.gmra.mxu1 %vm467_vm3, %v9895_v62 }
 0x718   : > { %7923 = vmatprep.mubr.bf16.mxu1 %v14015_v33 }
 0x71b   : > { %8403 = vmatmul.mubr.msk.bf16.gmra.mxu0 %vm467_vm3, %v9896_v18 }
 0x71f   : > { %8412 = vmatmul.mubr.msk.bf16.gmra.mxu1 %vm467_vm3, %v9897_v37 }
 0x745   : > { %v6558_v41 = vpop.f32.mrf.mxu1 }
 0x747   : > { %v6560_v39 = vpop.f32.mrf.mxu1 }
 0x749   : > { %v6562_v17 = vpop.f32.mrf.mxu1 }
 0x74b   : > { %v6563_v54 = vpop.f32.mrf.mxu1 }
 0x74d   : > { %v6566_v5 = vpop.f32.mrf.mxu1 }
 0x74f   : > { %v6567_v11 = vpop.f32.mrf.mxu1 }
 0x751   : > { %v6568_v52 = vpop.f32.mrf.mxu1 }
 0x753   : > { %v6569_v23 = vpop.f32.mrf.mxu1 }
 0x755   : > { %v6572_v20 = vpop.f32.mrf.mxu1 }
 0x757   : > { %v6573_v59 = vpop.f32.mrf.mxu1 }
 0x759   : > { %v6574_v55 = vpop.f32.mrf.mxu1 }
 0x75b   : > { %v6575_v40 = vpop.f32.mrf.mxu1 }
 0x75d   : > { %v6578_v31 = vpop.f32.mrf.mxu1 }
 0x75f   : > { %v6579_v47 = vpop.f32.mrf.mxu1 }
 0x761   : > { %v6580_v33 = vpop.f32.mrf.mxu1 }
 0x763   : > { %v6649_v51 = vpop.f32.mrf.mxu0  ;;  %v6581_v46 = vpop.f32.mrf.mxu1 }
 0x764   : > { %v6650_v9 = vadd.f32 %v6649_v51, %v6558_v41 }
 0x765   : > { %v6651_v63 = vpop.f32.mrf.mxu0 }
 0x766   : > { %v6652_v14 = vadd.f32 %v6651_v63, %v6560_v39 }
 0x767   : > { %v6653_v36 = vpop.f32.mrf.mxu0  ;;  %v6833_v49 = vpop.f32.mrf.mxu1 }
 0x768   : > { %v13847_v61 = vadd.f32 %v6833_v49, %v6650_v9 }
 0x769   : > { %v6654_v44 = vpop.f32.mrf.mxu0  ;;  %v6835_v15 = vpop.f32.mrf.mxu1 }
 0x76a   : > { %v13849_v10 = vadd.f32 %v6835_v15, %v6652_v14 }
 0x76b   : > { %v6657_v28 = vpop.f32.mrf.mxu0  ;;  %v6837_v19 = vpop.f32.mrf.mxu1 }
 0x76d   : > { %v6658_v1 = vpop.f32.mrf.mxu0  ;;  %v6838_v45 = vpop.f32.mrf.mxu1 }
 0x76f   : > { %v6659_v53 = vpop.f32.mrf.mxu0  ;;  %v6841_v12 = vpop.f32.mrf.mxu1 }
 0x771   : > { %v6660_v38 = vpop.f32.mrf.mxu0  ;;  %v6842_v56 = vpop.f32.mrf.mxu1 }
 0x773   : > { %v6663_v21 = vpop.f32.mrf.mxu0  ;;  %v6843_v6 = vpop.f32.mrf.mxu1 }
 0x775   : > { %v6664_v22 = vpop.f32.mrf.mxu0  ;;  %v6844_v3 = vpop.f32.mrf.mxu1 }
 0x777   : > { %v6665_v35 = vpop.f32.mrf.mxu0  ;;  %v6847_v60 = vpop.f32.mrf.mxu1 }
 0x779   : > { %v6666_v8 = vpop.f32.mrf.mxu0  ;;  %v6848_v27 = vpop.f32.mrf.mxu1 }
 0x77b   : > { %v6669_v42 = vpop.f32.mrf.mxu0  ;;  %v6849_v58 = vpop.f32.mrf.mxu1 }
 0x77d   : > { %v6670_v24 = vpop.f32.mrf.mxu0  ;;  %v6850_v25 = vpop.f32.mrf.mxu1 }
 0x77f   : > { %v6671_v30 = vpop.f32.mrf.mxu0  ;;  %v6853_v7 = vpop.f32.mrf.mxu1 }
 0x781   : > { %v6672_v0 = vpop.f32.mrf.mxu0  ;;  %v6854_v4 = vpop.f32.mrf.mxu1 }
 0x783   : > { %v6855_v34 = vpop.f32.mrf.mxu1  ;;  %v7019_v50 = vpop.f32.mrf.mxu0 }
 0x784   : > { %v7044_v0 = vadd.f32 %v7019_v50, %v13847_v61 }
 0x785   : > { %v6856_v26 = vpop.f32.mrf.mxu1  ;;  %v7021_v48 = vpop.f32.mrf.mxu0 }
 0x786   : > { %v7045_v26 = vadd.f32 %v7021_v48, %v13849_v10  ;;  %v7937_v48 = vpop.permute.xlu1 %7936 }
 0x787   : > { %v7023_v2 = vpop.f32.mrf.mxu0  ;;  %v7161_v32 = vpop.f32.mrf.mxu1 }
 0x788   : > { %v7186_v2 = vadd.f32 %v7161_v32, %v7044_v0 }
 0x789   : > { %v7024_v57 = vpop.f32.mrf.mxu0  ;;  %v7163_v13 = vpop.f32.mrf.mxu1 }
 0x78b   : > { %v7027_v29 = vpop.f32.mrf.mxu0  ;;  %v7165_v43 = vpop.f32.mrf.mxu1 }
 0x78c   : > { %v7187_v43 = vadd.f32 %v7163_v13, %v7045_v26 }
 0x78d   : > { %v7028_v16 = vpop.f32.mrf.mxu0  ;;  %v7166_v62 = vpop.f32.mrf.mxu1 }
 0x78f   : > { %v7029_v18 = vpop.f32.mrf.mxu0  ;;  %v7169_v37 = vpop.f32.mrf.mxu1 }
 0x791   : > { %v7030_v41 = vpop.f32.mrf.mxu0  ;;  %v7170_v39 = vpop.f32.mrf.mxu1 }
 0x793   : > { %v7033_v17 = vpop.f32.mrf.mxu0  ;;  %v7171_v54 = vpop.f32.mrf.mxu1 }
 0x795   : > { %v7034_v5 = vpop.f32.mrf.mxu0  ;;  %v7172_v11 = vpop.f32.mrf.mxu1 }
 0x797   : > { %v7035_v52 = vpop.f32.mrf.mxu0  ;;  %v7175_v23 = vpop.f32.mrf.mxu1 }
 0x799   : > { %v7036_v20 = vpop.f32.mrf.mxu0  ;;  %v7176_v59 = vpop.f32.mrf.mxu1 }
 0x79b   : > { %v7039_v55 = vpop.f32.mrf.mxu0  ;;  %v7177_v40 = vpop.f32.mrf.mxu1 }
 0x79d   : > { %v7040_v31 = vpop.f32.mrf.mxu0  ;;  %v7178_v47 = vpop.f32.mrf.mxu1 }
 0x79f   : > { %v7041_v33 = vpop.f32.mrf.mxu0  ;;  %v7181_v51 = vpop.f32.mrf.mxu1 }
 0x7a1   : > { %v7042_v46 = vpop.f32.mrf.mxu0  ;;  %v7182_v9 = vpop.f32.mrf.mxu1 }
 0x7a3   : > { %v7183_v63 = vpop.f32.mrf.mxu1  ;;  %v7347_v14 = vpop.f32.mrf.mxu0 }
 0x7a4   : > { %v7372_v16 = vadd.f32 %v7347_v14, %v7186_v2 }
 0x7a5   : > { %v7184_v36 = vpop.f32.mrf.mxu1  ;;  %v7349_v49 = vpop.f32.mrf.mxu0 }
 0x7a6   : > { %v7373_v37 = vadd.f32 %v7349_v49, %v7187_v43 }
 0x7a7   : > { %v7351_v44 = vpop.f32.mrf.mxu0  ;;  %v7533_v15 = vpop.f32.mrf.mxu1 }
 0x7a8   : > { %v7558_v41 = vadd.f32 %v7533_v15, %v7372_v16 }
 0x7a9   : > { %v7352_v28 = vpop.f32.mrf.mxu0  ;;  %v7535_v19 = vpop.f32.mrf.mxu1 }
 0x7aa   : > { %v7559_v54 = vadd.f32 %v7535_v19, %v7373_v37 }
 0x7ab   : > { %v7355_v1 = vpop.f32.mrf.mxu0  ;;  %v7537_v45 = vpop.f32.mrf.mxu1 }
 0x7ad   : > { %v7356_v53 = vpop.f32.mrf.mxu0  ;;  %v7538_v12 = vpop.f32.mrf.mxu1 }
 0x7af   : > { %v7357_v38 = vpop.f32.mrf.mxu0  ;;  %v7541_v56 = vpop.f32.mrf.mxu1 }
 0x7b1   : > { %v7358_v21 = vpop.f32.mrf.mxu0  ;;  %v7542_v6 = vpop.f32.mrf.mxu1 }
 0x7b3   : > { %v7361_v22 = vpop.f32.mrf.mxu0  ;;  %v7543_v3 = vpop.f32.mrf.mxu1 }
 0x7b5   : > { %v7362_v35 = vpop.f32.mrf.mxu0  ;;  %v7544_v60 = vpop.f32.mrf.mxu1 }
 0x7b7   : > { %v7363_v8 = vpop.f32.mrf.mxu0  ;;  %v7547_v27 = vpop.f32.mrf.mxu1 }
 0x7b9   : > { %v7364_v42 = vpop.f32.mrf.mxu0  ;;  %v7548_v58 = vpop.f32.mrf.mxu1 }
 0x7bb   : > { %v7367_v24 = vpop.f32.mrf.mxu0  ;;  %v7549_v25 = vpop.f32.mrf.mxu1 }
 0x7bd   : > { %v7368_v30 = vpop.f32.mrf.mxu0  ;;  %v7550_v7 = vpop.f32.mrf.mxu1 }
 0x7bf   : > { %v7369_v4 = vpop.f32.mrf.mxu0  ;;  %v7553_v34 = vpop.f32.mrf.mxu1 }
 0x7c1   : > { %v7370_v57 = vpop.f32.mrf.mxu0  ;;  %v7554_v29 = vpop.f32.mrf.mxu1 }
 0x7c3   : > { %v7555_v62 = vpop.f32.mrf.mxu1  ;;  %v7719_v18 = vpop.f32.mrf.mxu0 }
 0x7c4   : > { %v7744_v5 = vadd.f32 %v7719_v18, %v7558_v41 }
 0x7c5   : > { %v7556_v39 = vpop.f32.mrf.mxu1  ;;  %v7721_v17 = vpop.f32.mrf.mxu0 }
 0x7c6   : > { %v7745_v50 = vadd.f32 %v7721_v17, %v7559_v54 }
 0x7c7   : > { %v7905_v11 = vpop.f32.mrf.mxu1  ;;  %v7723_v61 = vpop.f32.mrf.mxu0 }
 0x7c8   : > { %v7930_v52 = vadd.f32 %v7905_v11, %v7744_v5 }
 0x7c9   : > { %v7907_v23 = vpop.f32.mrf.mxu1  ;;  %v7724_v10 = vpop.f32.mrf.mxu0 }
 0x7ca   : > { %v7931_v32 = vadd.f32 %v7907_v23, %v7745_v50  ;;  %v7939_v59 = vadd.f32 %v7937_v48, %v7930_v52 }
 0x7cb   : > { %v7909_v13 = vpop.f32.mrf.mxu1  ;;  %v7727_v20 = vpop.f32.mrf.mxu0 }
 0x7cc   : > { %v7940_v55 = vadd.f32 %v7937_v48, %v7931_v32 }
 0x7cd   : > { %v7910_v40 = vpop.f32.mrf.mxu1  ;;  %v7728_v31 = vpop.f32.mrf.mxu0 }
 0x7ce   : > { %v7943_v47 = vcombine.low %v7939_v59, %v7940_v55 }
 0x7cf   : > { %v7913_v33 = vpop.f32.mrf.mxu1  ;;  %v7729_v51 = vpop.f32.mrf.mxu0 }
 0x7d0   : > { %7945 = vst [vmem:[%s212_s27] sm:$0x77] %v7943_v47 }
 0x7d1   : > { %v7914_v46 = vpop.f32.mrf.mxu1  ;;  %v7730_v9 = vpop.f32.mrf.mxu0 }
 0x7d3   : > { %v7915_v63 = vpop.f32.mrf.mxu1  ;;  %v7733_v14 = vpop.f32.mrf.mxu0 }
 0x7d5   : > { %v7916_v36 = vpop.f32.mrf.mxu1  ;;  %v7734_v49 = vpop.f32.mrf.mxu0 }
 0x7d7   : > { %v7919_v44 = vpop.f32.mrf.mxu1  ;;  %v7735_v15 = vpop.f32.mrf.mxu0 }
 0x7d9   : > { %v7920_v28 = vpop.f32.mrf.mxu1  ;;  %v7736_v19 = vpop.f32.mrf.mxu0 }
 0x7db   : > { %v7921_v1 = vpop.f32.mrf.mxu1  ;;  %v7739_v45 = vpop.f32.mrf.mxu0 }
 0x7dd   : > { %v7922_v53 = vpop.f32.mrf.mxu1  ;;  %v7740_v12 = vpop.f32.mrf.mxu0 }
 0x7df   : > { %v7925_v38 = vpop.f32.mrf.mxu1  ;;  %v7741_v56 = vpop.f32.mrf.mxu0 }
 0x7e1   : > { %v7926_v21 = vpop.f32.mrf.mxu1  ;;  %v7742_v6 = vpop.f32.mrf.mxu0 }
 0x7e3   : > { %v7927_v22 = vpop.f32.mrf.mxu1 }
 0x7e5   : > { %v7928_v3 = vpop.f32.mrf.mxu1 }
 0x7e6 PF: > { %s15_s15 = sadd.s32 1, %s9959_s15  }
 0x7e7   : > { %p12_p1 = scmp.ge.s32.totalorder %s15_s15, 4  }
 0x7e9   :  { %14 = sbr.rel (!%p12_p1) target bundleno = 1 (0x1), region = 116 }
 0x7ee   :  { %7967 = vsyncpa [#allocation4], 1 }
 0x7ef   :  { %7969 = vsyncpa [#allocation4 + $0x1], 1 }

</bundles_post_ra>
